<compile_context>
chip_gen: v6e
topology: v6e:2x2x1
jax: 0.10.0
libtpu: 0.0.40
codegen_flags: <defaults>
</compile_context>

<pallas_src>
import functools

import jax
import jax.numpy as jnp
from jax.experimental import pallas as pl
from jax.experimental.pallas import tpu as pltpu


def _leaky_relu(v, slope=0.2):
    return jnp.where(v > 0, v, slope * v)


def _cond_disc_kernel(x_ref, c_ref,
                      w11_ref, b11_ref,
                      w12_ref, b12_ref,
                      w2a_ref, w2b_ref, b2_ref,
                      w3_ref, b3_ref,
                      w4_ref, b4_ref,
                      y_ref, *, reduce_final):
    # fc1_1 / fc1_2 : bf16 MXU matmuls, f32 accumulation, f32 elementwise.
    x1 = _leaky_relu(
        jnp.dot(x_ref[...], w11_ref[...], preferred_element_type=jnp.float32)
        + b11_ref[...])
    x2 = _leaky_relu(
        jnp.dot(c_ref[...], w12_ref[...], preferred_element_type=jnp.float32)
        + b12_ref[...])

    # fc2 on the "concatenated" input without materializing the concat:
    #   concat([x1, x2]) @ W2  ==  x1 @ W2[:1024] + x2 @ W2[1024:]
    h = _leaky_relu(
        jnp.dot(x1.astype(jnp.bfloat16), w2a_ref[...],
                preferred_element_type=jnp.float32)
        + jnp.dot(x2.astype(jnp.bfloat16), w2b_ref[...],
                  preferred_element_type=jnp.float32)
        + b2_ref[...])

    # fc3
    h = _leaky_relu(
        jnp.dot(h.astype(jnp.bfloat16), w3_ref[...],
                preferred_element_type=jnp.float32)
        + b3_ref[...])

    # fc4
    if reduce_final:
        # y_size == 1: w4_ref is the transposed weight (1, 256) in f32.
        # Cross-lane reduction on the VPU/XLU instead of an N=1 MXU matmul.
        logits = (jnp.sum(h * w4_ref[...], axis=-1, keepdims=True)
                  + b4_ref[...])
    else:
        logits = (jnp.dot(h.astype(jnp.bfloat16), w4_ref[...],
                          preferred_element_type=jnp.float32)
                  + b4_ref[...])

    y_ref[...] = jax.nn.sigmoid(logits).astype(y_ref.dtype)


@functools.partial(jax.jit, static_argnames=("block_b",))
def conditional_discriminator(x, c, params, *, block_b=128):
    """x: (B, x_size), c: (B, class_num) condition vectors, params: dict of W/b.

    block_b: batch tile (rows per grid step). Should be a multiple of 8;
    128 fills the MXU rows on all generations (use 256 on v6e/v7x for a bit
    more if the batch is large).
    """
    B, x_size = x.shape
    _, class_num = c.shape
    hidden1 = params["w11"].shape[1]            # 1024
    y_size = params["w4"].shape[1]

    # Pad the batch so the grid tiles evenly (remainder handling).
    Bp = ((B + block_b - 1) // block_b) * block_b
    if Bp != B:
        x = jnp.pad(x, ((0, Bp - B), (0, 0)))
        c = jnp.pad(c, ((0, Bp - B), (0, 0)))

    # bf16 matmul operands (halves weight DMA/VMEM, feeds the MXU at bf16 peak).
    x_bf = x.astype(jnp.bfloat16)
    c_bf = c.astype(jnp.bfloat16)
    w11 = params["w11"].astype(jnp.bfloat16)
    w12 = params["w12"].astype(jnp.bfloat16)
    w2a = params["w2"][:hidden1].astype(jnp.bfloat16)   # (1024, 512)
    w2b = params["w2"][hidden1:].astype(jnp.bfloat16)   # (1024, 512)
    w3 = params["w3"].astype(jnp.bfloat16)

    reduce_final = (y_size == 1)
    if reduce_final:
        w4 = params["w4"].T                   # (1, 256), kept f32 for the VPU reduction
    else:
        w4 = params["w4"].astype(jnp.bfloat16)

    b11, b12, b2, b3, b4 = (params["b11"], params["b12"], params["b2"],
                            params["b3"], params["b4"])

    def full_spec(arr):
        n = arr.ndim
        return pl.BlockSpec(arr.shape, lambda i: (0,) * n)

    in_specs = [
        pl.BlockSpec((block_b, x_size), lambda i: (i, 0)),      # x tile
        pl.BlockSpec((block_b, class_num), lambda i: (i, 0)),   # c tile
        full_spec(w11), full_spec(b11),
        full_spec(w12), full_spec(b12),
        full_spec(w2a), full_spec(w2b), full_spec(b2),
        full_spec(w3), full_spec(b3),
        full_spec(w4), full_spec(b4),
    ]
    out_spec = pl.BlockSpec((block_b, y_size), lambda i: (i, 0))

    kernel = functools.partial(_cond_disc_kernel, reduce_final=reduce_final)

    y = pl.pallas_call(
        kernel,
        out_shape=jax.ShapeDtypeStruct((Bp, y_size), jnp.float32),
        grid_spec=pltpu.PrefetchScalarGridSpec(
            num_scalar_prefetch=0,
            grid=(Bp // block_b,),
            in_specs=in_specs,
            out_specs=out_spec,
        ),
        compiler_params=pltpu.CompilerParams(
            dimension_semantics=("parallel",),
            vmem_limit_bytes=32 * 1024 * 1024,
        ),
    )(x_bf, c_bf,
      w11, b11,
      w12, b12,
      w2a, w2b, b2,
      w3, b3,
      w4, b4)

    return y[:B] if Bp != B else y


def init_params(key, x_size, class_num, y_size, std=0.02):
    """normal(0, std) weights; small non-zero biases so the bias add is exercised
    (the PyTorch weight_init would zero them, which is a special case of this)."""
    ks = jax.random.split(key, 10)

    def lin(kw, kb, fan_in, fan_out):
        w = std * jax.random.normal(kw, (fan_in, fan_out), jnp.float32)
        b = 0.01 * jax.random.normal(kb, (1, fan_out), jnp.float32)  # 2D for TPU layout
        return w, b

    w11, b11 = lin(ks[0], ks[1], x_size, 1024)
    w12, b12 = lin(ks[2], ks[3], class_num, 1024)
    w2, b2 = lin(ks[4], ks[5], 2048, 512)
    w3, b3 = lin(ks[6], ks[7], 512, 256)
    w4, b4 = lin(ks[8], ks[9], 256, y_size)
    return dict(w11=w11, b11=b11, w12=w12, b12=b12,
                w2=w2, b2=b2, w3=w3, b3=b3, w4=w4, b4=b4)


def reference_forward(x, c, p):
    """Pure-JAX f32 reference mirroring the PyTorch forward."""
    x1 = jax.nn.leaky_relu(x @ p["w11"] + p["b11"], 0.2)
    x2 = jax.nn.leaky_relu(c @ p["w12"] + p["b12"], 0.2)
    h = jnp.concatenate([x1, x2], axis=-1)
    h = jax.nn.leaky_relu(h @ p["w2"] + p["b2"], 0.2)
    h = jax.nn.leaky_relu(h @ p["w3"] + p["b3"], 0.2)
    return jax.nn.sigmoid(h @ p["w4"] + p["b4"])


if __name__ == "__main__":
    # Module-consistent shapes. B=256 with block_b=128 -> grid of 2 "parallel"
    # steps (keeps both v7x TensorCores busy) while staying tiny.
    B, X_SIZE, CLASS_NUM, Y_SIZE = 256, 64, 16, 1
    BLOCK_B = 128

    key = jax.random.PRNGKey(0)
    k_x, k_c, k_p = jax.random.split(key, 3)

    x = jax.random.normal(k_x, (B, X_SIZE), jnp.float32)
    labels = jax.random.randint(k_c, (B,), 0, CLASS_NUM)
    c = jax.nn.one_hot(labels, CLASS_NUM, dtype=jnp.float32)

    params = init_params(k_p, X_SIZE, CLASS_NUM, Y_SIZE)

    y = conditional_discriminator(x, c, params, block_b=BLOCK_B)
    y = jax.block_until_ready(y)

    y_ref = reference_forward(x, c, params)
    assert y.shape == (B, Y_SIZE)
    # bf16 MXU operands vs. pure-f32 reference: expect small deviations.
    assert jnp.allclose(y, y_ref, atol=1e-2, rtol=0.0), (
        "mismatch vs reference, max abs err = "
        f"{float(jnp.max(jnp.abs(y - y_ref)))}")

    print("KERNEL_OK")
</pallas_src>

<mosaic_0001>
module attributes {stable_mosaic.version = 11 : i64} {
  func.func @_cond_disc_kernel(%arg0: i32, %arg1: memref<128x64xbf16, #tpu.memory_space<vmem>>, %arg2: memref<128x16xbf16, #tpu.memory_space<vmem>>, %arg3: memref<64x1024xbf16, #tpu.memory_space<vmem>>, %arg4: memref<1x1024xf32, #tpu.memory_space<vmem>>, %arg5: memref<16x1024xbf16, #tpu.memory_space<vmem>>, %arg6: memref<1x1024xf32, #tpu.memory_space<vmem>>, %arg7: memref<1024x512xbf16, #tpu.memory_space<vmem>>, %arg8: memref<1024x512xbf16, #tpu.memory_space<vmem>>, %arg9: memref<1x512xf32, #tpu.memory_space<vmem>>, %arg10: memref<512x256xbf16, #tpu.memory_space<vmem>>, %arg11: memref<1x256xf32, #tpu.memory_space<vmem>>, %arg12: memref<1x256xf32, #tpu.memory_space<vmem>>, %arg13: memref<1x1xf32, #tpu.memory_space<vmem>>, %arg14: memref<128x1xf32, #tpu.memory_space<vmem>>) attributes {dimension_semantics = [#tpu.dimension_semantics<parallel>], iteration_bounds = array<i64: 2>, scalar_prefetch = 0 : i64, scratch_operands = 0 : i64, tpu.core_type = #tpu.core_type<tc>, window_params = [{transform_indices = @transform_0, window_bounds = array<i64: 128, 64>}, {transform_indices = @transform_1, window_bounds = array<i64: 128, 16>}, {pipeline_mode = #tpu.pipeline_mode<synchronous>, transform_indices = @transform_2, window_bounds = array<i64: 64, 1024>}, {pipeline_mode = #tpu.pipeline_mode<synchronous>, transform_indices = @transform_3, window_bounds = array<i64: 1, 1024>}, {pipeline_mode = #tpu.pipeline_mode<synchronous>, transform_indices = @transform_4, window_bounds = array<i64: 16, 1024>}, {pipeline_mode = #tpu.pipeline_mode<synchronous>, transform_indices = @transform_5, window_bounds = array<i64: 1, 1024>}, {pipeline_mode = #tpu.pipeline_mode<synchronous>, transform_indices = @transform_6, window_bounds = array<i64: 1024, 512>}, {pipeline_mode = #tpu.pipeline_mode<synchronous>, transform_indices = @transform_7, window_bounds = array<i64: 1024, 512>}, {pipeline_mode = #tpu.pipeline_mode<synchronous>, transform_indices = @transform_8, window_bounds = array<i64: 1, 512>}, {pipeline_mode = #tpu.pipeline_mode<synchronous>, transform_indices = @transform_9, window_bounds = array<i64: 512, 256>}, {pipeline_mode = #tpu.pipeline_mode<synchronous>, transform_indices = @transform_10, window_bounds = array<i64: 1, 256>}, {pipeline_mode = #tpu.pipeline_mode<synchronous>, transform_indices = @transform_11, window_bounds = array<i64: 1, 256>}, {pipeline_mode = #tpu.pipeline_mode<synchronous>, transform_indices = @transform_12, window_bounds = array<i64: 1, 1>}, {transform_indices = @transform_13, window_bounds = array<i64: 128, 1>}]} {
    %c0 = arith.constant 0 : index
    %c0_0 = arith.constant 0 : index
    %0 = vector.load %arg1[%c0, %c0_0] : memref<128x64xbf16, #tpu.memory_space<vmem>>, vector<128x64xbf16>
    %c0_1 = arith.constant 0 : index
    %c0_2 = arith.constant 0 : index
    %1 = vector.load %arg3[%c0_1, %c0_2] : memref<64x1024xbf16, #tpu.memory_space<vmem>>, vector<64x1024xbf16>
    %cst = arith.constant dense<0.000000e+00> : vector<128x1024xf32>
    %2 = tpu.matmul %0, %1, %cst {dimension_numbers = #tpu.dot_dimension_numbers<[1], [0], [0], [1], [0, 0, 1, 1], [], []>} : vector<128x64xbf16>, vector<64x1024xbf16>, vector<128x1024xf32> -> vector<128x1024xf32>
    %c0_3 = arith.constant 0 : index
    %c0_4 = arith.constant 0 : index
    %3 = vector.load %arg4[%c0_3, %c0_4] : memref<1x1024xf32, #tpu.memory_space<vmem>>, vector<1x1024xf32>
    %4 = vector.broadcast %3 : vector<1x1024xf32> to vector<128x1024xf32>
    %5 = arith.addf %2, %4 : vector<128x1024xf32>
    %cst_5 = arith.constant 0.000000e+00 : f32
    %6 = vector.broadcast %cst_5 : f32 to vector<128x1024xf32>
    %7 = arith.cmpf ogt, %5, %6 : vector<128x1024xf32>
    %cst_6 = arith.constant 2.000000e-01 : f32
    %8 = vector.broadcast %cst_6 : f32 to vector<128x1024xf32>
    %9 = arith.mulf %8, %5 : vector<128x1024xf32>
    %10 = arith.select %7, %5, %9 : vector<128x1024xi1>, vector<128x1024xf32>
    %c0_7 = arith.constant 0 : index
    %c0_8 = arith.constant 0 : index
    %11 = vector.load %arg2[%c0_7, %c0_8] : memref<128x16xbf16, #tpu.memory_space<vmem>>, vector<128x16xbf16>
    %c0_9 = arith.constant 0 : index
    %c0_10 = arith.constant 0 : index
    %12 = vector.load %arg5[%c0_9, %c0_10] : memref<16x1024xbf16, #tpu.memory_space<vmem>>, vector<16x1024xbf16>
    %cst_11 = arith.constant dense<0.000000e+00> : vector<128x1024xf32>
    %13 = tpu.matmul %11, %12, %cst_11 {dimension_numbers = #tpu.dot_dimension_numbers<[1], [0], [0], [1], [0, 0, 1, 1], [], []>} : vector<128x16xbf16>, vector<16x1024xbf16>, vector<128x1024xf32> -> vector<128x1024xf32>
    %c0_12 = arith.constant 0 : index
    %c0_13 = arith.constant 0 : index
    %14 = vector.load %arg6[%c0_12, %c0_13] : memref<1x1024xf32, #tpu.memory_space<vmem>>, vector<1x1024xf32>
    %15 = vector.broadcast %14 : vector<1x1024xf32> to vector<128x1024xf32>
    %16 = arith.addf %13, %15 : vector<128x1024xf32>
    %cst_14 = arith.constant 0.000000e+00 : f32
    %17 = vector.broadcast %cst_14 : f32 to vector<128x1024xf32>
    %18 = arith.cmpf ogt, %16, %17 : vector<128x1024xf32>
    %cst_15 = arith.constant 2.000000e-01 : f32
    %19 = vector.broadcast %cst_15 : f32 to vector<128x1024xf32>
    %20 = arith.mulf %19, %16 : vector<128x1024xf32>
    %21 = arith.select %18, %16, %20 : vector<128x1024xi1>, vector<128x1024xf32>
    %22 = arith.truncf %10 : vector<128x1024xf32> to vector<128x1024xbf16>
    %c0_16 = arith.constant 0 : index
    %c0_17 = arith.constant 0 : index
    %23 = vector.load %arg7[%c0_16, %c0_17] : memref<1024x512xbf16, #tpu.memory_space<vmem>>, vector<1024x512xbf16>
    %cst_18 = arith.constant dense<0.000000e+00> : vector<128x512xf32>
    %24 = tpu.matmul %22, %23, %cst_18 {dimension_numbers = #tpu.dot_dimension_numbers<[1], [0], [0], [1], [0, 0, 1, 1], [], []>} : vector<128x1024xbf16>, vector<1024x512xbf16>, vector<128x512xf32> -> vector<128x512xf32>
    %25 = arith.truncf %21 : vector<128x1024xf32> to vector<128x1024xbf16>
    %c0_19 = arith.constant 0 : index
    %c0_20 = arith.constant 0 : index
    %26 = vector.load %arg8[%c0_19, %c0_20] : memref<1024x512xbf16, #tpu.memory_space<vmem>>, vector<1024x512xbf16>
    %cst_21 = arith.constant dense<0.000000e+00> : vector<128x512xf32>
    %27 = tpu.matmul %25, %26, %cst_21 {dimension_numbers = #tpu.dot_dimension_numbers<[1], [0], [0], [1], [0, 0, 1, 1], [], []>} : vector<128x1024xbf16>, vector<1024x512xbf16>, vector<128x512xf32> -> vector<128x512xf32>
    %28 = arith.addf %24, %27 : vector<128x512xf32>
    %c0_22 = arith.constant 0 : index
    %c0_23 = arith.constant 0 : index
    %29 = vector.load %arg9[%c0_22, %c0_23] : memref<1x512xf32, #tpu.memory_space<vmem>>, vector<1x512xf32>
    %30 = vector.broadcast %29 : vector<1x512xf32> to vector<128x512xf32>
    %31 = arith.addf %28, %30 : vector<128x512xf32>
    %cst_24 = arith.constant 0.000000e+00 : f32
    %32 = vector.broadcast %cst_24 : f32 to vector<128x512xf32>
    %33 = arith.cmpf ogt, %31, %32 : vector<128x512xf32>
    %cst_25 = arith.constant 2.000000e-01 : f32
    %34 = vector.broadcast %cst_25 : f32 to vector<128x512xf32>
    %35 = arith.mulf %34, %31 : vector<128x512xf32>
    %36 = arith.select %33, %31, %35 : vector<128x512xi1>, vector<128x512xf32>
    %37 = arith.truncf %36 : vector<128x512xf32> to vector<128x512xbf16>
    %c0_26 = arith.constant 0 : index
    %c0_27 = arith.constant 0 : index
    %38 = vector.load %arg10[%c0_26, %c0_27] : memref<512x256xbf16, #tpu.memory_space<vmem>>, vector<512x256xbf16>
    %cst_28 = arith.constant dense<0.000000e+00> : vector<128x256xf32>
    %39 = tpu.matmul %37, %38, %cst_28 {dimension_numbers = #tpu.dot_dimension_numbers<[1], [0], [0], [1], [0, 0, 1, 1], [], []>} : vector<128x512xbf16>, vector<512x256xbf16>, vector<128x256xf32> -> vector<128x256xf32>
    %c0_29 = arith.constant 0 : index
    %c0_30 = arith.constant 0 : index
    %40 = vector.load %arg11[%c0_29, %c0_30] : memref<1x256xf32, #tpu.memory_space<vmem>>, vector<1x256xf32>
    %41 = vector.broadcast %40 : vector<1x256xf32> to vector<128x256xf32>
    %42 = arith.addf %39, %41 : vector<128x256xf32>
    %cst_31 = arith.constant 0.000000e+00 : f32
    %43 = vector.broadcast %cst_31 : f32 to vector<128x256xf32>
    %44 = arith.cmpf ogt, %42, %43 : vector<128x256xf32>
    %cst_32 = arith.constant 2.000000e-01 : f32
    %45 = vector.broadcast %cst_32 : f32 to vector<128x256xf32>
    %46 = arith.mulf %45, %42 : vector<128x256xf32>
    %47 = arith.select %44, %42, %46 : vector<128x256xi1>, vector<128x256xf32>
    %c0_33 = arith.constant 0 : index
    %c0_34 = arith.constant 0 : index
    %48 = vector.load %arg12[%c0_33, %c0_34] : memref<1x256xf32, #tpu.memory_space<vmem>>, vector<1x256xf32>
    %49 = vector.broadcast %48 : vector<1x256xf32> to vector<128x256xf32>
    %50 = arith.mulf %47, %49 : vector<128x256xf32>
    %cst_35 = arith.constant dense<0.000000e+00> : vector<128xf32>
    %51 = vector.multi_reduction <add>, %50, %cst_35 [1] : vector<128x256xf32> to vector<128xf32>
    %52 = vector.shape_cast %51 : vector<128xf32> to vector<128x1xf32>
    %c0_36 = arith.constant 0 : index
    %c0_37 = arith.constant 0 : index
    %53 = vector.load %arg13[%c0_36, %c0_37] : memref<1x1xf32, #tpu.memory_space<vmem>>, vector<1x1xf32>
    %54 = vector.broadcast %53 : vector<1x1xf32> to vector<128x1xf32>
    %55 = arith.addf %52, %54 : vector<128x1xf32>
    %56 = arith.negf %55 : vector<128x1xf32>
    %57 = math.exp %56 : vector<128x1xf32>
    %cst_38 = arith.constant 1.000000e+00 : f32
    %58 = vector.broadcast %cst_38 : f32 to vector<128x1xf32>
    %59 = arith.addf %58, %57 : vector<128x1xf32>
    %60 = arith.divf %58, %59 : vector<128x1xf32>
    %c0_39 = arith.constant 0 : index
    %c0_40 = arith.constant 0 : index
    %61 = vector.load %arg14[%c0_39, %c0_40] : memref<128x1xf32, #tpu.memory_space<vmem>>, vector<128x1xf32>
    tpu.vector_store %arg14[%c0_39, %c0_40], %60 {strides = array<i32>} : memref<128x1xf32, #tpu.memory_space<vmem>>, vector<128x1xf32>,
    return
  }
  func.func @transform_0(%arg0: i32) -> (i32, i32) {
    %c0_i32 = arith.constant 0 : i32
    %c0_i32_0 = arith.constant 0 : i32
    return %arg0, %c0_i32 : i32, i32
  }
  func.func @transform_1(%arg0: i32) -> (i32, i32) {
    %c0_i32 = arith.constant 0 : i32
    %c0_i32_0 = arith.constant 0 : i32
    return %arg0, %c0_i32 : i32, i32
  }
  func.func @transform_2(%arg0: i32) -> (i32, i32) {
    %c0_i32 = arith.constant 0 : i32
    %c0_i32_0 = arith.constant 0 : i32
    %c0_i32_1 = arith.constant 0 : i32
    return %c0_i32, %c0_i32_0 : i32, i32
  }
  func.func @transform_3(%arg0: i32) -> (i32, i32) {
    %c0_i32 = arith.constant 0 : i32
    %c0_i32_0 = arith.constant 0 : i32
    %c0_i32_1 = arith.constant 0 : i32
    return %c0_i32, %c0_i32_0 : i32, i32
  }
  func.func @transform_4(%arg0: i32) -> (i32, i32) {
    %c0_i32 = arith.constant 0 : i32
    %c0_i32_0 = arith.constant 0 : i32
    %c0_i32_1 = arith.constant 0 : i32
    return %c0_i32, %c0_i32_0 : i32, i32
  }
  func.func @transform_5(%arg0: i32) -> (i32, i32) {
    %c0_i32 = arith.constant 0 : i32
    %c0_i32_0 = arith.constant 0 : i32
    %c0_i32_1 = arith.constant 0 : i32
    return %c0_i32, %c0_i32_0 : i32, i32
  }
  func.func @transform_6(%arg0: i32) -> (i32, i32) {
    %c0_i32 = arith.constant 0 : i32
    %c0_i32_0 = arith.constant 0 : i32
    %c0_i32_1 = arith.constant 0 : i32
    return %c0_i32, %c0_i32_0 : i32, i32
  }
  func.func @transform_7(%arg0: i32) -> (i32, i32) {
    %c0_i32 = arith.constant 0 : i32
    %c0_i32_0 = arith.constant 0 : i32
    %c0_i32_1 = arith.constant 0 : i32
    return %c0_i32, %c0_i32_0 : i32, i32
  }
  func.func @transform_8(%arg0: i32) -> (i32, i32) {
    %c0_i32 = arith.constant 0 : i32
    %c0_i32_0 = arith.constant 0 : i32
    %c0_i32_1 = arith.constant 0 : i32
    return %c0_i32, %c0_i32_0 : i32, i32
  }
  func.func @transform_9(%arg0: i32) -> (i32, i32) {
    %c0_i32 = arith.constant 0 : i32
    %c0_i32_0 = arith.constant 0 : i32
    %c0_i32_1 = arith.constant 0 : i32
    return %c0_i32, %c0_i32_0 : i32, i32
  }
  func.func @transform_10(%arg0: i32) -> (i32, i32) {
    %c0_i32 = arith.constant 0 : i32
    %c0_i32_0 = arith.constant 0 : i32
    %c0_i32_1 = arith.constant 0 : i32
    return %c0_i32, %c0_i32_0 : i32, i32
  }
  func.func @transform_11(%arg0: i32) -> (i32, i32) {
    %c0_i32 = arith.constant 0 : i32
    %c0_i32_0 = arith.constant 0 : i32
    %c0_i32_1 = arith.constant 0 : i32
    return %c0_i32, %c0_i32_0 : i32, i32
  }
  func.func @transform_12(%arg0: i32) -> (i32, i32) {
    %c0_i32 = arith.constant 0 : i32
    %c0_i32_0 = arith.constant 0 : i32
    %c0_i32_1 = arith.constant 0 : i32
    return %c0_i32, %c0_i32_0 : i32, i32
  }
  func.func @transform_13(%arg0: i32) -> (i32, i32) {
    %c0_i32 = arith.constant 0 : i32
    %c0_i32_0 = arith.constant 0 : i32
    return %arg0, %c0_i32 : i32, i32
  }
}

</mosaic_0001>

<bundles_post_ra>
// kernel: conditional_discriminator.1
= control target key start
LH: loop header
LB: loop body
LE: loop exit
PB: predicated region body
PF: predicated region fallthrough
CT: control target
= control target key end

     0   :  { %s10721_s27 = smov 0   ;;  %s15497_s0 = inlined_call_operand.vmem [shape: bf16[256,64], index: 0, kind: input, shape index: {}]   ;;  %s15498_s1 = inlined_call_operand.vmem [shape: bf16[256,16], index: 1, kind: input, shape index: {}]   ;;  %s15499_s2 = inlined_call_operand.vmem [shape: bf16[64,1024], index: 2, kind: input, shape index: {}]   ;;  %s15500_s3 = inlined_call_operand.vmem [shape: f32[1,1024], index: 3, kind: input, shape index: {}]   ;;  %s15501_s4 = inlined_call_operand.vmem [shape: bf16[16,1024], index: 4, kind: input, shape index: {}]   ;;  %s15502_s5 = inlined_call_operand.vmem [shape: f32[1,1024], index: 5, kind: input, shape index: {}]   ;;  %s15503_s6 = inlined_call_operand.vmem [shape: bf16[1024,512], index: 6, kind: input, shape index: {}]   ;;  %s15504_s7 = inlined_call_operand.vmem [shape: bf16[1024,512], index: 7, kind: input, shape index: {}]   ;;  %s15505_s8 = inlined_call_operand.vmem [shape: f32[1,512], index: 8, kind: input, shape index: {}]   ;;  %s15506_s9 = inlined_call_operand.vmem [shape: bf16[512,256], index: 9, kind: input, shape index: {}]   ;;  %s15507_s10 = inlined_call_operand.vmem [shape: f32[1,256], index: 10, kind: input, shape index: {}]   ;;  %s15508_s11 = inlined_call_operand.vmem [shape: f32[1,256], index: 11, kind: input, shape index: {}]   ;;  %s15509_s12 = inlined_call_operand.<no memory space> [shape: f32[1,1], index: 12, kind: input, shape index: {}]   ;;  %s15510_s13 = inlined_call_operand.vmem [shape: f32[256,1], index: 13, kind: output, shape index: {}]  }
   0x1   :  { %v18_v0 = vstv %s15509_s12 }
   0x2   :  { %19 = vst [vmem:[#allocation2] sm:$0x1] %v18_v0 }
   0x3 LB: > { %s8959_s28 = sadd.s32 4294967295, %s10645_s27   ;;  %p8963_p0 = scmp.ge.s32.totalorder %s10645_s27, 1  ;;  %s10645_s27 = sphi %s10721_s27, %s25_s27  }
   0x4   : > { %p401_p1 = scmp.lt.s32.totalorder %s10645_s27, 3 }
   0x6   : > { %p402_p2 = pnand %p8963_p0, %p401_p1 }
   0x8   : > { %405 = sbr.rel (%p402_p2) target bundleno = 1486 (0x5ce), region = 72 }
   0xd   : > { %v509_v1 = vld [vmem:[%s15499_s2 + $0xc0] sm:$0xff]  ;;  %v510_v3 = vld [vmem:[%s15499_s2 + $0xc8] sm:$0xff]  ;;  %s8964_s17 = sshll.u32 %s8959_s28, 4  ;;  %v15511_v9 = vmov 0   ;;  %v511_v32 = vld [vmem:[%s15499_s2 + $0xd0] sm:$0xff]  ;;  %vm759_vm0 = vcmask 523264  }
   0xe   : > { %v513_v2 = vld [vmem:[%s15499_s2 + $0xe0] sm:$0xff]  ;;  %v514_v5 = vld [vmem:[%s15499_s2 + $0xe8] sm:$0xff]  ;;  %816 = vmatprep.mubr.bf16.mxu0 %v15511_v9  ;;  %929 = vmatprep.mubr.bf16.mxu1 %v15511_v9  ;;  %p451_p3 = scmp.lt.s32.totalorder %s8964_s17, 31  ;;  %v515_v33 = vld [vmem:[%s15499_s2 + $0xf0] sm:$0xff]  ;;  %vm1766_vm1 = vcmask 130048  }
   0xf   : > { %v9003_v4 = vcombine.high %v509_v1, %v513_v2  ;;  %v9002_v6 = vcombine.low %v509_v1, %v513_v2  ;;  %v501_v7 = vld [vmem:[%s15499_s2 + $0x80] sm:$0xff]  ;;  %v9005_v10 = vcombine.high %v510_v3, %v514_v5  ;;  %v9004_v11 = vcombine.low %v510_v3, %v514_v5  ;;  %v502_v13 = vld [vmem:[%s15499_s2 + $0x88] sm:$0xff]  ;;  %v512_v34 = vld [vmem:[%s15499_s2 + $0xd8] sm:$0xff] }
  0x10   : > { %v505_v8 = vld [vmem:[%s15499_s2 + $0xa0] sm:$0xff]  ;;  %v506_v14 = vld [vmem:[%s15499_s2 + $0xa8] sm:$0xff]  ;;  %s16062_s17 = smov (!%p451_p3, %s8964_s17), 31  ;;  %v516_v35 = vld [vmem:[%s15499_s2 + $0xf8] sm:$0xff]  ;;  %v9007_v38 = vcombine.high %v511_v32, %v515_v33  ;;  %v9006_v43 = vcombine.low %v511_v32, %v515_v33 }
  0x11   : > { %v8995_v12 = vcombine.high %v501_v7, %v505_v8  ;;  %v493_v15 = vld [vmem:[%s15499_s2 + $0x40] sm:$0xff]  ;;  %792 = vmatprep.subr.bf16.mxu0 %v9003_v4  ;;  %v8997_v16 = vcombine.high %v502_v13, %v506_v14  ;;  %v494_v18 = vld [vmem:[%s15499_s2 + $0x48] sm:$0xff]  ;;  %905 = vmatprep.subr.bf16.mxu1 %v9005_v10  ;;  %v8994_v20 = vcombine.low %v501_v7, %v505_v8  ;;  %s8965_s20 = sshll.u32 %s16062_s17, 2  ;;  %v503_v39 = vld [vmem:[%s15499_s2 + $0x90] sm:$0xff]  ;;  %s8969_s21 = sshll.u32 %s16062_s17, 3 }
  0x12   : > { %v497_v17 = vld [vmem:[%s15499_s2 + $0x60] sm:$0xff]  ;;  %v498_v19 = vld [vmem:[%s15499_s2 + $0x68] sm:$0xff]  ;;  %793 = vmatpush1.bf16.msra.mxu0 %v9002_v6  ;;  %906 = vmatpush1.bf16.msra.mxu1 %v9004_v11  ;;  %v8996_v21 = vcombine.low %v502_v13, %v506_v14  ;;  %s10784_s30 = scalar_lea.vmem %s15497_s0, %s8965_s20  ;;  %v9009_v41 = vcombine.high %v512_v34, %v516_v35  ;;  %v507_v42 = vld [vmem:[%s15499_s2 + $0xb0] sm:$0xff]  ;;  %v9008_v46 = vcombine.low %v512_v34, %v516_v35  ;;  %s10827_s25 = scalar_lea.vmem %s15498_s1, %s8965_s20 }
  0x13   : > { %794 = vmatprep.subr.bf16.mxu0 %v8995_v12  ;;  %v8987_v22 = vcombine.high %v493_v15, %v497_v17  ;;  %907 = vmatprep.subr.bf16.mxu1 %v8997_v16  ;;  %v8989_v23 = vcombine.high %v494_v18, %v498_v19  ;;  %v485_v24 = vld [vmem:[%s15499_s2] sm:$0xff]  ;;  %v486_v26 = vld [vmem:[%s15499_s2 + $0x8] sm:$0xff]  ;;  %v8986_v28 = vcombine.low %v493_v15, %v497_v17  ;;  %v504_v44 = vld [vmem:[%s15499_s2 + $0x98] sm:$0xff]  ;;  %s15452_s23 = scalar_lea.vmem %s15510_s13, %s8969_s21 }
  0x14   : > { %v489_v25 = vld [vmem:[%s15499_s2 + $0x20] sm:$0xff]  ;;  %v490_v27 = vld [vmem:[%s15499_s2 + $0x28] sm:$0xff]  ;;  %v8988_v29 = vcombine.low %v494_v18, %v498_v19  ;;  %v508_v45 = vld [vmem:[%s15499_s2 + $0xb8] sm:$0xff]  ;;  %v8999_v47 = vcombine.high %v503_v39, %v507_v42  ;;  %v8998_v53 = vcombine.low %v503_v39, %v507_v42 }
  0x15   : > { %v8979_v30 = vcombine.high %v485_v24, %v489_v25  ;;  %v8981_v31 = vcombine.high %v486_v26, %v490_v27  ;;  %v8978_v36 = vcombine.low %v485_v24, %v489_v25  ;;  %v8980_v37 = vcombine.low %v486_v26, %v490_v27  ;;  %v10805_v40 = vld [vmem:[%s10784_s30] sm:$0xff]   ;;  %v495_v48 = vld [vmem:[%s15499_s2 + $0x50] sm:$0xff]  ;;  %v496_v51 = vld [vmem:[%s15499_s2 + $0x58] sm:$0xff] }
  0x16   : > { %795 = vmatpush1.bf16.msra.mxu0 %v8994_v20  ;;  %908 = vmatpush1.bf16.msra.mxu1 %v8996_v21  ;;  %v499_v49 = vld [vmem:[%s15499_s2 + $0x70] sm:$0xff]  ;;  %v9001_v50 = vcombine.high %v504_v44, %v508_v45  ;;  %v500_v52 = vld [vmem:[%s15499_s2 + $0x78] sm:$0xff]  ;;  %v10841_v54 = vld [vmem:[%s10784_s30 + $0x8] sm:$0xff]   ;;  %v9000_v55 = vcombine.low %v504_v44, %v508_v45 }
  0x17   : > { %796 = vmatprep.subr.bf16.mxu0 %v8987_v22  ;;  %909 = vmatprep.subr.bf16.mxu1 %v8989_v23  ;;  %v8991_v56 = vcombine.high %v495_v48, %v499_v49  ;;  %v487_v57 = vld [vmem:[%s15499_s2 + $0x10] sm:$0xff]  ;;  %v8993_v59 = vcombine.high %v496_v51, %v500_v52  ;;  %v488_v60 = vld [vmem:[%s15499_s2 + $0x18] sm:$0xff]  ;;  %v8990_v62 = vcombine.low %v495_v48, %v499_v49  ;;  %v10859_v63 = vld [vmem:[%s15501_s4] sm:$0xff] }
  0x18   : > { %v491_v58 = vld [vmem:[%s15499_s2 + $0x30] sm:$0xff]  ;;  %v492_v61 = vld [vmem:[%s15499_s2 + $0x38] sm:$0xff]  ;;  %v10864_v0 = vld [vmem:[%s15501_s4 + $0x20] sm:$0xff]  ;;  %v8992_v1 = vcombine.low %v496_v51, %v500_v52 }
  0x19   : > { %v8983_v2 = vcombine.high %v487_v57, %v491_v58  ;;  %v1637_v3 = vld [vmem:[%s15501_s4 + $0x8] sm:$0xff]  ;;  %v8985_v5 = vcombine.high %v488_v60, %v492_v61  ;;  %v10879_v6 = vld [vmem:[%s10784_s30 + $0x10] sm:$0xff]   ;;  %v8982_v7 = vcombine.low %v487_v57, %v491_v58  ;;  %v8984_v8 = vcombine.low %v488_v60, %v492_v61  ;;  %v9697_v12 = vld [vmem:[%s10784_s30 + $0x18] sm:$0xff]  }
  0x1a   : > { %797 = vmatpush1.bf16.msra.mxu0 %v8986_v28  ;;  %910 = vmatpush1.bf16.msra.mxu1 %v8988_v29  ;;  %v1641_v4 = vld [vmem:[%s15501_s4 + $0x28] sm:$0xff]  ;;  %v9051_v10 = vcombine.high %v10859_v63, %v10864_v0  ;;  %v9698_v13 = vld [vmem:[%s10784_s30 + $0x20] sm:$0xff]   ;;  %v9700_v15 = vld [vmem:[%s10784_s30 + $0x30] sm:$0xff]   ;;  %v9050_v21 = vcombine.low %v10859_v63, %v10864_v0 }
  0x1b   : > { %798 = vmatprep.subr.bf16.mxu0 %v8979_v30  ;;  %911 = vmatprep.subr.bf16.mxu1 %v8981_v31  ;;  %v9053_v11 = vcombine.high %v1637_v3, %v1641_v4  ;;  %v9699_v14 = vld [vmem:[%s10784_s30 + $0x28] sm:$0xff]   ;;  %v9701_v16 = vld [vmem:[%s10784_s30 + $0x38] sm:$0xff]   ;;  %v1638_v17 = vld [vmem:[%s15501_s4 + $0x10] sm:$0xff]  ;;  %v9052_v22 = vcombine.low %v1637_v3, %v1641_v4 }
  0x1c   : > { %v1642_v18 = vld [vmem:[%s15501_s4 + $0x30] sm:$0xff]  ;;  %v1639_v19 = vld [vmem:[%s15501_s4 + $0x18] sm:$0xff]  ;;  %v10967_v25 = vld [vmem:[%s10827_s25] sm:$0xff]  }
  0x1d   : > { %v1643_v20 = vld [vmem:[%s15501_s4 + $0x38] sm:$0xff]  ;;  %v9055_v23 = vcombine.high %v1638_v17, %v1642_v18  ;;  %v9054_v26 = vcombine.low %v1638_v17, %v1642_v18  ;;  %v10975_v28 = vld [vmem:[%s10827_s25 + $0x8] sm:$0xff]   ;;  %v10985_v29 = vld [vmem:[%s10827_s25 + $0x10] sm:$0xff]  }
  0x1e   : > { %799 = vmatpush1.bf16.msra.mxu0 %v8978_v36  ;;  %912 = vmatpush1.bf16.msra.mxu1 %v8980_v37  ;;  %v9057_v24 = vcombine.high %v1639_v19, %v1643_v20  ;;  %v9056_v27 = vcombine.low %v1639_v19, %v1643_v20  ;;  %v9712_v30 = vld [vmem:[%s15504_s7 + $0xe4] ss:$16 sps:$4 sm:$0xff]   ;;  %v11000_v32 = vld [vmem:[%s10827_s25 + $0x18] sm:$0xff]   ;;  %v11018_v34 = vld [vmem:[%s10827_s25 + $0x28] sm:$0xff]   ;;  %v519_v36 = vlaneseq }
  0x1f   : > { %1018 = vmatprep.subr.bf16.mxu0 %v9007_v38  ;;  %1131 = vmatprep.subr.bf16.mxu1 %v9009_v41  ;;  %v9715_v31 = vld [vmem:[%s15504_s7 + $0x2e4] ss:$16 sps:$4 sm:$0xff]   ;;  %v11036_v37 = vld [vmem:[%s10827_s25 + $0x38] sm:$0xff]   ;;  %v9710_v42 = vld [vmem:[%s15504_s7 + $0xe0] ss:$16 sps:$4 sm:$0xff]  }
  0x20   : > { %v11009_v33 = vld [vmem:[%s10827_s25 + $0x20] sm:$0xff]   ;;  %v11027_v35 = vld [vmem:[%s10827_s25 + $0x30] sm:$0xff]   ;;  %v11038_v38 = vshrl.u32 %v519_v36, 7 }
  0x21   : > { %9010 = vmatmul.mubr.msk.bf16.vlgmr.msra.gmra.mxu0 %vm759_vm0, %v10805_v40  ;;  %9018 = vmatmul.mubr.msk.bf16.vlgmr.msra.gmra.mxu1 %vm759_vm0, %v10805_v40  ;;  %v11048_v39 = vld [vmem:[%s15500_s3] sm:$0xff] }
  0x22   : > { %1019 = vmatpush1.bf16.msra.mxu0 %v9006_v43  ;;  %1132 = vmatpush1.bf16.msra.mxu1 %v9008_v46  ;;  %15617 = vst [vmem:[#allocation3_spill] sm:$0xff] %v11038_v38  ;;  %v11055_v41 = vsub.s32 2, %v11038_v38  ;;  %v11065_v44 = vsub.s32 1, %v11038_v38  ;;  %v9713_v45 = vld [vmem:[%s15504_s7 + $0x2e0] ss:$16 sps:$4 sm:$0xff]   ;;  %v11117_v4 = vsub.s32 3, %v11038_v38 }
  0x23   : > { %826 = vmatprep.mubr.bf16.mxu0 %v15511_v9  ;;  %939 = vmatprep.mubr.bf16.mxu1 %v15511_v9  ;;  %v9718_v46 = vld [vmem:[%s15504_s7 + $0xc4] ss:$16 sps:$4 sm:$0xff]  }
  0x24   : > { %1020 = vmatprep.subr.bf16.mxu0 %v8999_v47  ;;  %1133 = vmatprep.subr.bf16.mxu1 %v9001_v50  ;;  %15619 = vst [vmem:[#allocation5_spill] sm:$0xff] %v11055_v41  ;;  %15620 = vst [vmem:[#allocation6_spill] sm:$0xff] %v11065_v44  ;;  %v11075_v47 = vrot.slane %v11048_v39, %v11055_v41  ;;  %v9721_v49 = vld [vmem:[%s15504_s7 + $0x2c4] ss:$16 sps:$4 sm:$0xff]   ;;  %v11087_v52 = vrot.slane %v11048_v39, %v11065_v44 }
  0x25   : > { %v9727_v61 = vld [vmem:[%s15504_s7 + $0x2a4] ss:$16 sps:$4 sm:$0xff]   ;;  %15622 = vst [vmem:[#allocation8_spill] sm:$0xff] %v11117_v4  ;;  %v11158_v36 = vrot.slane %v11048_v39, %v11117_v4 }
  0x26   : > { %1021 = vmatpush1.bf16.msra.mxu0 %v8998_v53  ;;  %1134 = vmatpush1.bf16.msra.mxu1 %v9000_v55  ;;  %15621 = vst [vmem:[#allocation7_spill] sm:$0xff] %v11087_v52  ;;  %v9716_v53 = vld [vmem:[%s15504_s7 + $0xc0] ss:$16 sps:$4 sm:$0xff]   ;;  %v9724_v55 = vld [vmem:[%s15504_s7 + $0xa4] ss:$16 sps:$4 sm:$0xff]  }
  0x27   : > { %1022 = vmatprep.subr.bf16.mxu0 %v8991_v56  ;;  %1135 = vmatprep.subr.bf16.mxu1 %v8993_v59  ;;  %15625 = vst [vmem:[#allocation11_spill] sm:$0xff] %v11158_v36 }
  0x29   : > { %9011 = vmatmul.mubr.msk.bf16.gmra.mxu0 %vm759_vm0, %v10841_v54  ;;  %9019 = vmatmul.mubr.msk.bf16.gmra.mxu1 %vm759_vm0, %v10841_v54 }
  0x2a   : > { %836 = vmatprep.mubr.bf16.mxu0 %v15511_v9  ;;  %949 = vmatprep.mubr.bf16.mxu1 %v15511_v9 }
  0x2b   : > { %1023 = vmatpush1.bf16.msra.mxu0 %v8990_v62  ;;  %1136 = vmatpush1.bf16.msra.mxu1 %v8992_v1  ;;  %v9722_v1 = vld [vmem:[%s15504_s7 + $0xa0] ss:$16 sps:$4 sm:$0xff]  }
  0x2c   : > { %1024 = vmatprep.subr.bf16.mxu0 %v8983_v2  ;;  %1137 = vmatprep.subr.bf16.mxu1 %v8985_v5  ;;  %v9725_v2 = vld [vmem:[%s15504_s7 + $0x2a0] ss:$16 sps:$4 sm:$0xff]  }
  0x2f   : > { %1025 = vmatpush1.bf16.msra.mxu0 %v8982_v7  ;;  %1138 = vmatpush1.bf16.msra.mxu1 %v8984_v8  ;;  %v9730_v7 = vld [vmem:[%s15504_s7 + $0x84] ss:$16 sps:$4 sm:$0xff]  }
  0x30   : > { %1805 = vmatprep.subr.bf16.mxu0 %v9051_v10  ;;  %1918 = vmatprep.subr.bf16.mxu1 %v9053_v11 }
  0x31   : > { %9012 = vmatmul.mubr.msk.bf16.gmra.mxu0 %vm759_vm0, %v10879_v6  ;;  %9020 = vmatmul.mubr.msk.bf16.gmra.mxu1 %vm759_vm0, %v10879_v6 }
  0x32   : > { %846 = vmatprep.mubr.bf16.mxu0 %v15511_v9  ;;  %959 = vmatprep.mubr.bf16.mxu1 %v15511_v9 }
  0x39   : > { %9013 = vmatmul.mubr.msk.bf16.gmra.mxu0 %vm759_vm0, %v9697_v12  ;;  %9021 = vmatmul.mubr.msk.bf16.gmra.mxu1 %vm759_vm0, %v9697_v12 }
  0x3a   : > { %856 = vmatprep.mubr.bf16.mxu0 %v15511_v9  ;;  %969 = vmatprep.mubr.bf16.mxu1 %v15511_v9 }
  0x41   : > { %9014 = vmatmul.mubr.msk.bf16.gmra.mxu0 %vm759_vm0, %v9698_v13  ;;  %9022 = vmatmul.mubr.msk.bf16.gmra.mxu1 %vm759_vm0, %v9698_v13 }
  0x42   : > { %866 = vmatprep.mubr.bf16.mxu0 %v15511_v9  ;;  %979 = vmatprep.mubr.bf16.mxu1 %v15511_v9 }
  0x49   : > { %9015 = vmatmul.mubr.msk.bf16.gmra.mxu0 %vm759_vm0, %v9699_v14  ;;  %9023 = vmatmul.mubr.msk.bf16.gmra.mxu1 %vm759_vm0, %v9699_v14 }
  0x4a   : > { %876 = vmatprep.mubr.bf16.mxu0 %v15511_v9  ;;  %989 = vmatprep.mubr.bf16.mxu1 %v15511_v9 }
  0x51   : > { %9016 = vmatmul.mubr.msk.bf16.gmra.mxu0 %vm759_vm0, %v9700_v15  ;;  %9024 = vmatmul.mubr.msk.bf16.gmra.mxu1 %vm759_vm0, %v9700_v15 }
  0x52   : > { %886 = vmatprep.mubr.bf16.mxu0 %v15511_v9  ;;  %999 = vmatprep.mubr.bf16.mxu1 %v15511_v9 }
  0x59   : > { %9017 = vmatmul.mubr.msk.bf16.gmra.mxu0 %vm759_vm0, %v9701_v16  ;;  %9025 = vmatmul.mubr.msk.bf16.gmra.mxu1 %vm759_vm0, %v9701_v16 }
  0x5a   : > { %1042 = vmatprep.mubr.bf16.mxu0 %v15511_v9  ;;  %1155 = vmatprep.mubr.bf16.mxu1 %v15511_v9 }
  0x61   : > { %9026 = vmatmul.mubr.msk.bf16.vlgmr.msra.gmra.mxu0 %vm759_vm0, %v10805_v40  ;;  %9034 = vmatmul.mubr.msk.bf16.vlgmr.msra.gmra.mxu1 %vm759_vm0, %v10805_v40  ;;  %v11051_v40 = vsub.s32 0, %v11038_v38 }
  0x62   : > { %1806 = vmatpush1.bf16.msra.mxu0 %v9050_v21  ;;  %1919 = vmatpush1.bf16.msra.mxu1 %v9052_v22 }
  0x63   : > { %1052 = vmatprep.mubr.bf16.mxu0 %v15511_v9  ;;  %1165 = vmatprep.mubr.bf16.mxu1 %v15511_v9  ;;  %15618 = vst [vmem:[#allocation4_spill] sm:$0xff] %v11051_v40  ;;  %v11062_v43 = vrot.slane %v11048_v39, %v11051_v40 }
  0x64   : > { %2031 = vmatprep.subr.bf16.mxu0 %v9055_v23  ;;  %2144 = vmatprep.subr.bf16.mxu1 %v9057_v24 }
  0x69   : > { %9027 = vmatmul.mubr.msk.bf16.gmra.mxu0 %vm759_vm0, %v10841_v54  ;;  %9035 = vmatmul.mubr.msk.bf16.gmra.mxu1 %vm759_vm0, %v10841_v54  ;;  %v9719_v54 = vld [vmem:[%s15504_s7 + $0x2c0] ss:$16 sps:$4 sm:$0xff]  }
  0x6a   : > { %1062 = vmatprep.mubr.bf16.mxu0 %v15511_v9  ;;  %1175 = vmatprep.mubr.bf16.mxu1 %v15511_v9 }
  0x71   : > { %9028 = vmatmul.mubr.msk.bf16.gmra.mxu0 %vm759_vm0, %v10879_v6  ;;  %9036 = vmatmul.mubr.msk.bf16.gmra.mxu1 %vm759_vm0, %v10879_v6 }
  0x72   : > { %1072 = vmatprep.mubr.bf16.mxu0 %v15511_v9  ;;  %1185 = vmatprep.mubr.bf16.mxu1 %v15511_v9 }
  0x79   : > { %9029 = vmatmul.mubr.msk.bf16.gmra.mxu0 %vm759_vm0, %v9697_v12  ;;  %9037 = vmatmul.mubr.msk.bf16.gmra.mxu1 %vm759_vm0, %v9697_v12 }
  0x7a   : > { %1082 = vmatprep.mubr.bf16.mxu0 %v15511_v9  ;;  %1195 = vmatprep.mubr.bf16.mxu1 %v15511_v9 }
  0x81   : > { %9030 = vmatmul.mubr.msk.bf16.gmra.mxu0 %vm759_vm0, %v9698_v13  ;;  %9038 = vmatmul.mubr.msk.bf16.gmra.mxu1 %vm759_vm0, %v9698_v13 }
  0x82   : > { %1092 = vmatprep.mubr.bf16.mxu0 %v15511_v9  ;;  %1205 = vmatprep.mubr.bf16.mxu1 %v15511_v9 }
  0x89   : > { %9031 = vmatmul.mubr.msk.bf16.gmra.mxu0 %vm759_vm0, %v9699_v14  ;;  %9039 = vmatmul.mubr.msk.bf16.gmra.mxu1 %vm759_vm0, %v9699_v14 }
  0x8a   : > { %1102 = vmatprep.mubr.bf16.mxu0 %v15511_v9  ;;  %1215 = vmatprep.mubr.bf16.mxu1 %v15511_v9 }
  0x91   : > { %9032 = vmatmul.mubr.msk.bf16.gmra.mxu0 %vm759_vm0, %v9700_v15  ;;  %9040 = vmatmul.mubr.msk.bf16.gmra.mxu1 %vm759_vm0, %v9700_v15  ;;  %v9733_v15 = vld [vmem:[%s15504_s7 + $0x284] ss:$16 sps:$4 sm:$0xff]  }
  0x92   : > { %1112 = vmatprep.mubr.bf16.mxu0 %v15511_v9  ;;  %1225 = vmatprep.mubr.bf16.mxu1 %v15511_v9 }
  0x99   : > { %9033 = vmatmul.mubr.msk.bf16.gmra.mxu0 %vm759_vm0, %v9701_v16  ;;  %9041 = vmatmul.mubr.msk.bf16.gmra.mxu1 %vm759_vm0, %v9701_v16 }
  0x9a   : > { %1823 = vmatprep.mubr.bf16.mxu0 %v15511_v9  ;;  %1936 = vmatprep.mubr.bf16.mxu1 %v15511_v9 }
  0xa1   : > { %9058 = vmatmul.mubr.msk.bf16.vlgmr.msra.gmra.mxu0 %vm1766_vm1, %v10967_v25  ;;  %9066 = vmatmul.mubr.msk.bf16.vlgmr.msra.gmra.mxu1 %vm1766_vm1, %v10967_v25 }
  0xa2   : > { %2032 = vmatpush1.bf16.msra.mxu0 %v9054_v26  ;;  %2145 = vmatpush1.bf16.msra.mxu1 %v9056_v27 }
  0xa3   : > { %1833 = vmatprep.mubr.bf16.mxu0 %v15511_v9  ;;  %1946 = vmatprep.mubr.bf16.mxu1 %v15511_v9 }
  0xa4   : > { %4547 = vmatprep.subr.bf16.mxu0 %v9712_v30  ;;  %4660 = vmatprep.subr.bf16.mxu1 %v9715_v31  ;;  %v9731_v30 = vld [vmem:[%s15504_s7 + $0x280] ss:$16 sps:$4 sm:$0xff]   ;;  %v9736_v31 = vld [vmem:[%s15504_s7 + $0x64] ss:$16 sps:$4 sm:$0xff]  }
  0xa9   : > { %9059 = vmatmul.mubr.msk.bf16.gmra.mxu0 %vm1766_vm1, %v10975_v28  ;;  %9067 = vmatmul.mubr.msk.bf16.gmra.mxu1 %vm1766_vm1, %v10975_v28 }
  0xaa   : > { %1843 = vmatprep.mubr.bf16.mxu0 %v15511_v9  ;;  %1956 = vmatprep.mubr.bf16.mxu1 %v15511_v9 }
  0xb1   : > { %9060 = vmatmul.mubr.msk.bf16.gmra.mxu0 %vm1766_vm1, %v10985_v29  ;;  %9068 = vmatmul.mubr.msk.bf16.gmra.mxu1 %vm1766_vm1, %v10985_v29 }
  0xb2   : > { %1853 = vmatprep.mubr.bf16.mxu0 %v15511_v9  ;;  %1966 = vmatprep.mubr.bf16.mxu1 %v15511_v9 }
  0xb9   : > { %9061 = vmatmul.mubr.msk.bf16.gmra.mxu0 %vm1766_vm1, %v11000_v32  ;;  %9069 = vmatmul.mubr.msk.bf16.gmra.mxu1 %vm1766_vm1, %v11000_v32 }
  0xba   : > { %1863 = vmatprep.mubr.bf16.mxu0 %v15511_v9  ;;  %1976 = vmatprep.mubr.bf16.mxu1 %v15511_v9 }
  0xc1   : > { %9062 = vmatmul.mubr.msk.bf16.gmra.mxu0 %vm1766_vm1, %v11009_v33  ;;  %9070 = vmatmul.mubr.msk.bf16.gmra.mxu1 %vm1766_vm1, %v11009_v33 }
  0xc2   : > { %1873 = vmatprep.mubr.bf16.mxu0 %v15511_v9  ;;  %1986 = vmatprep.mubr.bf16.mxu1 %v15511_v9 }
  0xc9   : > { %9063 = vmatmul.mubr.msk.bf16.gmra.mxu0 %vm1766_vm1, %v11018_v34  ;;  %9071 = vmatmul.mubr.msk.bf16.gmra.mxu1 %vm1766_vm1, %v11018_v34 }
  0xca   : > { %1883 = vmatprep.mubr.bf16.mxu0 %v15511_v9  ;;  %1996 = vmatprep.mubr.bf16.mxu1 %v15511_v9 }
  0xd1   : > { %9064 = vmatmul.mubr.msk.bf16.gmra.mxu0 %vm1766_vm1, %v11027_v35  ;;  %9072 = vmatmul.mubr.msk.bf16.gmra.mxu1 %vm1766_vm1, %v11027_v35 }
  0xd2   : > { %1893 = vmatprep.mubr.bf16.mxu0 %v15511_v9  ;;  %2006 = vmatprep.mubr.bf16.mxu1 %v15511_v9 }
  0xd9   : > { %9065 = vmatmul.mubr.msk.bf16.gmra.mxu0 %vm1766_vm1, %v11036_v37  ;;  %9073 = vmatmul.mubr.msk.bf16.gmra.mxu1 %vm1766_vm1, %v11036_v37 }
  0xda   : > { %2049 = vmatprep.mubr.bf16.mxu0 %v15511_v9  ;;  %2162 = vmatprep.mubr.bf16.mxu1 %v15511_v9 }
  0xe1   : > { %v818_v48 = vpop.f32.mrf.mxu0  ;;  %9074 = vmatmul.mubr.msk.bf16.vlgmr.msra.gmra.mxu0 %vm1766_vm1, %v10967_v25  ;;  %v931_v51 = vpop.f32.mrf.mxu1  ;;  %9082 = vmatmul.mubr.msk.bf16.vlgmr.msra.gmra.mxu1 %vm1766_vm1, %v10967_v25  ;;  %v9728_v25 = vld [vmem:[%s15504_s7 + $0x80] ss:$16 sps:$4 sm:$0xff]  }
  0xe2   : > { %v819_v50 = vadd.f32 %v818_v48, %v11062_v43  ;;  %2059 = vmatprep.mubr.bf16.mxu0 %v15511_v9  ;;  %v932_v56 = vadd.f32 %v931_v51, %v11075_v47  ;;  %2172 = vmatprep.mubr.bf16.mxu1 %v15511_v9 }
  0xe3   : > { %v820_v57 = vpop.f32.mrf.mxu0  ;;  %4548 = vmatpush1.bf16.msra.mxu0 %v9710_v42  ;;  %v11101_v58 = vpop.f32.mrf.mxu1  ;;  %4661 = vmatpush1.bf16.msra.mxu1 %v9713_v45 }
  0xe4   : > { %4549 = vmatprep.subr.bf16.mxu0 %v9718_v46  ;;  %v1364_v59 = vmul.f32 0.2, %v819_v50  ;;  %4662 = vmatprep.subr.bf16.mxu1 %v9721_v49  ;;  %vm1236_vm2 = vcmp.gt.f32.partialorder %v819_v50, 0.0  ;;  %v11107_v62 = vadd.f32 %v820_v57, %v11087_v52  ;;  %v1366_v3 = vmul.f32 0.2, %v932_v56 }
  0xe5   : > { %v822_v60 = vpop.f32.mrf.mxu0  ;;  %v935_v0 = vpop.f32.mrf.mxu1  ;;  %vm1238_vm3 = vcmp.gt.f32.partialorder %v932_v56, 0.0  ;;  %v9739_v46 = vld [vmem:[%s15504_s7 + $0x264] ss:$16 sps:$4 sm:$0xff]  }
  0xe6   : > { %v823_v63 = vadd.f32 %v822_v60, %v11062_v43  ;;  %v936_v5 = vadd.f32 %v935_v0, %v11075_v47  ;;  %v1492_v12 = vsel %vm1236_vm2, %v819_v50, %v1364_v59  ;;  %v1365_v16 = vmul.f32 0.2, %v11107_v62  ;;  %v9734_v50 = vld [vmem:[%s15504_s7 + $0x60] ss:$16 sps:$4 sm:$0xff]   ;;  %v9745_v57 = vld [vmem:[%s15504_s7 + $0x244] ss:$16 sps:$4 sm:$0xff]  }
  0xe7   : > { %v824_v6 = vpop.f32.mrf.mxu0  ;;  %4550 = vmatpush1.bf16.msra.mxu0 %v9716_v53  ;;  %v937_v11 = vpop.f32.mrf.mxu1  ;;  %4663 = vmatpush1.bf16.msra.mxu1 %v9719_v54  ;;  %v1494_v21 = vsel %vm1238_vm3, %v932_v56, %v1366_v3  ;;  %vm1237_vm7 = vcmp.gt.f32.partialorder %v11107_v62, 0.0  ;;  %v9742_v56 = vld [vmem:[%s15504_s7 + $0x44] ss:$16 sps:$4 sm:$0xff]  }
  0xe8   : > { %vm1244_vm4 = vcmp.gt.f32.partialorder %v823_v63, 0.0  ;;  %v1372_v8 = vmul.f32 0.2, %v823_v63  ;;  %v825_v10 = vadd.f32 %v824_v6, %v11087_v52  ;;  %4551 = vmatprep.subr.bf16.mxu0 %v9724_v55  ;;  %vm1246_vm5 = vcmp.gt.f32.partialorder %v936_v5, 0.0  ;;  %4664 = vmatprep.subr.bf16.mxu1 %v9727_v61  ;;  %v9737_v55 = vld [vmem:[%s15504_s7 + $0x260] ss:$16 sps:$4 sm:$0xff]  }
  0xe9   : > { %v1374_v13 = vmul.f32 0.2, %v936_v5  ;;  %v828_v14 = vpop.f32.mrf.mxu0  ;;  %9075 = vmatmul.mubr.msk.bf16.gmra.mxu0 %vm1766_vm1, %v10975_v28  ;;  %v941_v20 = vpop.f32.mrf.mxu1  ;;  %9083 = vmatmul.mubr.msk.bf16.gmra.mxu1 %vm1766_vm1, %v10975_v28  ;;  %v938_v53 = vadd.f32 %v937_v11, %v11158_v36  ;;  %v1493_v59 = vsel %vm1237_vm7, %v11107_v62, %v1365_v16  ;;  %v9748_v16 = vld [vmem:[%s15504_s7 + $0x24] ss:$16 sps:$4 sm:$0xff]  }
  0xea   : > { %v1500_v17 = vsel %vm1244_vm4, %v823_v63, %v1372_v8  ;;  %v1373_v18 = vmul.f32 0.2, %v825_v10  ;;  %v829_v19 = vadd.f32 %v828_v14, %v11062_v43  ;;  %2069 = vmatprep.mubr.bf16.mxu0 %v15511_v9  ;;  %vm1245_vm6 = vcmp.gt.f32.partialorder %v825_v10, 0.0  ;;  %2182 = vmatprep.mubr.bf16.mxu1 %v15511_v9 }
  0xeb   : > { %v11136_v22 = vpack.c.bf16 %v1500_v17, %v1492_v12  ;;  %v1502_v23 = vsel %vm1246_vm5, %v936_v5, %v1374_v13  ;;  %v11138_v24 = vpop.f32.mrf.mxu0  ;;  %4552 = vmatpush1.bf16.msra.mxu0 %v9722_v1  ;;  %v942_v27 = vadd.f32 %v941_v20, %v11075_v47  ;;  %v11148_v28 = vpop.f32.mrf.mxu1  ;;  %4665 = vmatpush1.bf16.msra.mxu1 %v9725_v2  ;;  %v9740_v12 = vld [vmem:[%s15504_s7 + $0x40] ss:$16 sps:$4 sm:$0xff]   ;;  %vm1247_vm12 = vcmp.gt.f32.partialorder %v938_v53, 0.0 }
  0xec   : > { %v11145_v26 = vpack.c.bf16 %v1502_v23, %v1494_v21  ;;  %4553 = vmatprep.subr.bf16.mxu0 %v9730_v7  ;;  %v1380_v42 = vmul.f32 0.2, %v829_v19  ;;  %4666 = vmatprep.subr.bf16.mxu1 %v9733_v15  ;;  %vm1252_vm8 = vcmp.gt.f32.partialorder %v829_v19, 0.0  ;;  %v1501_v51 = vsel %vm1245_vm6, %v825_v10, %v1373_v18  ;;  %v9751_v23 = vld [vmem:[%s15504_s7 + $0x224] ss:$16 sps:$4 sm:$0xff]  }
  0xed   : > { %15623 = vst [vmem:[#allocation9_spill] sm:$0xff] %v11136_v22  ;;  %v832_v45 = vpop.f32.mrf.mxu0  ;;  %v945_v49 = vpop.f32.mrf.mxu1  ;;  %v1382_v60 = vmul.f32 0.2, %v942_v27  ;;  %v934_v1 = vadd.f32 %v11101_v58, %v11158_v36  ;;  %vm1254_vm10 = vcmp.gt.f32.partialorder %v942_v27, 0.0  ;;  %v11189_v62 = vpack.c.bf16 %v1501_v51, %v1493_v59  ;;  %v9754_v51 = vld [vmem:[%s15504_s7 + $0x4] ss:$16 sps:$4 sm:$0xff]  }
  0xee   : > { %15624 = vst [vmem:[#allocation10_spill] sm:$0xff] %v11145_v26  ;;  %v833_v48 = vadd.f32 %v832_v45, %v11062_v43  ;;  %v946_v63 = vadd.f32 %v945_v49, %v11075_v47  ;;  %v1508_v2 = vsel %vm1252_vm8, %v829_v19, %v1380_v42  ;;  %v1375_v58 = vmul.f32 0.2, %v938_v53  ;;  %v9746_v42 = vld [vmem:[%s15504_s7 + $0x20] ss:$16 sps:$4 sm:$0xff]  }
  0xef   : > { %v834_v54 = vpop.f32.mrf.mxu0  ;;  %4554 = vmatpush1.bf16.msra.mxu0 %v9728_v25  ;;  %v11182_v0 = vpop.f32.mrf.mxu1  ;;  %4667 = vmatpush1.bf16.msra.mxu1 %v9731_v30  ;;  %15626 = vst [vmem:[#allocation12_spill] sm:$0xff] %v11189_v62  ;;  %v1510_v13 = vsel %vm1254_vm10, %v942_v27, %v1382_v60  ;;  %v1367_v17 = vmul.f32 0.2, %v934_v1  ;;  %vm1239_vm13 = vcmp.gt.f32.partialorder %v934_v1, 0.0  ;;  %v9749_v45 = vld [vmem:[%s15504_s7 + $0x220] ss:$16 sps:$4 sm:$0xff]  }
  0xf0   : > { %vm1260_vm9 = vcmp.gt.f32.partialorder %v833_v48, 0.0  ;;  %v1388_v61 = vmul.f32 0.2, %v833_v48  ;;  %4555 = vmatprep.subr.bf16.mxu0 %v9736_v31  ;;  %4668 = vmatprep.subr.bf16.mxu1 %v9739_v46  ;;  %vm1262_vm11 = vcmp.gt.f32.partialorder %v946_v63, 0.0  ;;  %v1390_v6 = vmul.f32 0.2, %v946_v63 }
  0xf1   : > { %v838_v3 = vpop.f32.mrf.mxu0  ;;  %9076 = vmatmul.mubr.msk.bf16.gmra.mxu0 %vm1766_vm1, %v10985_v29  ;;  %v951_v8 = vpop.f32.mrf.mxu1  ;;  %9084 = vmatmul.mubr.msk.bf16.gmra.mxu1 %vm1766_vm1, %v10985_v29  ;;  %v9743_v29 = vld [vmem:[%s15504_s7 + $0x240] ss:$16 sps:$4 sm:$0xff]   ;;  %v11215_v19 = vadd.f32 %v834_v54, %v11087_v52  ;;  %v1503_v46 = vsel %vm1247_vm12, %v938_v53, %v1375_v58 }
  0xf2   : > { %v1516_v5 = vsel %vm1260_vm9, %v833_v48, %v1388_v61  ;;  %v839_v7 = vadd.f32 %v838_v3, %v11062_v43  ;;  %2079 = vmatprep.mubr.bf16.mxu0 %v15511_v9  ;;  %2192 = vmatprep.mubr.bf16.mxu1 %v15511_v9  ;;  %v1518_v14 = vsel %vm1262_vm11, %v946_v63, %v1390_v6 }
  0xf3   : > { %v11195_v10 = vpack.c.bf16 %v1516_v5, %v1508_v2  ;;  %v11197_v11 = vpop.f32.mrf.mxu0  ;;  %4556 = vmatpush1.bf16.msra.mxu0 %v9734_v50  ;;  %v11204_v15 = vpop.f32.mrf.mxu1  ;;  %4669 = vmatpush1.bf16.msra.mxu1 %v9737_v55  ;;  %v11212_v18 = vpack.c.bf16 %v1518_v14, %v1510_v13  ;;  %v952_v20 = vadd.f32 %v951_v8, %v11075_v47  ;;  %v1389_v54 = vmul.f32 0.2, %v11215_v19  ;;  %v9760_v8 = vld [vmem:[%s15504_s7 + $0x1e4] ss:$16 sps:$4 sm:$0xff]  }
  0xf4   : > { %4557 = vmatprep.subr.bf16.mxu0 %v9742_v56  ;;  %4670 = vmatprep.subr.bf16.mxu1 %v9745_v57  ;;  %v1396_v25 = vmul.f32 0.2, %v839_v7  ;;  %vm1268_vm14 = vcmp.gt.f32.partialorder %v839_v7, 0.0  ;;  %v11233_v48 = vadd.f32 %v11138_v24, %v11087_v52  ;;  %v9757_v24 = vld [vmem:[%s15504_s7 + $0x204] ss:$16 sps:$4 sm:$0xff]   ;;  %v1495_v57 = vsel %vm1239_vm13, %v934_v1, %v1367_v17 }
  0xf5   : > { %15627 = vst [vmem:[#allocation13_spill] sm:$0xff] %v11195_v10  ;;  %15628 = vst [vmem:[#allocation14_spill] sm:$0xff] %v11212_v18  ;;  %v842_v21 = vpop.f32.mrf.mxu0  ;;  %v955_v30 = vpop.f32.mrf.mxu1  ;;  %v1398_v55 = vmul.f32 0.2, %v952_v20  ;;  %vm1270_vm0 = vcmp.gt.f32.partialorder %v952_v20, 0.0  ;;  %v11252_v63 = vpack.c.bf16 %v1503_v46, %v1495_v57  ;;  %vm1261_vm3 = vcmp.gt.f32.partialorder %v11215_v19, 0.0 }
  0xf6   : > { %v843_v27 = vadd.f32 %v842_v21, %v11062_v43  ;;  %v956_v56 = vadd.f32 %v955_v30, %v11075_v47  ;;  %v1524_v59 = vsel %vm1268_vm14, %v839_v7, %v1396_v25  ;;  %v9752_v1 = vld [vmem:[%s15504_s7] ss:$16 sps:$4 sm:$0xff]   ;;  %v1381_v58 = vmul.f32 0.2, %v11233_v48 }
  0xf7   : > { %v11222_v31 = vpop.f32.mrf.mxu0  ;;  %4558 = vmatpush1.bf16.msra.mxu0 %v9740_v12  ;;  %v11235_v50 = vpop.f32.mrf.mxu1  ;;  %4671 = vmatpush1.bf16.msra.mxu1 %v9743_v29  ;;  %15629 = vst [vmem:[#allocation15_spill] sm:$0xff] %v11252_v63  ;;  %v9755_v7 = vld [vmem:[%s15504_s7 + $0x200] ss:$16 sps:$4 sm:$0xff]   ;;  %v1526_v12 = vsel %vm1270_vm0, %v952_v20, %v1398_v55  ;;  %vm1253_vm4 = vcmp.gt.f32.partialorder %v11233_v48, 0.0 }
  0xf8   : > { %vm1276_vm15 = vcmp.gt.f32.partialorder %v843_v27, 0.0  ;;  %v1404_v49 = vmul.f32 0.2, %v843_v27  ;;  %4559 = vmatprep.subr.bf16.mxu0 %v9748_v16  ;;  %vm1278_vm2 = vcmp.gt.f32.partialorder %v956_v56, 0.0  ;;  %v1406_v3 = vmul.f32 0.2, %v956_v56  ;;  %4672 = vmatprep.subr.bf16.mxu1 %v9751_v23 }
  0xf9   : > { %v848_v53 = vpop.f32.mrf.mxu0  ;;  %9077 = vmatmul.mubr.msk.bf16.gmra.mxu0 %vm1766_vm1, %v11000_v32  ;;  %v961_v61 = vpop.f32.mrf.mxu1  ;;  %9085 = vmatmul.mubr.msk.bf16.gmra.mxu1 %vm1766_vm1, %v11000_v32  ;;  %v9763_v16 = vld [vmem:[%s15504_s7 + $0x3e4] ss:$16 sps:$4 sm:$0xff]   ;;  %v9758_v20 = vld [vmem:[%s15504_s7 + $0x1e0] ss:$16 sps:$4 sm:$0xff]  }
  0xfa   : > { %v1532_v60 = vsel %vm1276_vm15, %v843_v27, %v1404_v49  ;;  %2089 = vmatprep.mubr.bf16.mxu0 %v15511_v9  ;;  %v849_v5 = vadd.f32 %v848_v53, %v11062_v43  ;;  %2202 = vmatprep.mubr.bf16.mxu1 %v15511_v9  ;;  %v1534_v13 = vsel %vm1278_vm2, %v956_v56, %v1406_v3  ;;  %v9761_v25 = vld [vmem:[%s15504_s7 + $0x3e0] ss:$16 sps:$4 sm:$0xff]  }
  0xfb   : > { %v11254_v2 = vpack.c.bf16 %v1532_v60, %v1524_v59  ;;  %v11257_v6 = vpop.f32.mrf.mxu0  ;;  %v11264_v32 = vpop.f32.mrf.mxu1  ;;  %4560 = vmatpush1.bf16.msra.mxu0 %v9746_v42  ;;  %4673 = vmatpush1.bf16.msra.mxu1 %v9749_v45  ;;  %v962_v14 = vadd.f32 %v961_v61, %v11075_v47  ;;  %v11279_v17 = vpack.c.bf16 %v1534_v13, %v1526_v12  ;;  %v9766_v42 = vld [vmem:[%s15504_s7 + $0x1c4] ss:$16 sps:$4 sm:$0xff]   ;;  %v9842_v18 = vld [vmem:[%s15504_s7 + $0x420] ss:$16 sps:$4 sm:$0xff]  }
  0xfc   : > { %4561 = vmatprep.subr.bf16.mxu0 %v9754_v51  ;;  %4674 = vmatprep.subr.bf16.mxu1 %v9757_v24  ;;  %v1412_v27 = vmul.f32 0.2, %v849_v5  ;;  %v1517_v45 = vsel %vm1261_vm3, %v11215_v19, %v1389_v54  ;;  %vm1284_vm5 = vcmp.gt.f32.partialorder %v849_v5, 0.0  ;;  %v9769_v51 = vld [vmem:[%s15504_s7 + $0x3c4] ss:$16 sps:$4 sm:$0xff]   ;;  %v1509_v19 = vsel %vm1253_vm4, %v11233_v48, %v1381_v58 }
  0xfd   : > { %15630 = vst [vmem:[#allocation16_spill] sm:$0xff] %v11254_v2  ;;  %v852_v29 = vpop.f32.mrf.mxu0  ;;  %15631 = vst [vmem:[#allocation17_spill] sm:$0xff] %v11279_v17  ;;  %v965_v23 = vpop.f32.mrf.mxu1  ;;  %v1414_v46 = vmul.f32 0.2, %v962_v14  ;;  %vm1286_vm7 = vcmp.gt.f32.partialorder %v962_v14, 0.0  ;;  %v11311_v57 = vpack.c.bf16 %v1517_v45, %v1509_v19  ;;  %v948_v19 = vadd.f32 %v11182_v0, %v11158_v36 }
  0xfe   : > { %v853_v21 = vadd.f32 %v852_v29, %v11062_v43  ;;  %v966_v56 = vadd.f32 %v965_v23, %v11075_v47  ;;  %v1540_v59 = vsel %vm1284_vm5, %v849_v5, %v1412_v27  ;;  %v9767_v5 = vld [vmem:[%s15504_s7 + $0x3c0] ss:$16 sps:$4 sm:$0xff]   ;;  %v9772_v13 = vld [vmem:[%s15504_s7 + $0x1a4] ss:$16 sps:$4 sm:$0xff]  }
  0xff   : > { %v11288_v30 = vpop.f32.mrf.mxu0  ;;  %v11296_v49 = vpop.f32.mrf.mxu1  ;;  %4562 = vmatpush1.bf16.msra.mxu0 %v9752_v1  ;;  %4675 = vmatpush1.bf16.msra.mxu1 %v9755_v7  ;;  %15632 = vst [vmem:[#allocation18_spill] sm:$0xff] %v11311_v57  ;;  %v1542_v7 = vsel %vm1286_vm7, %v962_v14, %v1414_v46  ;;  %v9775_v29 = vld [vmem:[%s15504_s7 + $0x3a4] ss:$16 sps:$4 sm:$0xff]   ;;  %vm1263_vm13 = vcmp.gt.f32.partialorder %v948_v19, 0.0 }
 0x100   : > { %vm1292_vm6 = vcmp.gt.f32.partialorder %v853_v21, 0.0  ;;  %v1420_v55 = vmul.f32 0.2, %v853_v21  ;;  %4563 = vmatprep.subr.bf16.mxu0 %v9760_v8  ;;  %vm1294_vm8 = vcmp.gt.f32.partialorder %v966_v56, 0.0  ;;  %v1422_v61 = vmul.f32 0.2, %v966_v56  ;;  %4676 = vmatprep.subr.bf16.mxu1 %v9763_v16 }
 0x101   : > { %v858_v53 = vpop.f32.mrf.mxu0  ;;  %9078 = vmatmul.mubr.msk.bf16.gmra.mxu0 %vm1766_vm1, %v11009_v33  ;;  %v971_v24 = vpop.f32.mrf.mxu1  ;;  %9086 = vmatmul.mubr.msk.bf16.gmra.mxu1 %vm1766_vm1, %v11009_v33  ;;  %v9764_v33 = vld [vmem:[%s15504_s7 + $0x1c0] ss:$16 sps:$4 sm:$0xff]  }
 0x102   : > { %v859_v54 = vadd.f32 %v858_v53, %v11062_v43  ;;  %2099 = vmatprep.mubr.bf16.mxu0 %v15511_v9  ;;  %v1548_v60 = vsel %vm1292_vm6, %v853_v21, %v1420_v55  ;;  %2212 = vmatprep.mubr.bf16.mxu1 %v15511_v9  ;;  %v1550_v8 = vsel %vm1294_vm8, %v966_v56, %v1422_v61  ;;  %v9781_v55 = vld [vmem:[%s15504_s7 + $0x384] ss:$16 sps:$4 sm:$0xff]  }
 0x103   : > { %v11315_v3 = vpop.f32.mrf.mxu0  ;;  %v11318_v48 = vpack.c.bf16 %v1548_v60, %v1540_v59  ;;  %v11320_v1 = vpop.f32.mrf.mxu1  ;;  %4564 = vmatpush2.bf16.msra.mxu0 %v9758_v20  ;;  %4677 = vmatpush2.bf16.msra.mxu1 %v9761_v25  ;;  %v972_v58 = vadd.f32 %v971_v24, %v11075_v47  ;;  %v11336_v16 = vpack.c.bf16 %v1550_v8, %v1542_v7  ;;  %v9770_v20 = vld [vmem:[%s15504_s7 + $0x1a0] ss:$16 sps:$4 sm:$0xff]  }
 0x104   : > { %15633 = vst [vmem:[#allocation19_spill] sm:$0xff] %v11315_v3  ;;  %15635 = vst [vmem:[#allocation21_spill] sm:$0xff] %v11320_v1  ;;  %4565 = vmatprep.subr.bf16.mxu0 %v9766_v42  ;;  %4678 = vmatprep.subr.bf16.mxu1 %v9769_v51  ;;  %v1428_v21 = vmul.f32 0.2, %v859_v54  ;;  %v9773_v25 = vld [vmem:[%s15504_s7 + $0x3a0] ss:$16 sps:$4 sm:$0xff]  }
 0x105   : > { %15634 = vst [vmem:[#allocation20_spill] sm:$0xff] %v11318_v48  ;;  %v862_v12 = vpop.f32.mrf.mxu0  ;;  %15636 = vst [vmem:[#allocation22_spill] sm:$0xff] %v11336_v16  ;;  %v975_v14 = vpop.f32.mrf.mxu1  ;;  %v1430_v27 = vmul.f32 0.2, %v972_v58  ;;  %vm1300_vm9 = vcmp.gt.f32.partialorder %v859_v54, 0.0  ;;  %vm1302_vm10 = vcmp.gt.f32.partialorder %v972_v58, 0.0 }
 0x106   : > { %v863_v23 = vadd.f32 %v862_v12, %v11062_v43  ;;  %v976_v42 = vadd.f32 %v975_v14, %v11075_v47  ;;  %v9778_v51 = vld [vmem:[%s15504_s7 + $0x184] ss:$16 sps:$4 sm:$0xff]   ;;  %v1556_v61 = vsel %vm1300_vm9, %v859_v54, %v1428_v21  ;;  %v9779_v54 = vld [vmem:[%s15504_s7 + $0x380] ss:$16 sps:$4 sm:$0xff]  }
 0x107   : > { %v11346_v45 = vpop.f32.mrf.mxu0  ;;  %v11348_v46 = vpop.f32.mrf.mxu1  ;;  %4566 = vmatpush2.bf16.msra.mxu0 %v9764_v33  ;;  %4679 = vmatpush2.bf16.msra.mxu1 %v9767_v5  ;;  %v1558_v33 = vsel %vm1302_vm10, %v972_v58, %v1430_v27  ;;  %v944_v58 = vadd.f32 %v11148_v28, %v11158_v36  ;;  %v9787_v14 = vld [vmem:[%s15504_s7 + $0x364] ss:$16 sps:$4 sm:$0xff]   ;;  %v9782_v28 = vld [vmem:[%s15504_s7 + $0x160] ss:$16 sps:$4 sm:$0xff]  }
 0x108   : > { %15637 = vst [vmem:[#allocation23_spill] sm:$0xff] %v11346_v45  ;;  %15638 = vst [vmem:[#allocation24_spill] sm:$0xff] %v11348_v46  ;;  %vm1308_vm11 = vcmp.gt.f32.partialorder %v863_v23, 0.0  ;;  %v1436_v56 = vmul.f32 0.2, %v863_v23  ;;  %vm1310_vm12 = vcmp.gt.f32.partialorder %v976_v42, 0.0  ;;  %4567 = vmatprep.subr.bf16.mxu0 %v9772_v13  ;;  %4680 = vmatprep.subr.bf16.mxu1 %v9775_v29 }
 0x109   : > { %v868_v53 = vpop.f32.mrf.mxu0  ;;  %9079 = vmatmul.mubr.msk.bf16.gmra.mxu0 %vm1766_vm1, %v11018_v34  ;;  %v1438_v24 = vmul.f32 0.2, %v976_v42  ;;  %v981_v60 = vpop.f32.mrf.mxu1  ;;  %9087 = vmatmul.mubr.msk.bf16.gmra.mxu1 %vm1766_vm1, %v11018_v34  ;;  %v9776_v34 = vld [vmem:[%s15504_s7 + $0x180] ss:$16 sps:$4 sm:$0xff]   ;;  %vm1255_vm3 = vcmp.gt.f32.partialorder %v944_v58, 0.0 }
 0x10a   : > { %v869_v59 = vadd.f32 %v868_v53, %v11062_v43  ;;  %2109 = vmatprep.mubr.bf16.mxu0 %v15511_v9  ;;  %v1564_v5 = vsel %vm1308_vm11, %v863_v23, %v1436_v56  ;;  %2222 = vmatprep.mubr.bf16.mxu1 %v15511_v9  ;;  %v982_v12 = vadd.f32 %v981_v60, %v11075_v47  ;;  %v9784_v23 = vld [vmem:[%s15504_s7 + $0x164] ss:$16 sps:$4 sm:$0xff]   ;;  %v9785_v56 = vld [vmem:[%s15504_s7 + $0x360] ss:$16 sps:$4 sm:$0xff]  }
 0x10b   : > { %v11366_v7 = vpop.f32.mrf.mxu0  ;;  %v11369_v0 = vpack.c.bf16 %v1564_v5, %v1556_v61  ;;  %v1566_v8 = vsel %vm1310_vm12, %v976_v42, %v1438_v24  ;;  %v11373_v13 = vpop.f32.mrf.mxu1  ;;  %4568 = vmatpush2.bf16.msra.mxu0 %v9770_v20  ;;  %4681 = vmatpush2.bf16.msra.mxu1 %v9773_v25  ;;  %v1391_v20 = vmul.f32 0.2, %v948_v19  ;;  %v9790_v53 = vld [vmem:[%s15504_s7 + $0x144] ss:$16 sps:$4 sm:$0xff]  }
 0x10c   : > { %15639 = vst [vmem:[#allocation25_spill] sm:$0xff] %v11366_v7  ;;  %15641 = vst [vmem:[#allocation27_spill] sm:$0xff] %v11373_v13  ;;  %v11383_v29 = vpack.c.bf16 %v1566_v8, %v1558_v33  ;;  %4569 = vmatprep.subr.bf16.mxu0 %v9778_v51  ;;  %4682 = vmatprep.subr.bf16.mxu1 %v9781_v55  ;;  %v1444_v25 = vmul.f32 0.2, %v869_v59  ;;  %vm1316_vm14 = vcmp.gt.f32.partialorder %v869_v59, 0.0  ;;  %vm1318_vm15 = vcmp.gt.f32.partialorder %v982_v12, 0.0 }
 0x10d   : > { %15640 = vst [vmem:[#allocation26_spill] sm:$0xff] %v11369_v0  ;;  %v872_v21 = vpop.f32.mrf.mxu0  ;;  %v985_v27 = vpop.f32.mrf.mxu1  ;;  %v1446_v24 = vmul.f32 0.2, %v982_v12  ;;  %v9793_v61 = vld [vmem:[%s15504_s7 + $0x344] ss:$16 sps:$4 sm:$0xff]  }
 0x10e   : > { %15642 = vst [vmem:[#allocation28_spill] sm:$0xff] %v11383_v29  ;;  %v873_v42 = vadd.f32 %v872_v21, %v11062_v43  ;;  %v986_v51 = vadd.f32 %v985_v27, %v11075_v47  ;;  %v1383_v33 = vmul.f32 0.2, %v944_v58  ;;  %v1572_v21 = vsel %vm1316_vm14, %v869_v59, %v1444_v25 }
 0x10f   : > { %v11396_v55 = vpop.f32.mrf.mxu0  ;;  %v11404_v60 = vpop.f32.mrf.mxu1  ;;  %4570 = vmatpush2.bf16.msra.mxu0 %v9776_v34  ;;  %4683 = vmatpush2.bf16.msra.mxu1 %v9779_v54  ;;  %v15645_v34 = vmov 0   ;;  %v1519_v54 = vsel %vm1263_vm13, %v948_v19, %v1391_v20  ;;  %v1574_v59 = vsel %vm1318_vm15, %v982_v12, %v1446_v24  ;;  %v9788_v19 = vld [vmem:[%s15504_s7 + $0x140] ss:$16 sps:$4 sm:$0xff]   ;;  %v9796_v12 = vld [vmem:[%s15504_s7 + $0x124] ss:$16 sps:$4 sm:$0xff]  }
 0x110   : > { %15643 = vst [vmem:[#allocation29_spill] sm:$0xff] %v11396_v55  ;;  %15644 = vst [vmem:[#allocation30_spill] sm:$0xff] %v11404_v60  ;;  %vm1324_vm0 = vcmp.gt.f32.partialorder %v873_v42, 0.0  ;;  %v1452_v5 = vmul.f32 0.2, %v873_v42  ;;  %4571 = vmatprep.subr.bf16.mxu0 %v9784_v23  ;;  %vm1326_vm2 = vcmp.gt.f32.partialorder %v986_v51, 0.0  ;;  %4684 = vmatprep.subr.bf16.mxu1 %v9787_v14 }
 0x111   : > { %v878_v8 = vpop.f32.mrf.mxu0  ;;  %9080 = vmatmul.mubr.msk.bf16.gmra.mxu0 %vm1766_vm1, %v11027_v35  ;;  %v1454_v27 = vmul.f32 0.2, %v986_v51  ;;  %v991_v9 = vpop.f32.mrf.mxu1  ;;  %9088 = vmatmul.mubr.msk.bf16.gmra.mxu1 %vm1766_vm1, %v11027_v35 }
 0x112   : > { %2119 = vmatprep.mubr.bf16.mxu0 %v15645_v34  ;;  %v1580_v29 = vsel %vm1324_vm0, %v873_v42, %v1452_v5  ;;  %v879_v0 = vadd.f32 %v878_v8, %v11062_v43  ;;  %v992_v16 = vadd.f32 %v991_v9, %v11075_v47  ;;  %2232 = vmatprep.mubr.bf16.mxu1 %v15645_v34  ;;  %v9791_v9 = vld [vmem:[%s15504_s7 + $0x340] ss:$16 sps:$4 sm:$0xff]   ;;  %v9799_v42 = vld [vmem:[%s15504_s7 + $0x324] ss:$16 sps:$4 sm:$0xff]  }
 0x113   : > { %v11418_v48 = vpop.f32.mrf.mxu0  ;;  %v11422_v23 = vpack.c.bf16 %v1580_v29, %v1572_v21  ;;  %v1582_v35 = vsel %vm1326_vm2, %v986_v51, %v1454_v27  ;;  %v11424_v25 = vpop.f32.mrf.mxu1  ;;  %4572 = vmatpush2.bf16.msra.mxu0 %v9782_v28  ;;  %4685 = vmatpush2.bf16.msra.mxu1 %v9785_v56  ;;  %v1511_v51 = vsel %vm1255_vm3, %v944_v58, %v1383_v33  ;;  %v9802_v34 = vld [vmem:[%s15504_s7 + $0x104] ss:$16 sps:$4 sm:$0xff]  }
 0x114   : > { %15646 = vst [vmem:[#allocation31_spill] sm:$0xff] %v11418_v48  ;;  %15648 = vst [vmem:[#allocation33_spill] sm:$0xff] %v11424_v25  ;;  %v11432_v20 = vpack.c.bf16 %v1582_v35, %v1574_v59  ;;  %4573 = vmatprep.subr.bf16.mxu0 %v9790_v53  ;;  %4686 = vmatprep.subr.bf16.mxu1 %v9793_v61  ;;  %v1460_v29 = vmul.f32 0.2, %v879_v0  ;;  %v1462_v56 = vmul.f32 0.2, %v992_v16 }
 0x115   : > { %15647 = vst [vmem:[#allocation32_spill] sm:$0xff] %v11422_v23  ;;  %v882_v14 = vpop.f32.mrf.mxu0  ;;  %v995_v28 = vpop.f32.mrf.mxu1  ;;  %v9794_v53 = vld [vmem:[%s15504_s7 + $0x120] ss:$16 sps:$4 sm:$0xff]   ;;  %v11451_v21 = vpack.c.bf16 %v1519_v54, %v1511_v51  ;;  %v845_v58 = vadd.f32 %v11222_v31, %v11087_v52  ;;  %vm1332_vm4 = vcmp.gt.f32.partialorder %v879_v0, 0.0  ;;  %vm1334_vm5 = vcmp.gt.f32.partialorder %v992_v16, 0.0 }
 0x116   : > { %15649 = vst [vmem:[#allocation34_spill] sm:$0xff] %v11432_v20  ;;  %v883_v24 = vadd.f32 %v882_v14, %v11062_v43  ;;  %v996_v5 = vadd.f32 %v995_v28, %v11075_v47  ;;  %v9797_v61 = vld [vmem:[%s15504_s7 + $0x320] ss:$16 sps:$4 sm:$0xff]   ;;  %v9805_v54 = vld [vmem:[%s15504_s7 + $0x304] ss:$16 sps:$4 sm:$0xff]   ;;  %v1588_v51 = vsel %vm1332_vm4, %v879_v0, %v1460_v29  ;;  %v1590_v31 = vsel %vm1334_vm5, %v992_v16, %v1462_v56 }
 0x117   : > { %v11443_v8 = vpop.f32.mrf.mxu0  ;;  %15651 = vst [vmem:[#allocation36_spill] sm:$0xff] %v11451_v21  ;;  %v11455_v33 = vpop.f32.mrf.mxu1  ;;  %4574 = vmatpush2.bf16.msra.mxu0 %v9788_v19  ;;  %4687 = vmatpush2.bf16.msra.mxu1 %v9791_v9  ;;  %v841_v19 = vadd.f32 %v11197_v11, %v11087_v52  ;;  %v9800_v28 = vld [vmem:[%s15504_s7 + $0x100] ss:$16 sps:$4 sm:$0xff]   ;;  %v9811_v29 = vld [vmem:[%s15504_s7 + $0x6e4] ss:$16 sps:$4 sm:$0xff]  }
 0x118   : > { %15650 = vst [vmem:[#allocation35_spill] sm:$0xff] %v11443_v8  ;;  %15652 = vst [vmem:[#allocation37_spill] sm:$0xff] %v11455_v33  ;;  %vm1340_vm6 = vcmp.gt.f32.partialorder %v883_v24, 0.0  ;;  %v1468_v59 = vmul.f32 0.2, %v883_v24  ;;  %4575 = vmatprep.subr.bf16.mxu0 %v9796_v12  ;;  %vm1342_vm7 = vcmp.gt.f32.partialorder %v996_v5, 0.0  ;;  %4688 = vmatprep.subr.bf16.mxu1 %v9799_v42 }
 0x119   : > { %v888_v35 = vpop.f32.mrf.mxu0  ;;  %9081 = vmatmul.mubr.msk.bf16.gmra.mxu0 %vm1766_vm1, %v11036_v37  ;;  %v1470_v9 = vmul.f32 0.2, %v996_v5  ;;  %v1001_v14 = vpop.f32.mrf.mxu1  ;;  %9089 = vmatmul.mubr.msk.bf16.gmra.mxu1 %vm1766_vm1, %v11036_v37  ;;  %v9803_v12 = vld [vmem:[%s15504_s7 + $0x300] ss:$16 sps:$4 sm:$0xff]   ;;  %v9808_v37 = vld [vmem:[%s15504_s7 + $0x4e4] ss:$16 sps:$4 sm:$0xff]  }
 0x11a   : > { %v1596_v11 = vsel %vm1340_vm6, %v883_v24, %v1468_v59  ;;  %v889_v27 = vadd.f32 %v888_v35, %v11062_v43  ;;  %v1405_v42 = vmul.f32 0.2, %v845_v58  ;;  %v1002_v33 = vadd.f32 %v1001_v14, %v11075_v47 }
 0x11b   : > { %v11481_v20 = vpop.f32.mrf.mxu0  ;;  %v11486_v23 = vpack.c.bf16 %v1596_v11, %v1588_v51  ;;  %v1598_v25 = vsel %vm1342_vm7, %v996_v5, %v1470_v9  ;;  %v11489_v48 = vpop.f32.mrf.mxu1  ;;  %4576 = vmatpush2.bf16.msra.mxu0 %v9794_v53  ;;  %4689 = vmatpush2.bf16.msra.mxu1 %v9797_v61  ;;  %vm1277_vm1 = vcmp.gt.f32.partialorder %v845_v58, 0.0  ;;  %v1397_v56 = vmul.f32 0.2, %v841_v19 }
 0x11c   : > { %15653 = vst [vmem:[#allocation38_spill] sm:$0xff] %v11481_v20  ;;  %15655 = vst [vmem:[#allocation40_spill] sm:$0xff] %v11489_v48  ;;  %v11491_v16 = vpack.c.bf16 %v1598_v25, %v1590_v31  ;;  %4577 = vmatprep.subr.bf16.mxu0 %v9802_v34  ;;  %4690 = vmatprep.subr.bf16.mxu1 %v9805_v54  ;;  %v1476_v24 = vmul.f32 0.2, %v889_v27  ;;  %v15657_v5 = vsub.s32 4, %v11038_v38  ;;  %v15658_v53 = vsub.s32 6, %v11038_v38 }
 0x11d   : > { %15654 = vst [vmem:[#allocation39_spill] sm:$0xff] %v11486_v23  ;;  %v892_v0 = vpop.f32.mrf.mxu0  ;;  %v1005_v59 = vpop.f32.mrf.mxu1  ;;  %vm1269_vm8 = vcmp.gt.f32.partialorder %v841_v19, 0.0  ;;  %vm1348_vm9 = vcmp.gt.f32.partialorder %v889_v27, 0.0  ;;  %v1478_v54 = vmul.f32 0.2, %v1002_v33  ;;  %v1533_v14 = vsel %vm1277_vm1, %v845_v58, %v1405_v42 }
 0x11e   : > { %15656 = vst [vmem:[#allocation41_spill] sm:$0xff] %v11491_v16  ;;  %v11499_v35 = vrot.slane %v11048_v39, %v15657_v5  ;;  %v11504_v25 = vrot.slane %v11048_v39, %v15658_v53  ;;  %v893_v61 = vadd.f32 %v892_v0, %v11062_v43  ;;  %v1006_v34 = vadd.f32 %v1005_v59, %v11075_v47 }
 0x11f   : > { %v11508_v31 = vpop.f32.mrf.mxu0  ;;  %v11510_v9 = vpop.f32.mrf.mxu1  ;;  %4578 = vmatpush2.bf16.msra.mxu0 %v9800_v28  ;;  %4691 = vmatpush2.bf16.msra.mxu1 %v9803_v12  ;;  %vm1350_vm10 = vcmp.gt.f32.partialorder %v1002_v33, 0.0  ;;  %v1604_v11 = vsel %vm1348_vm9, %v889_v27, %v1476_v24  ;;  %v1525_v47 = vsel %vm1269_vm8, %v841_v19, %v1397_v56  ;;  %v958_v42 = vadd.f32 %v11235_v50, %v11158_v36 }
 0x120   : > { %15659 = vst [vmem:[#allocation42_spill] sm:$0xff] %v11508_v31  ;;  %15660 = vst [vmem:[#allocation43_spill] sm:$0xff] %v11510_v9  ;;  %vm1356_vm11 = vcmp.gt.f32.partialorder %v893_v61, 0.0  ;;  %v1484_v51 = vmul.f32 0.2, %v893_v61  ;;  %4773 = vmatprep.subr.bf16.mxu0 %v9808_v37  ;;  %4886 = vmatprep.subr.bf16.mxu1 %v9811_v29  ;;  %vm1358_vm12 = vcmp.gt.f32.partialorder %v1006_v34, 0.0  ;;  %v11518_v58 = vpack.c.bf16 %v1533_v14, %v1525_v47 }
 0x121   : > { %v1044_v39 = vpop.f32.mrf.mxu0  ;;  %v1486_v43 = vmul.f32 0.2, %v1006_v34  ;;  %v1157_v0 = vpop.f32.mrf.mxu1  ;;  %v1606_v37 = vsel %vm1350_vm10, %v1002_v33, %v1478_v54  ;;  %v954_v53 = vadd.f32 %v11204_v15, %v11158_v36  ;;  %v1407_v33 = vmul.f32 0.2, %v958_v42 }
 0x122   : > { %v1612_v59 = vsel %vm1356_vm11, %v893_v61, %v1484_v51  ;;  %v1045_v5 = vadd.f32 %v1044_v39, %v11499_v35  ;;  %v1158_v28 = vadd.f32 %v1157_v0, %v11504_v25  ;;  %15662 = vst [vmem:[#allocation45_spill] sm:$0xff] %v11518_v58  ;;  %vm1279_vm15 = vcmp.gt.f32.partialorder %v958_v42, 0.0 }
 0x123   : > { %v11516_v12 = vpop.f32.mrf.mxu0  ;;  %v11523_v27 = vpack.c.bf16 %v1612_v59, %v1604_v11  ;;  %v1614_v29 = vsel %vm1358_vm12, %v1006_v34, %v1486_v43  ;;  %v11525_v24 = vpop.f32.mrf.mxu1  ;;  %vm1271_vm2 = vcmp.gt.f32.partialorder %v954_v53, 0.0  ;;  %v1399_v15 = vmul.f32 0.2, %v954_v53 }
 0x124   : > { %15661 = vst [vmem:[#allocation44_spill] sm:$0xff] %v11516_v12  ;;  %15664 = vst [vmem:[#allocation47_spill] sm:$0xff] %v11525_v24  ;;  %v11527_v19 = vpack.c.bf16 %v1614_v29, %v1606_v37  ;;  %v1368_v51 = vmul.f32 0.2, %v1045_v5  ;;  %v1370_v14 = vmul.f32 0.2, %v1158_v28  ;;  %v1535_v24 = vsel %vm1279_vm15, %v958_v42, %v1407_v33 }
 0x125   : > { %15663 = vst [vmem:[#allocation46_spill] sm:$0xff] %v11523_v27  ;;  %v1048_v56 = vpop.f32.mrf.mxu0  ;;  %v1161_v61 = vpop.f32.mrf.mxu1  ;;  %vm1240_vm13 = vcmp.gt.f32.partialorder %v1045_v5, 0.0  ;;  %vm1242_vm14 = vcmp.gt.f32.partialorder %v1158_v28, 0.0 }
 0x126   : > { %15665 = vst [vmem:[#allocation48_spill] sm:$0xff] %v11527_v19  ;;  %v1049_v39 = vadd.f32 %v1048_v56, %v11499_v35  ;;  %v1162_v50 = vadd.f32 %v1161_v61, %v11504_v25  ;;  %v1496_v59 = vsel %vm1240_vm13, %v1045_v5, %v1368_v51  ;;  %v1498_v37 = vsel %vm1242_vm14, %v1158_v28, %v1370_v14 }
 0x127   : > { %v11533_v0 = vpop.f32.mrf.mxu0  ;;  %v11535_v34 = vpop.f32.mrf.mxu1  ;;  %v1527_v5 = vsel %vm1271_vm2, %v954_v53, %v1399_v15 }
 0x128   : > { %15666 = vst [vmem:[#allocation49_spill] sm:$0xff] %v11533_v0  ;;  %15667 = vst [vmem:[#allocation50_spill] sm:$0xff] %v11535_v34  ;;  %vm1248_vm0 = vcmp.gt.f32.partialorder %v1049_v39, 0.0  ;;  %v1376_v54 = vmul.f32 0.2, %v1049_v39  ;;  %vm1250_vm3 = vcmp.gt.f32.partialorder %v1162_v50, 0.0 }
 0x129   : > { %v1054_v11 = vpop.f32.mrf.mxu0  ;;  %v1378_v43 = vmul.f32 0.2, %v1162_v50  ;;  %v1167_v47 = vpop.f32.mrf.mxu1 }
 0x12a   : > { %v1504_v29 = vsel %vm1248_vm0, %v1049_v39, %v1376_v54  ;;  %v1055_v56 = vadd.f32 %v1054_v11, %v11499_v35  ;;  %v1168_v16 = vadd.f32 %v1167_v47, %v11504_v25 }
 0x12b   : > { %v11538_v61 = vpop.f32.mrf.mxu0  ;;  %v11540_v19 = vpack.c.bf16 %v1504_v29, %v1496_v59  ;;  %v1506_v27 = vsel %vm1250_vm3, %v1162_v50, %v1378_v43  ;;  %v11543_v23 = vpop.f32.mrf.mxu1  ;;  %v11553_v50 = vpack.c.bf16 %v1535_v24, %v1527_v5 }
 0x12c   : > { %15668 = vst [vmem:[#allocation51_spill] sm:$0xff] %v11538_v61  ;;  %15670 = vst [vmem:[#allocation53_spill] sm:$0xff] %v11543_v23  ;;  %v11546_v34 = vpack.c.bf16 %v1506_v27, %v1498_v37  ;;  %v1384_v28 = vmul.f32 0.2, %v1055_v56  ;;  %vm1256_vm4 = vcmp.gt.f32.partialorder %v1055_v56, 0.0  ;;  %vm1258_vm5 = vcmp.gt.f32.partialorder %v1168_v16, 0.0 }
 0x12d   : > { %15669 = vst [vmem:[#allocation52_spill] sm:$0xff] %v11540_v19  ;;  %v1058_v12 = vpop.f32.mrf.mxu0  ;;  %v1171_v0 = vpop.f32.mrf.mxu1  ;;  %15673 = vst [vmem:[#allocation56_spill] sm:$0xff] %v11553_v50  ;;  %v1386_v54 = vmul.f32 0.2, %v1168_v16 }
 0x12e   : > { %15671 = vst [vmem:[#allocation54_spill] sm:$0xff] %v11546_v34  ;;  %v1059_v51 = vadd.f32 %v1058_v12, %v11499_v35  ;;  %v1172_v14 = vadd.f32 %v1171_v0, %v11504_v25  ;;  %v1512_v15 = vsel %vm1256_vm4, %v1055_v56, %v1384_v28 }
 0x12f   : > { %v11551_v39 = vpop.f32.mrf.mxu0  ;;  %v11555_v11 = vpop.f32.mrf.mxu1  ;;  %v1514_v47 = vsel %vm1258_vm5, %v1168_v16, %v1386_v54 }
 0x130   : > { %15672 = vst [vmem:[#allocation55_spill] sm:$0xff] %v11551_v39  ;;  %15674 = vst [vmem:[#allocation57_spill] sm:$0xff] %v11555_v11  ;;  %vm1264_vm6 = vcmp.gt.f32.partialorder %v1059_v51, 0.0  ;;  %v1392_v42 = vmul.f32 0.2, %v1059_v51  ;;  %vm1266_vm7 = vcmp.gt.f32.partialorder %v1172_v14, 0.0 }
 0x131   : > { %v1064_v27 = vpop.f32.mrf.mxu0  ;;  %v1394_v33 = vmul.f32 0.2, %v1172_v14  ;;  %v1177_v53 = vpop.f32.mrf.mxu1 }
 0x132   : > { %v1520_v43 = vsel %vm1264_vm6, %v1059_v51, %v1392_v42  ;;  %v1065_v12 = vadd.f32 %v1064_v27, %v11499_v35  ;;  %v1178_v37 = vadd.f32 %v1177_v53, %v11504_v25 }
 0x133   : > { %v11558_v0 = vpop.f32.mrf.mxu0  ;;  %v11560_v24 = vpack.c.bf16 %v1520_v43, %v1512_v15  ;;  %v1522_v59 = vsel %vm1266_vm7, %v1172_v14, %v1394_v33  ;;  %v11563_v29 = vpop.f32.mrf.mxu1 }
 0x134   : > { %15675 = vst [vmem:[#allocation58_spill] sm:$0xff] %v11558_v0  ;;  %15677 = vst [vmem:[#allocation60_spill] sm:$0xff] %v11563_v29  ;;  %v11565_v5 = vpack.c.bf16 %v1522_v59, %v1514_v47  ;;  %v1400_v23 = vmul.f32 0.2, %v1065_v12  ;;  %vm1272_vm1 = vcmp.gt.f32.partialorder %v1065_v12, 0.0  ;;  %vm1274_vm8 = vcmp.gt.f32.partialorder %v1178_v37, 0.0 }
 0x135   : > { %15676 = vst [vmem:[#allocation59_spill] sm:$0xff] %v11560_v24  ;;  %v1068_v34 = vpop.f32.mrf.mxu0  ;;  %v1181_v19 = vpop.f32.mrf.mxu1  ;;  %v1402_v16 = vmul.f32 0.2, %v1178_v37 }
 0x136   : > { %15678 = vst [vmem:[#allocation61_spill] sm:$0xff] %v11565_v5  ;;  %v1069_v56 = vadd.f32 %v1068_v34, %v11499_v35  ;;  %v1182_v28 = vadd.f32 %v1181_v19, %v11504_v25  ;;  %v1528_v53 = vsel %vm1272_vm1, %v1065_v12, %v1400_v23  ;;  %v855_v23 = vadd.f32 %v11288_v30, %v11087_v52 }
 0x137   : > { %v11569_v51 = vpop.f32.mrf.mxu0  ;;  %v11571_v54 = vpop.f32.mrf.mxu1  ;;  %v1530_v19 = vsel %vm1274_vm8, %v1178_v37, %v1402_v16 }
 0x138   : > { %15679 = vst [vmem:[#allocation62_spill] sm:$0xff] %v11569_v51  ;;  %15680 = vst [vmem:[#allocation63_spill] sm:$0xff] %v11571_v54  ;;  %vm1280_vm9 = vcmp.gt.f32.partialorder %v1069_v56, 0.0  ;;  %v1408_v14 = vmul.f32 0.2, %v1069_v56  ;;  %vm1282_vm10 = vcmp.gt.f32.partialorder %v1182_v28, 0.0 }
 0x139   : > { %v1074_v42 = vpop.f32.mrf.mxu0  ;;  %v1410_v27 = vmul.f32 0.2, %v1182_v28  ;;  %v1187_v33 = vpop.f32.mrf.mxu1  ;;  %vm1293_vm15 = vcmp.gt.f32.partialorder %v855_v23, 0.0 }
 0x13a   : > { %v1536_v15 = vsel %vm1280_vm9, %v1069_v56, %v1408_v14  ;;  %v1075_v43 = vadd.f32 %v1074_v42, %v11499_v35  ;;  %v1188_v5 = vadd.f32 %v1187_v33, %v11504_v25  ;;  %v851_v33 = vadd.f32 %v11257_v6, %v11087_v52 }
 0x13b   : > { %v11574_v34 = vpop.f32.mrf.mxu0  ;;  %v11576_v47 = vpack.c.bf16 %v1536_v15, %v1528_v53  ;;  %v1538_v59 = vsel %vm1282_vm10, %v1182_v28, %v1410_v27  ;;  %v11579_v24 = vpop.f32.mrf.mxu1  ;;  %v1421_v15 = vmul.f32 0.2, %v855_v23  ;;  %v15715_v52 = vsub.s32 4, %v11038_v38 }
 0x13c   : > { %15681 = vst [vmem:[#allocation64_spill] sm:$0xff] %v11574_v34  ;;  %15683 = vst [vmem:[#allocation66_spill] sm:$0xff] %v11579_v24  ;;  %v11581_v29 = vpack.c.bf16 %v1538_v59, %v1530_v19  ;;  %v1416_v12 = vmul.f32 0.2, %v1075_v43  ;;  %vm1288_vm11 = vcmp.gt.f32.partialorder %v1075_v43, 0.0  ;;  %vm1290_vm12 = vcmp.gt.f32.partialorder %v1188_v5, 0.0 }
 0x13d   : > { %15682 = vst [vmem:[#allocation65_spill] sm:$0xff] %v11576_v47  ;;  %v1078_v54 = vpop.f32.mrf.mxu0  ;;  %v1191_v0 = vpop.f32.mrf.mxu1  ;;  %v1418_v28 = vmul.f32 0.2, %v1188_v5  ;;  %v1413_v51 = vmul.f32 0.2, %v851_v33  ;;  %vm1285_vm0 = vcmp.gt.f32.partialorder %v851_v33, 0.0 }
 0x13e   : > { %15684 = vst [vmem:[#allocation67_spill] sm:$0xff] %v11581_v29  ;;  %v1079_v56 = vadd.f32 %v1078_v54, %v11499_v35  ;;  %v1192_v14 = vadd.f32 %v1191_v0, %v11504_v25  ;;  %v1544_v54 = vsel %vm1288_vm11, %v1075_v43, %v1416_v12 }
 0x13f   : > { %v11587_v37 = vpop.f32.mrf.mxu0  ;;  %v11589_v16 = vpop.f32.mrf.mxu1  ;;  %v1546_v29 = vsel %vm1290_vm12, %v1188_v5, %v1418_v28 }
 0x140   : > { %15685 = vst [vmem:[#allocation68_spill] sm:$0xff] %v11587_v37  ;;  %15686 = vst [vmem:[#allocation69_spill] sm:$0xff] %v11589_v16  ;;  %vm1296_vm13 = vcmp.gt.f32.partialorder %v1079_v56, 0.0  ;;  %v1424_v42 = vmul.f32 0.2, %v1079_v56  ;;  %vm1298_vm14 = vcmp.gt.f32.partialorder %v1192_v14, 0.0 }
 0x141   : > { %v1084_v27 = vpop.f32.mrf.mxu0  ;;  %v1426_v30 = vmul.f32 0.2, %v1192_v14  ;;  %v1197_v53 = vpop.f32.mrf.mxu1 }
 0x142   : > { %v1552_v19 = vsel %vm1296_vm13, %v1079_v56, %v1424_v42  ;;  %v1085_v0 = vadd.f32 %v1084_v27, %v11499_v35  ;;  %v1198_v16 = vadd.f32 %v1197_v53, %v11504_v25  ;;  %v1549_v42 = vsel %vm1293_vm15, %v855_v23, %v1421_v15 }
 0x143   : > { %v11594_v59 = vpop.f32.mrf.mxu0  ;;  %v11596_v47 = vpack.c.bf16 %v1552_v19, %v1544_v54  ;;  %v1554_v24 = vsel %vm1298_vm14, %v1192_v14, %v1426_v30  ;;  %v11599_v34 = vpop.f32.mrf.mxu1  ;;  %v1541_v54 = vsel %vm1285_vm0, %v851_v33, %v1413_v51  ;;  %v968_v23 = vadd.f32 %v11296_v49, %v11158_v36 }
 0x144   : > { %15687 = vst [vmem:[#allocation70_spill] sm:$0xff] %v11594_v59  ;;  %15689 = vst [vmem:[#allocation72_spill] sm:$0xff] %v11599_v34  ;;  %v11601_v6 = vpack.c.bf16 %v1554_v24, %v1546_v29  ;;  %v1432_v11 = vmul.f32 0.2, %v1085_v0  ;;  %vm1304_vm2 = vcmp.gt.f32.partialorder %v1085_v0, 0.0  ;;  %vm1306_vm3 = vcmp.gt.f32.partialorder %v1198_v16, 0.0 }
 0x145   : > { %15688 = vst [vmem:[#allocation71_spill] sm:$0xff] %v11596_v47  ;;  %v1088_v37 = vpop.f32.mrf.mxu0  ;;  %v1201_v43 = vpop.f32.mrf.mxu1  ;;  %v1434_v14 = vmul.f32 0.2, %v1198_v16  ;;  %v11614_v47 = vpack.c.bf16 %v1549_v42, %v1541_v54  ;;  %v964_v33 = vadd.f32 %v11264_v32, %v11158_v36  ;;  %vm1295_vm1 = vcmp.gt.f32.partialorder %v968_v23, 0.0 }
 0x146   : > { %15690 = vst [vmem:[#allocation73_spill] sm:$0xff] %v11601_v6  ;;  %v1089_v12 = vadd.f32 %v1088_v37, %v11499_v35  ;;  %v1202_v5 = vadd.f32 %v1201_v43, %v11504_v25  ;;  %v1560_v27 = vsel %vm1304_vm2, %v1085_v0, %v1432_v11 }
 0x147   : > { %v11605_v56 = vpop.f32.mrf.mxu0  ;;  %v11607_v28 = vpop.f32.mrf.mxu1  ;;  %15694 = vst [vmem:[#allocation77_spill] sm:$0xff] %v11614_v47  ;;  %v1562_v15 = vsel %vm1306_vm3, %v1198_v16, %v1434_v14  ;;  %v1423_v16 = vmul.f32 0.2, %v968_v23  ;;  %vm1287_vm9 = vcmp.gt.f32.partialorder %v964_v33, 0.0  ;;  %v1415_v32 = vmul.f32 0.2, %v964_v33 }
 0x148   : > { %15691 = vst [vmem:[#allocation74_spill] sm:$0xff] %v11605_v56  ;;  %15692 = vst [vmem:[#allocation75_spill] sm:$0xff] %v11607_v28  ;;  %vm1312_vm4 = vcmp.gt.f32.partialorder %v1089_v12, 0.0  ;;  %v1440_v24 = vmul.f32 0.2, %v1089_v12  ;;  %vm1314_vm5 = vcmp.gt.f32.partialorder %v1202_v5, 0.0 }
 0x149   : > { %v1094_v29 = vpop.f32.mrf.mxu0  ;;  %v1442_v30 = vmul.f32 0.2, %v1202_v5  ;;  %v1207_v53 = vpop.f32.mrf.mxu1 }
 0x14a   : > { %v1568_v19 = vsel %vm1312_vm4, %v1089_v12, %v1440_v24  ;;  %v1095_v37 = vadd.f32 %v1094_v29, %v11499_v35  ;;  %v1208_v43 = vadd.f32 %v1207_v53, %v11504_v25 }
 0x14b   : > { %v11612_v6 = vpop.f32.mrf.mxu0  ;;  %v11618_v34 = vpack.c.bf16 %v1568_v19, %v1560_v27  ;;  %v1570_v11 = vsel %vm1314_vm5, %v1202_v5, %v1442_v30  ;;  %v11620_v0 = vpop.f32.mrf.mxu1 }
 0x14c   : > { %15693 = vst [vmem:[#allocation76_spill] sm:$0xff] %v11612_v6  ;;  %15696 = vst [vmem:[#allocation79_spill] sm:$0xff] %v11620_v0  ;;  %v11622_v28 = vpack.c.bf16 %v1570_v11, %v1562_v15  ;;  %v1448_v24 = vmul.f32 0.2, %v1095_v37  ;;  %v1450_v29 = vmul.f32 0.2, %v1208_v43  ;;  %v1551_v6 = vsel %vm1295_vm1, %v968_v23, %v1423_v16 }
 0x14d   : > { %15695 = vst [vmem:[#allocation78_spill] sm:$0xff] %v11618_v34  ;;  %v1098_v51 = vpop.f32.mrf.mxu0  ;;  %v1211_v12 = vpop.f32.mrf.mxu1  ;;  %vm1320_vm6 = vcmp.gt.f32.partialorder %v1095_v37, 0.0  ;;  %vm1322_vm7 = vcmp.gt.f32.partialorder %v1208_v43, 0.0 }
 0x14e   : > { %15697 = vst [vmem:[#allocation80_spill] sm:$0xff] %v11622_v28  ;;  %v1099_v42 = vadd.f32 %v1098_v51, %v11499_v35  ;;  %v1212_v53 = vadd.f32 %v1211_v12, %v11504_v25  ;;  %v1576_v19 = vsel %vm1320_vm6, %v1095_v37, %v1448_v24  ;;  %v1578_v15 = vsel %vm1322_vm7, %v1208_v43, %v1450_v29 }
 0x14f   : > { %v11628_v49 = vpop.f32.mrf.mxu0  ;;  %v11630_v5 = vpop.f32.mrf.mxu1  ;;  %v1543_v37 = vsel %vm1287_vm9, %v964_v33, %v1415_v32 }
 0x150   : > { %15698 = vst [vmem:[#allocation81_spill] sm:$0xff] %v11628_v49  ;;  %15699 = vst [vmem:[#allocation82_spill] sm:$0xff] %v11630_v5  ;;  %vm1328_vm8 = vcmp.gt.f32.partialorder %v1099_v42, 0.0  ;;  %v1456_v14 = vmul.f32 0.2, %v1099_v42  ;;  %vm1330_vm10 = vcmp.gt.f32.partialorder %v1212_v53, 0.0 }
 0x151   : > { %v1104_v27 = vpop.f32.mrf.mxu0  ;;  %v1458_v30 = vmul.f32 0.2, %v1212_v53  ;;  %v1217_v54 = vpop.f32.mrf.mxu1 }
 0x152   : > { %v1584_v11 = vsel %vm1328_vm8, %v1099_v42, %v1456_v14  ;;  %v1105_v51 = vadd.f32 %v1104_v27, %v11499_v35  ;;  %v1218_v0 = vadd.f32 %v1217_v54, %v11504_v25 }
 0x153   : > { %v11633_v12 = vpop.f32.mrf.mxu0  ;;  %v11635_v28 = vpack.c.bf16 %v1584_v11, %v1576_v19  ;;  %v1586_v34 = vsel %vm1330_vm10, %v1212_v53, %v1458_v30  ;;  %v11638_v5 = vpop.f32.mrf.mxu1  ;;  %v11648_v53 = vpack.c.bf16 %v1551_v6, %v1543_v37 }
 0x154   : > { %15700 = vst [vmem:[#allocation83_spill] sm:$0xff] %v11633_v12  ;;  %15702 = vst [vmem:[#allocation85_spill] sm:$0xff] %v11638_v5  ;;  %v11641_v49 = vpack.c.bf16 %v1586_v34, %v1578_v15  ;;  %v1464_v43 = vmul.f32 0.2, %v1105_v51  ;;  %vm1336_vm11 = vcmp.gt.f32.partialorder %v1105_v51, 0.0  ;;  %vm1338_vm12 = vcmp.gt.f32.partialorder %v1218_v0, 0.0 }
 0x155   : > { %15701 = vst [vmem:[#allocation84_spill] sm:$0xff] %v11635_v28  ;;  %v1108_v59 = vpop.f32.mrf.mxu0  ;;  %v1221_v56 = vpop.f32.mrf.mxu1  ;;  %15705 = vst [vmem:[#allocation88_spill] sm:$0xff] %v11648_v53  ;;  %v1466_v14 = vmul.f32 0.2, %v1218_v0 }
 0x156   : > { %15703 = vst [vmem:[#allocation86_spill] sm:$0xff] %v11641_v49  ;;  %v1109_v24 = vadd.f32 %v1108_v59, %v11499_v35  ;;  %v1222_v29 = vadd.f32 %v1221_v56, %v11504_v25  ;;  %v1592_v32 = vsel %vm1336_vm11, %v1105_v51, %v1464_v43 }
 0x157   : > { %v11646_v42 = vpop.f32.mrf.mxu0  ;;  %v11650_v27 = vpop.f32.mrf.mxu1  ;;  %v1594_v54 = vsel %vm1338_vm12, %v1218_v0, %v1466_v14 }
 0x158   : > { %15704 = vst [vmem:[#allocation87_spill] sm:$0xff] %v11646_v42  ;;  %15706 = vst [vmem:[#allocation89_spill] sm:$0xff] %v11650_v27  ;;  %vm1344_vm13 = vcmp.gt.f32.partialorder %v1109_v24, 0.0  ;;  %v1472_v34 = vmul.f32 0.2, %v1109_v24  ;;  %vm1346_vm14 = vcmp.gt.f32.partialorder %v1222_v29, 0.0 }
 0x159   : > { %v1114_v23 = vpop.f32.mrf.mxu0  ;;  %v1474_v16 = vmul.f32 0.2, %v1222_v29  ;;  %v1227_v33 = vpop.f32.mrf.mxu1 }
 0x15a   : > { %v1600_v30 = vsel %vm1344_vm13, %v1109_v24, %v1472_v34  ;;  %v1115_v59 = vadd.f32 %v1114_v23, %v11499_v35  ;;  %v1228_v15 = vadd.f32 %v1227_v33, %v11504_v25 }
 0x15b   : > { %v11653_v56 = vpop.f32.mrf.mxu0  ;;  %v11655_v6 = vpack.c.bf16 %v1600_v30, %v1592_v32  ;;  %v1602_v19 = vsel %vm1346_vm14, %v1222_v29, %v1474_v16  ;;  %v11658_v11 = vpop.f32.mrf.mxu1  ;;  %v11671_v16 = vld [vmem:[%s15502_s5] sm:$0xff] }
 0x15c   : > { %15707 = vst [vmem:[#allocation90_spill] sm:$0xff] %v11653_v56  ;;  %15709 = vst [vmem:[#allocation92_spill] sm:$0xff] %v11658_v11  ;;  %v11660_v37 = vpack.c.bf16 %v1602_v19, %v1594_v54  ;;  %v1480_v5 = vmul.f32 0.2, %v1115_v59  ;;  %vm1352_vm15 = vcmp.gt.f32.partialorder %v1115_v59, 0.0  ;;  %vm1354_vm0 = vcmp.gt.f32.partialorder %v1228_v15, 0.0 }
 0x15d   : > { %15708 = vst [vmem:[#allocation91_spill] sm:$0xff] %v11655_v6  ;;  %v1118_v49 = vpop.f32.mrf.mxu0  ;;  %v1231_v28 = vpop.f32.mrf.mxu1  ;;  %v1482_v0 = vmul.f32 0.2, %v1228_v15  ;;  %v11683_v6 = vrot.slane %v11671_v16, %v11055_v41 }
 0x15e   : > { %15710 = vst [vmem:[#allocation93_spill] sm:$0xff] %v11660_v37  ;;  %v1119_v51 = vadd.f32 %v1118_v49, %v11499_v35  ;;  %v1232_v43 = vadd.f32 %v1231_v28, %v11504_v25  ;;  %v1608_v49 = vsel %vm1352_vm15, %v1115_v59, %v1480_v5  ;;  %v11679_v37 = vrot.slane %v11671_v16, %v11051_v40 }
 0x15f   : > { %v11664_v24 = vpop.f32.mrf.mxu0  ;;  %v11666_v14 = vpop.f32.mrf.mxu1  ;;  %v1610_v33 = vsel %vm1354_vm0, %v1228_v15, %v1482_v0  ;;  %v11687_v5 = vrot.slane %v11671_v16, %v11065_v44 }
 0x160   : > { %15711 = vst [vmem:[#allocation94_spill] sm:$0xff] %v11664_v24  ;;  %15712 = vst [vmem:[#allocation95_spill] sm:$0xff] %v11666_v14  ;;  %vm1360_vm2 = vcmp.gt.f32.partialorder %v1119_v51, 0.0  ;;  %v1488_v29 = vmul.f32 0.2, %v1119_v51  ;;  %vm1362_vm3 = vcmp.gt.f32.partialorder %v1232_v43, 0.0 }
 0x161   : > { %v1825_v34 = vpop.f32.mrf.mxu0  ;;  %v1490_v23 = vmul.f32 0.2, %v1232_v43  ;;  %v1938_v35 = vpop.f32.mrf.mxu1 }
 0x162   : > { %v1616_v25 = vsel %vm1360_vm2, %v1119_v51, %v1488_v29  ;;  %v1826_v29 = vadd.f32 %v1825_v34, %v11679_v37 }
 0x163   : > { %v1827_v28 = vpop.f32.mrf.mxu0  ;;  %v11673_v32 = vpack.c.bf16 %v1616_v25, %v1608_v49  ;;  %v1618_v30 = vsel %vm1362_vm3, %v1232_v43, %v1490_v23  ;;  %v1940_v54 = vpop.f32.mrf.mxu1  ;;  %v11692_v43 = vrot.slane %v11671_v16, %v11117_v4  ;;  %v1939_v23 = vadd.f32 %v1938_v35, %v11683_v6 }
 0x164   : > { %v11675_v19 = vpack.c.bf16 %v1618_v30, %v1610_v33  ;;  %v1828_v25 = vadd.f32 %v1827_v28, %v11687_v5  ;;  %v2371_v34 = vmul.f32 0.2, %v1826_v29  ;;  %vm2243_vm6 = vcmp.gt.f32.partialorder %v1826_v29, 0.0 }
 0x165   : > { %15713 = vst [vmem:[#allocation96_spill] sm:$0xff] %v11673_v32  ;;  %v1829_v11 = vpop.f32.mrf.mxu0  ;;  %v1942_v59 = vpop.f32.mrf.mxu1  ;;  %v1941_v4 = vadd.f32 %v1940_v54, %v11692_v43  ;;  %v2373_v14 = vmul.f32 0.2, %v1939_v23  ;;  %vm2245_vm7 = vcmp.gt.f32.partialorder %v1939_v23, 0.0 }
 0x166   : > { %15714 = vst [vmem:[#allocation97_spill] sm:$0xff] %v11675_v19  ;;  %v1830_v15 = vadd.f32 %v1829_v11, %v11679_v37  ;;  %v1943_v33 = vadd.f32 %v1942_v59, %v11683_v6  ;;  %v2372_v28 = vmul.f32 0.2, %v1828_v25  ;;  %vm2244_vm1 = vcmp.gt.f32.partialorder %v1828_v25, 0.0 }
 0x167   : > { %v1831_v51 = vpop.f32.mrf.mxu0  ;;  %v1944_v0 = vpop.f32.mrf.mxu1  ;;  %v2374_v54 = vmul.f32 0.2, %v1941_v4  ;;  %v2499_v61 = vsel %vm2243_vm6, %v1826_v29, %v2371_v34  ;;  %v2501_v39 = vsel %vm2245_vm7, %v1939_v23, %v2373_v14  ;;  %vm2246_vm10 = vcmp.gt.f32.partialorder %v1941_v4, 0.0 }
 0x168   : > { %v1832_v30 = vadd.f32 %v1831_v51, %v11687_v5  ;;  %v2379_v44 = vmul.f32 0.2, %v1830_v15  ;;  %v1945_v11 = vadd.f32 %v1944_v0, %v11692_v43  ;;  %vm2251_vm4 = vcmp.gt.f32.partialorder %v1830_v15, 0.0 }
 0x169   : > { %v1835_v49 = vpop.f32.mrf.mxu0  ;;  %v1948_v41 = vpop.f32.mrf.mxu1  ;;  %v2381_v59 = vmul.f32 0.2, %v1943_v33  ;;  %vm2253_vm8 = vcmp.gt.f32.partialorder %v1943_v33, 0.0  ;;  %v2500_v31 = vsel %vm2244_vm1, %v1828_v25, %v2372_v28  ;;  %v9820_v28 = vld [vmem:[%s15504_s7 + $0x4a4] ss:$16 sps:$4 sm:$0xff]  }
 0x16a   : > { %v2380_v19 = vmul.f32 0.2, %v1832_v30  ;;  %vm2252_vm5 = vcmp.gt.f32.partialorder %v1832_v30, 0.0  ;;  %v2507_v51 = vsel %vm2251_vm4, %v1830_v15, %v2379_v44  ;;  %v2382_v24 = vmul.f32 0.2, %v1945_v11 }
 0x16b   : > { %v1837_v40 = vpop.f32.mrf.mxu0  ;;  %v1950_v32 = vpop.f32.mrf.mxu1  ;;  %vm2254_vm9 = vcmp.gt.f32.partialorder %v1945_v11, 0.0  ;;  %v1836_v48 = vadd.f32 %v1835_v49, %v11679_v37  ;;  %v11706_v20 = vpack.c.bf16 %v2507_v51, %v2499_v61  ;;  %v2509_v44 = vsel %vm2253_vm8, %v1943_v33, %v2381_v59  ;;  %v9806_v61 = vld [vmem:[%s15504_s7 + $0x4e0] ss:$16 sps:$4 sm:$0xff]  }
 0x16c   : > { %v2508_v42 = vsel %vm2252_vm5, %v1832_v30, %v2380_v19  ;;  %v1949_v15 = vadd.f32 %v1948_v41, %v11683_v6  ;;  %v11713_v8 = vadd.f32 %v1837_v40, %v11687_v5  ;;  %v2510_v29 = vsel %vm2254_vm9, %v1945_v11, %v2382_v24 }
 0x16d   : > { %v1839_v35 = vpop.f32.mrf.mxu0  ;;  %v1952_v56 = vpop.f32.mrf.mxu1  ;;  %v11716_v14 = vpack.c.bf16 %v2508_v42, %v2500_v31  ;;  %v2502_v40 = vsel %vm2246_vm10, %v1941_v4, %v2374_v54  ;;  %v9814_v31 = vld [vmem:[%s15504_s7 + $0x4c4] ss:$16 sps:$4 sm:$0xff]   ;;  %v11733_v42 = vpack.c.bf16 %v2509_v44, %v2501_v39  ;;  %v9812_v4 = vld [vmem:[%s15504_s7 + $0x4c0] ss:$16 sps:$4 sm:$0xff]   ;;  %vm2259_vm11 = vcmp.gt.f32.partialorder %v1836_v48, 0.0 }
 0x16e   : > { %v1840_v19 = vadd.f32 %v1839_v35, %v11679_v37  ;;  %v1953_v41 = vadd.f32 %v1952_v56, %v11683_v6  ;;  %v11736_v24 = vpack.c.bf16 %v2510_v29, %v2502_v40  ;;  %v9809_v56 = vld [vmem:[%s15504_s7 + $0x6e0] ss:$16 sps:$4 sm:$0xff]   ;;  %v2387_v39 = vmul.f32 0.2, %v1836_v48 }
 0x16f   : > { %v1841_v0 = vpop.f32.mrf.mxu0  ;;  %v1954_v12 = vpop.f32.mrf.mxu1  ;;  %4579 = vmatprep.mubr.bf16.mxu0 %v11716_v14  ;;  %v2389_v11 = vmul.f32 0.2, %v1949_v15  ;;  %v1951_v34 = vadd.f32 %v1950_v32, %v11692_v43  ;;  %vm2261_vm12 = vcmp.gt.f32.partialorder %v1949_v15, 0.0  ;;  %v2388_v59 = vmul.f32 0.2, %v11713_v8 }
 0x170   : > { %v1842_v49 = vadd.f32 %v1841_v0, %v11687_v5  ;;  %v1955_v25 = vadd.f32 %v1954_v12, %v11692_v43  ;;  %v9817_v12 = vld [vmem:[%s15504_s7 + $0x6c4] ss:$16 sps:$4 sm:$0xff]   ;;  %4580 = vmatmul.mubr.bf16.vlgmr.msra.gmra.mxu0 %v11706_v20  ;;  %vm2267_vm13 = vcmp.gt.f32.partialorder %v1840_v19, 0.0  ;;  %v2395_v51 = vmul.f32 0.2, %v1840_v19  ;;  %4692 = vmatprep.mubr.bf16.mxu1 %v11736_v24 }
 0x171   : > { %v11704_v9 = vpop.f32.mrf.mxu0  ;;  %v11710_v27 = vpop.f32.mrf.mxu1  ;;  %4774 = vmatpush1.bf16.msra.mxu0 %v9806_v61  ;;  %v2397_v54 = vmul.f32 0.2, %v1953_v41  ;;  %4693 = vmatmul.mubr.bf16.vlgmr.msra.gmra.mxu1 %v11733_v42  ;;  %vm2269_vm14 = vcmp.gt.f32.partialorder %v1953_v41, 0.0  ;;  %v9815_v40 = vld [vmem:[%s15504_s7 + $0x6c0] ss:$16 sps:$4 sm:$0xff]   ;;  %v2515_v7 = vsel %vm2259_vm11, %v1836_v48, %v2387_v39  ;;  %vm2260_vm2 = vcmp.gt.f32.partialorder %v11713_v8, 0.0 }
 0x172   : > { %v2396_v44 = vmul.f32 0.2, %v1842_v49  ;;  %v2398_v29 = vmul.f32 0.2, %v1955_v25  ;;  %4775 = vmatprep.subr.bf16.mxu0 %v9814_v31  ;;  %vm2268_vm15 = vcmp.gt.f32.partialorder %v1842_v49, 0.0  ;;  %vm2270_vm0 = vcmp.gt.f32.partialorder %v1955_v25, 0.0  ;;  %4887 = vmatpush1.bf16.msra.mxu1 %v9809_v56 }
 0x173   : > { %v11722_v23 = vpop.f32.mrf.mxu0  ;;  %v11728_v33 = vpop.f32.mrf.mxu1  ;;  %v2390_v31 = vmul.f32 0.2, %v1951_v34  ;;  %4888 = vmatprep.subr.bf16.mxu1 %v9817_v12  ;;  %v9823_v56 = vld [vmem:[%s15504_s7 + $0x6a4] ss:$16 sps:$4 sm:$0xff]   ;;  %v2517_v53 = vsel %vm2261_vm12, %v1949_v15, %v2389_v11  ;;  %vm2262_vm3 = vcmp.gt.f32.partialorder %v1951_v34, 0.0  ;;  %v1846_v61 = vadd.f32 %v11704_v9, %v11679_v37 }
 0x174   : > { %v9818_v48 = vld [vmem:[%s15504_s7 + $0x4a0] ss:$16 sps:$4 sm:$0xff]   ;;  %v2525_v39 = vsel %vm2269_vm14, %v1953_v41, %v2397_v54  ;;  %v1959_v17 = vadd.f32 %v11710_v27, %v11683_v6  ;;  %v2524_v15 = vsel %vm2268_vm15, %v1842_v49, %v2396_v44  ;;  %v2526_v11 = vsel %vm2270_vm0, %v1955_v25, %v2398_v29  ;;  %v9826_v9 = vld [vmem:[%s15504_s7 + $0x484] ss:$16 sps:$4 sm:$0xff]  }
 0x175   : > { %v1849_v30 = vpop.f32.mrf.mxu0  ;;  %v1962_v35 = vpop.f32.mrf.mxu1  ;;  %4776 = vmatpush1.bf16.msra.mxu0 %v9812_v4  ;;  %v2516_v27 = vsel %vm2260_vm2, %v11713_v8, %v2388_v59  ;;  %v11795_v25 = vadd.f32 %v11722_v23, %v11687_v5  ;;  %v2518_v54 = vsel %vm2262_vm3, %v1951_v34, %v2390_v31  ;;  %v2403_v29 = vmul.f32 0.2, %v1846_v61  ;;  %v9824_v34 = vld [vmem:[%s15504_s7 + $0x480] ss:$16 sps:$4 sm:$0xff]   ;;  %v9829_v59 = vld [vmem:[%s15504_s7 + $0x684] ss:$16 sps:$4 sm:$0xff]  }
 0x176   : > { %v1850_v13 = vadd.f32 %v1849_v30, %v11679_v37  ;;  %v2523_v30 = vsel %vm2267_vm13, %v1840_v19, %v2395_v51  ;;  %4777 = vmatprep.subr.bf16.mxu0 %v9820_v28  ;;  %v1963_v51 = vadd.f32 %v1962_v35, %v11683_v6  ;;  %4889 = vmatpush1.bf16.msra.mxu1 %v9815_v40  ;;  %v9821_v35 = vld [vmem:[%s15504_s7 + $0x6a0] ss:$16 sps:$4 sm:$0xff]   ;;  %vm2275_vm5 = vcmp.gt.f32.partialorder %v1846_v61, 0.0 }
 0x177   : > { %v1851_v0 = vpop.f32.mrf.mxu0  ;;  %v1964_v32 = vpop.f32.mrf.mxu1  ;;  %v11797_v28 = vpack.c.bf16 %v2524_v15, %v2516_v27  ;;  %4890 = vmatprep.subr.bf16.mxu1 %v9823_v56  ;;  %v11803_v44 = vpack.c.bf16 %v2523_v30, %v2515_v7  ;;  %v11807_v8 = vadd.f32 %v11728_v33, %v11692_v43  ;;  %v11809_v23 = vpack.c.bf16 %v2526_v11, %v2518_v54  ;;  %v9832_v30 = vld [vmem:[%s15504_s7 + $0x464] ss:$16 sps:$4 sm:$0xff]   ;;  %v9830_v54 = vld [vmem:[%s15504_s7 + $0x460] ss:$16 sps:$4 sm:$0xff]  }
 0x178   : > { %v2411_v4 = vmul.f32 0.2, %v1850_v13  ;;  %v1852_v41 = vadd.f32 %v1851_v0, %v11687_v5  ;;  %vm2283_vm4 = vcmp.gt.f32.partialorder %v1850_v13, 0.0  ;;  %v11817_v31 = vpack.c.bf16 %v2525_v39, %v2517_v53  ;;  %v9827_v53 = vld [vmem:[%s15504_s7 + $0x680] ss:$16 sps:$4 sm:$0xff]  }
 0x179   : > { %v11759_v60 = vpop.f32.mrf.mxu0  ;;  %v11767_v55 = vpop.f32.mrf.mxu1  ;;  %4778 = vmatpush1.bf16.msra.mxu0 %v9818_v48  ;;  %v2405_v7 = vmul.f32 0.2, %v1959_v17  ;;  %v1965_v56 = vadd.f32 %v1964_v32, %v11692_v43  ;;  %4589 = vmatprep.mubr.bf16.mxu0 %v11797_v28  ;;  %vm2277_vm6 = vcmp.gt.f32.partialorder %v1959_v17, 0.0  ;;  %v2413_v15 = vmul.f32 0.2, %v1963_v51 }
 0x17a   : > { %4779 = vmatprep.subr.bf16.mxu0 %v9826_v9  ;;  %v2539_v48 = vsel %vm2283_vm4, %v1850_v13, %v2411_v4  ;;  %v2412_v11 = vmul.f32 0.2, %v1852_v41  ;;  %4702 = vmatprep.mubr.bf16.mxu1 %v11809_v23  ;;  %vm2276_vm7 = vcmp.gt.f32.partialorder %v11795_v25, 0.0  ;;  %v2404_v39 = vmul.f32 0.2, %v11795_v25 }
 0x17b   : > { %v11776_v12 = vpop.f32.mrf.mxu0  ;;  %v11783_v19 = vpop.f32.mrf.mxu1  ;;  %4590 = vmatmul.mubr.bf16.gmra.mxu0 %v11803_v44  ;;  %vm2285_vm1 = vcmp.gt.f32.partialorder %v1963_v51, 0.0  ;;  %vm2284_vm8 = vcmp.gt.f32.partialorder %v1852_v41, 0.0  ;;  %4703 = vmatmul.mubr.bf16.gmra.mxu1 %v11817_v31  ;;  %v2531_v9 = vsel %vm2275_vm5, %v1846_v61, %v2403_v29  ;;  %vm2278_vm9 = vcmp.gt.f32.partialorder %v11807_v8, 0.0 }
 0x17c   : > { %v2406_v4 = vmul.f32 0.2, %v11807_v8  ;;  %v11842_v27 = vadd.f32 %v11759_v60, %v11679_v37  ;;  %4891 = vmatpush1.bf16.msra.mxu1 %v9821_v35  ;;  %v2533_v2 = vsel %vm2277_vm6, %v1959_v17, %v2405_v7  ;;  %v11850_v1 = vpack.c.bf16 %v2539_v48, %v2531_v9  ;;  %v9835_v60 = vld [vmem:[%s15504_s7 + $0x664] ss:$16 sps:$4 sm:$0xff]  }
 0x17d   : > { %v1859_v49 = vpop.f32.mrf.mxu0  ;;  %v1972_v0 = vpop.f32.mrf.mxu1  ;;  %4780 = vmatpush1.bf16.msra.mxu0 %v9824_v34  ;;  %v2414_v61 = vmul.f32 0.2, %v1965_v56  ;;  %v11854_v29 = vadd.f32 %v11767_v55, %v11683_v6  ;;  %4892 = vmatprep.subr.bf16.mxu1 %v9829_v59  ;;  %v2541_v34 = vsel %vm2285_vm1, %v1963_v51, %v2413_v15  ;;  %vm2286_vm10 = vcmp.gt.f32.partialorder %v1965_v56, 0.0  ;;  %v9838_v55 = vld [vmem:[%s15504_s7 + $0x444] ss:$16 sps:$4 sm:$0xff]  }
 0x17e   : > { %4781 = vmatprep.subr.bf16.mxu0 %v9832_v30  ;;  %v1860_v17 = vadd.f32 %v1859_v49, %v11679_v37  ;;  %v2540_v7 = vsel %vm2284_vm8, %v1852_v41, %v2412_v11  ;;  %v1973_v59 = vadd.f32 %v1972_v0, %v11683_v6  ;;  %v2532_v51 = vsel %vm2276_vm7, %v11795_v25, %v2404_v39  ;;  %v9833_v49 = vld [vmem:[%s15504_s7 + $0x660] ss:$16 sps:$4 sm:$0xff]  }
 0x17f   : > { %v1861_v40 = vpop.f32.mrf.mxu0  ;;  %v1974_v33 = vpop.f32.mrf.mxu1  ;;  %vm2291_vm11 = vcmp.gt.f32.partialorder %v11842_v27, 0.0  ;;  %v11881_v15 = vadd.f32 %v11776_v12, %v11687_v5  ;;  %v11885_v0 = vadd.f32 %v11783_v19, %v11692_v43  ;;  %v9836_v25 = vld [vmem:[%s15504_s7 + $0x440] ss:$16 sps:$4 sm:$0xff]   ;;  %v2419_v12 = vmul.f32 0.2, %v11842_v27 }
 0x180   : > { %v1862_v30 = vadd.f32 %v1861_v40, %v11687_v5  ;;  %v1975_v9 = vadd.f32 %v1974_v33, %v11692_v43  ;;  %4893 = vmatpush1.bf16.msra.mxu1 %v9827_v53  ;;  %v11887_v40 = vpack.c.bf16 %v2540_v7, %v2532_v51  ;;  %v9841_v33 = vld [vmem:[%s15504_s7 + $0x644] ss:$16 sps:$4 sm:$0xff]   ;;  %vm2293_vm12 = vcmp.gt.f32.partialorder %v11854_v29, 0.0 }
 0x181   : > { %v11830_v32 = vpop.f32.mrf.mxu0  ;;  %v11835_v13 = vpop.f32.mrf.mxu1  ;;  %4782 = vmatpush1.bf16.msra.mxu0 %v9830_v54  ;;  %v2534_v19 = vsel %vm2278_vm9, %v11807_v8, %v2406_v4  ;;  %v2542_v53 = vsel %vm2286_vm10, %v1965_v56, %v2414_v61  ;;  %4894 = vmatprep.subr.bf16.mxu1 %v9835_v60  ;;  %v9844_v54 = vld [vmem:[%s15504_s7 + $0x424] ss:$16 sps:$4 sm:$0xff]   ;;  %v2421_v7 = vmul.f32 0.2, %v11854_v29  ;;  %vm2299_vm13 = vcmp.gt.f32.partialorder %v1860_v17, 0.0 }
 0x182   : > { %v2427_v51 = vmul.f32 0.2, %v1860_v17  ;;  %4599 = vmatprep.mubr.bf16.mxu0 %v11887_v40  ;;  %v11910_v46 = vpack.c.bf16 %v2542_v53, %v2534_v19  ;;  %4783 = vmatprep.subr.bf16.mxu0 %v9838_v55  ;;  %v9839_v8 = vld [vmem:[%s15504_s7 + $0x640] ss:$16 sps:$4 sm:$0xff]   ;;  %v11917_v4 = vpack.c.bf16 %v2541_v34, %v2533_v2  ;;  %v2429_v61 = vmul.f32 0.2, %v1973_v59 }
 0x183   : > { %v11847_v47 = vpop.f32.mrf.mxu0  ;;  %v11859_v35 = vpop.f32.mrf.mxu1  ;;  %v2428_v60 = vmul.f32 0.2, %v1862_v30  ;;  %v2430_v36 = vmul.f32 0.2, %v1975_v9  ;;  %4600 = vmatmul.mubr.bf16.gmra.mxu0 %v11850_v1  ;;  %v2420_v45 = vmul.f32 0.2, %v11881_v15  ;;  %v2547_v50 = vsel %vm2291_vm11, %v11842_v27, %v2419_v12 }
 0x184   : > { %vm2301_vm14 = vcmp.gt.f32.partialorder %v1973_v59, 0.0  ;;  %vm2300_vm15 = vcmp.gt.f32.partialorder %v1862_v30, 0.0  ;;  %vm2302_vm0 = vcmp.gt.f32.partialorder %v1975_v9, 0.0  ;;  %4712 = vmatprep.mubr.bf16.mxu1 %v11910_v46  ;;  %4895 = vmatpush1.bf16.msra.mxu1 %v9833_v49  ;;  %vm2292_vm2 = vcmp.gt.f32.partialorder %v11881_v15, 0.0  ;;  %v9847_v19 = vld [vmem:[%s15504_s7 + $0x624] ss:$16 sps:$4 sm:$0xff]  }
 0x185   : > { %v1869_v48 = vpop.f32.mrf.mxu0  ;;  %v11876_v41 = vpop.f32.mrf.mxu1  ;;  %v2422_v2 = vmul.f32 0.2, %v11885_v0  ;;  %4713 = vmatmul.mubr.bf16.gmra.mxu1 %v11917_v4  ;;  %4896 = vmatprep.subr.bf16.mxu1 %v9841_v33  ;;  %v11938_v49 = vrot.slane %v11671_v16, %v15715_v52  ;;  %v2549_v33 = vsel %vm2293_vm12, %v11854_v29, %v2421_v7  ;;  %vm2294_vm3 = vcmp.gt.f32.partialorder %v11885_v0, 0.0  ;;  %v9850_v29 = vld [vmem:[%s15504_s7 + $0x404] ss:$16 sps:$4 sm:$0xff]  }
 0x186   : > { %v1870_v34 = vadd.f32 %v1869_v48, %v11679_v37  ;;  %v2555_v48 = vsel %vm2299_vm13, %v1860_v17, %v2427_v51  ;;  %4784 = vmatpush1.bf16.msra.mxu0 %v9836_v25  ;;  %v2557_v52 = vsel %vm2301_vm14, %v1973_v59, %v2429_v61  ;;  %v1866_v10 = vadd.f32 %v11830_v32, %v11679_v37 }
 0x187   : > { %v11895_v11 = vpop.f32.mrf.mxu0  ;;  %v11903_v39 = vpop.f32.mrf.mxu1  ;;  %v2556_v27 = vsel %vm2300_vm15, %v1862_v30, %v2428_v60  ;;  %v2558_v12 = vsel %vm2302_vm0, %v1975_v9, %v2430_v36  ;;  %4785 = vmatprep.subr.bf16.mxu0 %v9844_v54  ;;  %v1979_v25 = vadd.f32 %v11835_v13, %v11683_v6  ;;  %v11963_v7 = vadd.f32 %v11847_v47, %v11687_v5 }
 0x188   : > { %v11967_v32 = vadd.f32 %v11859_v35, %v11692_v43  ;;  %4897 = vmatpush1.bf16.msra.mxu1 %v9839_v8  ;;  %v2548_v36 = vsel %vm2292_vm2, %v11881_v15, %v2420_v45  ;;  %v2443_v30 = vmul.f32 0.2, %v1870_v34  ;;  %v1983_v9 = vadd.f32 %v11876_v41, %v11683_v6  ;;  %v9845_v41 = vld [vmem:[%s15504_s7 + $0x620] ss:$16 sps:$4 sm:$0xff]  }
 0x189   : > { %v11915_v56 = vpop.f32.mrf.mxu0  ;;  %v11920_v3 = vpop.f32.mrf.mxu1  ;;  %v11976_v13 = vpack.c.bf16 %v2556_v27, %v2548_v36  ;;  %v2550_v47 = vsel %vm2294_vm3, %v11885_v0, %v2422_v2  ;;  %4898 = vmatprep.subr.bf16.mxu1 %v9847_v19  ;;  %v11983_v54 = vpack.c.bf16 %v2555_v48, %v2547_v50  ;;  %vm2315_vm4 = vcmp.gt.f32.partialorder %v1870_v34, 0.0  ;;  %v9848_v0 = vld [vmem:[%s15504_s7 + $0x400] ss:$16 sps:$4 sm:$0xff]  }
 0x18a   : > { %v1872_v45 = vadd.f32 %v11895_v11, %v11687_v5  ;;  %v11987_v15 = vpack.c.bf16 %v2558_v12, %v2550_v47  ;;  %4786 = vmatpush1.bf16.msra.mxu0 %v9842_v18  ;;  %v11997_v8 = vpack.c.bf16 %v2557_v52, %v2549_v33  ;;  %v2435_v50 = vmul.f32 0.2, %v1866_v10  ;;  %v9853_v11 = vld [vmem:[%s15504_s7 + $0x604] ss:$16 sps:$4 sm:$0xff]   ;;  %v9851_v33 = vld [vmem:[%s15504_s7 + $0x600] ss:$16 sps:$4 sm:$0xff]  }
 0x18b   : > { %v11924_v55 = vpop.f32.mrf.mxu0  ;;  %v11933_v53 = vpop.f32.mrf.mxu1  ;;  %15716 = vst [vmem:[#allocation98_spill] sm:$0xff] %v11983_v54  ;;  %v1985_v61 = vadd.f32 %v11903_v39, %v11692_v43  ;;  %4609 = vmatprep.mubr.bf16.mxu0 %v11976_v13  ;;  %4787 = vmatprep.subr.bf16.mxu0 %v9850_v29  ;;  %v9856_v18 = vld [vmem:[%s15504_s7 + $0x5e4] ss:$16 sps:$4 sm:$0xff]   ;;  %v15718_v2 = vsub.s32 6, %v11038_v38  ;;  %vm2307_vm5 = vcmp.gt.f32.partialorder %v1866_v10, 0.0  ;;  %vm2309_vm6 = vcmp.gt.f32.partialorder %v1979_v25, 0.0 }
 0x18c   : > { %15717 = vst [vmem:[#allocation99_spill] sm:$0xff] %v11997_v8  ;;  %v2437_v39 = vmul.f32 0.2, %v1979_v25  ;;  %vm2308_vm7 = vcmp.gt.f32.partialorder %v11963_v7, 0.0  ;;  %4722 = vmatprep.mubr.bf16.mxu1 %v11987_v15  ;;  %4610 = vmatmul.mubr.bf16.gmra.mxu0 %v11983_v54  ;;  %v2436_v52 = vmul.f32 0.2, %v11963_v7  ;;  %v2571_v27 = vsel %vm2315_vm4, %v1870_v34, %v2443_v30 }
 0x18d   : > { %v1879_v58 = vpop.f32.mrf.mxu0  ;;  %v1992_v17 = vpop.f32.mrf.mxu1  ;;  %v12013_v19 = vrot.slane %v11671_v16, %v15718_v2  ;;  %vm2310_vm1 = vcmp.gt.f32.partialorder %v11967_v32, 0.0  ;;  %v2445_v12 = vmul.f32 0.2, %v1983_v9  ;;  %4723 = vmatmul.mubr.bf16.gmra.mxu1 %v11997_v8  ;;  %v2438_v36 = vmul.f32 0.2, %v11967_v32 }
 0x18e   : > { %vm2317_vm8 = vcmp.gt.f32.partialorder %v1983_v9, 0.0  ;;  %v2444_v47 = vmul.f32 0.2, %v1872_v45  ;;  %4899 = vmatpush1.bf16.msra.mxu1 %v9845_v41  ;;  %v1880_v2 = vadd.f32 %v1879_v58, %v11679_v37  ;;  %v2563_v26 = vsel %vm2307_vm5, %v1866_v10, %v2435_v50  ;;  %4788 = vmatpush1.bf16.msra.mxu0 %v9848_v0  ;;  %v9859_v30 = vld [vmem:[%s15504_s7 + $0x7e4] ss:$16 sps:$4 sm:$0xff]  }
 0x18f   : > { %v11972_v59 = vpop.f32.mrf.mxu0  ;;  %v11981_v35 = vpop.f32.mrf.mxu1  ;;  %vm2316_vm9 = vcmp.gt.f32.partialorder %v1872_v45, 0.0  ;;  %v2446_v57 = vmul.f32 0.2, %v1985_v61  ;;  %4900 = vmatprep.subr.bf16.mxu1 %v9853_v11  ;;  %v1993_v34 = vadd.f32 %v1992_v17, %v11683_v6  ;;  %v2565_v41 = vsel %vm2309_vm6, %v1979_v25, %v2437_v39  ;;  %v9854_v58 = vld [vmem:[%s15504_s7 + $0x5e0] ss:$16 sps:$4 sm:$0xff]   ;;  %4789 = vmatprep.subr.bf16.mxu0 %v9856_v18 }
 0x190   : > { %v12041_v63 = vpack.c.bf16 %v2571_v27, %v2563_v26  ;;  %vm2318_vm10 = vcmp.gt.f32.partialorder %v1985_v61, 0.0  ;;  %v1876_v10 = vadd.f32 %v11915_v56, %v11679_v37  ;;  %v2573_v0 = vsel %vm2317_vm8, %v1983_v9, %v2445_v12  ;;  %v9862_v56 = vld [vmem:[%s15504_s7 + $0x5c4] ss:$16 sps:$4 sm:$0xff]  }
 0x191   : > { %v11995_v51 = vpop.f32.mrf.mxu0  ;;  %v12008_v60 = vpop.f32.mrf.mxu1  ;;  %v1989_v50 = vadd.f32 %v11920_v3, %v11683_v6  ;;  %v12055_v26 = vadd.f32 %v11924_v55, %v11687_v5  ;;  %v12059_v25 = vadd.f32 %v11933_v53, %v11692_v43  ;;  %v2459_v18 = vmul.f32 0.2, %v1880_v2 }
 0x192   : > { %15719 = vst [vmem:[#allocation100_spill] sm:$0xff] %v12041_v63  ;;  %4901 = vmatpush1.bf16.msra.mxu1 %v9851_v33  ;;  %v1882_v9 = vadd.f32 %v11972_v59, %v11687_v5  ;;  %v2564_v3 = vsel %vm2308_vm7, %v11963_v7, %v2436_v52  ;;  %v2572_v55 = vsel %vm2316_vm9, %v1872_v45, %v2444_v47  ;;  %v2461_v53 = vmul.f32 0.2, %v1993_v34  ;;  %v9857_v59 = vld [vmem:[%s15504_s7 + $0x7e0] ss:$16 sps:$4 sm:$0xff]  }
 0x193   : > { %v12021_v48 = vpop.f32.mrf.mxu0  ;;  %v12027_v29 = vpop.f32.mrf.mxu1  ;;  %v12074_v27 = vpack.c.bf16 %v2572_v55, %v2564_v3  ;;  %v2566_v12 = vsel %vm2310_vm1, %v11967_v32, %v2438_v36  ;;  %v2574_v33 = vsel %vm2318_vm10, %v1985_v61, %v2446_v57  ;;  %4902 = vmatprep.subr.bf16.mxu1 %v9859_v30  ;;  %v9860_v7 = vld [vmem:[%s15504_s7 + $0x5c0] ss:$16 sps:$4 sm:$0xff]   ;;  %v2451_v52 = vmul.f32 0.2, %v1876_v10  ;;  %4790 = vmatpush2.bf16.msra.mxu0 %v9854_v58  ;;  %v9865_v57 = vld [vmem:[%s15504_s7 + $0x7c4] ss:$16 sps:$4 sm:$0xff]  }
 0x194   : > { %vm2331_vm11 = vcmp.gt.f32.partialorder %v1880_v2, 0.0  ;;  %vm2333_vm12 = vcmp.gt.f32.partialorder %v1993_v34, 0.0  ;;  %v12088_v47 = vpack.c.bf16 %v2574_v33, %v2566_v12  ;;  %v12095_v61 = vpack.c.bf16 %v2573_v0, %v2565_v41  ;;  %4791 = vmatprep.subr.bf16.mxu0 %v9862_v56  ;;  %v9868_v58 = vld [vmem:[%s15504_s7 + $0x5a4] ss:$16 sps:$4 sm:$0xff]  }
 0x195   : > { %v12031_v21 = vpop.f32.mrf.mxu0  ;;  %v12038_v22 = vpop.f32.mrf.mxu1  ;;  %15720 = vst [vmem:[#allocation101_spill] sm:$0xff] %v12074_v27  ;;  %vm2323_vm13 = vcmp.gt.f32.partialorder %v1876_v10, 0.0  ;;  %v2453_v36 = vmul.f32 0.2, %v1989_v50  ;;  %v1995_v30 = vadd.f32 %v11981_v35, %v11692_v43  ;;  %4619 = vmatprep.mubr.bf16.mxu0 %v12074_v27  ;;  %vm2325_vm14 = vcmp.gt.f32.partialorder %v1989_v50, 0.0 }
 0x196   : > { %15721 = vst [vmem:[#allocation102_spill] sm:$0xff] %v12088_v47  ;;  %15722 = vst [vmem:[#allocation103_spill] sm:$0xff] %v12095_v61  ;;  %vm2324_vm15 = vcmp.gt.f32.partialorder %v12055_v26, 0.0  ;;  %v2452_v41 = vmul.f32 0.2, %v12055_v26  ;;  %4732 = vmatprep.mubr.bf16.mxu1 %v12088_v47  ;;  %4620 = vmatmul.mubr.bf16.gmra.mxu0 %v12041_v63  ;;  %vm2326_vm0 = vcmp.gt.f32.partialorder %v12059_v25, 0.0  ;;  %v2587_v56 = vsel %vm2331_vm11, %v1880_v2, %v2459_v18 }
 0x197   : > { %v12048_v17 = vpop.f32.mrf.mxu0  ;;  %v12064_v11 = vpop.f32.mrf.mxu1  ;;  %v2460_v0 = vmul.f32 0.2, %v1882_v9  ;;  %v2589_v55 = vsel %vm2333_vm12, %v1993_v34, %v2461_v53  ;;  %vm2332_vm2 = vcmp.gt.f32.partialorder %v1882_v9, 0.0  ;;  %4733 = vmatmul.mubr.bf16.gmra.mxu1 %v12095_v61  ;;  %v2579_v33 = vsel %vm2323_vm13, %v1876_v10, %v2451_v52  ;;  %v9863_v2 = vld [vmem:[%s15504_s7 + $0x7c0] ss:$16 sps:$4 sm:$0xff]   ;;  %4792 = vmatpush2.bf16.msra.mxu0 %v9860_v7 }
 0x198   : > { %v2454_v62 = vmul.f32 0.2, %v12059_v25  ;;  %v12121_v63 = vadd.f32 %v11995_v51, %v11679_v37  ;;  %4903 = vmatpush2.bf16.msra.mxu1 %v9857_v59  ;;  %v1890_v34 = vadd.f32 %v12031_v21, %v11679_v37  ;;  %v9866_v18 = vld [vmem:[%s15504_s7 + $0x5a0] ss:$16 sps:$4 sm:$0xff]   ;;  %v2581_v53 = vsel %vm2325_vm14, %v1989_v50, %v2453_v36  ;;  %4793 = vmatprep.subr.bf16.mxu0 %v9868_v58  ;;  %v9871_v21 = vld [vmem:[%s15504_s7 + $0x7a4] ss:$16 sps:$4 sm:$0xff]  }
 0x199   : > { %v12072_v39 = vpop.f32.mrf.mxu0  ;;  %v12086_v45 = vpop.f32.mrf.mxu1  ;;  %vm2334_vm3 = vcmp.gt.f32.partialorder %v1995_v30, 0.0  ;;  %v2462_v51 = vmul.f32 0.2, %v1995_v30  ;;  %4904 = vmatprep.subr.bf16.mxu1 %v9865_v57  ;;  %v2003_v59 = vadd.f32 %v12038_v22, %v11683_v6  ;;  %v12141_v52 = vpack.c.bf16 %v2587_v56, %v2579_v33  ;;  %v9874_v22 = vld [vmem:[%s15504_s7 + $0x584] ss:$16 sps:$4 sm:$0xff]  }
 0x19a   : > { %v12143_v61 = vpack.c.bf16 %v2589_v55, %v2581_v53  ;;  %v1999_v50 = vadd.f32 %v12008_v60, %v11683_v6  ;;  %v2588_v36 = vsel %vm2332_vm2, %v1882_v9, %v2460_v0  ;;  %v12155_v58 = vadd.f32 %v12021_v48, %v11687_v5  ;;  %v9869_v9 = vld [vmem:[%s15504_s7 + $0x7a0] ss:$16 sps:$4 sm:$0xff]  }
 0x19b   : > { %v12093_v32 = vpop.f32.mrf.mxu0  ;;  %v12103_v3 = vpop.f32.mrf.mxu1  ;;  %15723 = vst [vmem:[#allocation104_spill] sm:$0xff] %v12141_v52  ;;  %v1892_v56 = vadd.f32 %v12048_v17, %v11687_v5  ;;  %v2005_v55 = vadd.f32 %v12064_v11, %v11692_v43  ;;  %v2580_v60 = vsel %vm2324_vm15, %v12055_v26, %v2452_v41  ;;  %vm2339_vm4 = vcmp.gt.f32.partialorder %v12121_v63, 0.0  ;;  %4794 = vmatpush2.bf16.msra.mxu0 %v9866_v18  ;;  %v9872_v26 = vld [vmem:[%s15504_s7 + $0x580] ss:$16 sps:$4 sm:$0xff]   ;;  %v9877_v11 = vld [vmem:[%s15504_s7 + $0x784] ss:$16 sps:$4 sm:$0xff]  }
 0x19c   : > { %15724 = vst [vmem:[#allocation105_spill] sm:$0xff] %v12143_v61  ;;  %v12172_v48 = vadd.f32 %v12027_v29, %v11692_v43  ;;  %v2475_v17 = vmul.f32 0.2, %v1890_v34  ;;  %4905 = vmatpush2.bf16.msra.mxu1 %v9863_v2  ;;  %v12174_v33 = vpack.c.bf16 %v2588_v36, %v2580_v60  ;;  %vm2347_vm5 = vcmp.gt.f32.partialorder %v1890_v34, 0.0  ;;  %v9880_v18 = vld [vmem:[%s15504_s7 + $0x564] ss:$16 sps:$4 sm:$0xff]   ;;  %4795 = vmatprep.subr.bf16.mxu0 %v9874_v22 }
 0x19d   : > { %v12109_v35 = vpop.f32.mrf.mxu0  ;;  %v12115_v12 = vpop.f32.mrf.mxu1  ;;  %v2477_v53 = vmul.f32 0.2, %v2003_v59  ;;  %v2582_v29 = vsel %vm2326_vm0, %v12059_v25, %v2454_v62  ;;  %v2590_v2 = vsel %vm2334_vm3, %v1995_v30, %v2462_v51  ;;  %4906 = vmatprep.subr.bf16.mxu1 %v9871_v21  ;;  %v2467_v60 = vmul.f32 0.2, %v12121_v63  ;;  %v9875_v22 = vld [vmem:[%s15504_s7 + $0x780] ss:$16 sps:$4 sm:$0xff]  }
 0x19e   : > { %15725 = vst [vmem:[#allocation106_spill] sm:$0xff] %v12174_v33  ;;  %v2469_v47 = vmul.f32 0.2, %v1999_v50  ;;  %vm2349_vm6 = vcmp.gt.f32.partialorder %v2003_v59, 0.0  ;;  %4629 = vmatprep.mubr.bf16.mxu0 %v12174_v33  ;;  %v12195_v8 = vpack.c.bf16 %v2590_v2, %v2582_v29  ;;  %vm2341_vm7 = vcmp.gt.f32.partialorder %v1999_v50, 0.0 }
 0x19f   : > { %v12131_v10 = vpop.f32.mrf.mxu0  ;;  %v12139_v7 = vpop.f32.mrf.mxu1  ;;  %vm2340_vm1 = vcmp.gt.f32.partialorder %v12155_v58, 0.0  ;;  %v2476_v62 = vmul.f32 0.2, %v1892_v56  ;;  %v2478_v25 = vmul.f32 0.2, %v2005_v55  ;;  %4630 = vmatmul.mubr.bf16.gmra.mxu0 %v12141_v52  ;;  %v2603_v21 = vsel %vm2347_vm5, %v1890_v34, %v2475_v17 }
 0x1a0   : > { %15726 = vst [vmem:[#allocation107_spill] sm:$0xff] %v12195_v8  ;;  %v2468_v51 = vmul.f32 0.2, %v12155_v58  ;;  %vm2348_vm8 = vcmp.gt.f32.partialorder %v1892_v56, 0.0  ;;  %vm2350_vm9 = vcmp.gt.f32.partialorder %v2005_v55, 0.0  ;;  %4742 = vmatprep.mubr.bf16.mxu1 %v12195_v8  ;;  %4907 = vmatpush2.bf16.msra.mxu1 %v9869_v9  ;;  %v2605_v52 = vsel %vm2349_vm6, %v2003_v59, %v2477_v53 }
 0x1a1   : > { %v12151_v57 = vpop.f32.mrf.mxu0  ;;  %v12167_v0 = vpop.f32.mrf.mxu1  ;;  %v2470_v2 = vmul.f32 0.2, %v12172_v48  ;;  %4743 = vmatmul.mubr.bf16.gmra.mxu1 %v12143_v61  ;;  %v1896_v34 = vadd.f32 %v12072_v39, %v11679_v37  ;;  %4908 = vmatprep.subr.bf16.mxu1 %v9877_v11  ;;  %v1900_v17 = vadd.f32 %v12109_v35, %v11679_v37  ;;  %v9883_v9 = vld [vmem:[%s15504_s7 + $0x764] ss:$16 sps:$4 sm:$0xff]   ;;  %v2595_v33 = vsel %vm2339_vm4, %v12121_v63, %v2467_v60  ;;  %v9878_v37 = vld [vmem:[%s15504_s7 + $0x560] ss:$16 sps:$4 sm:$0xff]  }
 0x1a2   : > { %v2597_v59 = vsel %vm2341_vm7, %v1999_v50, %v2469_v47  ;;  %vm2342_vm10 = vcmp.gt.f32.partialorder %v12172_v48, 0.0  ;;  %v2013_v39 = vadd.f32 %v12115_v12, %v11683_v6  ;;  %4796 = vmatpush2.bf16.msra.mxu0 %v9872_v26  ;;  %v12235_v11 = vpack.c.bf16 %v2603_v21, %v2595_v33  ;;  %v9886_v12 = vld [vmem:[%s15504_s7 + $0x544] ss:$16 sps:$4 sm:$0xff]  }
 0x1a3   : > { %v12182_v41 = vpop.f32.mrf.mxu0  ;;  %v12191_v36 = vpop.f32.mrf.mxu1  ;;  %v2009_v53 = vadd.f32 %v12086_v45, %v11683_v6  ;;  %v2604_v63 = vsel %vm2348_vm8, %v1892_v56, %v2476_v62  ;;  %v2606_v47 = vsel %vm2350_vm9, %v2005_v55, %v2478_v25  ;;  %4797 = vmatprep.subr.bf16.mxu0 %v9880_v18  ;;  %v12246_v26 = vpack.c.bf16 %v2605_v52, %v2597_v59  ;;  %v9892_v59 = vld [vmem:[%s15504_s7 + $0x524] ss:$16 sps:$4 sm:$0xff]  }
 0x1a4   : > { %15727 = vst [vmem:[#allocation108_spill] sm:$0xff] %v12235_v11  ;;  %v12250_v33 = vadd.f32 %v12093_v32, %v11687_v5  ;;  %v12254_v6 = vadd.f32 %v12103_v3, %v11692_v43  ;;  %4909 = vmatpush2.bf16.msra.mxu1 %v9875_v22  ;;  %v2596_v45 = vsel %vm2340_vm1, %v12155_v58, %v2468_v51  ;;  %v2483_v55 = vmul.f32 0.2, %v1896_v34  ;;  %v9881_v3 = vld [vmem:[%s15504_s7 + $0x760] ss:$16 sps:$4 sm:$0xff]  }
 0x1a5   : > { %v12197_v27 = vpop.f32.mrf.mxu0  ;;  %v12201_v30 = vpop.f32.mrf.mxu1  ;;  %15728 = vst [vmem:[#allocation109_spill] sm:$0xff] %v12246_v26  ;;  %v2491_v18 = vmul.f32 0.2, %v1900_v17  ;;  %v12261_v60 = vpack.c.bf16 %v2604_v63, %v2596_v45  ;;  %v2598_v32 = vsel %vm2342_vm10, %v12172_v48, %v2470_v2  ;;  %4910 = vmatprep.subr.bf16.mxu1 %v9883_v9  ;;  %vm2363_vm11 = vcmp.gt.f32.partialorder %v1900_v17, 0.0  ;;  %v9884_v51 = vld [vmem:[%s15504_s7 + $0x540] ss:$16 sps:$4 sm:$0xff]  }
 0x1a6   : > { %v2493_v62 = vmul.f32 0.2, %v2013_v39  ;;  %v1902_v58 = vadd.f32 %v12131_v10, %v11687_v5  ;;  %v12273_v25 = vpack.c.bf16 %v2606_v47, %v2598_v32  ;;  %4798 = vmatpush2.bf16.msra.mxu0 %v9878_v37  ;;  %vm2355_vm12 = vcmp.gt.f32.partialorder %v1896_v34, 0.0  ;;  %v9889_v5 = vld [vmem:[%s15504_s7 + $0x744] ss:$16 sps:$4 sm:$0xff]  }
 0x1a7   : > { %v12209_v29 = vpop.f32.mrf.mxu0  ;;  %v12221_v8 = vpop.f32.mrf.mxu1  ;;  %15729 = vst [vmem:[#allocation110_spill] sm:$0xff] %v12261_v60  ;;  %v2485_v21 = vmul.f32 0.2, %v2009_v53  ;;  %vm2365_vm13 = vcmp.gt.f32.partialorder %v2013_v39, 0.0  ;;  %v2015_v22 = vadd.f32 %v12139_v7, %v11692_v43  ;;  %4639 = vmatprep.mubr.bf16.mxu0 %v12261_v60  ;;  %4799 = vmatprep.subr.bf16.mxu0 %v9886_v12  ;;  %vm2357_vm14 = vcmp.gt.f32.partialorder %v2009_v53, 0.0 }
 0x1a8   : > { %15730 = vst [vmem:[#allocation111_spill] sm:$0xff] %v12273_v25  ;;  %vm2356_vm15 = vcmp.gt.f32.partialorder %v12250_v33, 0.0  ;;  %4752 = vmatprep.mubr.bf16.mxu1 %v12273_v25  ;;  %4640 = vmatmul.mubr.bf16.gmra.mxu0 %v12235_v11  ;;  %v15731_v2 = vsub.s32 5, %v11038_v38  ;;  %v15732_v7 = vsub.s32 7, %v11038_v38  ;;  %v2484_v63 = vmul.f32 0.2, %v12250_v33 }
 0x1a9   : > { %v12233_v35 = vpop.f32.mrf.mxu0  ;;  %v12244_v50 = vpop.f32.mrf.mxu1  ;;  %vm2358_vm0 = vcmp.gt.f32.partialorder %v12254_v6, 0.0  ;;  %v2486_v47 = vmul.f32 0.2, %v12254_v6  ;;  %v2619_v12 = vsel %vm2363_vm11, %v1900_v17, %v2491_v18  ;;  %4753 = vmatmul.mubr.bf16.gmra.mxu1 %v12246_v26  ;;  %v2621_v32 = vsel %vm2365_vm13, %v2013_v39, %v2493_v62  ;;  %v9895_v39 = vld [vmem:[%s15504_s7 + $0x724] ss:$16 sps:$4 sm:$0xff]  }
 0x1aa   : > { %v12294_v43 = vrot.slane %v11671_v16, %v15731_v2  ;;  %v12299_v9 = vrot.slane %v11671_v16, %v15732_v7  ;;  %v2611_v16 = vsel %vm2355_vm12, %v1896_v34, %v2483_v55  ;;  %v2492_v2 = vmul.f32 0.2, %v1902_v58  ;;  %4911 = vmatpush2.bf16.msra.mxu1 %v9881_v3  ;;  %v9887_v7 = vld [vmem:[%s15504_s7 + $0x740] ss:$16 sps:$4 sm:$0xff]   ;;  %4800 = vmatpush2.bf16.msra.mxu0 %v9884_v51 }
 0x1ab   : > { %v12259_v56 = vpop.f32.mrf.mxu0  ;;  %v12269_v52 = vpop.f32.mrf.mxu1  ;;  %v2056_v38 = vadd.f32 %v12197_v27, %v11938_v49  ;;  %v2613_v17 = vsel %vm2357_vm14, %v2009_v53, %v2485_v21  ;;  %vm2364_vm2 = vcmp.gt.f32.partialorder %v1902_v58, 0.0  ;;  %v2494_v18 = vmul.f32 0.2, %v2015_v22  ;;  %4912 = vmatprep.subr.bf16.mxu1 %v9889_v5  ;;  %4801 = vmatprep.subr.bf16.mxu0 %v9892_v59 }
 0x1ac   : > { %v2169_v34 = vadd.f32 %v12201_v30, %v12013_v19  ;;  %v12330_v3 = vpack.c.bf16 %v2619_v12, %v2611_v16  ;;  %vm2366_vm3 = vcmp.gt.f32.partialorder %v2015_v22, 0.0  ;;  %v2052_v27 = vadd.f32 %v12151_v57, %v11938_v49  ;;  %v9890_v30 = vld [vmem:[%s15504_s7 + $0x520] ss:$16 sps:$4 sm:$0xff]  }
 0x1ad   : > { %v12278_v48 = vpop.f32.mrf.mxu0  ;;  %v12286_v10 = vpop.f32.mrf.mxu1  ;;  %v2165_v53 = vadd.f32 %v12167_v0, %v12013_v19  ;;  %v12341_v51 = vpack.c.bf16 %v2621_v32, %v2613_v17  ;;  %v12345_v21 = vadd.f32 %v12182_v41, %v12294_v43  ;;  %v12349_v5 = vadd.f32 %v12191_v36, %v12299_v9  ;;  %v9898_v0 = vld [vmem:[%s15504_s7 + $0x504] ss:$16 sps:$4 sm:$0xff]  }
 0x1ae   : > { %15733 = vst [vmem:[#allocation112_spill] sm:$0xff] %v12330_v3  ;;  %v12353_v57 = vadd.f32 %v12209_v29, %v12294_v43  ;;  %vm2255_vm4 = vcmp.gt.f32.partialorder %v2056_v38, 0.0  ;;  %v2383_v12 = vmul.f32 0.2, %v2056_v38  ;;  %4913 = vmatpush2.bf16.msra.mxu1 %v9887_v7  ;;  %v2612_v41 = vsel %vm2356_vm15, %v12250_v33, %v2484_v63  ;;  %v9893_v29 = vld [vmem:[%s15504_s7 + $0x720] ss:$16 sps:$4 sm:$0xff]   ;;  %4802 = vmatpush2.bf16.msra.mxu0 %v9890_v30 }
 0x1af   : > { %v12304_v37 = vpop.f32.mrf.mxu0  ;;  %v12311_v45 = vpop.f32.mrf.mxu1  ;;  %15734 = vst [vmem:[#allocation113_spill] sm:$0xff] %v12341_v51  ;;  %v2620_v36 = vsel %vm2364_vm2, %v1902_v58, %v2492_v2  ;;  %v2385_v32 = vmul.f32 0.2, %v2169_v34  ;;  %v2614_v26 = vsel %vm2358_vm0, %v12254_v6, %v2486_v47  ;;  %v2622_v7 = vsel %vm2366_vm3, %v2015_v22, %v2494_v18  ;;  %4914 = vmatprep.subr.bf16.mxu1 %v9895_v39  ;;  %v9896_v33 = vld [vmem:[%s15504_s7 + $0x500] ss:$16 sps:$4 sm:$0xff]  }
 0x1b0   : > { %v12369_v17 = vpack.c.bf16 %v2620_v36, %v2612_v41  ;;  %v9901_v58 = vld [vmem:[%s15504_s7 + $0x704] ss:$16 sps:$4 sm:$0xff]   ;;  %v2375_v2 = vmul.f32 0.2, %v2052_v27  ;;  %v2377_v41 = vmul.f32 0.2, %v2165_v53  ;;  %v12383_v36 = vpack.c.bf16 %v2622_v7, %v2614_v26  ;;  %4803 = vmatprep.subr.bf16.mxu0 %v9898_v0 }
 0x1b1   : > { %v12320_v11 = vpop.f32.mrf.mxu0  ;;  %v12328_v55 = vpop.f32.mrf.mxu1  ;;  %vm2257_vm5 = vcmp.gt.f32.partialorder %v2169_v34, 0.0  ;;  %vm2247_vm6 = vcmp.gt.f32.partialorder %v2052_v27, 0.0  ;;  %vm2249_vm7 = vcmp.gt.f32.partialorder %v2165_v53, 0.0  ;;  %vm2248_vm1 = vcmp.gt.f32.partialorder %v12345_v21, 0.0  ;;  %v9904_v47 = vld [vmem:[%s15504_s7 + $0xec] ss:$16 sps:$4 sm:$0xff]  }
 0x1b2   : > { %15735 = vst [vmem:[#allocation114_spill] sm:$0xff] %v12369_v17  ;;  %15736 = vst [vmem:[#allocation115_spill] sm:$0xff] %v12383_v36  ;;  %v2171_v22 = vadd.f32 %v12221_v8, %v12299_v9  ;;  %4649 = vmatprep.mubr.bf16.mxu0 %v12369_v17  ;;  %v2376_v26 = vmul.f32 0.2, %v12345_v21  ;;  %v2511_v39 = vsel %vm2255_vm4, %v2056_v38, %v2383_v12  ;;  %v2384_v30 = vmul.f32 0.2, %v12353_v57 }
 0x1b3   : > { %v12339_v62 = vpop.f32.mrf.mxu0  ;;  %v12358_v59 = vpop.f32.mrf.mxu1  ;;  %4762 = vmatprep.mubr.bf16.mxu1 %v12383_v36  ;;  %4650 = vmatmul.mubr.bf16.gmra.mxu0 %v12330_v3  ;;  %v2066_v8 = vadd.f32 %v12278_v48, %v11938_v49  ;;  %vm2250_vm8 = vcmp.gt.f32.partialorder %v12349_v5, 0.0  ;;  %v2513_v7 = vsel %vm2257_vm5, %v2169_v34, %v2385_v32  ;;  %vm2256_vm9 = vcmp.gt.f32.partialorder %v12353_v57, 0.0  ;;  %v9899_v34 = vld [vmem:[%s15504_s7 + $0x700] ss:$16 sps:$4 sm:$0xff]  }
 0x1b4   : > { %4763 = vmatmul.mubr.bf16.gmra.mxu1 %v12341_v51  ;;  %v2179_v38 = vadd.f32 %v12286_v10, %v12013_v19  ;;  %v2503_v3 = vsel %vm2247_vm6, %v2052_v27, %v2375_v2  ;;  %v2505_v36 = vsel %vm2249_vm7, %v2165_v53, %v2377_v41  ;;  %v2378_v48 = vmul.f32 0.2, %v12349_v5  ;;  %4804 = vmatpush2.bf16.msra.mxu0 %v9896_v33 }
 0x1b5   : > { %v12367_v16 = vpop.f32.mrf.mxu0  ;;  %v12381_v63 = vpop.f32.mrf.mxu1  ;;  %v2062_v17 = vadd.f32 %v12233_v35, %v11938_v49  ;;  %4915 = vmatpush2.bf16.msra.mxu1 %v9893_v29  ;;  %v12423_v10 = vpack.c.bf16 %v2511_v39, %v2503_v3  ;;  %vm2258_vm10 = vcmp.gt.f32.partialorder %v2171_v22, 0.0  ;;  %v2386_v51 = vmul.f32 0.2, %v2171_v22  ;;  %4999 = vmatprep.subr.bf16.mxu0 %v9904_v47  ;;  %v9907_v35 = vld [vmem:[%s15504_s7 + $0x2ec] ss:$16 sps:$4 sm:$0xff]  }
 0x1b6   : > { %v2175_v27 = vadd.f32 %v12244_v50, %v12013_v19  ;;  %4916 = vmatprep.subr.bf16.mxu1 %v9901_v58  ;;  %v12432_v29 = vpack.c.bf16 %v2513_v7, %v2505_v36  ;;  %v12436_v33 = vadd.f32 %v12259_v56, %v12294_v43  ;;  %v2399_v3 = vmul.f32 0.2, %v2066_v8 }
 0x1b7   : > { %v12385_v6 = vpop.f32.mrf.mxu0  ;;  %v12394_v18 = vpop.f32.mrf.mxu1  ;;  %15737 = vst [vmem:[#allocation116_spill] sm:$0xff] %v12423_v10  ;;  %v2512_v2 = vsel %vm2256_vm9, %v12353_v57, %v2384_v30  ;;  %vm2271_vm11 = vcmp.gt.f32.partialorder %v2066_v8, 0.0  ;;  %v2401_v58 = vmul.f32 0.2, %v2179_v38  ;;  %v2068_v41 = vadd.f32 %v12304_v37, %v12294_v43  ;;  %v9902_v30 = vld [vmem:[%s15504_s7 + $0xe8] ss:$16 sps:$4 sm:$0xff]  }
 0x1b8   : > { %15738 = vst [vmem:[#allocation117_spill] sm:$0xff] %v12432_v29  ;;  %v2504_v36 = vsel %vm2248_vm1, %v12345_v21, %v2376_v26  ;;  %v2391_v56 = vmul.f32 0.2, %v2062_v17  ;;  %v12452_v39 = vadd.f32 %v12269_v52, %v12299_v9  ;;  %vm2273_vm12 = vcmp.gt.f32.partialorder %v2179_v38, 0.0  ;;  %v9910_v52 = vld [vmem:[%s15504_s7 + $0xcc] ss:$16 sps:$4 sm:$0xff]  }
 0x1b9   : > { %v12403_v0 = vpop.f32.mrf.mxu0  ;;  %v12411_v12 = vpop.f32.mrf.mxu1  ;;  %4917 = vmatpush2.bf16.msra.mxu1 %v9899_v34  ;;  %v12454_v57 = vpack.c.bf16 %v2512_v2, %v2504_v36  ;;  %vm2263_vm13 = vcmp.gt.f32.partialorder %v2062_v17, 0.0  ;;  %v2393_v7 = vmul.f32 0.2, %v2175_v27  ;;  %v2506_v21 = vsel %vm2250_vm8, %v12349_v5, %v2378_v48  ;;  %v9913_v5 = vld [vmem:[%s15504_s7 + $0x2cc] ss:$16 sps:$4 sm:$0xff]  }
 0x1ba   : > { %v2514_v26 = vsel %vm2258_vm10, %v2171_v22, %v2386_v51  ;;  %5112 = vmatprep.subr.bf16.mxu1 %v9907_v35  ;;  %vm2265_vm14 = vcmp.gt.f32.partialorder %v2175_v27, 0.0  ;;  %v2527_v2 = vsel %vm2271_vm11, %v2066_v8, %v2399_v3  ;;  %v2181_v36 = vadd.f32 %v12311_v45, %v12299_v9  ;;  %v9905_v51 = vld [vmem:[%s15504_s7 + $0x2e8] ss:$16 sps:$4 sm:$0xff]  }
 0x1bb   : > { %v12421_v32 = vpop.f32.mrf.mxu0  ;;  %v12430_v53 = vpop.f32.mrf.mxu1  ;;  %15739 = vst [vmem:[#allocation118_spill] sm:$0xff] %v12454_v57  ;;  %4805 = vmatprep.mubr.bf16.mxu0 %v12454_v57  ;;  %v12474_v25 = vpack.c.bf16 %v2514_v26, %v2506_v21  ;;  %vm2264_vm15 = vcmp.gt.f32.partialorder %v12436_v33, 0.0  ;;  %v2392_v8 = vmul.f32 0.2, %v12436_v33  ;;  %v2529_v45 = vsel %vm2273_vm12, %v2179_v38, %v2401_v58  ;;  %v9908_v21 = vld [vmem:[%s15504_s7 + $0xc8] ss:$16 sps:$4 sm:$0xff]  }
 0x1bc   : > { %v2400_v48 = vmul.f32 0.2, %v2068_v41  ;;  %4806 = vmatmul.mubr.bf16.vlgmr.msra.gmra.mxu0 %v12423_v10  ;;  %v2519_v3 = vsel %vm2263_vm13, %v2062_v17, %v2391_v56  ;;  %vm2266_vm0 = vcmp.gt.f32.partialorder %v12452_v39, 0.0  ;;  %vm2272_vm2 = vcmp.gt.f32.partialorder %v2068_v41, 0.0 }
 0x1bd   : > { %v12441_v50 = vpop.f32.mrf.mxu0  ;;  %v12448_v47 = vpop.f32.mrf.mxu1  ;;  %15740 = vst [vmem:[#allocation119_spill] sm:$0xff] %v12474_v25  ;;  %4918 = vmatprep.mubr.bf16.mxu1 %v12474_v25  ;;  %5000 = vmatpush1.bf16.msra.mxu0 %v9902_v30  ;;  %v2076_v38 = vadd.f32 %v12367_v16, %v11938_v49  ;;  %v2521_v26 = vsel %vm2265_vm14, %v2175_v27, %v2393_v7  ;;  %v2394_v10 = vmul.f32 0.2, %v12452_v39  ;;  %v9916_v30 = vld [vmem:[%s15504_s7 + $0xac] ss:$16 sps:$4 sm:$0xff]   ;;  %vm2274_vm3 = vcmp.gt.f32.partialorder %v2181_v36, 0.0 }
 0x1be   : > { %v12502_v17 = vpack.c.bf16 %v2527_v2, %v2519_v3  ;;  %4919 = vmatmul.mubr.bf16.vlgmr.msra.gmra.mxu1 %v12432_v29  ;;  %v2072_v56 = vadd.f32 %v12320_v11, %v11938_v49  ;;  %5001 = vmatprep.subr.bf16.mxu0 %v9910_v52  ;;  %v12512_v16 = vpack.c.bf16 %v2529_v45, %v2521_v26  ;;  %v2402_v27 = vmul.f32 0.2, %v2181_v36  ;;  %v9911_v2 = vld [vmem:[%s15504_s7 + $0x2c8] ss:$16 sps:$4 sm:$0xff]  }
 0x1bf   : > { %v12459_v37 = vpop.f32.mrf.mxu0  ;;  %v12468_v34 = vpop.f32.mrf.mxu1  ;;  %v2185_v7 = vadd.f32 %v12328_v55, %v12013_v19  ;;  %5113 = vmatpush1.bf16.msra.mxu1 %v9905_v51  ;;  %v12523_v52 = vadd.f32 %v12339_v62, %v12294_v43  ;;  %v12527_v45 = vadd.f32 %v12358_v59, %v12299_v9  ;;  %v2189_v3 = vadd.f32 %v12381_v63, %v12013_v19  ;;  %v9919_v51 = vld [vmem:[%s15504_s7 + $0x2ac] ss:$16 sps:$4 sm:$0xff]  }
 0x1c0   : > { %15741 = vst [vmem:[#allocation120_spill] sm:$0xff] %v12502_v17  ;;  %5114 = vmatprep.subr.bf16.mxu1 %v9913_v5  ;;  %v2528_v55 = vsel %vm2272_vm2, %v2068_v41, %v2400_v48  ;;  %v2415_v29 = vmul.f32 0.2, %v2076_v38  ;;  %v2078_v62 = vadd.f32 %v12385_v6, %v12294_v43  ;;  %v2191_v59 = vadd.f32 %v12394_v18, %v12299_v9  ;;  %v9914_v41 = vld [vmem:[%s15504_s7 + $0xa8] ss:$16 sps:$4 sm:$0xff]  }
 0x1c1   : > { %v12482_v22 = vpop.f32.mrf.mxu0  ;;  %v12488_v35 = vpop.f32.mrf.mxu1  ;;  %5002 = vmatpush1.bf16.msra.mxu0 %v9908_v21  ;;  %v2520_v63 = vsel %vm2264_vm15, %v12436_v33, %v2392_v8  ;;  %vm2279_vm4 = vcmp.gt.f32.partialorder %v2072_v56, 0.0  ;;  %v2407_v48 = vmul.f32 0.2, %v2072_v56  ;;  %vm2287_vm5 = vcmp.gt.f32.partialorder %v2076_v38, 0.0  ;;  %v9917_v6 = vld [vmem:[%s15504_s7 + $0x2a8] ss:$16 sps:$4 sm:$0xff]  }
 0x1c2   : > { %v12549_v21 = vpack.c.bf16 %v2528_v55, %v2520_v63  ;;  %5003 = vmatprep.subr.bf16.mxu0 %v9916_v30  ;;  %v9922_v18 = vld [vmem:[%s15504_s7 + $0x8c] ss:$16 sps:$4 sm:$0xff]   ;;  %vm2281_vm6 = vcmp.gt.f32.partialorder %v2185_v7, 0.0  ;;  %v2409_v8 = vmul.f32 0.2, %v2185_v7  ;;  %v2522_v57 = vsel %vm2266_vm0, %v12452_v39, %v2394_v10 }
 0x1c3   : > { %v12498_v58 = vpop.f32.mrf.mxu0  ;;  %v12510_v25 = vpop.f32.mrf.mxu1  ;;  %5115 = vmatpush1.bf16.msra.mxu1 %v9911_v2  ;;  %v2530_v55 = vsel %vm2274_vm3, %v2181_v36, %v2402_v27  ;;  %v9925_v30 = vld [vmem:[%s15504_s7 + $0x28c] ss:$16 sps:$4 sm:$0xff]   ;;  %vm2280_vm7 = vcmp.gt.f32.partialorder %v12523_v52, 0.0  ;;  %v2408_v61 = vmul.f32 0.2, %v12523_v52  ;;  %v2543_v10 = vsel %vm2287_vm5, %v2076_v38, %v2415_v29 }
 0x1c4   : > { %15742 = vst [vmem:[#allocation121_spill] sm:$0xff] %v12549_v21  ;;  %v2417_v60 = vmul.f32 0.2, %v2189_v3  ;;  %4815 = vmatprep.mubr.bf16.mxu0 %v12549_v21  ;;  %v12571_v2 = vpack.c.bf16 %v2530_v55, %v2522_v57  ;;  %5116 = vmatprep.subr.bf16.mxu1 %v9919_v51  ;;  %vm2289_vm1 = vcmp.gt.f32.partialorder %v2189_v3, 0.0  ;;  %v2416_v39 = vmul.f32 0.2, %v2078_v62 }
 0x1c5   : > { %v12519_v11 = vpop.f32.mrf.mxu0  ;;  %v12535_v26 = vpop.f32.mrf.mxu1  ;;  %v2418_v36 = vmul.f32 0.2, %v2191_v59  ;;  %4816 = vmatmul.mubr.bf16.gmra.mxu0 %v12502_v17  ;;  %vm2288_vm8 = vcmp.gt.f32.partialorder %v2078_v62, 0.0  ;;  %vm2290_vm9 = vcmp.gt.f32.partialorder %v2191_v59, 0.0  ;;  %v2082_v57 = vadd.f32 %v12403_v0, %v11938_v49  ;;  %v9920_v51 = vld [vmem:[%s15504_s7 + $0x88] ss:$16 sps:$4 sm:$0xff]  }
 0x1c6   : > { %15743 = vst [vmem:[#allocation122_spill] sm:$0xff] %v12571_v2  ;;  %4928 = vmatprep.mubr.bf16.mxu1 %v12571_v2  ;;  %5004 = vmatpush1.bf16.msra.mxu0 %v9914_v41  ;;  %v2086_v29 = vadd.f32 %v12441_v50, %v11938_v49  ;;  %v2535_v55 = vsel %vm2279_vm4, %v2072_v56, %v2407_v48  ;;  %vm2282_vm10 = vcmp.gt.f32.partialorder %v12527_v45, 0.0  ;;  %v2410_v2 = vmul.f32 0.2, %v12527_v45  ;;  %v9928_v0 = vld [vmem:[%s15504_s7 + $0x6c] ss:$16 sps:$4 sm:$0xff]  }
 0x1c7   : > { %v12547_v5 = vpop.f32.mrf.mxu0  ;;  %v12557_v33 = vpop.f32.mrf.mxu1  ;;  %v2537_v17 = vsel %vm2281_vm6, %v2185_v7, %v2409_v8  ;;  %4929 = vmatmul.mubr.bf16.gmra.mxu1 %v12512_v16  ;;  %5005 = vmatprep.subr.bf16.mxu0 %v9922_v18  ;;  %v12599_v50 = vpack.c.bf16 %v2543_v10, %v2535_v55  ;;  %v2545_v21 = vsel %vm2289_vm1, %v2189_v3, %v2417_v60  ;;  %v9923_v7 = vld [vmem:[%s15504_s7 + $0x288] ss:$16 sps:$4 sm:$0xff]   ;;  %vm2295_vm12 = vcmp.gt.f32.partialorder %v2082_v57, 0.0  ;;  %v9934_v55 = vld [vmem:[%s15504_s7 + $0x4c] ss:$16 sps:$4 sm:$0xff]  }
 0x1c8   : > { %v2195_v56 = vadd.f32 %v12411_v12, %v12013_v19  ;;  %5117 = vmatpush1.bf16.msra.mxu1 %v9917_v6  ;;  %v2199_v48 = vadd.f32 %v12448_v47, %v12013_v19  ;;  %v12613_v8 = vadd.f32 %v12421_v32, %v12294_v43  ;;  %v12617_v60 = vadd.f32 %v12430_v53, %v12299_v9  ;;  %v9931_v6 = vld [vmem:[%s15504_s7 + $0x26c] ss:$16 sps:$4 sm:$0xff]  }
 0x1c9   : > { %v12566_v63 = vpop.f32.mrf.mxu0  ;;  %v12573_v54 = vpop.f32.mrf.mxu1  ;;  %5118 = vmatprep.subr.bf16.mxu1 %v9925_v30  ;;  %v2544_v12 = vsel %vm2288_vm8, %v2078_v62, %v2416_v39  ;;  %v2546_v3 = vsel %vm2290_vm9, %v2191_v59, %v2418_v36  ;;  %v2423_v47 = vmul.f32 0.2, %v2082_v57  ;;  %v2431_v10 = vmul.f32 0.2, %v2086_v29  ;;  %v9926_v62 = vld [vmem:[%s15504_s7 + $0x68] ss:$16 sps:$4 sm:$0xff]  }
 0x1ca   : > { %5006 = vmatpush1.bf16.msra.mxu0 %v9920_v51  ;;  %v2088_v32 = vadd.f32 %v12459_v37, %v12294_v43  ;;  %v2536_v53 = vsel %vm2280_vm7, %v12523_v52, %v2408_v61  ;;  %vm2303_vm11 = vcmp.gt.f32.partialorder %v2086_v29, 0.0  ;;  %v2433_v39 = vmul.f32 0.2, %v2199_v48  ;;  %v9929_v61 = vld [vmem:[%s15504_s7 + $0x268] ss:$16 sps:$4 sm:$0xff]  }
 0x1cb   : > { %v12577_v27 = vpop.f32.mrf.mxu0  ;;  %v12587_v38 = vpop.f32.mrf.mxu1  ;;  %v12636_v36 = vpack.c.bf16 %v2544_v12, %v2536_v53  ;;  %v2538_v37 = vsel %vm2282_vm10, %v12527_v45, %v2410_v2  ;;  %5007 = vmatprep.subr.bf16.mxu0 %v9928_v0  ;;  %v2425_v52 = vmul.f32 0.2, %v2195_v56  ;;  %vm2305_vm13 = vcmp.gt.f32.partialorder %v2199_v48, 0.0  ;;  %v9937_v2 = vld [vmem:[%s15504_s7 + $0x24c] ss:$16 sps:$4 sm:$0xff]  }
 0x1cc   : > { %5119 = vmatpush1.bf16.msra.mxu1 %v9923_v7  ;;  %v12644_v51 = vpack.c.bf16 %v2546_v3, %v2538_v37  ;;  %v12649_v12 = vpack.c.bf16 %v2545_v21, %v2537_v17  ;;  %vm2297_vm14 = vcmp.gt.f32.partialorder %v2195_v56, 0.0  ;;  %v2201_v45 = vadd.f32 %v12468_v34, %v12299_v9 }
 0x1cd   : > { %v12597_v41 = vpop.f32.mrf.mxu0  ;;  %v12609_v18 = vpop.f32.mrf.mxu1  ;;  %4825 = vmatprep.mubr.bf16.mxu0 %v12636_v36  ;;  %5120 = vmatprep.subr.bf16.mxu1 %v9931_v6  ;;  %vm2296_vm15 = vcmp.gt.f32.partialorder %v12613_v8, 0.0  ;;  %v2424_v0 = vmul.f32 0.2, %v12613_v8  ;;  %v2559_v7 = vsel %vm2303_vm11, %v2086_v29, %v2431_v10  ;;  %v2432_v3 = vmul.f32 0.2, %v2088_v32 }
 0x1ce   : > { %4938 = vmatprep.mubr.bf16.mxu1 %v12644_v51  ;;  %4826 = vmatmul.mubr.bf16.gmra.mxu0 %v12599_v50  ;;  %v2551_v21 = vsel %vm2295_vm12, %v2082_v57, %v2423_v47  ;;  %vm2298_vm0 = vcmp.gt.f32.partialorder %v12617_v60, 0.0  ;;  %v2561_v6 = vsel %vm2305_vm13, %v2199_v48, %v2433_v39  ;;  %vm2304_vm2 = vcmp.gt.f32.partialorder %v2088_v32, 0.0  ;;  %v9932_v29 = vld [vmem:[%s15504_s7 + $0x48] ss:$16 sps:$4 sm:$0xff]   ;;  %v9940_v47 = vld [vmem:[%s15504_s7 + $0x2c] ss:$16 sps:$4 sm:$0xff]  }
 0x1cf   : > { %v12632_v30 = vpop.f32.mrf.mxu0  ;;  %v12634_v59 = vpop.f32.mrf.mxu1  ;;  %4939 = vmatmul.mubr.bf16.gmra.mxu1 %v12649_v12  ;;  %5008 = vmatpush1.bf16.msra.mxu0 %v9926_v62  ;;  %v2553_v10 = vsel %vm2297_vm14, %v2195_v56, %v2425_v52  ;;  %v2426_v53 = vmul.f32 0.2, %v12617_v60  ;;  %v2092_v37 = vadd.f32 %v12482_v22, %v11938_v49  ;;  %v9935_v57 = vld [vmem:[%s15504_s7 + $0x248] ss:$16 sps:$4 sm:$0xff]   ;;  %v2096_v48 = vadd.f32 %v12519_v11, %v11938_v49  ;;  %v9943_v39 = vld [vmem:[%s15504_s7 + $0x22c] ss:$16 sps:$4 sm:$0xff]  }
 0x1d0   : > { %5121 = vmatpush1.bf16.msra.mxu1 %v9929_v61  ;;  %5009 = vmatprep.subr.bf16.mxu0 %v9934_v55  ;;  %v12685_v62 = vpack.c.bf16 %v2559_v7, %v2551_v21  ;;  %vm2306_vm3 = vcmp.gt.f32.partialorder %v2201_v45, 0.0  ;;  %v2434_v56 = vmul.f32 0.2, %v2201_v45  ;;  %v2209_v22 = vadd.f32 %v12535_v26, %v12013_v19 }
 0x1d1   : > { %v12662_v17 = vpop.f32.mrf.mxu0  ;;  %v12664_v34 = vpop.f32.mrf.mxu1  ;;  %5122 = vmatprep.subr.bf16.mxu1 %v9937_v2  ;;  %v12692_v61 = vpack.c.bf16 %v2561_v6, %v2553_v10  ;;  %v2205_v11 = vadd.f32 %v12488_v35, %v12013_v19  ;;  %v12698_v52 = vadd.f32 %v12498_v58, %v12294_v43  ;;  %v2560_v55 = vsel %vm2304_vm2, %v2088_v32, %v2432_v3 }
 0x1d2   : > { %v12707_v26 = vadd.f32 %v12510_v25, %v12299_v9  ;;  %v2447_v21 = vmul.f32 0.2, %v2096_v48  ;;  %v2098_v6 = vadd.f32 %v12547_v5, %v12294_v43  ;;  %v2552_v35 = vsel %vm2296_vm15, %v12613_v8, %v2424_v0  ;;  %v9938_v25 = vld [vmem:[%s15504_s7 + $0x28] ss:$16 sps:$4 sm:$0xff]   ;;  %v9946_v8 = vld [vmem:[%s15504_s7 + $0xc] ss:$16 sps:$4 sm:$0xff]  }
 0x1d3   : > { %15744 = vst [vmem:[#allocation123_spill] sm:$0xff] %v12692_v61  ;;  %v12701_v7 = vpop.f32.mrf.mxu0  ;;  %v12703_v2 = vpop.f32.mrf.mxu1  ;;  %5010 = vmatpush1.bf16.msra.mxu0 %v9932_v29  ;;  %vm2311_vm4 = vcmp.gt.f32.partialorder %v2092_v37, 0.0  ;;  %vm2319_vm5 = vcmp.gt.f32.partialorder %v2096_v48, 0.0  ;;  %v2449_v58 = vmul.f32 0.2, %v2209_v22  ;;  %v12714_v32 = vpack.c.bf16 %v2560_v55, %v2552_v35 }
 0x1d4   : > { %5123 = vmatpush1.bf16.msra.mxu1 %v9935_v57  ;;  %5011 = vmatprep.subr.bf16.mxu0 %v9940_v47  ;;  %v2439_v3 = vmul.f32 0.2, %v2092_v37  ;;  %vm2321_vm6 = vcmp.gt.f32.partialorder %v2209_v22, 0.0  ;;  %v2554_v5 = vsel %vm2298_vm0, %v12617_v60, %v2426_v53  ;;  %v2562_v29 = vsel %vm2306_vm3, %v2201_v45, %v2434_v56  ;;  %v9941_v60 = vld [vmem:[%s15504_s7 + $0x228] ss:$16 sps:$4 sm:$0xff]  }
 0x1d5   : > { %5124 = vmatprep.subr.bf16.mxu1 %v9943_v39  ;;  %vm2313_vm7 = vcmp.gt.f32.partialorder %v2205_v11, 0.0  ;;  %v2441_v0 = vmul.f32 0.2, %v2205_v11  ;;  %v2211_v10 = vadd.f32 %v12557_v33, %v12299_v9  ;;  %4835 = vmatprep.mubr.bf16.mxu0 %v12714_v32  ;;  %v12729_v57 = vpack.c.bf16 %v2562_v29, %v2554_v5  ;;  %v12734_v53 = vpop.f32.mrf.mxu0  ;;  %v12736_v45 = vpop.f32.mrf.mxu1  ;;  %v9949_v33 = vld [vmem:[%s15504_s7 + $0x20c] ss:$16 sps:$4 sm:$0xff]  }
 0x1d6   : > { %vm2312_vm1 = vcmp.gt.f32.partialorder %v12698_v52, 0.0  ;;  %v2575_v47 = vsel %vm2319_vm5, %v2096_v48, %v2447_v21  ;;  %v2448_v56 = vmul.f32 0.2, %v2098_v6  ;;  %4836 = vmatmul.mubr.bf16.gmra.mxu0 %v12685_v62  ;;  %v2106_v39 = vadd.f32 %v12597_v41, %v11938_v49  ;;  %v9944_v21 = vld [vmem:[%s15504_s7 + $0x8] ss:$16 sps:$4 sm:$0xff]  }
 0x1d7   : > { %v2440_v55 = vmul.f32 0.2, %v12698_v52  ;;  %v2577_v35 = vsel %vm2321_vm6, %v2209_v22, %v2449_v58  ;;  %vm2320_vm8 = vcmp.gt.f32.partialorder %v2098_v6, 0.0  ;;  %4948 = vmatprep.mubr.bf16.mxu1 %v12729_v57  ;;  %v2102_v48 = vadd.f32 %v12566_v63, %v11938_v49  ;;  %5012 = vmatpush1.bf16.msra.mxu0 %v9938_v25  ;;  %v9952_v63 = vld [vmem:[%s15504_s7 + $0x1ec] ss:$16 sps:$4 sm:$0xff]   ;;  %v12769_v29 = vpop.f32.mrf.mxu0 }
 0x1d8   : > { %v2567_v5 = vsel %vm2311_vm4, %v2092_v37, %v2439_v3  ;;  %vm2314_vm9 = vcmp.gt.f32.partialorder %v12707_v26, 0.0  ;;  %v2442_v41 = vmul.f32 0.2, %v12707_v26  ;;  %4949 = vmatmul.mubr.bf16.gmra.mxu1 %v12692_v61  ;;  %v2215_v22 = vadd.f32 %v12573_v54, %v12013_v19  ;;  %5013 = vmatprep.subr.bf16.mxu0 %v9946_v8  ;;  %v9947_v3 = vld [vmem:[%s15504_s7 + $0x208] ss:$16 sps:$4 sm:$0xff]   ;;  %v12771_v61 = vpop.f32.mrf.mxu1 }
 0x1d9   : > { %v2569_v58 = vsel %vm2313_vm7, %v2205_v11, %v2441_v0  ;;  %v12764_v25 = vpack.c.bf16 %v2575_v47, %v2567_v5  ;;  %vm2322_vm10 = vcmp.gt.f32.partialorder %v2211_v10, 0.0  ;;  %v2450_v37 = vmul.f32 0.2, %v2211_v10  ;;  %5125 = vmatpush1.bf16.msra.mxu1 %v9941_v60  ;;  %v9955_v60 = vld [vmem:[%s15504_s7 + $0x3ec] ss:$16 sps:$4 sm:$0xff]  }
 0x1da   : > { %v12773_v54 = vpack.c.bf16 %v2577_v35, %v2569_v58  ;;  %v12777_v8 = vadd.f32 %v12577_v27, %v12294_v43  ;;  %5126 = vmatprep.subr.bf16.mxu1 %v9949_v33  ;;  %v2463_v11 = vmul.f32 0.2, %v2106_v39  ;;  %v2576_v0 = vsel %vm2320_vm8, %v2098_v6, %v2448_v56  ;;  %v9950_v27 = vld [vmem:[%s15504_s7 + $0x1e8] ss:$16 sps:$4 sm:$0xff]   ;;  %v9958_v58 = vld [vmem:[%s15504_s7 + $0x1cc] ss:$16 sps:$4 sm:$0xff]  }
 0x1db   : > { %15745 = vst [vmem:[#allocation124_spill] sm:$0xff] %v12764_v25  ;;  %vm2327_vm11 = vcmp.gt.f32.partialorder %v2102_v48, 0.0  ;;  %vm2335_vm12 = vcmp.gt.f32.partialorder %v2106_v39, 0.0  ;;  %v2219_v47 = vadd.f32 %v12609_v18, %v12013_v19  ;;  %5014 = vmatpush1.bf16.msra.mxu0 %v9944_v21  ;;  %v2108_v35 = vadd.f32 %v12632_v30, %v12294_v43 }
 0x1dc   : > { %15746 = vst [vmem:[#allocation125_spill] sm:$0xff] %v12773_v54  ;;  %v2455_v33 = vmul.f32 0.2, %v2102_v48  ;;  %vm2329_vm13 = vcmp.gt.f32.partialorder %v2215_v22, 0.0  ;;  %v12792_v6 = vadd.f32 %v12587_v38, %v12299_v9  ;;  %v2568_v56 = vsel %vm2312_vm1, %v12698_v52, %v2440_v55  ;;  %5015 = vmatprep.subr.bf16.mxu0 %v9952_v63  ;;  %v9953_v38 = vld [vmem:[%s15504_s7 + $0x3e8] ss:$16 sps:$4 sm:$0xff]   ;;  %v12809_v52 = vpop.f32.mrf.mxu0  ;;  %v12811_v55 = vpop.f32.mrf.mxu1 }
 0x1dd   : > { %v2457_v18 = vmul.f32 0.2, %v2215_v22  ;;  %5127 = vmatpush1.bf16.msra.mxu1 %v9947_v3  ;;  %v12797_v21 = vpack.c.bf16 %v2576_v0, %v2568_v56  ;;  %v2570_v30 = vsel %vm2314_vm9, %v12707_v26, %v2442_v41  ;;  %v2578_v5 = vsel %vm2322_vm10, %v2211_v10, %v2450_v37  ;;  %v9956_v41 = vld [vmem:[%s15504_s7 + $0x1c8] ss:$16 sps:$4 sm:$0xff]   ;;  %v9961_v37 = vld [vmem:[%s15504_s7 + $0x3cc] ss:$16 sps:$4 sm:$0xff]  }
 0x1de   : > { %vm2328_vm14 = vcmp.gt.f32.partialorder %v12777_v8, 0.0  ;;  %v2591_v63 = vsel %vm2335_vm12, %v2106_v39, %v2463_v11  ;;  %v2221_v26 = vadd.f32 %v12634_v59, %v12299_v9  ;;  %v12817_v10 = vpack.c.bf16 %v2578_v5, %v2570_v30  ;;  %5128 = vmatprep.subr.bf16.mxu1 %v9955_v60  ;;  %v9964_v60 = vld [vmem:[%s15504_s7 + $0x1ac] ss:$16 sps:$4 sm:$0xff]  }
 0x1df   : > { %v2456_v3 = vmul.f32 0.2, %v12777_v8  ;;  %v2465_v0 = vmul.f32 0.2, %v2219_v47  ;;  %v2464_v56 = vmul.f32 0.2, %v2108_v35  ;;  %4845 = vmatprep.mubr.bf16.mxu0 %v12797_v21  ;;  %v12829_v59 = vadd.f32 %v12662_v17, %v11938_v49  ;;  %5016 = vmatpush2.bf16.msra.mxu0 %v9950_v27  ;;  %v2123_v27 = vpop.f32.mrf.mxu0 }
 0x1e0   : > { %15747 = vst [vmem:[#allocation126_spill] sm:$0xff] %v12817_v10  ;;  %v2583_v39 = vsel %vm2327_vm11, %v2102_v48, %v2455_v33  ;;  %vm2337_vm15 = vcmp.gt.f32.partialorder %v2219_v47, 0.0  ;;  %vm2336_vm0 = vcmp.gt.f32.partialorder %v2108_v35, 0.0  ;;  %4958 = vmatprep.mubr.bf16.mxu1 %v12817_v10  ;;  %4846 = vmatmul.mubr.bf16.gmra.mxu0 %v12764_v25  ;;  %v2116_v11 = vadd.f32 %v12734_v53, %v11938_v49  ;;  %v2236_v33 = vpop.f32.mrf.mxu1 }
 0x1e1   : > { %v2585_v30 = vsel %vm2329_vm13, %v2215_v22, %v2457_v18  ;;  %vm2330_vm2 = vcmp.gt.f32.partialorder %v12792_v6, 0.0  ;;  %v2458_v17 = vmul.f32 0.2, %v12792_v6  ;;  %v12842_v48 = vpack.c.bf16 %v2591_v63, %v2583_v39  ;;  %4959 = vmatmul.mubr.bf16.gmra.mxu1 %v12773_v54  ;;  %5017 = vmatprep.subr.bf16.mxu0 %v9958_v58  ;;  %v9959_v22 = vld [vmem:[%s15504_s7 + $0x3c8] ss:$16 sps:$4 sm:$0xff]  }
 0x1e2   : > { %vm2338_vm3 = vcmp.gt.f32.partialorder %v2221_v26, 0.0  ;;  %v2466_v5 = vmul.f32 0.2, %v2221_v26  ;;  %v2225_v53 = vadd.f32 %v12664_v34, %v12013_v19  ;;  %5129 = vmatpush2.bf16.msra.mxu1 %v9953_v38  ;;  %v2229_v18 = vadd.f32 %v12736_v45, %v12013_v19  ;;  %v9962_v38 = vld [vmem:[%s15504_s7 + $0x1a8] ss:$16 sps:$4 sm:$0xff]  }
 0x1e3   : > { %v2593_v63 = vsel %vm2337_vm15, %v2219_v47, %v2465_v0  ;;  %vm2343_vm4 = vcmp.gt.f32.partialorder %v12829_v59, 0.0  ;;  %v12856_v58 = vadd.f32 %v12701_v7, %v12294_v43  ;;  %5130 = vmatprep.subr.bf16.mxu1 %v9961_v37  ;;  %5018 = vmatpush2.bf16.msra.mxu0 %v9956_v41  ;;  %v2592_v34 = vsel %vm2336_vm0, %v2108_v35, %v2464_v56  ;;  %v9967_v45 = vld [vmem:[%s15504_s7 + $0x3ac] ss:$16 sps:$4 sm:$0xff]   ;;  %v2125_v37 = vpop.f32.mrf.mxu0  ;;  %v2238_v56 = vpop.f32.mrf.mxu1 }
 0x1e4   : > { %v2471_v47 = vmul.f32 0.2, %v12829_v59  ;;  %v12868_v0 = vadd.f32 %v12703_v2, %v12299_v9  ;;  %v2479_v7 = vmul.f32 0.2, %v2116_v11  ;;  %v2481_v39 = vmul.f32 0.2, %v2229_v18  ;;  %5019 = vmatprep.subr.bf16.mxu0 %v9964_v60 }
 0x1e5   : > { %vm2351_vm5 = vcmp.gt.f32.partialorder %v2116_v11, 0.0  ;;  %vm2353_vm6 = vcmp.gt.f32.partialorder %v2229_v18, 0.0  ;;  %v2118_v35 = vadd.f32 %v12769_v29, %v12294_v43  ;;  %v2584_v41 = vsel %vm2328_vm14, %v12777_v8, %v2456_v3  ;;  %v9970_v29 = vld [vmem:[%s15504_s7 + $0x18c] ss:$16 sps:$4 sm:$0xff]  }
 0x1e6   : > { %v2473_v54 = vmul.f32 0.2, %v2225_v53  ;;  %5131 = vmatpush2.bf16.msra.mxu1 %v9959_v22  ;;  %v12875_v25 = vpack.c.bf16 %v2592_v34, %v2584_v41  ;;  %v2586_v2 = vsel %vm2330_vm2, %v12792_v6, %v2458_v17  ;;  %v2594_v60 = vsel %vm2338_vm3, %v2221_v26, %v2466_v5  ;;  %v9965_v22 = vld [vmem:[%s15504_s7 + $0x3a8] ss:$16 sps:$4 sm:$0xff]   ;;  %v2127_v34 = vpop.f32.mrf.mxu0 }
 0x1e7   : > { %v12884_v10 = vpack.c.bf16 %v2593_v63, %v2585_v30  ;;  %vm2345_vm7 = vcmp.gt.f32.partialorder %v2225_v53, 0.0  ;;  %v2231_v8 = vadd.f32 %v12771_v61, %v12299_v9  ;;  %v12888_v3 = vpack.c.bf16 %v2594_v60, %v2586_v2  ;;  %5132 = vmatprep.subr.bf16.mxu1 %v9967_v45  ;;  %v9968_v6 = vld [vmem:[%s15504_s7 + $0x188] ss:$16 sps:$4 sm:$0xff]   ;;  %5020 = vmatpush2.bf16.msra.mxu0 %v9962_v38  ;;  %v9973_v61 = vld [vmem:[%s15504_s7 + $0x38c] ss:$16 sps:$4 sm:$0xff]   ;;  %v2240_v45 = vpop.f32.mrf.mxu1 }
 0x1e8   : > { %vm2344_vm1 = vcmp.gt.f32.partialorder %v12856_v58, 0.0  ;;  %v2472_v26 = vmul.f32 0.2, %v12856_v58  ;;  %v2607_v30 = vsel %vm2351_vm5, %v2116_v11, %v2479_v7  ;;  %v2609_v17 = vsel %vm2353_vm6, %v2229_v18, %v2481_v39  ;;  %4855 = vmatprep.mubr.bf16.mxu0 %v12875_v25  ;;  %v9976_v38 = vld [vmem:[%s15504_s7 + $0x16c] ss:$16 sps:$4 sm:$0xff]   ;;  %5021 = vmatprep.subr.bf16.mxu0 %v9970_v29 }
 0x1e9   : > { %v2599_v5 = vsel %vm2343_vm4, %v12829_v59, %v2471_v47  ;;  %v2480_v63 = vmul.f32 0.2, %v2118_v35  ;;  %4968 = vmatprep.mubr.bf16.mxu1 %v12888_v3  ;;  %4856 = vmatmul.mubr.bf16.gmra.mxu0 %v12842_v48  ;;  %v2124_v11 = vadd.f32 %v2123_v27, %v12294_v43  ;;  %v2237_v18 = vadd.f32 %v2236_v33, %v12299_v9  ;;  %v9974_v60 = vld [vmem:[%s15504_s7 + $0x168] ss:$16 sps:$4 sm:$0xff]  }
 0x1ea   : > { %v2601_v7 = vsel %vm2345_vm7, %v2225_v53, %v2473_v54  ;;  %vm2346_vm8 = vcmp.gt.f32.partialorder %v12868_v0, 0.0  ;;  %v2474_v59 = vmul.f32 0.2, %v12868_v0  ;;  %vm2352_vm9 = vcmp.gt.f32.partialorder %v2118_v35, 0.0  ;;  %4969 = vmatmul.mubr.bf16.gmra.mxu1 %v12884_v10  ;;  %v9971_v54 = vld [vmem:[%s15504_s7 + $0x388] ss:$16 sps:$4 sm:$0xff]  }
 0x1eb   : > { %v12918_v47 = vpack.c.bf16 %v2607_v30, %v2599_v5  ;;  %v12920_v27 = vpack.c.bf16 %v2609_v17, %v2601_v7  ;;  %vm2354_vm10 = vcmp.gt.f32.partialorder %v2231_v8, 0.0  ;;  %v12924_v33 = vadd.f32 %v12809_v52, %v11938_v49  ;;  %5133 = vmatpush2.bf16.msra.mxu1 %v9965_v22  ;;  %5022 = vmatpush2.bf16.msra.mxu0 %v9968_v6  ;;  %v9979_v52 = vld [vmem:[%s15504_s7 + $0x36c] ss:$16 sps:$4 sm:$0xff]   ;;  %v9977_v6 = vld [vmem:[%s15504_s7 + $0x368] ss:$16 sps:$4 sm:$0xff]  }
 0x1ec   : > { %v2482_v53 = vmul.f32 0.2, %v2231_v8  ;;  %5134 = vmatprep.subr.bf16.mxu1 %v9973_v61  ;;  %v2126_v39 = vadd.f32 %v2125_v37, %v11938_v49  ;;  %v2128_v41 = vadd.f32 %v2127_v34, %v12294_v43  ;;  %v2241_v2 = vadd.f32 %v2240_v45, %v12299_v9  ;;  %5023 = vmatprep.subr.bf16.mxu0 %v9976_v38  ;;  %v9982_v49 = vld [vmem:[%s15504_s7 + $0x14c] ss:$16 sps:$4 sm:$0xff]  }
 0x1ed   : > { %vm2360_vm11 = vcmp.gt.f32.partialorder %v2124_v11, 0.0  ;;  %v2488_v29 = vmul.f32 0.2, %v2124_v11  ;;  %vm2362_vm12 = vcmp.gt.f32.partialorder %v2237_v18, 0.0  ;;  %v2608_v22 = vsel %vm2352_vm9, %v2118_v35, %v2480_v63  ;;  %v9988_v38 = vld [vmem:[%s15504_s7 + $0x12c] ss:$16 sps:$4 sm:$0xff]  }
 0x1ee   : > { %v2490_v43 = vmul.f32 0.2, %v2237_v18  ;;  %v2239_v9 = vadd.f32 %v2238_v56, %v12013_v19  ;;  %vm2368_vm13 = vcmp.gt.f32.partialorder %v2128_v41, 0.0  ;;  %v2600_v37 = vsel %vm2344_vm1, %v12856_v58, %v2472_v26  ;;  %v9985_v58 = vld [vmem:[%s15504_s7 + $0x34c] ss:$16 sps:$4 sm:$0xff]  }
 0x1ef   : > { %5135 = vmatpush2.bf16.msra.mxu1 %v9971_v54  ;;  %v2496_v30 = vmul.f32 0.2, %v2128_v41  ;;  %vm2370_vm14 = vcmp.gt.f32.partialorder %v2241_v2, 0.0  ;;  %v2498_v35 = vmul.f32 0.2, %v2241_v2  ;;  %v12949_v17 = vpack.c.bf16 %v2608_v22, %v2600_v37  ;;  %5024 = vmatpush2.bf16.msra.mxu0 %v9974_v60 }
 0x1f0   : > { %v2235_v61 = vadd.f32 %v12811_v55, %v12013_v19  ;;  %v2602_v56 = vsel %vm2346_vm8, %v12868_v0, %v2474_v59  ;;  %v2610_v5 = vsel %vm2354_vm10, %v2231_v8, %v2482_v53  ;;  %5136 = vmatprep.subr.bf16.mxu1 %v9979_v52  ;;  %v2495_v26 = vmul.f32 0.2, %v2126_v39  ;;  %v9980_v19 = vld [vmem:[%s15504_s7 + $0x148] ss:$16 sps:$4 sm:$0xff]   ;;  %5025 = vmatprep.subr.bf16.mxu0 %v9982_v49  ;;  %v9994_v60 = vld [vmem:[%s15504_s7 + $0x10c] ss:$16 sps:$4 sm:$0xff]  }
 0x1f1   : > { %4865 = vmatprep.mubr.bf16.mxu0 %v12949_v17  ;;  %v12961_v63 = vpack.c.bf16 %v2610_v5, %v2602_v56  ;;  %v2616_v55 = vsel %vm2360_vm11, %v2124_v11, %v2488_v29  ;;  %v2624_v0 = vsel %vm2368_vm13, %v2128_v41, %v2496_v30  ;;  %vm2367_vm15 = vcmp.gt.f32.partialorder %v2126_v39, 0.0  ;;  %v9983_v11 = vld [vmem:[%s15504_s7 + $0x348] ss:$16 sps:$4 sm:$0xff]   ;;  %v9997_v49 = vld [vmem:[%s15504_s7 + $0x30c] ss:$16 sps:$4 sm:$0xff]  }
 0x1f2   : > { %4866 = vmatmul.mubr.bf16.gmra.mxu0 %v12918_v47  ;;  %v12969_v8 = vpack.c.bf16 %v2624_v0, %v2616_v55  ;;  %v2618_v34 = vsel %vm2362_vm12, %v2237_v18, %v2490_v43  ;;  %v2626_v45 = vsel %vm2370_vm14, %v2241_v2, %v2498_v35  ;;  %v2487_v7 = vmul.f32 0.2, %v12924_v33  ;;  %v9991_v18 = vld [vmem:[%s15504_s7 + $0x32c] ss:$16 sps:$4 sm:$0xff]   ;;  %v9986_v2 = vld [vmem:[%s15504_s7 + $0x128] ss:$16 sps:$4 sm:$0xff]  }
 0x1f3   : > { %v2497_v59 = vmul.f32 0.2, %v2239_v9  ;;  %4978 = vmatprep.mubr.bf16.mxu1 %v12961_v63  ;;  %5137 = vmatpush2.bf16.msra.mxu1 %v9977_v6  ;;  %v12981_v54 = vpack.c.bf16 %v2626_v45, %v2618_v34  ;;  %vm2359_vm0 = vcmp.gt.f32.partialorder %v12924_v33, 0.0  ;;  %vm2369_vm2 = vcmp.gt.f32.partialorder %v2239_v9, 0.0  ;;  %v9992_v37 = vld [vmem:[%s15504_s7 + $0x108] ss:$16 sps:$4 sm:$0xff]  }
 0x1f4   : > { %4979 = vmatmul.mubr.bf16.gmra.mxu1 %v12920_v27  ;;  %5138 = vmatprep.subr.bf16.mxu1 %v9985_v58  ;;  %v2489_v53 = vmul.f32 0.2, %v2235_v61  ;;  %v2623_v41 = vsel %vm2367_vm15, %v2126_v39, %v2495_v26  ;;  %vm2361_vm3 = vcmp.gt.f32.partialorder %v2235_v61, 0.0  ;;  %v2615_v52 = vsel %vm2359_vm0, %v12924_v33, %v2487_v7  ;;  %v9989_v39 = vld [vmem:[%s15504_s7 + $0x328] ss:$16 sps:$4 sm:$0xff]  }
 0x1f5   : > { %5026 = vmatpush2.bf16.msra.mxu0 %v9980_v19  ;;  %4875 = vmatprep.mubr.bf16.mxu0 %v12969_v8  ;;  %v2625_v29 = vsel %vm2369_vm2, %v2239_v9, %v2497_v59  ;;  %v13001_v22 = vpack.c.bf16 %v2623_v41, %v2615_v52  ;;  %v10000_v9 = vld [vmem:[%s15504_s7 + $0x4ec] ss:$16 sps:$4 sm:$0xff]   ;;  %v9995_v6 = vld [vmem:[%s15504_s7 + $0x308] ss:$16 sps:$4 sm:$0xff]  }
 0x1f6   : > { %4988 = vmatprep.mubr.bf16.mxu1 %v12981_v54  ;;  %5027 = vmatprep.subr.bf16.mxu0 %v9988_v38  ;;  %v2617_v43 = vsel %vm2361_vm3, %v2235_v61, %v2489_v53  ;;  %v10003_v30 = vld [vmem:[%s15504_s7 + $0x6ec] ss:$16 sps:$4 sm:$0xff]   ;;  %v10001_v61 = vld [vmem:[%s15504_s7 + $0x6e8] ss:$16 sps:$4 sm:$0xff]  }
 0x1f7   : > { %5139 = vmatpush2.bf16.msra.mxu1 %v9983_v11  ;;  %v13009_v33 = vpack.c.bf16 %v2625_v29, %v2617_v43  ;;  %v10006_v35 = vld [vmem:[%s15504_s7 + $0x4cc] ss:$16 sps:$4 sm:$0xff]   ;;  %v10004_v56 = vld [vmem:[%s15504_s7 + $0x4c8] ss:$16 sps:$4 sm:$0xff]  }
 0x1f8   : > { %5140 = vmatprep.subr.bf16.mxu1 %v9991_v18  ;;  %v10012_v5 = vld [vmem:[%s15504_s7 + $0x4ac] ss:$16 sps:$4 sm:$0xff]   ;;  %v10013_v58 = vld [vmem:[%s15504_s7 + $0x6a8] ss:$16 sps:$4 sm:$0xff]  }
 0x1f9   : > { %5028 = vmatpush2.bf16.msra.mxu0 %v9986_v2  ;;  %v10021_v26 = vld [vmem:[%s15504_s7 + $0x68c] ss:$16 sps:$4 sm:$0xff]   ;;  %v10016_v19 = vld [vmem:[%s15504_s7 + $0x488] ss:$16 sps:$4 sm:$0xff]  }
 0x1fa   : > { %4876 = vmatmul.mubr.bf16.gmra.mxu0 %v13001_v22  ;;  %5029 = vmatprep.subr.bf16.mxu0 %v9994_v60  ;;  %v10024_v55 = vld [vmem:[%s15504_s7 + $0x46c] ss:$16 sps:$4 sm:$0xff]   ;;  %v10025_v0 = vld [vmem:[%s15504_s7 + $0x668] ss:$16 sps:$4 sm:$0xff]  }
 0x1fb   : > { %5031 = vmatprep.mubr.bf16.mxu0 %v11716_v14  ;;  %5141 = vmatpush2.bf16.msra.mxu1 %v9989_v39  ;;  %v9998_v14 = vld [vmem:[%s15504_s7 + $0x4e8] ss:$16 sps:$4 sm:$0xff]   ;;  %v10033_v34 = vld [vmem:[%s15504_s7 + $0x64c] ss:$16 sps:$4 sm:$0xff]  }
 0x1fc   : > { %4989 = vmatmul.mubr.bf16.gmra.mxu1 %v13009_v33  ;;  %5142 = vmatprep.subr.bf16.mxu1 %v9997_v49  ;;  %v10028_v45 = vld [vmem:[%s15504_s7 + $0x448] ss:$16 sps:$4 sm:$0xff]   ;;  %v10036_v38 = vld [vmem:[%s15504_s7 + $0x42c] ss:$16 sps:$4 sm:$0xff]  }
 0x1fd   : > { %5144 = vmatprep.mubr.bf16.mxu1 %v11736_v24  ;;  %5030 = vmatpush2.bf16.msra.mxu0 %v9992_v37  ;;  %v10009_v24 = vld [vmem:[%s15504_s7 + $0x6cc] ss:$16 sps:$4 sm:$0xff]   ;;  %v10037_v7 = vld [vmem:[%s15504_s7 + $0x628] ss:$16 sps:$4 sm:$0xff]  }
 0x1fe   : > { %5225 = vmatprep.subr.bf16.mxu0 %v10000_v9  ;;  %v15748_v59 = vld [vmem:[#allocation98_spill] sm:$0xff]  ;;  %v15749_v18 = vld [vmem:[#allocation101_spill] sm:$0xff]  ;;  %v15750_v41 = vld [vmem:[#allocation99_spill] sm:$0xff] }
 0x1ff   : > { %5143 = vmatpush2.bf16.msra.mxu1 %v9995_v6  ;;  %v10045_v11 = vld [vmem:[%s15504_s7 + $0x60c] ss:$16 sps:$4 sm:$0xff]   ;;  %v10040_v53 = vld [vmem:[%s15504_s7 + $0x408] ss:$16 sps:$4 sm:$0xff]  }
 0x200   : > { %5338 = vmatprep.subr.bf16.mxu1 %v10003_v30  ;;  %v10048_v2 = vld [vmem:[%s15504_s7 + $0x5ec] ss:$16 sps:$4 sm:$0xff]   ;;  %v10043_v52 = vld [vmem:[%s15504_s7 + $0x608] ss:$16 sps:$4 sm:$0xff]  }
 0x201   : > { %v15751_v60 = vld [vmem:[#allocation102_spill] sm:$0xff]  ;;  %v15752_v37 = vld [vmem:[#allocation100_spill] sm:$0xff] }
 0x202   : > { %5032 = vmatmul.mubr.bf16.vlgmr.msra.gmra.mxu0 %v11706_v20  ;;  %v10007_v20 = vld [vmem:[%s15504_s7 + $0x6c8] ss:$16 sps:$4 sm:$0xff]   ;;  %v10051_v29 = vld [vmem:[%s15504_s7 + $0x7ec] ss:$16 sps:$4 sm:$0xff]  }
 0x203   : > { %5041 = vmatprep.mubr.bf16.mxu0 %v11797_v28  ;;  %5226 = vmatpush1.bf16.msra.mxu0 %v9998_v14  ;;  %v10015_v28 = vld [vmem:[%s15504_s7 + $0x6ac] ss:$16 sps:$4 sm:$0xff]   ;;  %v10046_v39 = vld [vmem:[%s15504_s7 + $0x5e8] ss:$16 sps:$4 sm:$0xff]  }
 0x204   : > { %5145 = vmatmul.mubr.bf16.vlgmr.msra.gmra.mxu1 %v11733_v42  ;;  %5227 = vmatprep.subr.bf16.mxu0 %v10006_v35  ;;  %v10010_v42 = vld [vmem:[%s15504_s7 + $0x4a8] ss:$16 sps:$4 sm:$0xff]   ;;  %v10054_v49 = vld [vmem:[%s15504_s7 + $0x5cc] ss:$16 sps:$4 sm:$0xff]  }
 0x205   : > { %5154 = vmatprep.mubr.bf16.mxu1 %v11809_v23  ;;  %5339 = vmatpush1.bf16.msra.mxu1 %v10001_v61  ;;  %v10018_v23 = vld [vmem:[%s15504_s7 + $0x48c] ss:$16 sps:$4 sm:$0xff]   ;;  %v10049_v43 = vld [vmem:[%s15504_s7 + $0x7e8] ss:$16 sps:$4 sm:$0xff]  }
 0x206   : > { %5340 = vmatprep.subr.bf16.mxu1 %v10009_v24  ;;  %v10057_v9 = vld [vmem:[%s15504_s7 + $0x7cc] ss:$16 sps:$4 sm:$0xff]   ;;  %v10052_v30 = vld [vmem:[%s15504_s7 + $0x5c8] ss:$16 sps:$4 sm:$0xff]  }
 0x207   : > { %5228 = vmatpush1.bf16.msra.mxu0 %v10004_v56  ;;  %v15753_v6 = vld [vmem:[#allocation106_spill] sm:$0xff]  ;;  %v15754_v14 = vld [vmem:[#allocation103_spill] sm:$0xff] }
 0x208   : > { %5229 = vmatprep.subr.bf16.mxu0 %v10012_v5  ;;  %v10060_v35 = vld [vmem:[%s15504_s7 + $0x5ac] ss:$16 sps:$4 sm:$0xff]   ;;  %v15755_v61 = vld [vmem:[#allocation107_spill] sm:$0xff] }
 0x209   : > { %5341 = vmatpush1.bf16.msra.mxu1 %v10007_v20  ;;  %v10055_v24 = vld [vmem:[%s15504_s7 + $0x7c8] ss:$16 sps:$4 sm:$0xff]   ;;  %v10063_v56 = vld [vmem:[%s15504_s7 + $0x7ac] ss:$16 sps:$4 sm:$0xff]  }
 0x20a   : > { %5042 = vmatmul.mubr.bf16.gmra.mxu0 %v11803_v44  ;;  %5342 = vmatprep.subr.bf16.mxu1 %v10015_v28  ;;  %v10019_v44 = vld [vmem:[%s15504_s7 + $0x688] ss:$16 sps:$4 sm:$0xff]   ;;  %v10066_v20 = vld [vmem:[%s15504_s7 + $0x58c] ss:$16 sps:$4 sm:$0xff]  }
 0x20b   : > { %5051 = vmatprep.mubr.bf16.mxu0 %v11887_v40  ;;  %5230 = vmatpush1.bf16.msra.mxu0 %v10010_v42  ;;  %v10027_v40 = vld [vmem:[%s15504_s7 + $0x66c] ss:$16 sps:$4 sm:$0xff]   ;;  %v10058_v5 = vld [vmem:[%s15504_s7 + $0x5a8] ss:$16 sps:$4 sm:$0xff]  }
 0x20c   : > { %5155 = vmatmul.mubr.bf16.gmra.mxu1 %v11817_v31  ;;  %5231 = vmatprep.subr.bf16.mxu0 %v10018_v23  ;;  %v10022_v31 = vld [vmem:[%s15504_s7 + $0x468] ss:$16 sps:$4 sm:$0xff]   ;;  %v10069_v23 = vld [vmem:[%s15504_s7 + $0x78c] ss:$16 sps:$4 sm:$0xff]  }
 0x20d   : > { %5164 = vmatprep.mubr.bf16.mxu1 %v11910_v46  ;;  %5343 = vmatpush1.bf16.msra.mxu1 %v10013_v58  ;;  %v10030_v46 = vld [vmem:[%s15504_s7 + $0x44c] ss:$16 sps:$4 sm:$0xff]   ;;  %v10061_v28 = vld [vmem:[%s15504_s7 + $0x7a8] ss:$16 sps:$4 sm:$0xff]  }
 0x20e   : > { %5344 = vmatprep.subr.bf16.mxu1 %v10021_v26  ;;  %v15756_v42 = vld [vmem:[#allocation104_spill] sm:$0xff]  ;;  %v15757_v58 = vld [vmem:[#allocation110_spill] sm:$0xff] }
 0x20f   : > { %5232 = vmatpush1.bf16.msra.mxu0 %v10016_v19  ;;  %v10064_v26 = vld [vmem:[%s15504_s7 + $0x588] ss:$16 sps:$4 sm:$0xff]  }
 0x210   : > { %5233 = vmatprep.subr.bf16.mxu0 %v10024_v55  ;;  %v15758_v19 = vld [vmem:[#allocation105_spill] sm:$0xff]  ;;  %v10072_v55 = vld [vmem:[%s15504_s7 + $0x56c] ss:$16 sps:$4 sm:$0xff]  }
 0x211   : > { %5345 = vmatpush1.bf16.msra.mxu1 %v10019_v44  ;;  %v15759_v44 = vld [vmem:[#allocation111_spill] sm:$0xff] }
 0x212   : > { %5052 = vmatmul.mubr.bf16.gmra.mxu0 %v11850_v1  ;;  %5346 = vmatprep.subr.bf16.mxu1 %v10027_v40  ;;  %v10031_v1 = vld [vmem:[%s15504_s7 + $0x648] ss:$16 sps:$4 sm:$0xff]  }
 0x213   : > { %5061 = vmatprep.mubr.bf16.mxu0 %v11976_v13  ;;  %5234 = vmatpush1.bf16.msra.mxu0 %v10022_v31  ;;  %v10039_v13 = vld [vmem:[%s15504_s7 + $0x62c] ss:$16 sps:$4 sm:$0xff]   ;;  %v10067_v40 = vld [vmem:[%s15504_s7 + $0x788] ss:$16 sps:$4 sm:$0xff]  }
 0x214   : > { %5165 = vmatmul.mubr.bf16.gmra.mxu1 %v11917_v4  ;;  %5235 = vmatprep.subr.bf16.mxu0 %v10030_v46  ;;  %v10034_v4 = vld [vmem:[%s15504_s7 + $0x428] ss:$16 sps:$4 sm:$0xff]   ;;  %v10075_v31 = vld [vmem:[%s15504_s7 + $0x76c] ss:$16 sps:$4 sm:$0xff]  }
 0x215   : > { %5174 = vmatprep.mubr.bf16.mxu1 %v11987_v15  ;;  %5347 = vmatpush1.bf16.msra.mxu1 %v10025_v0  ;;  %v10042_v15 = vld [vmem:[%s15504_s7 + $0x40c] ss:$16 sps:$4 sm:$0xff]   ;;  %v10070_v46 = vld [vmem:[%s15504_s7 + $0x568] ss:$16 sps:$4 sm:$0xff]  }
 0x216   : > { %5348 = vmatprep.subr.bf16.mxu1 %v10033_v34  ;;  %v10078_v34 = vld [vmem:[%s15504_s7 + $0x54c] ss:$16 sps:$4 sm:$0xff]  }
 0x217   : > { %5236 = vmatpush1.bf16.msra.mxu0 %v10028_v45  ;;  %v10073_v45 = vld [vmem:[%s15504_s7 + $0x768] ss:$16 sps:$4 sm:$0xff]  }
 0x218   : > { %5237 = vmatprep.subr.bf16.mxu0 %v10036_v38 }
 0x219   : > { %5349 = vmatpush1.bf16.msra.mxu1 %v10031_v1 }
 0x21a   : > { %5062 = vmatmul.mubr.bf16.gmra.mxu0 %v15748_v59  ;;  %5350 = vmatprep.subr.bf16.mxu1 %v10039_v13  ;;  %v15760_v13 = vld [vmem:[#allocation108_spill] sm:$0xff] }
 0x21b   : > { %5071 = vmatprep.mubr.bf16.mxu0 %v15749_v18  ;;  %5238 = vmatpush1.bf16.msra.mxu0 %v10034_v4  ;;  %v10081_v4 = vld [vmem:[%s15504_s7 + $0x74c] ss:$16 sps:$4 sm:$0xff]   ;;  %v10076_v59 = vld [vmem:[%s15504_s7 + $0x548] ss:$16 sps:$4 sm:$0xff]  }
 0x21c   : > { %5175 = vmatmul.mubr.bf16.gmra.mxu1 %v15750_v41  ;;  %5239 = vmatprep.subr.bf16.mxu0 %v10042_v15  ;;  %v10084_v41 = vld [vmem:[%s15504_s7 + $0x52c] ss:$16 sps:$4 sm:$0xff]  }
 0x21d   : > { %5184 = vmatprep.mubr.bf16.mxu1 %v15751_v60  ;;  %5351 = vmatpush1.bf16.msra.mxu1 %v10037_v7  ;;  %v15761_v7 = vld [vmem:[#allocation114_spill] sm:$0xff]  ;;  %v15763_v60 = vld [vmem:[#allocation115_spill] sm:$0xff] }
 0x21e   : > { %5352 = vmatprep.subr.bf16.mxu1 %v10045_v11 }
 0x21f   : > { %5240 = vmatpush1.bf16.msra.mxu0 %v10040_v53  ;;  %v15762_v53 = vld [vmem:[#allocation109_spill] sm:$0xff] }
 0x220   : > { %5241 = vmatprep.subr.bf16.mxu0 %v10048_v2 }
 0x221   : > { %5353 = vmatpush1.bf16.msra.mxu1 %v10043_v52  ;;  %v10079_v52 = vld [vmem:[%s15504_s7 + $0x748] ss:$16 sps:$4 sm:$0xff]  }
 0x222   : > { %5072 = vmatmul.mubr.bf16.gmra.mxu0 %v15752_v37  ;;  %5354 = vmatprep.subr.bf16.mxu1 %v10051_v29  ;;  %v10082_v37 = vld [vmem:[%s15504_s7 + $0x528] ss:$16 sps:$4 sm:$0xff]  }
 0x223   : > { %5081 = vmatprep.mubr.bf16.mxu0 %v15753_v6  ;;  %5242 = vmatpush2.bf16.msra.mxu0 %v10046_v39  ;;  %v10090_v6 = vld [vmem:[%s15504_s7 + $0x50c] ss:$16 sps:$4 sm:$0xff]  }
 0x224   : > { %5185 = vmatmul.mubr.bf16.gmra.mxu1 %v15754_v14  ;;  %5243 = vmatprep.subr.bf16.mxu0 %v10054_v49  ;;  %v10087_v49 = vld [vmem:[%s15504_s7 + $0x72c] ss:$16 sps:$4 sm:$0xff]   ;;  %v10085_v14 = vld [vmem:[%s15504_s7 + $0x728] ss:$16 sps:$4 sm:$0xff]  }
 0x225   : > { %5194 = vmatprep.mubr.bf16.mxu1 %v15755_v61  ;;  %5355 = vmatpush2.bf16.msra.mxu1 %v10049_v43  ;;  %v10093_v61 = vld [vmem:[%s15504_s7 + $0x70c] ss:$16 sps:$4 sm:$0xff]  }
 0x226   : > { %5356 = vmatprep.subr.bf16.mxu1 %v10057_v9 }
 0x227   : > { %5244 = vmatpush2.bf16.msra.mxu0 %v10052_v30 }
 0x228   : > { %5245 = vmatprep.subr.bf16.mxu0 %v10060_v35  ;;  %v15764_v35 = vld [vmem:[#allocation112_spill] sm:$0xff] }
 0x229   : > { %5357 = vmatpush2.bf16.msra.mxu1 %v10055_v24 }
 0x22a   : > { %5082 = vmatmul.mubr.bf16.gmra.mxu0 %v15756_v42  ;;  %5358 = vmatprep.subr.bf16.mxu1 %v10063_v56  ;;  %v15765_v56 = vld [vmem:[#allocation118_spill] sm:$0xff]  ;;  %v10096_v42 = vld [vmem:[%s15503_s6 + $0xe4] ss:$16 sps:$4 sm:$0xff]  }
 0x22b   : > { %5091 = vmatprep.mubr.bf16.mxu0 %v15757_v58  ;;  %5246 = vmatpush2.bf16.msra.mxu0 %v10058_v5  ;;  %v10088_v5 = vld [vmem:[%s15504_s7 + $0x508] ss:$16 sps:$4 sm:$0xff]  }
 0x22c   : > { %5195 = vmatmul.mubr.bf16.gmra.mxu1 %v15758_v19  ;;  %5247 = vmatprep.subr.bf16.mxu0 %v10066_v20  ;;  %v10091_v19 = vld [vmem:[%s15504_s7 + $0x708] ss:$16 sps:$4 sm:$0xff]  }
 0x22d   : > { %5204 = vmatprep.mubr.bf16.mxu1 %v15759_v44  ;;  %5359 = vmatpush2.bf16.msra.mxu1 %v10061_v28  ;;  %v15766_v28 = vld [vmem:[#allocation113_spill] sm:$0xff] }
 0x22e   : > { %5360 = vmatprep.subr.bf16.mxu1 %v10069_v23  ;;  %v10099_v44 = vld [vmem:[%s15503_s6 + $0x2e4] ss:$16 sps:$4 sm:$0xff]  }
 0x22f   : > { %5248 = vmatpush2.bf16.msra.mxu0 %v10064_v26  ;;  %v15767_v26 = vld [vmem:[#allocation119_spill] sm:$0xff] }
 0x230   : > { %v4581_v0 = vpop.f32.mrf.mxu0  ;;  %5249 = vmatprep.subr.bf16.mxu0 %v10072_v55 }
 0x231   : > { %5361 = vmatpush2.bf16.msra.mxu1 %v10067_v40  ;;  %v4694_v38 = vpop.f32.mrf.mxu1 }
 0x232   : > { %v4583_v1 = vpop.f32.mrf.mxu0  ;;  %5092 = vmatmul.mubr.bf16.gmra.mxu0 %v15760_v13  ;;  %5362 = vmatprep.subr.bf16.mxu1 %v10075_v31  ;;  %v13205_v15 = vadd.f32 %v4694_v38, %v4581_v0 }
 0x233   : > { %5101 = vmatprep.mubr.bf16.mxu0 %v15761_v7  ;;  %5250 = vmatpush2.bf16.msra.mxu0 %v10070_v46  ;;  %v4696_v11 = vpop.f32.mrf.mxu1  ;;  %v10094_v46 = vld [vmem:[%s15503_s6 + $0xe0] ss:$16 sps:$4 sm:$0xff]   ;;  %v10105_v7 = vld [vmem:[%s15503_s6 + $0x2c4] ss:$16 sps:$4 sm:$0xff]  }
 0x234   : > { %v4585_v18 = vpop.f32.mrf.mxu0  ;;  %5205 = vmatmul.mubr.bf16.gmra.mxu1 %v15762_v53  ;;  %5251 = vmatprep.subr.bf16.mxu0 %v10078_v34  ;;  %v13215_v2 = vadd.f32 %v4696_v11, %v4583_v1  ;;  %v10102_v34 = vld [vmem:[%s15503_s6 + $0xc4] ss:$16 sps:$4 sm:$0xff]   ;;  %v10097_v1 = vld [vmem:[%s15503_s6 + $0x2e0] ss:$16 sps:$4 sm:$0xff]  }
 0x235   : > { %5214 = vmatprep.mubr.bf16.mxu1 %v15763_v60  ;;  %5363 = vmatpush2.bf16.msra.mxu1 %v10073_v45  ;;  %v4698_v29 = vpop.f32.mrf.mxu1  ;;  %v15769_v11 = vld [vmem:[#allocation121_spill] sm:$0xff] }
 0x236   : > { %v4587_v39 = vpop.f32.mrf.mxu0  ;;  %5364 = vmatprep.subr.bf16.mxu1 %v10081_v4  ;;  %v13224_v43 = vadd.f32 %v4698_v29, %v4585_v18  ;;  %v15768_v4 = vld [vmem:[#allocation116_spill] sm:$0xff]  ;;  %v10108_v60 = vld [vmem:[%s15503_s6 + $0xa4] ss:$16 sps:$4 sm:$0xff]  }
 0x237   : > { %5252 = vmatpush2.bf16.msra.mxu0 %v10076_v59  ;;  %v4700_v9 = vpop.f32.mrf.mxu1  ;;  %v10100_v18 = vld [vmem:[%s15503_s6 + $0xc0] ss:$16 sps:$4 sm:$0xff]  }
 0x238   : > { %5253 = vmatprep.subr.bf16.mxu0 %v10084_v41  ;;  %v13232_v30 = vadd.f32 %v4700_v9, %v4587_v39  ;;  %v15770_v41 = vld [vmem:[#allocation117_spill] sm:$0xff] }
 0x239   : > { %5365 = vmatpush2.bf16.msra.mxu1 %v10079_v52  ;;  %v15771_v52 = vld [vmem:[#allocation122_spill] sm:$0xff] }
 0x23a   : > { %5102 = vmatmul.mubr.bf16.gmra.mxu0 %v15764_v35  ;;  %5366 = vmatprep.subr.bf16.mxu1 %v10087_v49  ;;  %v10103_v29 = vld [vmem:[%s15503_s6 + $0x2c0] ss:$16 sps:$4 sm:$0xff]  }
 0x23b   : > { %v4591_v24 = vpop.f32.mrf.mxu0  ;;  %5254 = vmatpush2.bf16.msra.mxu0 %v10082_v37  ;;  %5257 = vmatprep.mubr.bf16.mxu0 %v15765_v56  ;;  %v4704_v20 = vpop.f32.mrf.mxu1  ;;  %v10111_v37 = vld [vmem:[%s15503_s6 + $0x2a4] ss:$16 sps:$4 sm:$0xff]   ;;  %v10109_v56 = vld [vmem:[%s15503_s6 + $0x2a0] ss:$16 sps:$4 sm:$0xff]  }
 0x23c   : > { %5215 = vmatmul.mubr.bf16.gmra.mxu1 %v15766_v28  ;;  %5255 = vmatprep.subr.bf16.mxu0 %v10090_v6  ;;  %v13249_v23 = vadd.f32 %v4704_v20, %v4591_v24  ;;  %v10106_v6 = vld [vmem:[%s15503_s6 + $0xa0] ss:$16 sps:$4 sm:$0xff]  }
 0x23d   : > { %v4593_v58 = vpop.f32.mrf.mxu0  ;;  %5367 = vmatpush2.bf16.msra.mxu1 %v10085_v14  ;;  %5370 = vmatprep.mubr.bf16.mxu1 %v15767_v26  ;;  %v4706_v55 = vpop.f32.mrf.mxu1  ;;  %v15772_v28 = vld [vmem:[#allocation120_spill] sm:$0xff] }
 0x23e   : > { %5368 = vmatprep.subr.bf16.mxu1 %v10093_v61  ;;  %v13258_v40 = vadd.f32 %v4706_v55, %v4593_v58  ;;  %v10114_v61 = vld [vmem:[%s15503_s6 + $0x84] ss:$16 sps:$4 sm:$0xff]   ;;  %v10112_v26 = vld [vmem:[%s15503_s6 + $0x80] ss:$16 sps:$4 sm:$0xff]  }
 0x23f   : > { %v4595_v31 = vpop.f32.mrf.mxu0  ;;  %5256 = vmatpush2.bf16.msra.mxu0 %v10088_v5  ;;  %v4708_v0 = vpop.f32.mrf.mxu1  ;;  %v10120_v55 = vld [vmem:[%s15503_s6 + $0x64] ss:$16 sps:$4 sm:$0xff]  }
 0x240   : > { %6731 = vmatprep.subr.bf16.mxu0 %v10096_v42  ;;  %v13266_v45 = vadd.f32 %v4708_v0, %v4595_v31  ;;  %v10117_v42 = vld [vmem:[%s15503_s6 + $0x284] ss:$16 sps:$4 sm:$0xff]  }
 0x241   : > { %v4597_v38 = vpop.f32.mrf.mxu0  ;;  %5369 = vmatpush2.bf16.msra.mxu1 %v10091_v19  ;;  %v4710_v13 = vpop.f32.mrf.mxu1 }
 0x242   : > { %5258 = vmatmul.mubr.bf16.vlgmr.msra.gmra.mxu0 %v15768_v4  ;;  %6844 = vmatprep.subr.bf16.mxu1 %v10099_v44  ;;  %v13275_v59 = vadd.f32 %v4710_v13, %v4597_v38  ;;  %v10118_v38 = vld [vmem:[%s15503_s6 + $0x60] ss:$16 sps:$4 sm:$0xff]  }
 0x243   : > { %5267 = vmatprep.mubr.bf16.mxu0 %v15769_v11  ;;  %6732 = vmatpush1.bf16.msra.mxu0 %v10094_v46  ;;  %v4601_v53 = vpop.f32.mrf.mxu0 }
 0x244   : > { %5371 = vmatmul.mubr.bf16.vlgmr.msra.gmra.mxu1 %v15770_v41  ;;  %6733 = vmatprep.subr.bf16.mxu0 %v10102_v34 }
 0x245   : > { %5380 = vmatprep.mubr.bf16.mxu1 %v15771_v52  ;;  %6845 = vmatpush1.bf16.msra.mxu1 %v10097_v1  ;;  %v4714_v39 = vpop.f32.mrf.mxu1  ;;  %v4603_v49 = vpop.f32.mrf.mxu0  ;;  %v10126_v1 = vld [vmem:[%s15503_s6 + $0x44] ss:$16 sps:$4 sm:$0xff]  }
 0x246   : > { %6846 = vmatprep.subr.bf16.mxu1 %v10105_v7  ;;  %v13292_v9 = vadd.f32 %v4714_v39, %v4601_v53  ;;  %v10121_v7 = vld [vmem:[%s15503_s6 + $0x260] ss:$16 sps:$4 sm:$0xff]   ;;  %v10135_v39 = vld [vmem:[%s15503_s6 + $0x224] ss:$16 sps:$4 sm:$0xff]  }
 0x247   : > { %6734 = vmatpush1.bf16.msra.mxu0 %v10100_v18  ;;  %v4716_v14 = vpop.f32.mrf.mxu1  ;;  %v4605_v35 = vpop.f32.mrf.mxu0  ;;  %v10129_v18 = vld [vmem:[%s15503_s6 + $0x244] ss:$16 sps:$4 sm:$0xff]  }
 0x248   : > { %6735 = vmatprep.subr.bf16.mxu0 %v10108_v60  ;;  %v13300_v24 = vadd.f32 %v4716_v14, %v4603_v49  ;;  %v10124_v60 = vld [vmem:[%s15503_s6 + $0x40] ss:$16 sps:$4 sm:$0xff]  }
 0x249   : > { %6847 = vmatpush1.bf16.msra.mxu1 %v10103_v29  ;;  %v4718_v5 = vpop.f32.mrf.mxu1  ;;  %v4607_v20 = vpop.f32.mrf.mxu0  ;;  %v10130_v49 = vld [vmem:[%s15503_s6 + $0x20] ss:$16 sps:$4 sm:$0xff]  }
 0x24a   : > { %5268 = vmatmul.mubr.bf16.gmra.mxu0 %v15772_v28  ;;  %6848 = vmatprep.subr.bf16.mxu1 %v10111_v37  ;;  %v13309_v58 = vadd.f32 %v4718_v5, %v4605_v35  ;;  %v10133_v35 = vld [vmem:[%s15503_s6 + $0x220] ss:$16 sps:$4 sm:$0xff]  }
 0x24b   : > { %5277 = vmatprep.mubr.bf16.mxu0 %v12636_v36  ;;  %6736 = vmatpush1.bf16.msra.mxu0 %v10106_v6  ;;  %v4720_v19 = vpop.f32.mrf.mxu1  ;;  %v10115_v36 = vld [vmem:[%s15503_s6 + $0x280] ss:$16 sps:$4 sm:$0xff]  }
 0x24c   : > { %5381 = vmatmul.mubr.bf16.gmra.mxu1 %v12512_v16  ;;  %6737 = vmatprep.subr.bf16.mxu0 %v10114_v61  ;;  %v13319_v44 = vadd.f32 %v4720_v19, %v4607_v20  ;;  %v4611_v31 = vpop.f32.mrf.mxu0  ;;  %v10123_v16 = vld [vmem:[%s15503_s6 + $0x264] ss:$16 sps:$4 sm:$0xff]   ;;  %v10136_v28 = vld [vmem:[%s15503_s6] ss:$16 sps:$4 sm:$0xff]  }
 0x24d   : > { %5390 = vmatprep.mubr.bf16.mxu1 %v12644_v51  ;;  %6849 = vmatpush1.bf16.msra.mxu1 %v10109_v56  ;;  %v4724_v46 = vpop.f32.mrf.mxu1  ;;  %v10141_v56 = vld [vmem:[%s15503_s6 + $0x204] ss:$16 sps:$4 sm:$0xff]  }
 0x24e   : > { %6850 = vmatprep.subr.bf16.mxu1 %v10117_v42  ;;  %v13328_v0 = vadd.f32 %v4724_v46, %v4611_v31  ;;  %v4613_v34 = vpop.f32.mrf.mxu0  ;;  %v15774_v31 = vld [vmem:[#allocation126_spill] sm:$0xff]  ;;  %v10147_v46 = vld [vmem:[%s15503_s6 + $0x3e4] ss:$16 sps:$4 sm:$0xff]  }
 0x24f   : > { %6738 = vmatpush1.bf16.msra.mxu0 %v10112_v26  ;;  %v4726_v51 = vpop.f32.mrf.mxu1  ;;  %v15773_v26 = vld [vmem:[#allocation123_spill] sm:$0xff] }
 0x250   : > { %6739 = vmatprep.subr.bf16.mxu0 %v10120_v55  ;;  %v13336_v13 = vadd.f32 %v4726_v51, %v4613_v34  ;;  %v4615_v4 = vpop.f32.mrf.mxu0  ;;  %v10142_v34 = vld [vmem:[%s15503_s6 + $0x1e0] ss:$16 sps:$4 sm:$0xff]   ;;  %v10150_v51 = vld [vmem:[%s15503_s6 + $0x1c4] ss:$16 sps:$4 sm:$0xff]  }
 0x251   : > { %6851 = vmatpush1.bf16.msra.mxu1 %v10115_v36  ;;  %v4728_v11 = vpop.f32.mrf.mxu1 }
 0x252   : > { %5278 = vmatmul.mubr.bf16.gmra.mxu0 %v12599_v50  ;;  %6852 = vmatprep.subr.bf16.mxu1 %v10123_v16  ;;  %v13345_v53 = vadd.f32 %v4728_v11, %v4615_v4  ;;  %v4617_v41 = vpop.f32.mrf.mxu0  ;;  %v10132_v50 = vld [vmem:[%s15503_s6 + $0x24] ss:$16 sps:$4 sm:$0xff]   ;;  %v15775_v11 = vld [vmem:[#allocation124_spill] sm:$0xff] }
 0x253   : > { %5287 = vmatprep.mubr.bf16.mxu0 %v12714_v32  ;;  %6740 = vmatpush1.bf16.msra.mxu0 %v10118_v38  ;;  %v4730_v52 = vpop.f32.mrf.mxu1  ;;  %v10127_v32 = vld [vmem:[%s15503_s6 + $0x240] ss:$16 sps:$4 sm:$0xff]  }
 0x254   : > { %5391 = vmatmul.mubr.bf16.gmra.mxu1 %v12649_v12  ;;  %6741 = vmatprep.subr.bf16.mxu0 %v10126_v1  ;;  %v13355_v29 = vadd.f32 %v4730_v52, %v4617_v41  ;;  %v10145_v1 = vld [vmem:[%s15503_s6 + $0x3e0] ss:$16 sps:$4 sm:$0xff]  }
 0x255   : > { %5400 = vmatprep.mubr.bf16.mxu1 %v12729_v57  ;;  %6853 = vmatpush1.bf16.msra.mxu1 %v10121_v7  ;;  %v10138_v57 = vld [vmem:[%s15503_s6 + $0x4] ss:$16 sps:$4 sm:$0xff]  }
 0x256   : > { %6854 = vmatprep.subr.bf16.mxu1 %v10129_v18  ;;  %v4621_v12 = vpop.f32.mrf.mxu0  ;;  %v10153_v18 = vld [vmem:[%s15503_s6 + $0x3c4] ss:$16 sps:$4 sm:$0xff]  }
 0x257   : > { %6742 = vmatpush1.bf16.msra.mxu0 %v10124_v60  ;;  %v4734_v37 = vpop.f32.mrf.mxu1  ;;  %v10148_v60 = vld [vmem:[%s15503_s6 + $0x1c0] ss:$16 sps:$4 sm:$0xff]  }
 0x258   : > { %6743 = vmatprep.subr.bf16.mxu0 %v10132_v50  ;;  %v13370_v6 = vadd.f32 %v4734_v37, %v4621_v12  ;;  %v4623_v14 = vpop.f32.mrf.mxu0 }
 0x259   : > { %6855 = vmatpush1.bf16.msra.mxu1 %v10127_v32  ;;  %v4736_v61 = vpop.f32.mrf.mxu1  ;;  %v15776_v32 = vld [vmem:[#allocation125_spill] sm:$0xff] }
 0x25a   : > { %5288 = vmatmul.mubr.bf16.gmra.mxu0 %v12685_v62  ;;  %6856 = vmatprep.subr.bf16.mxu1 %v10135_v39  ;;  %v13379_v5 = vadd.f32 %v4736_v61, %v4623_v14  ;;  %v4625_v20 = vpop.f32.mrf.mxu0  ;;  %v10144_v62 = vld [vmem:[%s15503_s6 + $0x1e4] ss:$16 sps:$4 sm:$0xff]  }
 0x25b   : > { %5297 = vmatprep.mubr.bf16.mxu0 %v12797_v21  ;;  %6744 = vmatpush1.bf16.msra.mxu0 %v10130_v49  ;;  %v4738_v42 = vpop.f32.mrf.mxu1  ;;  %v10139_v21 = vld [vmem:[%s15503_s6 + $0x200] ss:$16 sps:$4 sm:$0xff]   ;;  %v10156_v39 = vld [vmem:[%s15503_s6 + $0x1a4] ss:$16 sps:$4 sm:$0xff]  }
 0x25c   : > { %5401 = vmatmul.mubr.bf16.gmra.mxu1 %v15773_v26  ;;  %6745 = vmatprep.subr.bf16.mxu0 %v10138_v57  ;;  %v13389_v19 = vadd.f32 %v4738_v42, %v4625_v20  ;;  %v4627_v55 = vpop.f32.mrf.mxu0  ;;  %v10159_v57 = vld [vmem:[%s15503_s6 + $0x3a4] ss:$16 sps:$4 sm:$0xff]  }
 0x25d   : > { %5410 = vmatprep.mubr.bf16.mxu1 %v15774_v31  ;;  %6857 = vmatpush1.bf16.msra.mxu1 %v10133_v35  ;;  %v4740_v36 = vpop.f32.mrf.mxu1  ;;  %v10154_v35 = vld [vmem:[%s15503_s6 + $0x1a0] ss:$16 sps:$4 sm:$0xff]   ;;  %v10162_v61 = vld [vmem:[%s15503_s6 + $0x184] ss:$16 sps:$4 sm:$0xff]  }
 0x25e   : > { %6858 = vmatprep.subr.bf16.mxu1 %v10141_v56  ;;  %v13398_v16 = vadd.f32 %v4740_v36, %v4627_v55  ;;  %v10165_v26 = vld [vmem:[%s15503_s6 + $0x384] ss:$16 sps:$4 sm:$0xff]   ;;  %v10160_v31 = vld [vmem:[%s15503_s6 + $0x180] ss:$16 sps:$4 sm:$0xff]  }
 0x25f   : > { %6746 = vmatpush1.bf16.msra.mxu0 %v10136_v28  ;;  %v4631_v38 = vpop.f32.mrf.mxu0  ;;  %v10157_v28 = vld [vmem:[%s15503_s6 + $0x3a0] ss:$16 sps:$4 sm:$0xff]  }
 0x260   : > { %6747 = vmatprep.subr.bf16.mxu0 %v10144_v62 }
 0x261   : > { %6859 = vmatpush1.bf16.msra.mxu1 %v10139_v21  ;;  %v4744_v4 = vpop.f32.mrf.mxu1  ;;  %v4633_v7 = vpop.f32.mrf.mxu0 }
 0x262   : > { %5298 = vmatmul.mubr.bf16.gmra.mxu0 %v15775_v11  ;;  %6860 = vmatprep.subr.bf16.mxu1 %v10147_v46  ;;  %v13413_v41 = vadd.f32 %v4744_v4, %v4631_v38  ;;  %v10174_v4 = vld [vmem:[%s15503_s6 + $0x144] ss:$16 sps:$4 sm:$0xff]   ;;  %v10169_v11 = vld [vmem:[%s15503_s6 + $0x360] ss:$16 sps:$4 sm:$0xff]  }
 0x263   : > { %5307 = vmatprep.mubr.bf16.mxu0 %v12875_v25  ;;  %6748 = vmatpush2.bf16.msra.mxu0 %v10142_v34  ;;  %v4746_v52 = vpop.f32.mrf.mxu1  ;;  %v4635_v50 = vpop.f32.mrf.mxu0  ;;  %v10151_v25 = vld [vmem:[%s15503_s6 + $0x3c0] ss:$16 sps:$4 sm:$0xff]  }
 0x264   : > { %5411 = vmatmul.mubr.bf16.gmra.mxu1 %v15776_v32  ;;  %6749 = vmatprep.subr.bf16.mxu0 %v10150_v51  ;;  %v13423_v12 = vadd.f32 %v4746_v52, %v4633_v7  ;;  %v10172_v52 = vld [vmem:[%s15503_s6 + $0x140] ss:$16 sps:$4 sm:$0xff]  }
 0x265   : > { %5420 = vmatprep.mubr.bf16.mxu1 %v12888_v3  ;;  %6861 = vmatpush2.bf16.msra.mxu1 %v10145_v1  ;;  %v4748_v49 = vpop.f32.mrf.mxu1  ;;  %v4637_v37 = vpop.f32.mrf.mxu0  ;;  %v10166_v1 = vld [vmem:[%s15503_s6 + $0x160] ss:$16 sps:$4 sm:$0xff]  }
 0x266   : > { %6862 = vmatprep.subr.bf16.mxu1 %v10153_v18  ;;  %v13432_v14 = vadd.f32 %v4748_v49, %v4635_v50  ;;  %v10177_v18 = vld [vmem:[%s15503_s6 + $0x344] ss:$16 sps:$4 sm:$0xff]  }
 0x267   : > { %6750 = vmatpush2.bf16.msra.mxu0 %v10148_v60  ;;  %v4750_v3 = vpop.f32.mrf.mxu1 }
 0x268   : > { %6751 = vmatprep.subr.bf16.mxu0 %v10156_v39  ;;  %v13440_v56 = vadd.f32 %v4750_v3, %v4637_v37  ;;  %v4641_v20 = vpop.f32.mrf.mxu0  ;;  %v10186_v3 = vld [vmem:[%s15503_s6 + $0x104] ss:$16 sps:$4 sm:$0xff]  }
 0x269   : > { %6863 = vmatpush2.bf16.msra.mxu1 %v10151_v25  ;;  %v4754_v42 = vpop.f32.mrf.mxu1 }
 0x26a   : > { %5308 = vmatmul.mubr.bf16.gmra.mxu0 %v12842_v48  ;;  %6864 = vmatprep.subr.bf16.mxu1 %v10159_v57  ;;  %v13449_v62 = vadd.f32 %v4754_v42, %v4641_v20  ;;  %v4643_v55 = vpop.f32.mrf.mxu0  ;;  %v10168_v48 = vld [vmem:[%s15503_s6 + $0x164] ss:$16 sps:$4 sm:$0xff]   ;;  %v10178_v57 = vld [vmem:[%s15503_s6 + $0x120] ss:$16 sps:$4 sm:$0xff]  }
 0x26b   : > { %5317 = vmatprep.mubr.bf16.mxu0 %v12949_v17  ;;  %6752 = vmatpush2.bf16.msra.mxu0 %v10154_v35  ;;  %v4756_v21 = vpop.f32.mrf.mxu1  ;;  %v10163_v17 = vld [vmem:[%s15503_s6 + $0x380] ss:$16 sps:$4 sm:$0xff]   ;;  %v10189_v42 = vld [vmem:[%s15503_s6 + $0x304] ss:$16 sps:$4 sm:$0xff]  }
 0x26c   : > { %5421 = vmatmul.mubr.bf16.gmra.mxu1 %v12884_v10  ;;  %6753 = vmatprep.subr.bf16.mxu0 %v10162_v61  ;;  %v13459_v36 = vadd.f32 %v4756_v21, %v4643_v55  ;;  %v4645_v46 = vpop.f32.mrf.mxu0  ;;  %v10171_v10 = vld [vmem:[%s15503_s6 + $0x364] ss:$16 sps:$4 sm:$0xff]   ;;  %v10181_v20 = vld [vmem:[%s15503_s6 + $0x320] ss:$16 sps:$4 sm:$0xff]  }
 0x26d   : > { %5430 = vmatprep.mubr.bf16.mxu1 %v12961_v63  ;;  %6865 = vmatpush2.bf16.msra.mxu1 %v10157_v28  ;;  %v4758_v34 = vpop.f32.mrf.mxu1  ;;  %v15777_v55 = vld [vmem:[#allocation12_spill] sm:$0xff] }
 0x26e   : > { %6866 = vmatprep.subr.bf16.mxu1 %v10165_v26  ;;  %v13468_v38 = vadd.f32 %v4758_v34, %v4645_v46  ;;  %v4647_v51 = vpop.f32.mrf.mxu0  ;;  %v15778_v46 = vld [vmem:[#allocation15_spill] sm:$0xff] }
 0x26f   : > { %6754 = vmatpush2.bf16.msra.mxu0 %v10160_v31  ;;  %v4760_v63 = vpop.f32.mrf.mxu1  ;;  %v10184_v31 = vld [vmem:[%s15503_s6 + $0x100] ss:$16 sps:$4 sm:$0xff]  }
 0x270   : > { %6755 = vmatprep.subr.bf16.mxu0 %v10168_v48  ;;  %v13476_v7 = vadd.f32 %v4760_v63, %v4647_v51  ;;  %v10192_v48 = vld [vmem:[%s15503_s6 + $0x4e4] ss:$16 sps:$4 sm:$0xff]  }
 0x271   : > { %6867 = vmatpush2.bf16.msra.mxu1 %v10163_v17  ;;  %v10187_v17 = vld [vmem:[%s15503_s6 + $0x300] ss:$16 sps:$4 sm:$0xff]  }
 0x272   : > { %5318 = vmatmul.mubr.bf16.gmra.mxu0 %v12918_v47  ;;  %6868 = vmatprep.subr.bf16.mxu1 %v10171_v10  ;;  %v10180_v47 = vld [vmem:[%s15503_s6 + $0x124] ss:$16 sps:$4 sm:$0xff]  }
 0x273   : > { %v4651_v60 = vpop.f32.mrf.mxu0  ;;  %5327 = vmatprep.mubr.bf16.mxu0 %v12969_v8  ;;  %6756 = vmatpush2.bf16.msra.mxu0 %v10166_v1  ;;  %v10175_v8 = vld [vmem:[%s15503_s6 + $0x340] ss:$16 sps:$4 sm:$0xff]  }
 0x274   : > { %v4764_v50 = vpop.f32.mrf.mxu1  ;;  %5431 = vmatmul.mubr.bf16.gmra.mxu1 %v12920_v27  ;;  %6757 = vmatprep.subr.bf16.mxu0 %v10174_v4  ;;  %v10183_v27 = vld [vmem:[%s15503_s6 + $0x324] ss:$16 sps:$4 sm:$0xff]   ;;  %v10190_v1 = vld [vmem:[%s15503_s6 + $0x4e0] ss:$16 sps:$4 sm:$0xff]  }
 0x275   : > { %v13490_v32 = vadd.f32 %v4764_v50, %v4651_v60  ;;  %v4653_v39 = vpop.f32.mrf.mxu0  ;;  %5440 = vmatprep.mubr.bf16.mxu1 %v12981_v54  ;;  %6869 = vmatpush2.bf16.msra.mxu1 %v10169_v11  ;;  %v10198_v60 = vld [vmem:[%s15503_s6 + $0x4c4] ss:$16 sps:$4 sm:$0xff]  }
 0x276   : > { %v4766_v25 = vpop.f32.mrf.mxu1  ;;  %6870 = vmatprep.subr.bf16.mxu1 %v10177_v18 }
 0x277   : > { %v13502_v49 = vadd.f32 %v4766_v25, %v4653_v39  ;;  %v4655_v37 = vpop.f32.mrf.mxu0  ;;  %6758 = vmatpush2.bf16.msra.mxu0 %v10172_v52  ;;  %v15783_v25 = vld [vmem:[#allocation18_spill] sm:$0xff] }
 0x278   : > { %v4768_v54 = vpop.f32.mrf.mxu1  ;;  %6759 = vmatprep.subr.bf16.mxu0 %v10180_v47  ;;  %v15781_v47 = vld [vmem:[#allocation9_spill] sm:$0xff] }
 0x279   : > { %v13507_v35 = vadd.f32 %v4768_v54, %v4655_v37  ;;  %v4657_v61 = vpop.f32.mrf.mxu0  ;;  %6871 = vmatpush2.bf16.msra.mxu1 %v10175_v8 }
 0x27a   : > { %v4770_v28 = vpop.f32.mrf.mxu1  ;;  %5328 = vmatmul.mubr.bf16.gmra.mxu0 %v13001_v22  ;;  %6872 = vmatprep.subr.bf16.mxu1 %v10183_v27  ;;  %v10196_v27 = vld [vmem:[%s15503_s6 + $0x4c0] ss:$16 sps:$4 sm:$0xff]  }
 0x27b   : > { %v13519_v26 = vadd.f32 %v4770_v28, %v4657_v61  ;;  %6760 = vmatpush2.bf16.msra.mxu0 %v10178_v57  ;;  %6763 = vmatprep.mubr.bf16.mxu0 %v15777_v55  ;;  %v15784_v57 = vld [vmem:[#allocation10_spill] sm:$0xff]  ;;  %v10204_v61 = vld [vmem:[%s15503_s6 + $0x4a4] ss:$16 sps:$4 sm:$0xff]  }
 0x27c   : > { %v4807_v21 = vpop.f32.mrf.mxu0  ;;  %5441 = vmatmul.mubr.bf16.gmra.mxu1 %v13009_v33  ;;  %6761 = vmatprep.subr.bf16.mxu0 %v10186_v3  ;;  %v10195_v33 = vld [vmem:[%s15503_s6 + $0x6e4] ss:$16 sps:$4 sm:$0xff]  }
 0x27d   : > { %v4808_v22 = vadd.f32 %v4807_v21, %v13205_v15  ;;  %6873 = vmatpush2.bf16.msra.mxu1 %v10181_v20  ;;  %6876 = vmatprep.mubr.bf16.mxu1 %v15778_v46  ;;  %v15786_v20 = vld [vmem:[#allocation36_spill] sm:$0xff] }
 0x27e   : > { %v4920_v34 = vpop.f32.mrf.mxu1  ;;  %v4809_v10 = vpop.f32.mrf.mxu0  ;;  %6874 = vmatprep.subr.bf16.mxu1 %v10189_v42 }
 0x27f   : > { %v13534_v51 = vadd.f32 %v4920_v34, %v4808_v22  ;;  %v4810_v15 = vadd.f32 %v4809_v10, %v13215_v2  ;;  %6762 = vmatpush2.bf16.msra.mxu0 %v10184_v31  ;;  %v10193_v2 = vld [vmem:[%s15503_s6 + $0x6e0] ss:$16 sps:$4 sm:$0xff]   ;;  %v10207_v31 = vld [vmem:[%s15503_s6 + $0x6a4] ss:$16 sps:$4 sm:$0xff]  }
 0x280   : > { %v4922_v63 = vpop.f32.mrf.mxu1  ;;  %v4811_v4 = vpop.f32.mrf.mxu0  ;;  %6957 = vmatprep.subr.bf16.mxu0 %v10192_v48  ;;  %v10202_v48 = vld [vmem:[%s15503_s6 + $0x4a0] ss:$16 sps:$4 sm:$0xff]  }
 0x281   : > { %15779 = vst [vmem:[#allocation98_spill] sm:$0xff] %v13534_v51  ;;  %v13543_v11 = vadd.f32 %v4922_v63, %v4810_v15  ;;  %v4812_v18 = vadd.f32 %v4811_v4, %v13224_v43  ;;  %6875 = vmatpush2.bf16.msra.mxu1 %v10187_v17  ;;  %v10201_v43 = vld [vmem:[%s15503_s6 + $0x6c4] ss:$16 sps:$4 sm:$0xff]  }
 0x282   : > { %v4924_v52 = vpop.f32.mrf.mxu1  ;;  %v4813_v50 = vpop.f32.mrf.mxu0  ;;  %6764 = vmatmul.mubr.bf16.vlgmr.msra.gmra.mxu0 %v15781_v47  ;;  %7070 = vmatprep.subr.bf16.mxu1 %v10195_v33  ;;  %v10205_v33 = vld [vmem:[%s15503_s6 + $0x6a0] ss:$16 sps:$4 sm:$0xff]   ;;  %v10213_v4 = vld [vmem:[%s15503_s6 + $0x684] ss:$16 sps:$4 sm:$0xff]  }
 0x283   : > { %15780 = vst [vmem:[#allocation101_spill] sm:$0xff] %v13543_v11  ;;  %v13553_v39 = vadd.f32 %v4924_v52, %v4812_v18  ;;  %v4814_v8 = vadd.f32 %v4813_v50, %v13232_v30  ;;  %6773 = vmatprep.mubr.bf16.mxu0 %v15783_v25  ;;  %6958 = vmatpush1.bf16.msra.mxu0 %v10190_v1  ;;  %v10199_v30 = vld [vmem:[%s15503_s6 + $0x6c0] ss:$16 sps:$4 sm:$0xff]  }
 0x284   : > { %v4926_v37 = vpop.f32.mrf.mxu1  ;;  %6877 = vmatmul.mubr.bf16.vlgmr.msra.gmra.mxu1 %v15784_v57  ;;  %6959 = vmatprep.subr.bf16.mxu0 %v10198_v60  ;;  %v15789_v63 = vld [vmem:[#allocation13_spill] sm:$0xff]  ;;  %v15792_v50 = vld [vmem:[#allocation14_spill] sm:$0xff] }
 0x285   : > { %15782 = vst [vmem:[#allocation99_spill] sm:$0xff] %v13553_v39  ;;  %v13564_v54 = vadd.f32 %v4926_v37, %v4814_v8  ;;  %v4817_v3 = vpop.f32.mrf.mxu0  ;;  %6886 = vmatprep.mubr.bf16.mxu1 %v15786_v20  ;;  %7071 = vmatpush1.bf16.msra.mxu1 %v10193_v2  ;;  %v15790_v60 = vld [vmem:[#allocation45_spill] sm:$0xff]  ;;  %v15846_v11 = vld [vmem:[#allocation50_spill] sm:$0xff] }
 0x286   : > { %v4818_v28 = vadd.f32 %v4817_v3, %v13249_v23  ;;  %7072 = vmatprep.subr.bf16.mxu1 %v10201_v43  ;;  %v10210_v23 = vld [vmem:[%s15503_s6 + $0x484] ss:$16 sps:$4 sm:$0xff]   ;;  %v10208_v52 = vld [vmem:[%s15503_s6 + $0x480] ss:$16 sps:$4 sm:$0xff]  }
 0x287   : > { %15785 = vst [vmem:[#allocation102_spill] sm:$0xff] %v13564_v54  ;;  %v4930_v42 = vpop.f32.mrf.mxu1  ;;  %v4819_v21 = vpop.f32.mrf.mxu0  ;;  %6960 = vmatpush1.bf16.msra.mxu0 %v10196_v27  ;;  %v10216_v8 = vld [vmem:[%s15503_s6 + $0x464] ss:$16 sps:$4 sm:$0xff]   ;;  %v15793_v27 = vld [vmem:[#allocation56_spill] sm:$0xff] }
 0x288   : > { %v13577_v22 = vadd.f32 %v4930_v42, %v4818_v28  ;;  %v4820_v17 = vadd.f32 %v4819_v21, %v13258_v40  ;;  %6961 = vmatprep.subr.bf16.mxu0 %v10204_v61  ;;  %v10211_v37 = vld [vmem:[%s15503_s6 + $0x680] ss:$16 sps:$4 sm:$0xff]   ;;  %v10219_v21 = vld [vmem:[%s15503_s6 + $0x664] ss:$16 sps:$4 sm:$0xff]  }
 0x289   : > { %v4932_v34 = vpop.f32.mrf.mxu1  ;;  %v4821_v10 = vpop.f32.mrf.mxu0  ;;  %7073 = vmatpush1.bf16.msra.mxu1 %v10199_v30  ;;  %v15795_v30 = vld [vmem:[#allocation7_spill] sm:$0xff] }
 0x28a   : > { %15787 = vst [vmem:[#allocation100_spill] sm:$0xff] %v13577_v22  ;;  %v13589_v15 = vadd.f32 %v4932_v34, %v4820_v17  ;;  %v4822_v1 = vadd.f32 %v4821_v10, %v13266_v45  ;;  %6774 = vmatmul.mubr.bf16.gmra.mxu0 %v15789_v63  ;;  %7074 = vmatprep.subr.bf16.mxu1 %v10207_v31  ;;  %v15797_v34 = vld [vmem:[#allocation19_spill] sm:$0xff] }
 0x28b   : > { %v4934_v40 = vpop.f32.mrf.mxu1  ;;  %v4823_v18 = vpop.f32.mrf.mxu0  ;;  %6783 = vmatprep.mubr.bf16.mxu0 %v15790_v60  ;;  %6962 = vmatpush1.bf16.msra.mxu0 %v10202_v48  ;;  %v10214_v48 = vld [vmem:[%s15503_s6 + $0x460] ss:$16 sps:$4 sm:$0xff]   ;;  %v861_v10 = vadd.f32 %v15797_v34, %v15795_v30  ;;  %v10255_v22 = vld [vmem:[%s15503_s6 + $0x7a4] ss:$16 sps:$4 sm:$0xff]  }
 0x28c   : > { %15788 = vst [vmem:[#allocation106_spill] sm:$0xff] %v13589_v15  ;;  %v13597_v2 = vadd.f32 %v4934_v40, %v4822_v1  ;;  %v4824_v45 = vadd.f32 %v4823_v18, %v13275_v59  ;;  %6887 = vmatmul.mubr.bf16.gmra.mxu1 %v15792_v50  ;;  %6963 = vmatprep.subr.bf16.mxu0 %v10210_v23  ;;  %v15796_v59 = vld [vmem:[#allocation23_spill] sm:$0xff] }
 0x28d   : > { %v4936_v43 = vpop.f32.mrf.mxu1  ;;  %6896 = vmatprep.mubr.bf16.mxu1 %v15793_v27  ;;  %7075 = vmatpush1.bf16.msra.mxu1 %v10205_v33  ;;  %v865_v28 = vadd.f32 %v15796_v59, %v15795_v30  ;;  %v15798_v23 = vld [vmem:[#allocation11_spill] sm:$0xff]  ;;  %v15799_v33 = vld [vmem:[#allocation24_spill] sm:$0xff]  ;;  %vm1301_vm5 = vcmp.gt.f32.partialorder %v861_v10, 0.0 }
 0x28e   : > { %15791 = vst [vmem:[#allocation103_spill] sm:$0xff] %v13597_v2  ;;  %v13611_v3 = vadd.f32 %v4936_v43, %v4824_v45  ;;  %v4827_v61 = vpop.f32.mrf.mxu0  ;;  %7076 = vmatprep.subr.bf16.mxu1 %v10213_v4  ;;  %v978_v1 = vadd.f32 %v15799_v33, %v15798_v23  ;;  %v10222_v18 = vld [vmem:[%s15503_s6 + $0x444] ss:$16 sps:$4 sm:$0xff]   ;;  %v10220_v34 = vld [vmem:[%s15503_s6 + $0x440] ss:$16 sps:$4 sm:$0xff]  }
 0x28f   : > { %v4828_v42 = vadd.f32 %v4827_v61, %v13292_v9  ;;  %v4940_v31 = vpop.f32.mrf.mxu1  ;;  %6964 = vmatpush1.bf16.msra.mxu0 %v10208_v52  ;;  %v10217_v52 = vld [vmem:[%s15503_s6 + $0x660] ss:$16 sps:$4 sm:$0xff]   ;;  %v1437_v59 = vmul.f32 0.2, %v865_v28  ;;  %vm1309_vm4 = vcmp.gt.f32.partialorder %v865_v28, 0.0 }
 0x290   : > { %15794 = vst [vmem:[#allocation107_spill] sm:$0xff] %v13611_v3  ;;  %v4829_v17 = vpop.f32.mrf.mxu0  ;;  %6965 = vmatprep.subr.bf16.mxu0 %v10216_v8  ;;  %v15801_v43 = vld [vmem:[#allocation21_spill] sm:$0xff]  ;;  %vm1311_vm6 = vcmp.gt.f32.partialorder %v978_v1, 0.0 }
 0x291   : > { %v13626_v40 = vadd.f32 %v4940_v31, %v4828_v42  ;;  %v4830_v9 = vadd.f32 %v4829_v17, %v13300_v24  ;;  %v4942_v4 = vpop.f32.mrf.mxu1  ;;  %7077 = vmatpush1.bf16.msra.mxu1 %v10211_v37  ;;  %v974_v61 = vadd.f32 %v15801_v43, %v15798_v23  ;;  %v15802_v42 = vld [vmem:[#allocation16_spill] sm:$0xff]  ;;  %v10225_v37 = vld [vmem:[%s15503_s6 + $0x644] ss:$16 sps:$4 sm:$0xff]   ;;  %v1429_v43 = vmul.f32 0.2, %v861_v10 }
 0x292   : > { %v4831_v45 = vpop.f32.mrf.mxu0  ;;  %6784 = vmatmul.mubr.bf16.gmra.mxu0 %v15802_v42  ;;  %7078 = vmatprep.subr.bf16.mxu1 %v10219_v21  ;;  %v15804_v17 = vld [vmem:[#allocation77_spill] sm:$0xff]  ;;  %v1439_v21 = vmul.f32 0.2, %v978_v1 }
 0x293   : > { %15800 = vst [vmem:[#allocation104_spill] sm:$0xff] %v13626_v40  ;;  %v13638_v8 = vadd.f32 %v4942_v4, %v4830_v9  ;;  %v4832_v24 = vadd.f32 %v4831_v45, %v13309_v58  ;;  %v4944_v31 = vpop.f32.mrf.mxu1  ;;  %6793 = vmatprep.mubr.bf16.mxu0 %v15804_v17  ;;  %6966 = vmatpush1.bf16.msra.mxu0 %v10214_v48  ;;  %v15805_v9 = vld [vmem:[#allocation17_spill] sm:$0xff]  ;;  %v15807_v48 = vld [vmem:[#allocation88_spill] sm:$0xff]  ;;  %vm1303_vm7 = vcmp.gt.f32.partialorder %v974_v61, 0.0 }
 0x294   : > { %v4833_v33 = vpop.f32.mrf.mxu0  ;;  %6897 = vmatmul.mubr.bf16.gmra.mxu1 %v15805_v9  ;;  %6967 = vmatprep.subr.bf16.mxu0 %v10222_v18  ;;  %v10228_v3 = vld [vmem:[%s15503_s6 + $0x424] ss:$16 sps:$4 sm:$0xff]   ;;  %v10223_v54 = vld [vmem:[%s15503_s6 + $0x640] ss:$16 sps:$4 sm:$0xff]   ;;  %v1557_v2 = vsel %vm1301_vm5, %v861_v10, %v1429_v43 }
 0x295   : > { %15803 = vst [vmem:[#allocation110_spill] sm:$0xff] %v13638_v8  ;;  %v13649_v4 = vadd.f32 %v4944_v31, %v4832_v24  ;;  %v4834_v58 = vadd.f32 %v4833_v33, %v13319_v44  ;;  %v4946_v45 = vpop.f32.mrf.mxu1  ;;  %6906 = vmatprep.mubr.bf16.mxu1 %v15807_v48  ;;  %7079 = vmatpush1.bf16.msra.mxu1 %v10217_v52  ;;  %v1431_v8 = vmul.f32 0.2, %v974_v61  ;;  %v15808_v24 = vld [vmem:[#allocation29_spill] sm:$0xff]  ;;  %v15813_v10 = vld [vmem:[#allocation27_spill] sm:$0xff] }
 0x296   : > { %v875_v18 = vadd.f32 %v15808_v24, %v15795_v30  ;;  %7080 = vmatprep.subr.bf16.mxu1 %v10225_v37  ;;  %v4837_v31 = vpop.f32.mrf.mxu0  ;;  %v10231_v33 = vld [vmem:[%s15503_s6 + $0x624] ss:$16 sps:$4 sm:$0xff]   ;;  %v10226_v40 = vld [vmem:[%s15503_s6 + $0x420] ss:$16 sps:$4 sm:$0xff]   ;;  %v984_v43 = vadd.f32 %v15813_v10, %v15798_v23 }
 0x297   : > { %15806 = vst [vmem:[#allocation105_spill] sm:$0xff] %v13649_v4  ;;  %v13661_v44 = vadd.f32 %v4946_v45, %v4834_v58  ;;  %v1565_v4 = vsel %vm1309_vm4, %v865_v28, %v1437_v59  ;;  %6968 = vmatpush1.bf16.msra.mxu0 %v10220_v34  ;;  %v4838_v52 = vadd.f32 %v4837_v31, %v13328_v0  ;;  %v15810_v24 = vld [vmem:[#allocation25_spill] sm:$0xff]  ;;  %v15811_v58 = vld [vmem:[#allocation30_spill] sm:$0xff] }
 0x298   : > { %v871_v37 = vadd.f32 %v15810_v24, %v15795_v30  ;;  %v988_v45 = vadd.f32 %v15811_v58, %v15798_v23  ;;  %6969 = vmatprep.subr.bf16.mxu0 %v10228_v3  ;;  %v1567_v28 = vsel %vm1311_vm6, %v978_v1, %v1439_v21  ;;  %v4839_v59 = vpop.f32.mrf.mxu0  ;;  %v10234_v0 = vld [vmem:[%s15503_s6 + $0x404] ss:$16 sps:$4 sm:$0xff]   ;;  %v10229_v31 = vld [vmem:[%s15503_s6 + $0x620] ss:$16 sps:$4 sm:$0xff]   ;;  %v13685_v24 = vpack.c.bf16 %v1565_v4, %v1557_v2 }
 0x299   : > { %15809 = vst [vmem:[#allocation111_spill] sm:$0xff] %v13661_v44  ;;  %v4950_v44 = vpop.f32.mrf.mxu1  ;;  %7081 = vmatpush1.bf16.msra.mxu1 %v10223_v54  ;;  %v4840_v3 = vadd.f32 %v4839_v59, %v13336_v13  ;;  %v1453_v1 = vmul.f32 0.2, %v875_v18  ;;  %v15814_v21 = vld [vmem:[#allocation20_spill] sm:$0xff]  ;;  %v1559_v58 = vsel %vm1303_vm7, %v974_v61, %v1431_v8  ;;  %vm1325_vm1 = vcmp.gt.f32.partialorder %v875_v18, 0.0  ;;  %v15816_v59 = vld [vmem:[#allocation22_spill] sm:$0xff] }
 0x29a   : > { %v13680_v34 = vadd.f32 %v4950_v44, %v4838_v52  ;;  %6794 = vmatmul.mubr.bf16.gmra.mxu0 %v15814_v21  ;;  %7082 = vmatprep.subr.bf16.mxu1 %v10231_v33  ;;  %v4841_v44 = vpop.f32.mrf.mxu0  ;;  %v10237_v52 = vld [vmem:[%s15503_s6 + $0x604] ss:$16 sps:$4 sm:$0xff]   ;;  %v13696_v2 = vpack.c.bf16 %v1567_v28, %v1559_v58  ;;  %v10232_v61 = vld [vmem:[%s15503_s6 + $0x400] ss:$16 sps:$4 sm:$0xff]   ;;  %v1445_v8 = vmul.f32 0.2, %v871_v37 }
 0x29b   : > { %v4952_v54 = vpop.f32.mrf.mxu1  ;;  %6803 = vmatprep.mubr.bf16.mxu0 %v13685_v24  ;;  %6970 = vmatpush1.bf16.msra.mxu0 %v10226_v40  ;;  %v4842_v4 = vadd.f32 %v4841_v44, %v13345_v53  ;;  %v1455_v33 = vmul.f32 0.2, %v988_v45  ;;  %v10240_v28 = vld [vmem:[%s15503_s6 + $0x5e4] ss:$16 sps:$4 sm:$0xff]   ;;  %vm1317_vm8 = vcmp.gt.f32.partialorder %v871_v37, 0.0  ;;  %vm1327_vm9 = vcmp.gt.f32.partialorder %v988_v45, 0.0 }
 0x29c   : > { %15812 = vst [vmem:[#allocation108_spill] sm:$0xff] %v13680_v34  ;;  %v13698_v13 = vadd.f32 %v4952_v54, %v4840_v3  ;;  %6907 = vmatmul.mubr.bf16.gmra.mxu1 %v15816_v59  ;;  %6971 = vmatprep.subr.bf16.mxu0 %v10234_v0  ;;  %v4843_v34 = vpop.f32.mrf.mxu0  ;;  %v10235_v40 = vld [vmem:[%s15503_s6 + $0x600] ss:$16 sps:$4 sm:$0xff]   ;;  %v1447_v58 = vmul.f32 0.2, %v984_v43  ;;  %vm1319_vm10 = vcmp.gt.f32.partialorder %v984_v43, 0.0  ;;  %v1573_v15 = vsel %vm1317_vm8, %v871_v37, %v1445_v8 }
 0x29d   : > { %v4954_v10 = vpop.f32.mrf.mxu1  ;;  %6916 = vmatprep.mubr.bf16.mxu1 %v13696_v2  ;;  %7083 = vmatpush1.bf16.msra.mxu1 %v10229_v31  ;;  %v4844_v3 = vadd.f32 %v4843_v34, %v13355_v29  ;;  %v15818_v0 = vld [vmem:[#allocation35_spill] sm:$0xff]  ;;  %v1581_v31 = vsel %vm1325_vm1, %v875_v18, %v1453_v1  ;;  %v1583_v18 = vsel %vm1327_vm9, %v988_v45, %v1455_v33  ;;  %v15824_v8 = vld [vmem:[#allocation26_spill] sm:$0xff] }
 0x29e   : > { %15815 = vst [vmem:[#allocation114_spill] sm:$0xff] %v13698_v13  ;;  %v13709_v53 = vadd.f32 %v4954_v10, %v4842_v4  ;;  %v885_v54 = vadd.f32 %v15818_v0, %v15795_v30  ;;  %7084 = vmatprep.subr.bf16.mxu1 %v10237_v52  ;;  %v10243_v13 = vld [vmem:[%s15503_s6 + $0x7e4] ss:$16 sps:$4 sm:$0xff]   ;;  %v10238_v29 = vld [vmem:[%s15503_s6 + $0x5e0] ss:$16 sps:$4 sm:$0xff]   ;;  %v1575_v45 = vsel %vm1319_vm10, %v984_v43, %v1447_v58 }
 0x29f   : > { %v4956_v44 = vpop.f32.mrf.mxu1  ;;  %6972 = vmatpush1.bf16.msra.mxu0 %v10232_v61  ;;  %v15820_v34 = vld [vmem:[#allocation31_spill] sm:$0xff]  ;;  %v15821_v52 = vld [vmem:[#allocation37_spill] sm:$0xff] }
 0x2a0   : > { %15817 = vst [vmem:[#allocation109_spill] sm:$0xff] %v13709_v53  ;;  %v13721_v4 = vadd.f32 %v4956_v44, %v4844_v3  ;;  %v881_v10 = vadd.f32 %v15820_v34, %v15795_v30  ;;  %v998_v0 = vadd.f32 %v15821_v52, %v15798_v23  ;;  %v4847_v53 = vpop.f32.mrf.mxu0  ;;  %6973 = vmatprep.subr.bf16.mxu0 %v10240_v28  ;;  %v10246_v1 = vld [vmem:[%s15503_s6 + $0x5c4] ss:$16 sps:$4 sm:$0xff]   ;;  %v10241_v44 = vld [vmem:[%s15503_s6 + $0x7e0] ss:$16 sps:$4 sm:$0xff]   ;;  %vm1341_vm11 = vcmp.gt.f32.partialorder %v885_v54, 0.0 }
 0x2a1   : > { %7085 = vmatpush1.bf16.msra.mxu1 %v10235_v40  ;;  %v4848_v61 = vadd.f32 %v4847_v53, %v13370_v6  ;;  %v4960_v3 = vpop.f32.mrf.mxu1  ;;  %v13739_v34 = vpack.c.bf16 %v1581_v31, %v1573_v15  ;;  %v15823_v28 = vld [vmem:[#allocation33_spill] sm:$0xff]  ;;  %v1469_v37 = vmul.f32 0.2, %v885_v54  ;;  %v13751_v15 = vpack.c.bf16 %v1583_v18, %v1575_v45 }
 0x2a2   : > { %15819 = vst [vmem:[#allocation115_spill] sm:$0xff] %v13721_v4  ;;  %v994_v52 = vadd.f32 %v15823_v28, %v15798_v23  ;;  %6804 = vmatmul.mubr.bf16.gmra.mxu0 %v15824_v8  ;;  %7086 = vmatprep.subr.bf16.mxu1 %v10243_v13  ;;  %v4849_v33 = vpop.f32.mrf.mxu0  ;;  %v10249_v6 = vld [vmem:[%s15503_s6 + $0x7c4] ss:$16 sps:$4 sm:$0xff]   ;;  %v10244_v43 = vld [vmem:[%s15503_s6 + $0x5c0] ss:$16 sps:$4 sm:$0xff]   ;;  %vm1333_vm12 = vcmp.gt.f32.partialorder %v881_v10, 0.0 }
 0x2a3   : > { %15822 = vst [vmem:[#allocation112_spill] sm:$0xff] %v13739_v34  ;;  %v13748_v53 = vadd.f32 %v4960_v3, %v4848_v61  ;;  %6813 = vmatprep.mubr.bf16.mxu0 %v13739_v34  ;;  %15826 = vst [vmem:[#allocation113_spill] sm:$0xff] %v13751_v15  ;;  %6974 = vmatpush2.bf16.msra.mxu0 %v10238_v29  ;;  %v4850_v40 = vadd.f32 %v4849_v33, %v13379_v5  ;;  %v4962_v31 = vpop.f32.mrf.mxu1  ;;  %v1461_v13 = vmul.f32 0.2, %v881_v10  ;;  %v15827_v28 = vld [vmem:[#allocation28_spill] sm:$0xff] }
 0x2a4   : > { %v1471_v58 = vmul.f32 0.2, %v998_v0  ;;  %6917 = vmatmul.mubr.bf16.gmra.mxu1 %v15827_v28  ;;  %v4851_v4 = vpop.f32.mrf.mxu0  ;;  %6975 = vmatprep.subr.bf16.mxu0 %v10246_v1  ;;  %v10252_v61 = vld [vmem:[%s15503_s6 + $0x5a4] ss:$16 sps:$4 sm:$0xff]   ;;  %vm1343_vm13 = vcmp.gt.f32.partialorder %v998_v0, 0.0  ;;  %v15829_v1 = vld [vmem:[#allocation42_spill] sm:$0xff] }
 0x2a5   : > { %15825 = vst [vmem:[#allocation118_spill] sm:$0xff] %v13748_v53  ;;  %6926 = vmatprep.mubr.bf16.mxu1 %v13751_v15  ;;  %7087 = vmatpush2.bf16.msra.mxu1 %v10241_v44  ;;  %v13762_v5 = vadd.f32 %v4962_v31, %v4850_v40  ;;  %v4852_v29 = vadd.f32 %v4851_v4, %v13389_v19  ;;  %v4964_v18 = vpop.f32.mrf.mxu1  ;;  %v10247_v3 = vld [vmem:[%s15503_s6 + $0x7c0] ss:$16 sps:$4 sm:$0xff]   ;;  %v1463_v45 = vmul.f32 0.2, %v994_v52  ;;  %vm1335_vm14 = vcmp.gt.f32.partialorder %v994_v52, 0.0 }
 0x2a6   : > { %v895_v33 = vadd.f32 %v15829_v1, %v15795_v30  ;;  %7088 = vmatprep.subr.bf16.mxu1 %v10249_v6  ;;  %v4853_v53 = vpop.f32.mrf.mxu0  ;;  %v1597_v44 = vsel %vm1341_vm11, %v885_v54, %v1469_v37  ;;  %v10250_v31 = vld [vmem:[%s15503_s6 + $0x5a0] ss:$16 sps:$4 sm:$0xff]   ;;  %v1589_v54 = vsel %vm1333_vm12, %v881_v10, %v1461_v13  ;;  %v1599_v37 = vsel %vm1343_vm13, %v998_v0, %v1471_v58 }
 0x2a7   : > { %15828 = vst [vmem:[#allocation119_spill] sm:$0xff] %v13762_v5  ;;  %v13774_v40 = vadd.f32 %v4964_v18, %v4852_v29  ;;  %6976 = vmatpush2.bf16.msra.mxu0 %v10244_v43  ;;  %v4854_v19 = vadd.f32 %v4853_v53, %v13398_v16  ;;  %v4966_v4 = vpop.f32.mrf.mxu1  ;;  %v15831_v6 = vld [vmem:[#allocation38_spill] sm:$0xff]  ;;  %v15832_v5 = vld [vmem:[#allocation43_spill] sm:$0xff]  ;;  %v15833_v53 = vld [vmem:[#allocation40_spill] sm:$0xff] }
 0x2a8   : > { %v891_v1 = vadd.f32 %v15831_v6, %v15795_v30  ;;  %v1008_v39 = vadd.f32 %v15832_v5, %v15798_v23  ;;  %6977 = vmatprep.subr.bf16.mxu0 %v10252_v61  ;;  %v10258_v16 = vld [vmem:[%s15503_s6 + $0x584] ss:$16 sps:$4 sm:$0xff]   ;;  %v13791_v43 = vadd.f32 %v15833_v53, %v15798_v23  ;;  %v10253_v61 = vld [vmem:[%s15503_s6 + $0x7a0] ss:$16 sps:$4 sm:$0xff]   ;;  %v13798_v5 = vpack.c.bf16 %v1597_v44, %v1589_v54 }
 0x2a9   : > { %15830 = vst [vmem:[#allocation116_spill] sm:$0xff] %v13774_v40  ;;  %7089 = vmatpush2.bf16.msra.mxu1 %v10247_v3  ;;  %v13793_v29 = vadd.f32 %v4966_v4, %v4854_v19  ;;  %v4857_v30 = vpop.f32.mrf.mxu0  ;;  %v1485_v10 = vmul.f32 0.2, %v895_v33  ;;  %v15836_v58 = vld [vmem:[#allocation32_spill] sm:$0xff]  ;;  %v1591_v23 = vsel %vm1335_vm14, %v994_v52, %v1463_v45  ;;  %v10261_v18 = vld [vmem:[%s15503_s6 + $0x784] ss:$16 sps:$4 sm:$0xff]  }
 0x2aa   : > { %15835 = vst [vmem:[#allocation117_spill] sm:$0xff] %v13798_v5  ;;  %v4858_v0 = vadd.f32 %v4857_v30, %v13413_v41  ;;  %v4970_v13 = vpop.f32.mrf.mxu1  ;;  %6814 = vmatmul.mubr.bf16.gmra.mxu0 %v15836_v58  ;;  %7090 = vmatprep.subr.bf16.mxu1 %v10255_v22  ;;  %vm1357_vm15 = vcmp.gt.f32.partialorder %v895_v33, 0.0  ;;  %v10638_v3 = vld [vmem:[%s15500_s3] sm:$0xff]  ;;  %v13814_v41 = vpack.c.bf16 %v1599_v37, %v1591_v23  ;;  %v1477_v45 = vmul.f32 0.2, %v891_v1 }
 0x2ab   : > { %15834 = vst [vmem:[#allocation121_spill] sm:$0xff] %v13793_v29  ;;  %v15837_v44 = vld [vmem:[#allocation3_spill] sm:$0xff]  ;;  %6823 = vmatprep.mubr.bf16.mxu0 %v13798_v5  ;;  %6978 = vmatpush2.bf16.msra.mxu0 %v10250_v31  ;;  %v4859_v22 = vpop.f32.mrf.mxu0  ;;  %v1487_v6 = vmul.f32 0.2, %v1008_v39  ;;  %v15841_v53 = vld [vmem:[#allocation34_spill] sm:$0xff]  ;;  %vm1349_vm0 = vcmp.gt.f32.partialorder %v891_v1, 0.0 }
 0x2ac   : > { %v15838_v19 = vsub.s32 5, %v15837_v44  ;;  %15839 = vst [vmem:[#allocation122_spill] sm:$0xff] %v13814_v41  ;;  %v10256_v52 = vld [vmem:[%s15503_s6 + $0x580] ss:$16 sps:$4 sm:$0xff]   ;;  %v13819_v54 = vadd.f32 %v4970_v13, %v4858_v0  ;;  %6927 = vmatmul.mubr.bf16.gmra.mxu1 %v15841_v53  ;;  %v4860_v30 = vadd.f32 %v4859_v22, %v13423_v12  ;;  %6979 = vmatprep.subr.bf16.mxu0 %v10258_v16  ;;  %v10264_v37 = vld [vmem:[%s15503_s6 + $0x564] ss:$16 sps:$4 sm:$0xff]  }
 0x2ad   : > { %v1479_v31 = vmul.f32 0.2, %v13791_v43  ;;  %vm1359_vm2 = vcmp.gt.f32.partialorder %v1008_v39, 0.0  ;;  %v15842_v23 = vsub.s32 7, %v15837_v44  ;;  %6936 = vmatprep.mubr.bf16.mxu1 %v13814_v41  ;;  %7091 = vmatpush2.bf16.msra.mxu1 %v10253_v61  ;;  %v4861_v0 = vpop.f32.mrf.mxu0  ;;  %v10259_v12 = vld [vmem:[%s15503_s6 + $0x780] ss:$16 sps:$4 sm:$0xff]   ;;  %v1613_v61 = vsel %vm1357_vm15, %v895_v33, %v1485_v10 }
 0x2ae   : > { %v13811_v4 = vrot.slane %v10638_v3, %v15838_v19  ;;  %15840 = vst [vmem:[#allocation120_spill] sm:$0xff] %v13819_v54  ;;  %v4972_v19 = vpop.f32.mrf.mxu1  ;;  %v15843_v16 = vld [vmem:[#allocation49_spill] sm:$0xff]  ;;  %v4862_v54 = vadd.f32 %v4861_v0, %v13432_v14  ;;  %7092 = vmatprep.subr.bf16.mxu1 %v10261_v18  ;;  %vm1351_vm3 = vcmp.gt.f32.partialorder %v13791_v43, 0.0  ;;  %v15845_v44 = vld [vmem:[#allocation44_spill] sm:$0xff]  ;;  %v1605_v33 = vsel %vm1349_vm0, %v891_v1, %v1477_v45  ;;  %v15851_v45 = vld [vmem:[#allocation39_spill] sm:$0xff] }
 0x2af   : > { %v13829_v29 = vrot.slane %v10638_v3, %v15842_v23  ;;  %v13837_v22 = vadd.f32 %v4972_v19, %v4860_v30  ;;  %v10267_v3 = vld [vmem:[%s15503_s6 + $0x764] ss:$16 sps:$4 sm:$0xff]   ;;  %6980 = vmatpush2.bf16.msra.mxu0 %v10256_v52  ;;  %v4863_v30 = vpop.f32.mrf.mxu0  ;;  %v10262_v14 = vld [vmem:[%s15503_s6 + $0x560] ss:$16 sps:$4 sm:$0xff]   ;;  %v1615_v10 = vsel %vm1359_vm2, %v1008_v39, %v1487_v6  ;;  %v1607_v39 = vsel %vm1351_vm3, %v13791_v43, %v1479_v31 }
 0x2b0   : > { %v1051_v13 = vadd.f32 %v15843_v16, %v13811_v4  ;;  %v4974_v40 = vpop.f32.mrf.mxu1  ;;  %v1047_v23 = vadd.f32 %v15845_v44, %v13811_v4  ;;  %v4864_v19 = vadd.f32 %v4863_v30, %v13440_v56  ;;  %6981 = vmatprep.subr.bf16.mxu0 %v10264_v37  ;;  %v10265_v52 = vld [vmem:[%s15503_s6 + $0x760] ss:$16 sps:$4 sm:$0xff]   ;;  %v13863_v44 = vpack.c.bf16 %v1613_v61, %v1605_v33  ;;  %v10273_v6 = vld [vmem:[%s15503_s6 + $0x744] ss:$16 sps:$4 sm:$0xff]  }
 0x2b1   : > { %15844 = vst [vmem:[#allocation123_spill] sm:$0xff] %v13837_v22  ;;  %v1164_v16 = vadd.f32 %v15846_v11, %v13829_v29  ;;  %v13852_v18 = vadd.f32 %v4974_v40, %v4862_v54  ;;  %v10270_v11 = vld [vmem:[%s15503_s6 + $0x544] ss:$16 sps:$4 sm:$0xff]   ;;  %7093 = vmatpush2.bf16.msra.mxu1 %v10259_v12  ;;  %v13878_v61 = vpack.c.bf16 %v1615_v10, %v1607_v39  ;;  %v10271_v10 = vld [vmem:[%s15503_s6 + $0x740] ss:$16 sps:$4 sm:$0xff]  }
 0x2b2   : > { %v4976_v0 = vpop.f32.mrf.mxu1  ;;  %15848 = vst [vmem:[#allocation124_spill] sm:$0xff] %v13863_v44  ;;  %v15849_v40 = vld [vmem:[#allocation47_spill] sm:$0xff]  ;;  %v1377_v54 = vmul.f32 0.2, %v1051_v13  ;;  %v4867_v1 = vpop.f32.mrf.mxu0  ;;  %6824 = vmatmul.mubr.bf16.gmra.mxu0 %v15851_v45  ;;  %7094 = vmatprep.subr.bf16.mxu1 %v10267_v3  ;;  %vm1249_vm4 = vcmp.gt.f32.partialorder %v1051_v13, 0.0  ;;  %v15853_v43 = vld [vmem:[#allocation41_spill] sm:$0xff] }
 0x2b3   : > { %15847 = vst [vmem:[#allocation126_spill] sm:$0xff] %v13852_v18  ;;  %v1160_v56 = vadd.f32 %v15849_v40, %v13829_v29  ;;  %v13867_v37 = vadd.f32 %v4976_v0, %v4864_v19  ;;  %v4868_v12 = vadd.f32 %v4867_v1, %v13449_v62  ;;  %6833 = vmatprep.mubr.bf16.mxu0 %v13863_v44  ;;  %15852 = vst [vmem:[#allocation12_spill] sm:$0xff] %v13878_v61  ;;  %v10268_v3 = vld [vmem:[%s15503_s6 + $0x540] ss:$16 sps:$4 sm:$0xff]   ;;  %v10276_v62 = vld [vmem:[%s15503_s6 + $0x524] ss:$16 sps:$4 sm:$0xff]  }
 0x2b4   : > { %6982 = vmatpush2.bf16.msra.mxu0 %v10262_v14  ;;  %v1369_v30 = vmul.f32 0.2, %v1047_v23  ;;  %v1379_v19 = vmul.f32 0.2, %v1164_v16  ;;  %v4980_v0 = vpop.f32.mrf.mxu1  ;;  %6937 = vmatmul.mubr.bf16.gmra.mxu1 %v15853_v43  ;;  %v4869_v31 = vpop.f32.mrf.mxu0  ;;  %vm1241_vm5 = vcmp.gt.f32.partialorder %v1047_v23, 0.0  ;;  %vm1251_vm6 = vcmp.gt.f32.partialorder %v1164_v16, 0.0 }
 0x2b5   : > { %15850 = vst [vmem:[#allocation125_spill] sm:$0xff] %v13867_v37  ;;  %6983 = vmatprep.subr.bf16.mxu0 %v10270_v11  ;;  %v13887_v33 = vadd.f32 %v4980_v0, %v4868_v12  ;;  %6946 = vmatprep.mubr.bf16.mxu1 %v13878_v61  ;;  %v4870_v14 = vadd.f32 %v4869_v31, %v13459_v36  ;;  %v1371_v40 = vmul.f32 0.2, %v1160_v56  ;;  %v15855_v11 = vld [vmem:[#allocation55_spill] sm:$0xff]  ;;  %vm1243_vm7 = vcmp.gt.f32.partialorder %v1160_v56, 0.0  ;;  %v15904_v45 = vld [vmem:[#allocation89_spill] sm:$0xff] }
 0x2b6   : > { %7095 = vmatpush2.bf16.msra.mxu1 %v10265_v52  ;;  %v1061_v1 = vadd.f32 %v15855_v11, %v13811_v4  ;;  %v4982_v39 = vpop.f32.mrf.mxu1  ;;  %v4871_v37 = vpop.f32.mrf.mxu0  ;;  %v10279_v12 = vld [vmem:[%s15503_s6 + $0x724] ss:$16 sps:$4 sm:$0xff]   ;;  %v1505_v0 = vsel %vm1249_vm4, %v1051_v13, %v1377_v54  ;;  %v10274_v31 = vld [vmem:[%s15503_s6 + $0x520] ss:$16 sps:$4 sm:$0xff]   ;;  %v1497_v13 = vsel %vm1241_vm5, %v1047_v23, %v1369_v30  ;;  %v1507_v54 = vsel %vm1251_vm6, %v1164_v16, %v1379_v19 }
 0x2b7   : > { %15854 = vst [vmem:[#allocation15_spill] sm:$0xff] %v13887_v33  ;;  %7096 = vmatprep.subr.bf16.mxu1 %v10273_v6  ;;  %v13900_v52 = vadd.f32 %v4982_v39, %v4870_v14  ;;  %v4872_v36 = vadd.f32 %v4871_v37, %v13468_v38  ;;  %v15857_v11 = vld [vmem:[#allocation51_spill] sm:$0xff]  ;;  %v15858_v6 = vld [vmem:[#allocation57_spill] sm:$0xff]  ;;  %v13921_v39 = vpack.c.bf16 %v1505_v0, %v1497_v13 }
 0x2b8   : > { %6984 = vmatpush2.bf16.msra.mxu0 %v10268_v3  ;;  %v1057_v33 = vadd.f32 %v15857_v11, %v13811_v4  ;;  %v1174_v18 = vadd.f32 %v15858_v6, %v13829_v29  ;;  %v4984_v22 = vpop.f32.mrf.mxu1  ;;  %v4873_v51 = vpop.f32.mrf.mxu0  ;;  %v10282_v38 = vld [vmem:[%s15503_s6 + $0x504] ss:$16 sps:$4 sm:$0xff]   ;;  %v10277_v14 = vld [vmem:[%s15503_s6 + $0x720] ss:$16 sps:$4 sm:$0xff]   ;;  %v1393_v30 = vmul.f32 0.2, %v1061_v1 }
 0x2b9   : > { %15856 = vst [vmem:[#allocation9_spill] sm:$0xff] %v13900_v52  ;;  %6985 = vmatprep.subr.bf16.mxu0 %v10276_v62  ;;  %v13915_v37 = vadd.f32 %v4984_v22, %v4872_v36  ;;  %v4874_v3 = vadd.f32 %v4873_v51, %v13476_v7  ;;  %15860 = vst [vmem:[#allocation10_spill] sm:$0xff] %v13921_v39  ;;  %v15861_v62 = vld [vmem:[#allocation53_spill] sm:$0xff]  ;;  %v15862_v11 = vld [vmem:[#allocation46_spill] sm:$0xff]  ;;  %v1499_v22 = vsel %vm1243_vm7, %v1160_v56, %v1371_v40 }
 0x2ba   : > { %7097 = vmatpush2.bf16.msra.mxu1 %v10271_v10  ;;  %v1170_v23 = vadd.f32 %v15861_v62, %v13829_v29  ;;  %v4986_v16 = vpop.f32.mrf.mxu1  ;;  %v4877_v19 = vpop.f32.mrf.mxu0  ;;  %6834 = vmatmul.mubr.bf16.gmra.mxu0 %v15862_v11  ;;  %v10285_v7 = vld [vmem:[%s15503_s6 + $0x704] ss:$16 sps:$4 sm:$0xff]   ;;  %vm1265_vm1 = vcmp.gt.f32.partialorder %v1061_v1, 0.0  ;;  %v13934_v0 = vpack.c.bf16 %v1507_v54, %v1499_v22  ;;  %v1385_v36 = vmul.f32 0.2, %v1057_v33  ;;  %v15865_v6 = vld [vmem:[#allocation48_spill] sm:$0xff] }
 0x2bb   : > { %15859 = vst [vmem:[#allocation18_spill] sm:$0xff] %v13915_v37  ;;  %7098 = vmatprep.subr.bf16.mxu1 %v10279_v12  ;;  %v13930_v51 = vadd.f32 %v4986_v16, %v4874_v3  ;;  %v4878_v10 = vadd.f32 %v4877_v19, %v13490_v32  ;;  %6989 = vmatprep.mubr.bf16.mxu0 %v13921_v39  ;;  %v10280_v12 = vld [vmem:[%s15503_s6 + $0x500] ss:$16 sps:$4 sm:$0xff]   ;;  %v1395_v56 = vmul.f32 0.2, %v1174_v18  ;;  %vm1257_vm8 = vcmp.gt.f32.partialorder %v1057_v33, 0.0 }
 0x2bc   : > { %6986 = vmatpush2.bf16.msra.mxu0 %v10274_v31  ;;  %15864 = vst [vmem:[#allocation13_spill] sm:$0xff] %v13934_v0  ;;  %v4990_v40 = vpop.f32.mrf.mxu1  ;;  %6947 = vmatmul.mubr.bf16.gmra.mxu1 %v15865_v6  ;;  %v4879_v13 = vpop.f32.mrf.mxu0  ;;  %v10288_v32 = vld [vmem:[%s15503_s6 + $0xec] ss:$16 sps:$4 sm:$0xff]   ;;  %vm1267_vm9 = vcmp.gt.f32.partialorder %v1174_v18, 0.0  ;;  %v10283_v3 = vld [vmem:[%s15503_s6 + $0x700] ss:$16 sps:$4 sm:$0xff]  }
 0x2bd   : > { %15863 = vst [vmem:[#allocation36_spill] sm:$0xff] %v13930_v51  ;;  %6987 = vmatprep.subr.bf16.mxu0 %v10282_v38  ;;  %v13943_v31 = vadd.f32 %v4990_v40, %v4878_v10  ;;  %7102 = vmatprep.mubr.bf16.mxu1 %v13934_v0  ;;  %v4880_v54 = vadd.f32 %v4879_v13, %v13502_v49  ;;  %v1387_v62 = vmul.f32 0.2, %v1170_v23  ;;  %v15867_v38 = vld [vmem:[#allocation62_spill] sm:$0xff]  ;;  %vm1259_vm10 = vcmp.gt.f32.partialorder %v1170_v23, 0.0  ;;  %v15912_v58 = vld [vmem:[#allocation95_spill] sm:$0xff] }
 0x2be   : > { %7099 = vmatpush2.bf16.msra.mxu1 %v10277_v14  ;;  %v1071_v16 = vadd.f32 %v15867_v38, %v13811_v4  ;;  %v4992_v19 = vpop.f32.mrf.mxu1  ;;  %v4881_v22 = vpop.f32.mrf.mxu0  ;;  %v10291_v10 = vld [vmem:[%s15503_s6 + $0x2ec] ss:$16 sps:$4 sm:$0xff]   ;;  %v1521_v14 = vsel %vm1265_vm1, %v1061_v1, %v1393_v30  ;;  %v10286_v13 = vld [vmem:[%s15503_s6 + $0xe8] ss:$16 sps:$4 sm:$0xff]   ;;  %v1513_v1 = vsel %vm1257_vm8, %v1057_v33, %v1385_v36  ;;  %v1523_v30 = vsel %vm1267_vm9, %v1174_v18, %v1395_v56 }
 0x2bf   : > { %15866 = vst [vmem:[#allocation45_spill] sm:$0xff] %v13943_v31  ;;  %7100 = vmatprep.subr.bf16.mxu1 %v10285_v7  ;;  %v13956_v40 = vadd.f32 %v4992_v19, %v4880_v54  ;;  %v4882_v49 = vadd.f32 %v4881_v22, %v13507_v35  ;;  %v15869_v38 = vld [vmem:[#allocation58_spill] sm:$0xff]  ;;  %v15870_v7 = vld [vmem:[#allocation63_spill] sm:$0xff]  ;;  %v13977_v22 = vpack.c.bf16 %v1521_v14, %v1513_v1 }
 0x2c0   : > { %6988 = vmatpush2.bf16.msra.mxu0 %v10280_v12  ;;  %v1067_v51 = vadd.f32 %v15869_v38, %v13811_v4  ;;  %v1184_v31 = vadd.f32 %v15870_v7, %v13829_v29  ;;  %v4994_v37 = vpop.f32.mrf.mxu1  ;;  %v4883_v52 = vpop.f32.mrf.mxu0  ;;  %v10294_v35 = vld [vmem:[%s15503_s6 + $0xcc] ss:$16 sps:$4 sm:$0xff]   ;;  %v10289_v19 = vld [vmem:[%s15503_s6 + $0x2e8] ss:$16 sps:$4 sm:$0xff]   ;;  %v1409_v36 = vmul.f32 0.2, %v1071_v16 }
 0x2c1   : > { %15868 = vst [vmem:[#allocation14_spill] sm:$0xff] %v13956_v40  ;;  %7183 = vmatprep.subr.bf16.mxu0 %v10288_v32  ;;  %v13971_v12 = vadd.f32 %v4994_v37, %v4882_v49  ;;  %v4884_v54 = vadd.f32 %v4883_v52, %v13519_v26  ;;  %15872 = vst [vmem:[#allocation7_spill] sm:$0xff] %v13977_v22  ;;  %v15873_v32 = vld [vmem:[#allocation60_spill] sm:$0xff]  ;;  %v1515_v37 = vsel %vm1259_vm10, %v1170_v23, %v1387_v62  ;;  %v15877_v23 = vld [vmem:[#allocation54_spill] sm:$0xff] }
 0x2c2   : > { %7101 = vmatpush2.bf16.msra.mxu1 %v10283_v3  ;;  %v1180_v33 = vadd.f32 %v15873_v32, %v13829_v29  ;;  %v4996_v18 = vpop.f32.mrf.mxu1  ;;  %v5033_v56 = vpop.f32.mrf.mxu0  ;;  %v15874_v38 = vld [vmem:[#allocation52_spill] sm:$0xff]  ;;  %vm1281_vm11 = vcmp.gt.f32.partialorder %v1071_v16, 0.0  ;;  %v13989_v3 = vpack.c.bf16 %v1523_v30, %v1515_v37  ;;  %v1401_v49 = vmul.f32 0.2, %v1067_v51  ;;  %v15880_v40 = vld [vmem:[#allocation69_spill] sm:$0xff]  ;;  %v15896_v11 = vld [vmem:[#allocation82_spill] sm:$0xff] }
 0x2c3   : > { %15871 = vst [vmem:[#allocation56_spill] sm:$0xff] %v13971_v12  ;;  %6990 = vmatmul.mubr.bf16.vlgmr.msra.gmra.mxu0 %v15874_v38  ;;  %7296 = vmatprep.subr.bf16.mxu1 %v10291_v10  ;;  %v10297_v26 = vld [vmem:[%s15503_s6 + $0x2cc] ss:$16 sps:$4 sm:$0xff]   ;;  %v13986_v52 = vadd.f32 %v4996_v18, %v4884_v54  ;;  %v10292_v14 = vld [vmem:[%s15503_s6 + $0xc8] ss:$16 sps:$4 sm:$0xff]   ;;  %vm1273_vm12 = vcmp.gt.f32.partialorder %v1067_v51, 0.0 }
 0x2c4   : > { %6999 = vmatprep.mubr.bf16.mxu0 %v13977_v22  ;;  %15876 = vst [vmem:[#allocation19_spill] sm:$0xff] %v13989_v3  ;;  %7184 = vmatpush1.bf16.msra.mxu0 %v10286_v13  ;;  %v1411_v10 = vmul.f32 0.2, %v1184_v31  ;;  %v5146_v7 = vpop.f32.mrf.mxu1  ;;  %v5035_v62 = vpop.f32.mrf.mxu0  ;;  %v10300_v1 = vld [vmem:[%s15503_s6 + $0xac] ss:$16 sps:$4 sm:$0xff]   ;;  %vm1283_vm13 = vcmp.gt.f32.partialorder %v1184_v31, 0.0  ;;  %v1529_v22 = vsel %vm1273_vm12, %v1067_v51, %v1401_v49 }
 0x2c5   : > { %15875 = vst [vmem:[#allocation23_spill] sm:$0xff] %v13986_v52  ;;  %7103 = vmatmul.mubr.bf16.vlgmr.msra.gmra.mxu1 %v15877_v23  ;;  %7185 = vmatprep.subr.bf16.mxu0 %v10294_v35  ;;  %v13998_v30 = vadd.f32 %v5146_v7, %v5033_v56  ;;  %v10295_v13 = vld [vmem:[%s15503_s6 + $0x2c8] ss:$16 sps:$4 sm:$0xff]   ;;  %v1403_v54 = vmul.f32 0.2, %v1180_v33  ;;  %v1537_v56 = vsel %vm1281_vm11, %v1071_v16, %v1409_v36  ;;  %vm1275_vm14 = vcmp.gt.f32.partialorder %v1180_v33, 0.0 }
 0x2c6   : > { %7112 = vmatprep.mubr.bf16.mxu1 %v13989_v3  ;;  %7297 = vmatpush1.bf16.msra.mxu1 %v10289_v19  ;;  %v15878_v32 = vld [vmem:[#allocation68_spill] sm:$0xff]  ;;  %v5148_v35 = vpop.f32.mrf.mxu1  ;;  %v5037_v37 = vpop.f32.mrf.mxu0  ;;  %v1539_v16 = vsel %vm1283_vm13, %v1184_v31, %v1411_v10  ;;  %v15883_v31 = vld [vmem:[#allocation59_spill] sm:$0xff] }
 0x2c7   : > { %v1081_v18 = vadd.f32 %v15878_v32, %v13811_v4  ;;  %7298 = vmatprep.subr.bf16.mxu1 %v10297_v26  ;;  %v10303_v52 = vld [vmem:[%s15503_s6 + $0x2ac] ss:$16 sps:$4 sm:$0xff]   ;;  %v14010_v7 = vadd.f32 %v5148_v35, %v5035_v62  ;;  %v10298_v19 = vld [vmem:[%s15503_s6 + $0xa8] ss:$16 sps:$4 sm:$0xff]   ;;  %v1194_v26 = vadd.f32 %v15880_v40, %v13829_v29  ;;  %v14029_v62 = vpack.c.bf16 %v1537_v56, %v1529_v22 }
 0x2c8   : > { %7186 = vmatpush1.bf16.msra.mxu0 %v10292_v14  ;;  %v15879_v12 = vld [vmem:[#allocation64_spill] sm:$0xff]  ;;  %v5150_v3 = vpop.f32.mrf.mxu1  ;;  %v5039_v23 = vpop.f32.mrf.mxu0  ;;  %v15882_v40 = vld [vmem:[#allocation66_spill] sm:$0xff]  ;;  %v1531_v10 = vsel %vm1275_vm14, %v1180_v33, %v1403_v54  ;;  %v15885_v33 = vld [vmem:[#allocation61_spill] sm:$0xff] }
 0x2c9   : > { %v1077_v32 = vadd.f32 %v15879_v12, %v13811_v4  ;;  %7187 = vmatprep.subr.bf16.mxu0 %v10300_v1  ;;  %v10306_v36 = vld [vmem:[%s15503_s6 + $0x8c] ss:$16 sps:$4 sm:$0xff]   ;;  %v14024_v14 = vadd.f32 %v5150_v3, %v5037_v37  ;;  %v10301_v12 = vld [vmem:[%s15503_s6 + $0x2a8] ss:$16 sps:$4 sm:$0xff]   ;;  %15881 = vst [vmem:[#allocation11_spill] sm:$0xff] %v14029_v62  ;;  %v1190_v1 = vadd.f32 %v15882_v40, %v13829_v29  ;;  %vm1297_vm15 = vcmp.gt.f32.partialorder %v1081_v18, 0.0 }
 0x2ca   : > { %7299 = vmatpush1.bf16.msra.mxu1 %v10295_v13  ;;  %v1425_v35 = vmul.f32 0.2, %v1081_v18  ;;  %v5152_v51 = vpop.f32.mrf.mxu1  ;;  %v5043_v49 = vpop.f32.mrf.mxu0  ;;  %v10309_v3 = vld [vmem:[%s15503_s6 + $0x28c] ss:$16 sps:$4 sm:$0xff]   ;;  %v14041_v22 = vpack.c.bf16 %v1539_v16, %v1531_v10  ;;  %v10304_v37 = vld [vmem:[%s15503_s6 + $0x88] ss:$16 sps:$4 sm:$0xff]  }
 0x2cb   : > { %7000 = vmatmul.mubr.bf16.gmra.mxu0 %v15883_v31  ;;  %7300 = vmatprep.subr.bf16.mxu1 %v10303_v52  ;;  %v14038_v13 = vadd.f32 %v5152_v51, %v5039_v23  ;;  %v1417_v56 = vmul.f32 0.2, %v1077_v32  ;;  %v1427_v52 = vmul.f32 0.2, %v1194_v26  ;;  %v10312_v23 = vld [vmem:[%s15503_s6 + $0x6c] ss:$16 sps:$4 sm:$0xff]  }
 0x2cc   : > { %7009 = vmatprep.mubr.bf16.mxu0 %v14029_v62  ;;  %15884 = vst [vmem:[#allocation24_spill] sm:$0xff] %v14041_v22  ;;  %7188 = vmatpush1.bf16.msra.mxu0 %v10298_v19  ;;  %v5156_v40 = vpop.f32.mrf.mxu1  ;;  %v5045_v54 = vpop.f32.mrf.mxu0  ;;  %vm1289_vm0 = vcmp.gt.f32.partialorder %v1077_v32, 0.0  ;;  %vm1299_vm2 = vcmp.gt.f32.partialorder %v1194_v26, 0.0  ;;  %v10307_v19 = vld [vmem:[%s15503_s6 + $0x288] ss:$16 sps:$4 sm:$0xff]   ;;  %vm1291_vm3 = vcmp.gt.f32.partialorder %v1190_v1, 0.0 }
 0x2cd   : > { %7113 = vmatmul.mubr.bf16.gmra.mxu1 %v15885_v33  ;;  %7189 = vmatprep.subr.bf16.mxu0 %v10306_v36  ;;  %v14050_v16 = vadd.f32 %v5156_v40, %v5043_v49  ;;  %v1419_v51 = vmul.f32 0.2, %v1190_v1  ;;  %v15886_v10 = vld [vmem:[#allocation74_spill] sm:$0xff]  ;;  %v1553_v49 = vsel %vm1297_vm15, %v1081_v18, %v1425_v35  ;;  %v15888_v38 = vld [vmem:[#allocation75_spill] sm:$0xff]  ;;  %v1545_v39 = vsel %vm1289_vm0, %v1077_v32, %v1417_v56 }
 0x2ce   : > { %7122 = vmatprep.mubr.bf16.mxu1 %v14041_v22  ;;  %7301 = vmatpush1.bf16.msra.mxu1 %v10301_v12  ;;  %v1091_v33 = vadd.f32 %v15886_v10, %v13811_v4  ;;  %v5158_v36 = vpop.f32.mrf.mxu1  ;;  %v5047_v62 = vpop.f32.mrf.mxu0  ;;  %v10315_v31 = vld [vmem:[%s15503_s6 + $0x26c] ss:$16 sps:$4 sm:$0xff]   ;;  %v10310_v12 = vld [vmem:[%s15503_s6 + $0x68] ss:$16 sps:$4 sm:$0xff]   ;;  %v1555_v18 = vsel %vm1299_vm2, %v1194_v26, %v1427_v52 }
 0x2cf   : > { %7302 = vmatprep.subr.bf16.mxu1 %v10309_v3  ;;  %v14062_v40 = vadd.f32 %v5158_v36, %v5045_v54  ;;  %v15887_v22 = vld [vmem:[#allocation70_spill] sm:$0xff]  ;;  %v1204_v3 = vadd.f32 %v15888_v38, %v13829_v29  ;;  %v14081_v54 = vpack.c.bf16 %v1553_v49, %v1545_v39  ;;  %v15890_v38 = vld [vmem:[#allocation72_spill] sm:$0xff]  ;;  %v15891_v26 = vld [vmem:[#allocation65_spill] sm:$0xff]  ;;  %v1547_v52 = vsel %vm1291_vm3, %v1190_v1, %v1419_v51 }
 0x2d0   : > { %7190 = vmatpush1.bf16.msra.mxu0 %v10304_v37  ;;  %v1087_v10 = vadd.f32 %v15887_v22, %v13811_v4  ;;  %v5160_v0 = vpop.f32.mrf.mxu1  ;;  %v5049_v6 = vpop.f32.mrf.mxu0  ;;  %v10318_v35 = vld [vmem:[%s15503_s6 + $0x4c] ss:$16 sps:$4 sm:$0xff]   ;;  %v10313_v22 = vld [vmem:[%s15503_s6 + $0x268] ss:$16 sps:$4 sm:$0xff]   ;;  %v1441_v36 = vmul.f32 0.2, %v1091_v33  ;;  %v14093_v39 = vpack.c.bf16 %v1555_v18, %v1547_v52 }
 0x2d1   : > { %7191 = vmatprep.subr.bf16.mxu0 %v10312_v23  ;;  %v14076_v37 = vadd.f32 %v5160_v0, %v5047_v62  ;;  %15889 = vst [vmem:[#allocation21_spill] sm:$0xff] %v14081_v54  ;;  %v1200_v23 = vadd.f32 %v15890_v38, %v13829_v29  ;;  %v10321_v0 = vld [vmem:[%s15503_s6 + $0x24c] ss:$16 sps:$4 sm:$0xff]   ;;  %vm1313_vm4 = vcmp.gt.f32.partialorder %v1091_v33, 0.0  ;;  %v15893_v1 = vld [vmem:[#allocation67_spill] sm:$0xff]  ;;  %vm1315_vm6 = vcmp.gt.f32.partialorder %v1204_v3, 0.0 }
 0x2d2   : > { %7303 = vmatpush1.bf16.msra.mxu1 %v10307_v19  ;;  %v5162_v32 = vpop.f32.mrf.mxu1  ;;  %v5053_v56 = vpop.f32.mrf.mxu0  ;;  %15892 = vst [vmem:[#allocation16_spill] sm:$0xff] %v14093_v39  ;;  %v10316_v19 = vld [vmem:[%s15503_s6 + $0x48] ss:$16 sps:$4 sm:$0xff]   ;;  %v1433_v49 = vmul.f32 0.2, %v1087_v10  ;;  %vm1305_vm5 = vcmp.gt.f32.partialorder %v1087_v10, 0.0 }
 0x2d3   : > { %7010 = vmatmul.mubr.bf16.gmra.mxu0 %v15891_v26  ;;  %7304 = vmatprep.subr.bf16.mxu1 %v10315_v31  ;;  %v14090_v62 = vadd.f32 %v5162_v32, %v5049_v6  ;;  %v1443_v31 = vmul.f32 0.2, %v1204_v3  ;;  %v10324_v6 = vld [vmem:[%s15503_s6 + $0x2c] ss:$16 sps:$4 sm:$0xff]   ;;  %v1435_v32 = vmul.f32 0.2, %v1200_v23 }
 0x2d4   : > { %7019 = vmatprep.mubr.bf16.mxu0 %v14081_v54  ;;  %7192 = vmatpush1.bf16.msra.mxu0 %v10310_v12  ;;  %v5166_v38 = vpop.f32.mrf.mxu1  ;;  %v5055_v51 = vpop.f32.mrf.mxu0  ;;  %v10319_v12 = vld [vmem:[%s15503_s6 + $0x248] ss:$16 sps:$4 sm:$0xff]   ;;  %v10327_v26 = vld [vmem:[%s15503_s6 + $0x22c] ss:$16 sps:$4 sm:$0xff]   ;;  %vm1307_vm7 = vcmp.gt.f32.partialorder %v1200_v23, 0.0  ;;  %v1561_v44 = vsel %vm1305_vm5, %v1087_v10, %v1433_v49 }
 0x2d5   : > { %7123 = vmatmul.mubr.bf16.gmra.mxu1 %v15893_v1  ;;  %7193 = vmatprep.subr.bf16.mxu0 %v10318_v35  ;;  %v14102_v18 = vadd.f32 %v5166_v38, %v5053_v56  ;;  %v15894_v52 = vld [vmem:[#allocation81_spill] sm:$0xff]  ;;  %v1569_v56 = vsel %vm1313_vm4, %v1091_v33, %v1441_v36  ;;  %v1571_v33 = vsel %vm1315_vm6, %v1204_v3, %v1443_v31  ;;  %v10330_v36 = vld [vmem:[%s15503_s6 + $0xc] ss:$16 sps:$4 sm:$0xff]   ;;  %v15899_v3 = vld [vmem:[#allocation71_spill] sm:$0xff] }
 0x2d6   : > { %7132 = vmatprep.mubr.bf16.mxu1 %v14093_v39  ;;  %7305 = vmatpush1.bf16.msra.mxu1 %v10313_v22  ;;  %v1101_v1 = vadd.f32 %v15894_v52, %v13811_v4  ;;  %v5168_v35 = vpop.f32.mrf.mxu1  ;;  %v5057_v54 = vpop.f32.mrf.mxu0  ;;  %v10322_v22 = vld [vmem:[%s15503_s6 + $0x28] ss:$16 sps:$4 sm:$0xff]   ;;  %v1563_v31 = vsel %vm1307_vm7, %v1200_v23, %v1435_v32 }
 0x2d7   : > { %7306 = vmatprep.subr.bf16.mxu1 %v10321_v0  ;;  %v14114_v38 = vadd.f32 %v5168_v35, %v5055_v51  ;;  %v15895_v39 = vld [vmem:[#allocation76_spill] sm:$0xff]  ;;  %v1214_v0 = vadd.f32 %v15896_v11, %v13829_v29  ;;  %v14133_v51 = vpack.c.bf16 %v1569_v56, %v1561_v44  ;;  %v15898_v11 = vld [vmem:[#allocation79_spill] sm:$0xff]  ;;  %v14145_v44 = vpack.c.bf16 %v1571_v33, %v1563_v31  ;;  %v15901_v23 = vld [vmem:[#allocation73_spill] sm:$0xff] }
 0x2d8   : > { %7194 = vmatpush1.bf16.msra.mxu0 %v10316_v19  ;;  %v1097_v52 = vadd.f32 %v15895_v39, %v13811_v4  ;;  %v5170_v61 = vpop.f32.mrf.mxu1  ;;  %v5059_v43 = vpop.f32.mrf.mxu0  ;;  %v10325_v39 = vld [vmem:[%s15503_s6 + $0x228] ss:$16 sps:$4 sm:$0xff]   ;;  %v1457_v35 = vmul.f32 0.2, %v1101_v1  ;;  %vm1329_vm1 = vcmp.gt.f32.partialorder %v1101_v1, 0.0 }
 0x2d9   : > { %7195 = vmatprep.subr.bf16.mxu0 %v10324_v6  ;;  %v14128_v19 = vadd.f32 %v5170_v61, %v5057_v54  ;;  %15897 = vst [vmem:[#allocation77_spill] sm:$0xff] %v14133_v51  ;;  %v1210_v6 = vadd.f32 %v15898_v11, %v13829_v29  ;;  %v10333_v61 = vld [vmem:[%s15503_s6 + $0x20c] ss:$16 sps:$4 sm:$0xff]   ;;  %15900 = vst [vmem:[#allocation17_spill] sm:$0xff] %v14145_v44  ;;  %vm1331_vm9 = vcmp.gt.f32.partialorder %v1214_v0, 0.0  ;;  %v15902_v31 = vld [vmem:[#allocation87_spill] sm:$0xff] }
 0x2da   : > { %7307 = vmatpush1.bf16.msra.mxu1 %v10319_v12  ;;  %v5172_v10 = vpop.f32.mrf.mxu1  ;;  %v5063_v49 = vpop.f32.mrf.mxu0  ;;  %v10328_v12 = vld [vmem:[%s15503_s6 + $0x8] ss:$16 sps:$4 sm:$0xff]   ;;  %v1449_v56 = vmul.f32 0.2, %v1097_v52  ;;  %vm1321_vm8 = vcmp.gt.f32.partialorder %v1097_v52, 0.0 }
 0x2db   : > { %7020 = vmatmul.mubr.bf16.gmra.mxu0 %v15899_v3  ;;  %7308 = vmatprep.subr.bf16.mxu1 %v10327_v26  ;;  %v14142_v54 = vadd.f32 %v5172_v10, %v5059_v43  ;;  %v1459_v26 = vmul.f32 0.2, %v1214_v0  ;;  %v10336_v43 = vld [vmem:[%s15503_s6 + $0x1ec] ss:$16 sps:$4 sm:$0xff]   ;;  %v1451_v10 = vmul.f32 0.2, %v1210_v6 }
 0x2dc   : > { %7029 = vmatprep.mubr.bf16.mxu0 %v14133_v51  ;;  %7196 = vmatpush1.bf16.msra.mxu0 %v10322_v22  ;;  %v5176_v11 = vpop.f32.mrf.mxu1  ;;  %v5065_v32 = vpop.f32.mrf.mxu0  ;;  %v10331_v22 = vld [vmem:[%s15503_s6 + $0x208] ss:$16 sps:$4 sm:$0xff]   ;;  %v10339_v3 = vld [vmem:[%s15503_s6 + $0x3ec] ss:$16 sps:$4 sm:$0xff]   ;;  %vm1323_vm10 = vcmp.gt.f32.partialorder %v1210_v6, 0.0  ;;  %v1577_v5 = vsel %vm1321_vm8, %v1097_v52, %v1449_v56 }
 0x2dd   : > { %7133 = vmatmul.mubr.bf16.gmra.mxu1 %v15901_v23  ;;  %7197 = vmatprep.subr.bf16.mxu0 %v10330_v36  ;;  %v14154_v33 = vadd.f32 %v5176_v11, %v5063_v49  ;;  %v1111_v23 = vadd.f32 %v15902_v31, %v13811_v4  ;;  %v1585_v49 = vsel %vm1329_vm1, %v1101_v1, %v1457_v35  ;;  %v10342_v35 = vld [vmem:[%s15503_s6 + $0x1cc] ss:$16 sps:$4 sm:$0xff]  }
 0x2de   : > { %7142 = vmatprep.mubr.bf16.mxu1 %v14145_v44  ;;  %7309 = vmatpush1.bf16.msra.mxu1 %v10325_v39  ;;  %v5178_v36 = vpop.f32.mrf.mxu1  ;;  %v5067_v51 = vpop.f32.mrf.mxu0  ;;  %v10334_v39 = vld [vmem:[%s15503_s6 + $0x1e8] ss:$16 sps:$4 sm:$0xff]   ;;  %v1587_v1 = vsel %vm1331_vm9, %v1214_v0, %v1459_v26  ;;  %v1579_v26 = vsel %vm1323_vm10, %v1210_v6, %v1451_v10 }
 0x2df   : > { %7310 = vmatprep.subr.bf16.mxu1 %v10333_v61  ;;  %v14166_v11 = vadd.f32 %v5178_v36, %v5065_v32  ;;  %v15903_v44 = vld [vmem:[#allocation83_spill] sm:$0xff]  ;;  %v1224_v61 = vadd.f32 %v15904_v45, %v13829_v29  ;;  %v14185_v32 = vpack.c.bf16 %v1585_v49, %v1577_v5  ;;  %v15906_v45 = vld [vmem:[#allocation85_spill] sm:$0xff]  ;;  %v1473_v36 = vmul.f32 0.2, %v1111_v23  ;;  %v15907_v0 = vld [vmem:[#allocation78_spill] sm:$0xff] }
 0x2e0   : > { %7198 = vmatpush1.bf16.msra.mxu0 %v10328_v12  ;;  %v1107_v31 = vadd.f32 %v15903_v44, %v13811_v4  ;;  %v5180_v41 = vpop.f32.mrf.mxu1  ;;  %v5069_v53 = vpop.f32.mrf.mxu0  ;;  %v10337_v44 = vld [vmem:[%s15503_s6 + $0x3e8] ss:$16 sps:$4 sm:$0xff]   ;;  %vm1345_vm11 = vcmp.gt.f32.partialorder %v1111_v23, 0.0  ;;  %v14197_v5 = vpack.c.bf16 %v1587_v1, %v1579_v26 }
 0x2e1   : > { %7199 = vmatprep.subr.bf16.mxu0 %v10336_v43  ;;  %v14180_v12 = vadd.f32 %v5180_v41, %v5067_v51  ;;  %15905 = vst [vmem:[#allocation88_spill] sm:$0xff] %v14185_v32  ;;  %v1220_v43 = vadd.f32 %v15906_v45, %v13829_v29  ;;  %v10345_v41 = vld [vmem:[%s15503_s6 + $0x3cc] ss:$16 sps:$4 sm:$0xff]   ;;  %vm1347_vm13 = vcmp.gt.f32.partialorder %v1224_v61, 0.0 }
 0x2e2   : > { %7311 = vmatpush1.bf16.msra.mxu1 %v10331_v22  ;;  %v5182_v52 = vpop.f32.mrf.mxu1  ;;  %v5073_v56 = vpop.f32.mrf.mxu0  ;;  %15908 = vst [vmem:[#allocation29_spill] sm:$0xff] %v14197_v5  ;;  %v10340_v22 = vld [vmem:[%s15503_s6 + $0x1c8] ss:$16 sps:$4 sm:$0xff]   ;;  %v1465_v49 = vmul.f32 0.2, %v1107_v31  ;;  %vm1337_vm12 = vcmp.gt.f32.partialorder %v1107_v31, 0.0 }
 0x2e3   : > { %7030 = vmatmul.mubr.bf16.gmra.mxu0 %v15907_v0  ;;  %7312 = vmatprep.subr.bf16.mxu1 %v10339_v3  ;;  %v14194_v51 = vadd.f32 %v5182_v52, %v5069_v53  ;;  %v1475_v3 = vmul.f32 0.2, %v1224_v61  ;;  %v15909_v6 = vld [vmem:[#allocation80_spill] sm:$0xff]  ;;  %v1467_v52 = vmul.f32 0.2, %v1220_v43  ;;  %v15910_v26 = vld [vmem:[#allocation94_spill] sm:$0xff] }
 0x2e4   : > { %7039 = vmatprep.mubr.bf16.mxu0 %v14185_v32  ;;  %7200 = vmatpush2.bf16.msra.mxu0 %v10334_v39  ;;  %v5186_v45 = vpop.f32.mrf.mxu1  ;;  %v5075_v10 = vpop.f32.mrf.mxu0  ;;  %v10348_v53 = vld [vmem:[%s15503_s6 + $0x1ac] ss:$16 sps:$4 sm:$0xff]   ;;  %v10343_v39 = vld [vmem:[%s15503_s6 + $0x3c8] ss:$16 sps:$4 sm:$0xff]   ;;  %vm1339_vm14 = vcmp.gt.f32.partialorder %v1220_v43, 0.0  ;;  %v1593_v34 = vsel %vm1337_vm12, %v1107_v31, %v1465_v49 }
 0x2e5   : > { %7143 = vmatmul.mubr.bf16.gmra.mxu1 %v15909_v6  ;;  %7201 = vmatprep.subr.bf16.mxu0 %v10342_v35  ;;  %v14206_v1 = vadd.f32 %v5186_v45, %v5073_v56  ;;  %v1121_v6 = vadd.f32 %v15910_v26, %v13811_v4  ;;  %v10351_v0 = vld [vmem:[%s15503_s6 + $0x3ac] ss:$16 sps:$4 sm:$0xff]   ;;  %v1601_v56 = vsel %vm1345_vm11, %v1111_v23, %v1473_v36 }
 0x2e6   : > { %7152 = vmatprep.mubr.bf16.mxu1 %v14197_v5  ;;  %7313 = vmatpush2.bf16.msra.mxu1 %v10337_v44  ;;  %v5188_v35 = vpop.f32.mrf.mxu1  ;;  %v5077_v32 = vpop.f32.mrf.mxu0  ;;  %v10346_v44 = vld [vmem:[%s15503_s6 + $0x1a8] ss:$16 sps:$4 sm:$0xff]   ;;  %v1603_v23 = vsel %vm1347_vm13, %v1224_v61, %v1475_v3  ;;  %v10354_v36 = vld [vmem:[%s15503_s6 + $0x18c] ss:$16 sps:$4 sm:$0xff]   ;;  %v1595_v3 = vsel %vm1339_vm14, %v1220_v43, %v1467_v52 }
 0x2e7   : > { %7314 = vmatprep.subr.bf16.mxu1 %v10345_v41  ;;  %v14218_v45 = vadd.f32 %v5188_v35, %v5075_v10  ;;  %v15911_v5 = vld [vmem:[#allocation90_spill] sm:$0xff]  ;;  %v1234_v41 = vadd.f32 %v15912_v58, %v13829_v29  ;;  %v15914_v58 = vld [vmem:[#allocation92_spill] sm:$0xff]  ;;  %vm1361_vm15 = vcmp.gt.f32.partialorder %v1121_v6, 0.0 }
 0x2e8   : > { %7202 = vmatpush2.bf16.msra.mxu0 %v10340_v22  ;;  %v1117_v26 = vadd.f32 %v15911_v5, %v13811_v4  ;;  %v5190_v15 = vpop.f32.mrf.mxu1  ;;  %v5079_v28 = vpop.f32.mrf.mxu0  ;;  %v10349_v4 = vld [vmem:[%s15503_s6 + $0x3a8] ss:$16 sps:$4 sm:$0xff]   ;;  %v14237_v5 = vpack.c.bf16 %v1601_v56, %v1593_v34  ;;  %v1230_v10 = vadd.f32 %v15914_v58, %v13829_v29  ;;  %v14249_v34 = vpack.c.bf16 %v1603_v23, %v1595_v3 }
 0x2e9   : > { %7203 = vmatprep.subr.bf16.mxu0 %v10348_v53  ;;  %v14232_v22 = vadd.f32 %v5190_v15, %v5077_v32  ;;  %v1489_v53 = vmul.f32 0.2, %v1121_v6  ;;  %v15915_v61 = vld [vmem:[#allocation84_spill] sm:$0xff]  ;;  %v15917_v43 = vld [vmem:[#allocation86_spill] sm:$0xff]  ;;  %vm1363_vm2 = vcmp.gt.f32.partialorder %v1234_v41, 0.0 }
 0x2ea   : > { %7315 = vmatpush2.bf16.msra.mxu1 %v10343_v39  ;;  %15913 = vst [vmem:[#allocation25_spill] sm:$0xff] %v14237_v5  ;;  %v5192_v31 = vpop.f32.mrf.mxu1  ;;  %v5083_v49 = vpop.f32.mrf.mxu0  ;;  %v10357_v15 = vld [vmem:[%s15503_s6 + $0x38c] ss:$16 sps:$4 sm:$0xff]   ;;  %15916 = vst [vmem:[#allocation30_spill] sm:$0xff] %v14249_v34  ;;  %v10352_v29 = vld [vmem:[%s15503_s6 + $0x188] ss:$16 sps:$4 sm:$0xff]  }
 0x2eb   : > { %7040 = vmatmul.mubr.bf16.gmra.mxu0 %v15915_v61  ;;  %7316 = vmatprep.subr.bf16.mxu1 %v10351_v0  ;;  %v14246_v32 = vadd.f32 %v5192_v31, %v5079_v28  ;;  %v1481_v39 = vmul.f32 0.2, %v1117_v26  ;;  %v1491_v0 = vmul.f32 0.2, %v1234_v41  ;;  %v10360_v28 = vld [vmem:[%s15503_s6 + $0x16c] ss:$16 sps:$4 sm:$0xff]   ;;  %v1617_v3 = vsel %vm1361_vm15, %v1121_v6, %v1489_v53 }
 0x2ec   : > { %7049 = vmatprep.mubr.bf16.mxu0 %v14237_v5  ;;  %7204 = vmatpush2.bf16.msra.mxu0 %v10346_v44  ;;  %v5196_v35 = vpop.f32.mrf.mxu1  ;;  %v5085_v52 = vpop.f32.mrf.mxu0  ;;  %vm1353_vm0 = vcmp.gt.f32.partialorder %v1117_v26, 0.0  ;;  %v10355_v44 = vld [vmem:[%s15503_s6 + $0x388] ss:$16 sps:$4 sm:$0xff]   ;;  %v1483_v23 = vmul.f32 0.2, %v1230_v10  ;;  %vm1355_vm3 = vcmp.gt.f32.partialorder %v1230_v10, 0.0 }
 0x2ed   : > { %7153 = vmatmul.mubr.bf16.gmra.mxu1 %v15917_v43  ;;  %7205 = vmatprep.subr.bf16.mxu0 %v10354_v36  ;;  %v14258_v56 = vadd.f32 %v5196_v35, %v5083_v49  ;;  %v10363_v36 = vld [vmem:[%s15503_s6 + $0x36c] ss:$16 sps:$4 sm:$0xff]   ;;  %v1609_v43 = vsel %vm1353_vm0, %v1117_v26, %v1481_v39  ;;  %v10361_v53 = vld [vmem:[%s15503_s6 + $0x368] ss:$16 sps:$4 sm:$0xff]  }
 0x2ee   : > { %7162 = vmatprep.mubr.bf16.mxu1 %v14249_v34  ;;  %7317 = vmatpush2.bf16.msra.mxu1 %v10349_v4  ;;  %v5198_v58 = vpop.f32.mrf.mxu1  ;;  %v5087_v31 = vpop.f32.mrf.mxu0  ;;  %v10358_v4 = vld [vmem:[%s15503_s6 + $0x168] ss:$16 sps:$4 sm:$0xff]   ;;  %v10366_v5 = vld [vmem:[%s15503_s6 + $0x14c] ss:$16 sps:$4 sm:$0xff]   ;;  %v1611_v26 = vsel %vm1355_vm3, %v1230_v10, %v1483_v23 }
 0x2ef   : > { %7318 = vmatprep.subr.bf16.mxu1 %v10357_v15  ;;  %v14268_v49 = vadd.f32 %v5198_v58, %v5085_v52  ;;  %v1619_v15 = vsel %vm1363_vm2, %v1234_v41, %v1491_v0  ;;  %v10369_v41 = vld [vmem:[%s15503_s6 + $0x34c] ss:$16 sps:$4 sm:$0xff]   ;;  %v10367_v23 = vld [vmem:[%s15503_s6 + $0x348] ss:$16 sps:$4 sm:$0xff]  }
 0x2f0   : > { %7206 = vmatpush2.bf16.msra.mxu0 %v10352_v29  ;;  %v5200_v35 = vpop.f32.mrf.mxu1  ;;  %v5089_v34 = vpop.f32.mrf.mxu0  ;;  %v14283_v29 = vpack.c.bf16 %v1617_v3, %v1609_v43  ;;  %v14293_v0 = vpack.c.bf16 %v1619_v15, %v1611_v26  ;;  %v10364_v43 = vld [vmem:[%s15503_s6 + $0x148] ss:$16 sps:$4 sm:$0xff]   ;;  %v10372_v10 = vld [vmem:[%s15503_s6 + $0x12c] ss:$16 sps:$4 sm:$0xff]  }
 0x2f1   : > { %7207 = vmatprep.subr.bf16.mxu0 %v10360_v28  ;;  %v14278_v6 = vadd.f32 %v5200_v35, %v5087_v31  ;;  %v15918_v28 = vld [vmem:[#allocation91_spill] sm:$0xff]  ;;  %v15920_v31 = vld [vmem:[#allocation93_spill] sm:$0xff] }
 0x2f2   : > { %7319 = vmatpush2.bf16.msra.mxu1 %v10355_v44  ;;  %v5202_v52 = vpop.f32.mrf.mxu1  ;;  %v5093_v58 = vpop.f32.mrf.mxu0  ;;  %15919 = vst [vmem:[#allocation27_spill] sm:$0xff] %v14293_v0  ;;  %v10370_v15 = vld [vmem:[%s15503_s6 + $0x128] ss:$16 sps:$4 sm:$0xff]  }
 0x2f3   : > { %7050 = vmatmul.mubr.bf16.gmra.mxu0 %v15918_v28  ;;  %7320 = vmatprep.subr.bf16.mxu1 %v10363_v36  ;;  %v14290_v39 = vadd.f32 %v5202_v52, %v5089_v34 }
 0x2f4   : > { %7059 = vmatprep.mubr.bf16.mxu0 %v14283_v29  ;;  %7208 = vmatpush2.bf16.msra.mxu0 %v10358_v4  ;;  %v5206_v44 = vpop.f32.mrf.mxu1  ;;  %v5095_v36 = vpop.f32.mrf.mxu0 }
 0x2f5   : > { %7163 = vmatmul.mubr.bf16.gmra.mxu1 %v15920_v31  ;;  %7209 = vmatprep.subr.bf16.mxu0 %v10366_v5  ;;  %v14302_v34 = vadd.f32 %v5206_v44, %v5093_v58  ;;  %v10375_v5 = vld [vmem:[%s15503_s6 + $0x32c] ss:$16 sps:$4 sm:$0xff]  }
 0x2f6   : > { %7172 = vmatprep.mubr.bf16.mxu1 %v14293_v0  ;;  %7321 = vmatpush2.bf16.msra.mxu1 %v10361_v53  ;;  %v5208_v3 = vpop.f32.mrf.mxu1  ;;  %v5097_v4 = vpop.f32.mrf.mxu0  ;;  %v10378_v58 = vld [vmem:[%s15503_s6 + $0x10c] ss:$16 sps:$4 sm:$0xff]  }
 0x2f7   : > { %7322 = vmatprep.subr.bf16.mxu1 %v10369_v41  ;;  %v14311_v35 = vadd.f32 %v5208_v3, %v5095_v36  ;;  %v10373_v41 = vld [vmem:[%s15503_s6 + $0x328] ss:$16 sps:$4 sm:$0xff]  }
 0x2f8   : > { %7210 = vmatpush2.bf16.msra.mxu0 %v10364_v43  ;;  %v5210_v52 = vpop.f32.mrf.mxu1  ;;  %v5099_v53 = vpop.f32.mrf.mxu0  ;;  %v15921_v36 = vld [vmem:[#allocation96_spill] sm:$0xff] }
 0x2f9   : > { %7211 = vmatprep.subr.bf16.mxu0 %v10372_v10  ;;  %v14319_v26 = vadd.f32 %v5210_v52, %v5097_v4  ;;  %v10381_v10 = vld [vmem:[%s15503_s6 + $0x30c] ss:$16 sps:$4 sm:$0xff]   ;;  %v15922_v52 = vld [vmem:[#allocation97_spill] sm:$0xff] }
 0x2fa   : > { %7323 = vmatpush2.bf16.msra.mxu1 %v10367_v23  ;;  %v5212_v44 = vpop.f32.mrf.mxu1  ;;  %v5103_v43 = vpop.f32.mrf.mxu0  ;;  %v10376_v23 = vld [vmem:[%s15503_s6 + $0x108] ss:$16 sps:$4 sm:$0xff]  }
 0x2fb   : > { %7060 = vmatmul.mubr.bf16.gmra.mxu0 %v15921_v36  ;;  %7324 = vmatprep.subr.bf16.mxu1 %v10375_v5  ;;  %v14328_v3 = vadd.f32 %v5212_v44, %v5099_v53  ;;  %v10384_v5 = vld [vmem:[%s15503_s6 + $0x4ec] ss:$16 sps:$4 sm:$0xff]  }
 0x2fc   : > { %7212 = vmatpush2.bf16.msra.mxu0 %v10370_v15  ;;  %7215 = vmatprep.mubr.bf16.mxu0 %v15777_v55  ;;  %v5216_v4 = vpop.f32.mrf.mxu1  ;;  %v5105_v0 = vpop.f32.mrf.mxu0  ;;  %v10379_v55 = vld [vmem:[%s15503_s6 + $0x308] ss:$16 sps:$4 sm:$0xff]  }
 0x2fd   : > { %7173 = vmatmul.mubr.bf16.gmra.mxu1 %v15922_v52  ;;  %7213 = vmatprep.subr.bf16.mxu0 %v10378_v58  ;;  %v14338_v36 = vadd.f32 %v5216_v4, %v5103_v43  ;;  %v10387_v58 = vld [vmem:[%s15503_s6 + $0x6ec] ss:$16 sps:$4 sm:$0xff]  }
 0x2fe   : > { %7325 = vmatpush2.bf16.msra.mxu1 %v10373_v41  ;;  %7328 = vmatprep.mubr.bf16.mxu1 %v15778_v46  ;;  %v5218_v15 = vpop.f32.mrf.mxu1  ;;  %v5107_v53 = vpop.f32.mrf.mxu0  ;;  %v10382_v41 = vld [vmem:[%s15503_s6 + $0x4e8] ss:$16 sps:$4 sm:$0xff]   ;;  %v10390_v4 = vld [vmem:[%s15503_s6 + $0x4cc] ss:$16 sps:$4 sm:$0xff]  }
 0x2ff   : > { %7326 = vmatprep.subr.bf16.mxu1 %v10381_v10  ;;  %v14347_v44 = vadd.f32 %v5218_v15, %v5105_v0  ;;  %v10385_v0 = vld [vmem:[%s15503_s6 + $0x6e8] ss:$16 sps:$4 sm:$0xff]  }
 0x300   : > { %7214 = vmatpush2.bf16.msra.mxu0 %v10376_v23  ;;  %v5220_v43 = vpop.f32.mrf.mxu1  ;;  %v5109_v46 = vpop.f32.mrf.mxu0 }
 0x301   : > { %7409 = vmatprep.subr.bf16.mxu0 %v10384_v5  ;;  %v14355_v52 = vadd.f32 %v5220_v43, %v5107_v53  ;;  %v10393_v5 = vld [vmem:[%s15503_s6 + $0x6cc] ss:$16 sps:$4 sm:$0xff]  }
 0x302   : > { %7327 = vmatpush2.bf16.msra.mxu1 %v10379_v55  ;;  %v5222_v10 = vpop.f32.mrf.mxu1  ;;  %v5259_v23 = vpop.f32.mrf.mxu0  ;;  %v10388_v55 = vld [vmem:[%s15503_s6 + $0x4c8] ss:$16 sps:$4 sm:$0xff]  }
 0x303   : > { %7216 = vmatmul.mubr.bf16.vlgmr.msra.gmra.mxu0 %v15781_v47  ;;  %7522 = vmatprep.subr.bf16.mxu1 %v10387_v58  ;;  %v14364_v15 = vadd.f32 %v5222_v10, %v5109_v46  ;;  %v5260_v31 = vadd.f32 %v5259_v23, %v13998_v30  ;;  %v10396_v58 = vld [vmem:[%s15503_s6 + $0x4ac] ss:$16 sps:$4 sm:$0xff]   ;;  %v10391_v30 = vld [vmem:[%s15503_s6 + $0x6c8] ss:$16 sps:$4 sm:$0xff]  }
 0x304   : > { %7225 = vmatprep.mubr.bf16.mxu0 %v15783_v25  ;;  %7410 = vmatpush1.bf16.msra.mxu0 %v10382_v41  ;;  %v5372_v53 = vpop.f32.mrf.mxu1  ;;  %v5261_v47 = vpop.f32.mrf.mxu0  ;;  %v10402_v10 = vld [vmem:[%s15503_s6 + $0x48c] ss:$16 sps:$4 sm:$0xff]  }
 0x305   : > { %7329 = vmatmul.mubr.bf16.vlgmr.msra.gmra.mxu1 %v15784_v57  ;;  %7411 = vmatprep.subr.bf16.mxu0 %v10390_v4  ;;  %v14375_v43 = vadd.f32 %v5372_v53, %v5260_v31  ;;  %v5262_v25 = vadd.f32 %v5261_v47, %v14010_v7  ;;  %v10399_v57 = vld [vmem:[%s15503_s6 + $0x6ac] ss:$16 sps:$4 sm:$0xff]  }
 0x306   : > { %7338 = vmatprep.mubr.bf16.mxu1 %v15786_v20  ;;  %7523 = vmatpush1.bf16.msra.mxu1 %v10385_v0  ;;  %v5374_v41 = vpop.f32.mrf.mxu1  ;;  %v5263_v46 = vpop.f32.mrf.mxu0  ;;  %v10394_v20 = vld [vmem:[%s15503_s6 + $0x4a8] ss:$16 sps:$4 sm:$0xff]   ;;  %v10405_v47 = vld [vmem:[%s15503_s6 + $0x68c] ss:$16 sps:$4 sm:$0xff]  }
 0x307   : > { %7524 = vmatprep.subr.bf16.mxu1 %v10393_v5  ;;  %v14385_v4 = vadd.f32 %v5374_v41, %v5262_v25  ;;  %v5264_v31 = vadd.f32 %v5263_v46, %v14024_v14  ;;  %v10397_v14 = vld [vmem:[%s15503_s6 + $0x6a8] ss:$16 sps:$4 sm:$0xff]   ;;  %v10408_v41 = vld [vmem:[%s15503_s6 + $0x46c] ss:$16 sps:$4 sm:$0xff]  }
 0x308   : > { %7412 = vmatpush1.bf16.msra.mxu0 %v10388_v55  ;;  %v5376_v7 = vpop.f32.mrf.mxu1  ;;  %v5265_v0 = vpop.f32.mrf.mxu0 }
 0x309   : > { %7413 = vmatprep.subr.bf16.mxu0 %v10396_v58  ;;  %v14394_v23 = vadd.f32 %v5376_v7, %v5264_v31  ;;  %v5266_v5 = vadd.f32 %v5265_v0, %v14038_v13  ;;  %v10400_v13 = vld [vmem:[%s15503_s6 + $0x488] ss:$16 sps:$4 sm:$0xff]  }
 0x30a   : > { %7525 = vmatpush1.bf16.msra.mxu1 %v10391_v30  ;;  %v5378_v55 = vpop.f32.mrf.mxu1  ;;  %v5269_v53 = vpop.f32.mrf.mxu0 }
 0x30b   : > { %7226 = vmatmul.mubr.bf16.gmra.mxu0 %v15789_v63  ;;  %7526 = vmatprep.subr.bf16.mxu1 %v10399_v57  ;;  %v14404_v58 = vadd.f32 %v5378_v55, %v5266_v5  ;;  %v5270_v25 = vadd.f32 %v5269_v53, %v14050_v16  ;;  %v10403_v16 = vld [vmem:[%s15503_s6 + $0x688] ss:$16 sps:$4 sm:$0xff]  }
 0x30c   : > { %7235 = vmatprep.mubr.bf16.mxu0 %v15790_v60  ;;  %7414 = vmatpush1.bf16.msra.mxu0 %v10394_v20  ;;  %v5382_v30 = vpop.f32.mrf.mxu1  ;;  %v5271_v63 = vpop.f32.mrf.mxu0 }
 0x30d   : > { %15923 = vst [vmem:[#allocation20_spill] sm:$0xff] %v14404_v58  ;;  %7339 = vmatmul.mubr.bf16.gmra.mxu1 %v15792_v50  ;;  %7415 = vmatprep.subr.bf16.mxu0 %v10402_v10  ;;  %v14415_v46 = vadd.f32 %v5382_v30, %v5270_v25  ;;  %v5272_v60 = vadd.f32 %v5271_v63, %v14062_v40  ;;  %v10411_v50 = vld [vmem:[%s15503_s6 + $0x66c] ss:$16 sps:$4 sm:$0xff]  }
 0x30e   : > { %7348 = vmatprep.mubr.bf16.mxu1 %v15793_v27  ;;  %7527 = vmatpush1.bf16.msra.mxu1 %v10397_v14  ;;  %v5384_v57 = vpop.f32.mrf.mxu1  ;;  %v5273_v31 = vpop.f32.mrf.mxu0  ;;  %v10406_v27 = vld [vmem:[%s15503_s6 + $0x468] ss:$16 sps:$4 sm:$0xff]   ;;  %v10414_v10 = vld [vmem:[%s15503_s6 + $0x44c] ss:$16 sps:$4 sm:$0xff]  }
 0x30f   : > { %7528 = vmatprep.subr.bf16.mxu1 %v10405_v47  ;;  %v14425_v20 = vadd.f32 %v5384_v57, %v5272_v60  ;;  %v5274_v7 = vadd.f32 %v5273_v31, %v14076_v37  ;;  %v10409_v37 = vld [vmem:[%s15503_s6 + $0x668] ss:$16 sps:$4 sm:$0xff]   ;;  %v10417_v47 = vld [vmem:[%s15503_s6 + $0x64c] ss:$16 sps:$4 sm:$0xff]  }
 0x310   : > { %7416 = vmatpush1.bf16.msra.mxu0 %v10400_v13  ;;  %v5386_v40 = vpop.f32.mrf.mxu1  ;;  %v5275_v0 = vpop.f32.mrf.mxu0  ;;  %v10420_v63 = vld [vmem:[%s15503_s6 + $0x42c] ss:$16 sps:$4 sm:$0xff]  }
 0x311   : > { %15924 = vst [vmem:[#allocation22_spill] sm:$0xff] %v14425_v20  ;;  %7417 = vmatprep.subr.bf16.mxu0 %v10408_v41  ;;  %v14434_v5 = vadd.f32 %v5386_v40, %v5274_v7  ;;  %v5276_v14 = vadd.f32 %v5275_v0, %v14090_v62  ;;  %v10412_v62 = vld [vmem:[%s15503_s6 + $0x448] ss:$16 sps:$4 sm:$0xff]   ;;  %v10426_v7 = vld [vmem:[%s15503_s6 + $0x40c] ss:$16 sps:$4 sm:$0xff]  }
 0x312   : > { %7529 = vmatpush1.bf16.msra.mxu1 %v10403_v16  ;;  %v5388_v55 = vpop.f32.mrf.mxu1  ;;  %v5279_v53 = vpop.f32.mrf.mxu0  ;;  %v16000_v58 = vld [vmem:[#allocation116_spill] sm:$0xff] }
 0x313   : > { %15925 = vst [vmem:[#allocation35_spill] sm:$0xff] %v14434_v5  ;;  %7236 = vmatmul.mubr.bf16.gmra.mxu0 %v15802_v42  ;;  %7530 = vmatprep.subr.bf16.mxu1 %v10411_v50  ;;  %v14444_v25 = vadd.f32 %v5388_v55, %v5276_v14  ;;  %v5280_v13 = vadd.f32 %v5279_v53, %v14102_v18  ;;  %v10415_v18 = vld [vmem:[%s15503_s6 + $0x648] ss:$16 sps:$4 sm:$0xff]   ;;  %v10429_v14 = vld [vmem:[%s15503_s6 + $0x60c] ss:$16 sps:$4 sm:$0xff]  }
 0x314   : > { %7245 = vmatprep.mubr.bf16.mxu0 %v15804_v17  ;;  %7418 = vmatpush1.bf16.msra.mxu0 %v10406_v27  ;;  %v5392_v30 = vpop.f32.mrf.mxu1  ;;  %v5281_v42 = vpop.f32.mrf.mxu0 }
 0x315   : > { %15926 = vst [vmem:[#allocation31_spill] sm:$0xff] %v14444_v25  ;;  %7349 = vmatmul.mubr.bf16.gmra.mxu1 %v15805_v9  ;;  %7419 = vmatprep.subr.bf16.mxu0 %v10414_v10  ;;  %v14455_v41 = vadd.f32 %v5392_v30, %v5280_v13  ;;  %v5282_v17 = vadd.f32 %v5281_v42, %v14114_v38  ;;  %v10423_v9 = vld [vmem:[%s15503_s6 + $0x62c] ss:$16 sps:$4 sm:$0xff]  }
 0x316   : > { %7358 = vmatprep.mubr.bf16.mxu1 %v15807_v48  ;;  %7531 = vmatpush1.bf16.msra.mxu1 %v10409_v37  ;;  %v5394_v60 = vpop.f32.mrf.mxu1  ;;  %v5283_v16 = vpop.f32.mrf.mxu0  ;;  %v10418_v48 = vld [vmem:[%s15503_s6 + $0x428] ss:$16 sps:$4 sm:$0xff]  }
 0x317   : > { %15927 = vst [vmem:[#allocation37_spill] sm:$0xff] %v14455_v41  ;;  %7532 = vmatprep.subr.bf16.mxu1 %v10417_v47  ;;  %v14465_v57 = vadd.f32 %v5394_v60, %v5282_v17  ;;  %v5284_v31 = vadd.f32 %v5283_v16, %v14128_v19  ;;  %v10421_v19 = vld [vmem:[%s15503_s6 + $0x628] ss:$16 sps:$4 sm:$0xff]   ;;  %v10432_v47 = vld [vmem:[%s15503_s6 + $0x5ec] ss:$16 sps:$4 sm:$0xff]  }
 0x318   : > { %7420 = vmatpush1.bf16.msra.mxu0 %v10412_v62  ;;  %v5396_v38 = vpop.f32.mrf.mxu1  ;;  %v5285_v50 = vpop.f32.mrf.mxu0 }
 0x319   : > { %15928 = vst [vmem:[#allocation33_spill] sm:$0xff] %v14465_v57  ;;  %7421 = vmatprep.subr.bf16.mxu0 %v10420_v63  ;;  %v14474_v27 = vadd.f32 %v5396_v38, %v5284_v31  ;;  %v5286_v40 = vadd.f32 %v5285_v50, %v14142_v54  ;;  %v10424_v54 = vld [vmem:[%s15503_s6 + $0x408] ss:$16 sps:$4 sm:$0xff]  }
 0x31a   : > { %7533 = vmatpush1.bf16.msra.mxu1 %v10415_v18  ;;  %v5398_v0 = vpop.f32.mrf.mxu1  ;;  %v5289_v10 = vpop.f32.mrf.mxu0  ;;  %v10438_v18 = vld [vmem:[%s15503_s6 + $0x5cc] ss:$16 sps:$4 sm:$0xff]  }
 0x31b   : > { %15929 = vst [vmem:[#allocation26_spill] sm:$0xff] %v14474_v27  ;;  %7246 = vmatmul.mubr.bf16.gmra.mxu0 %v15814_v21  ;;  %7534 = vmatprep.subr.bf16.mxu1 %v10423_v9  ;;  %v14484_v37 = vadd.f32 %v5398_v0, %v5286_v40  ;;  %v5290_v55 = vadd.f32 %v5289_v10, %v14154_v33  ;;  %v10427_v33 = vld [vmem:[%s15503_s6 + $0x608] ss:$16 sps:$4 sm:$0xff]   ;;  %v10444_v0 = vld [vmem:[%s15503_s6 + $0x5ac] ss:$16 sps:$4 sm:$0xff]  }
 0x31c   : > { %7255 = vmatprep.mubr.bf16.mxu0 %v13685_v24  ;;  %7422 = vmatpush1.bf16.msra.mxu0 %v10418_v48  ;;  %v5402_v53 = vpop.f32.mrf.mxu1  ;;  %v5291_v21 = vpop.f32.mrf.mxu0  ;;  %v10441_v48 = vld [vmem:[%s15503_s6 + $0x7cc] ss:$16 sps:$4 sm:$0xff]  }
 0x31d   : > { %15930 = vst [vmem:[#allocation42_spill] sm:$0xff] %v14484_v37  ;;  %7359 = vmatmul.mubr.bf16.gmra.mxu1 %v15816_v59  ;;  %7423 = vmatprep.subr.bf16.mxu0 %v10426_v7  ;;  %v14495_v13 = vadd.f32 %v5402_v53, %v5290_v55  ;;  %v5292_v24 = vadd.f32 %v5291_v21, %v14166_v11  ;;  %v10435_v59 = vld [vmem:[%s15503_s6 + $0x7ec] ss:$16 sps:$4 sm:$0xff]   ;;  %v10439_v55 = vld [vmem:[%s15503_s6 + $0x7c8] ss:$16 sps:$4 sm:$0xff]  }
 0x31e   : > { %7368 = vmatprep.mubr.bf16.mxu1 %v13696_v2  ;;  %7535 = vmatpush1.bf16.msra.mxu1 %v10421_v19  ;;  %v5404_v62 = vpop.f32.mrf.mxu1  ;;  %v5293_v30 = vpop.f32.mrf.mxu0  ;;  %v10430_v2 = vld [vmem:[%s15503_s6 + $0x5e8] ss:$16 sps:$4 sm:$0xff]   ;;  %v10447_v21 = vld [vmem:[%s15503_s6 + $0x7ac] ss:$16 sps:$4 sm:$0xff]  }
 0x31f   : > { %15931 = vst [vmem:[#allocation38_spill] sm:$0xff] %v14495_v13  ;;  %7536 = vmatprep.subr.bf16.mxu1 %v10429_v14  ;;  %v14505_v42 = vadd.f32 %v5404_v62, %v5292_v24  ;;  %v5294_v63 = vadd.f32 %v5293_v30, %v14180_v12  ;;  %v10433_v12 = vld [vmem:[%s15503_s6 + $0x7e8] ss:$16 sps:$4 sm:$0xff]   ;;  %v10450_v30 = vld [vmem:[%s15503_s6 + $0x58c] ss:$16 sps:$4 sm:$0xff]  }
 0x320   : > { %7424 = vmatpush1.bf16.msra.mxu0 %v10424_v54  ;;  %v5406_v11 = vpop.f32.mrf.mxu1  ;;  %v5295_v17 = vpop.f32.mrf.mxu0  ;;  %v15935_v7 = vld [vmem:[#allocation112_spill] sm:$0xff]  ;;  %v15938_v14 = vld [vmem:[#allocation113_spill] sm:$0xff] }
 0x321   : > { %15932 = vst [vmem:[#allocation43_spill] sm:$0xff] %v14505_v42  ;;  %7425 = vmatprep.subr.bf16.mxu0 %v10432_v47  ;;  %v14514_v60 = vadd.f32 %v5406_v11, %v5294_v63  ;;  %v5296_v16 = vadd.f32 %v5295_v17, %v14194_v51  ;;  %v10436_v51 = vld [vmem:[%s15503_s6 + $0x5c8] ss:$16 sps:$4 sm:$0xff]  }
 0x322   : > { %7537 = vmatpush1.bf16.msra.mxu1 %v10427_v33  ;;  %v5408_v9 = vpop.f32.mrf.mxu1  ;;  %v5299_v31 = vpop.f32.mrf.mxu0  ;;  %v15936_v19 = vld [vmem:[#allocation28_spill] sm:$0xff] }
 0x323   : > { %15933 = vst [vmem:[#allocation40_spill] sm:$0xff] %v14514_v60  ;;  %7256 = vmatmul.mubr.bf16.gmra.mxu0 %v15824_v8  ;;  %7538 = vmatprep.subr.bf16.mxu1 %v10435_v59  ;;  %v14524_v38 = vadd.f32 %v5408_v9, %v5296_v16  ;;  %v5300_v50 = vadd.f32 %v5299_v31, %v14206_v1  ;;  %v15941_v17 = vld [vmem:[#allocation32_spill] sm:$0xff]  ;;  %v15943_v9 = vld [vmem:[#allocation117_spill] sm:$0xff] }
 0x324   : > { %7265 = vmatprep.mubr.bf16.mxu0 %v15935_v7  ;;  %7426 = vmatpush2.bf16.msra.mxu0 %v10430_v2  ;;  %v5412_v40 = vpop.f32.mrf.mxu1  ;;  %v5301_v8 = vpop.f32.mrf.mxu0  ;;  %v10456_v7 = vld [vmem:[%s15503_s6 + $0x56c] ss:$16 sps:$4 sm:$0xff]  }
 0x325   : > { %15934 = vst [vmem:[#allocation3_spill] sm:$0xff] %v14524_v38  ;;  %7369 = vmatmul.mubr.bf16.gmra.mxu1 %v15936_v19  ;;  %7427 = vmatprep.subr.bf16.mxu0 %v10438_v18  ;;  %v14535_v10 = vadd.f32 %v5412_v40, %v5300_v50  ;;  %v5302_v1 = vadd.f32 %v5301_v8, %v14218_v45  ;;  %v10442_v45 = vld [vmem:[%s15503_s6 + $0x5a8] ss:$16 sps:$4 sm:$0xff]   ;;  %v10453_v18 = vld [vmem:[%s15503_s6 + $0x78c] ss:$16 sps:$4 sm:$0xff]  }
 0x326   : > { %7378 = vmatprep.mubr.bf16.mxu1 %v15938_v14  ;;  %7539 = vmatpush2.bf16.msra.mxu1 %v10433_v12  ;;  %v5414_v54 = vpop.f32.mrf.mxu1  ;;  %v5303_v53 = vpop.f32.mrf.mxu0  ;;  %v15946_v40 = vld [vmem:[#allocation122_spill] sm:$0xff] }
 0x327   : > { %15937 = vst [vmem:[#allocation49_spill] sm:$0xff] %v14535_v10  ;;  %7540 = vmatprep.subr.bf16.mxu1 %v10441_v48  ;;  %v14545_v47 = vadd.f32 %v5414_v54, %v5302_v1  ;;  %v5304_v24 = vadd.f32 %v5303_v53, %v14232_v22  ;;  %v10445_v22 = vld [vmem:[%s15503_s6 + $0x7a8] ss:$16 sps:$4 sm:$0xff]   ;;  %v10459_v14 = vld [vmem:[%s15503_s6 + $0x76c] ss:$16 sps:$4 sm:$0xff]  }
 0x328   : > { %7428 = vmatpush2.bf16.msra.mxu0 %v10436_v51  ;;  %v5416_v33 = vpop.f32.mrf.mxu1  ;;  %v5305_v62 = vpop.f32.mrf.mxu0  ;;  %v15944_v48 = vld [vmem:[#allocation34_spill] sm:$0xff] }
 0x329   : > { %15939 = vst [vmem:[#allocation44_spill] sm:$0xff] %v14545_v47  ;;  %7429 = vmatprep.subr.bf16.mxu0 %v10444_v0  ;;  %v14554_v59 = vadd.f32 %v5416_v33, %v5304_v24  ;;  %v5306_v63 = vadd.f32 %v5305_v62, %v14246_v32  ;;  %v10448_v32 = vld [vmem:[%s15503_s6 + $0x588] ss:$16 sps:$4 sm:$0xff]  }
 0x32a   : > { %7541 = vmatpush2.bf16.msra.mxu1 %v10439_v55  ;;  %v5418_v2 = vpop.f32.mrf.mxu1  ;;  %v5309_v11 = vpop.f32.mrf.mxu0  ;;  %v10451_v19 = vld [vmem:[%s15503_s6 + $0x788] ss:$16 sps:$4 sm:$0xff]  }
 0x32b   : > { %15940 = vst [vmem:[#allocation50_spill] sm:$0xff] %v14554_v59  ;;  %7266 = vmatmul.mubr.bf16.gmra.mxu0 %v15941_v17  ;;  %7542 = vmatprep.subr.bf16.mxu1 %v10447_v21  ;;  %v14564_v16 = vadd.f32 %v5418_v2, %v5306_v63  ;;  %v5310_v12 = vadd.f32 %v5309_v11, %v14258_v56  ;;  %v10462_v21 = vld [vmem:[%s15503_s6 + $0x54c] ss:$16 sps:$4 sm:$0xff]   ;;  %v10556_v10 = vld [vmem:[%s15506_s9 + $0x1d0] ss:$8 sps:$4 sm:$0xff]  }
 0x32c   : > { %7275 = vmatprep.mubr.bf16.mxu0 %v15943_v9  ;;  %7430 = vmatpush2.bf16.msra.mxu0 %v10442_v45  ;;  %v5422_v31 = vpop.f32.mrf.mxu1  ;;  %v5311_v50 = vpop.f32.mrf.mxu0  ;;  %v10465_v63 = vld [vmem:[%s15503_s6 + $0x74c] ss:$16 sps:$4 sm:$0xff]  }
 0x32d   : > { %15942 = vst [vmem:[#allocation47_spill] sm:$0xff] %v14564_v16  ;;  %7379 = vmatmul.mubr.bf16.gmra.mxu1 %v15944_v48  ;;  %7431 = vmatprep.subr.bf16.mxu0 %v10450_v30  ;;  %v14575_v51 = vadd.f32 %v5422_v31, %v5310_v12  ;;  %v5312_v56 = vadd.f32 %v5311_v50, %v14268_v49  ;;  %v10454_v49 = vld [vmem:[%s15503_s6 + $0x568] ss:$16 sps:$4 sm:$0xff]   ;;  %v10468_v9 = vld [vmem:[%s15503_s6 + $0x52c] ss:$16 sps:$4 sm:$0xff]  }
 0x32e   : > { %7388 = vmatprep.mubr.bf16.mxu1 %v15946_v40  ;;  %7543 = vmatpush2.bf16.msra.mxu1 %v10445_v22  ;;  %v5424_v8 = vpop.f32.mrf.mxu1  ;;  %v5313_v0 = vpop.f32.mrf.mxu0  ;;  %v15949_v30 = vld [vmem:[#allocation39_spill] sm:$0xff]  ;;  %v15951_v11 = vld [vmem:[#allocation124_spill] sm:$0xff] }
 0x32f   : > { %15945 = vst [vmem:[#allocation55_spill] sm:$0xff] %v14575_v51  ;;  %7544 = vmatprep.subr.bf16.mxu1 %v10453_v18  ;;  %v14585_v1 = vadd.f32 %v5424_v8, %v5312_v56  ;;  %v5314_v55 = vadd.f32 %v5313_v0, %v14278_v6  ;;  %v10457_v6 = vld [vmem:[%s15503_s6 + $0x768] ss:$16 sps:$4 sm:$0xff]   ;;  %v10471_v40 = vld [vmem:[%s15503_s6 + $0x72c] ss:$16 sps:$4 sm:$0xff]  }
 0x330   : > { %7432 = vmatpush2.bf16.msra.mxu0 %v10448_v32  ;;  %v5426_v54 = vpop.f32.mrf.mxu1  ;;  %v5315_v53 = vpop.f32.mrf.mxu0  ;;  %v15952_v18 = vld [vmem:[#allocation41_spill] sm:$0xff]  ;;  %v15954_v31 = vld [vmem:[#allocation12_spill] sm:$0xff] }
 0x331   : > { %15947 = vst [vmem:[#allocation51_spill] sm:$0xff] %v14585_v1  ;;  %7433 = vmatprep.subr.bf16.mxu0 %v10456_v7  ;;  %v14594_v24 = vadd.f32 %v5426_v54, %v5314_v55  ;;  %v5316_v45 = vadd.f32 %v5315_v53, %v14290_v39  ;;  %v10460_v39 = vld [vmem:[%s15503_s6 + $0x548] ss:$16 sps:$4 sm:$0xff]  }
 0x332   : > { %7545 = vmatpush2.bf16.msra.mxu1 %v10451_v19  ;;  %v5428_v33 = vpop.f32.mrf.mxu1  ;;  %v5319_v62 = vpop.f32.mrf.mxu0  ;;  %v10463_v48 = vld [vmem:[%s15503_s6 + $0x748] ss:$16 sps:$4 sm:$0xff]  }
 0x333   : > { %15948 = vst [vmem:[#allocation57_spill] sm:$0xff] %v14594_v24  ;;  %7276 = vmatmul.mubr.bf16.gmra.mxu0 %v15949_v30  ;;  %7546 = vmatprep.subr.bf16.mxu1 %v10459_v14  ;;  %v14604_v22 = vadd.f32 %v5428_v33, %v5316_v45  ;;  %v5320_v2 = vadd.f32 %v5319_v62, %v14302_v34  ;;  %v10474_v14 = vld [vmem:[%s15503_s6 + $0x50c] ss:$16 sps:$4 sm:$0xff]  }
 0x334   : > { %7285 = vmatprep.mubr.bf16.mxu0 %v15951_v11  ;;  %7434 = vmatpush2.bf16.msra.mxu0 %v10454_v49  ;;  %v5432_v17 = vpop.f32.mrf.mxu1  ;;  %v5321_v12 = vpop.f32.mrf.mxu0  ;;  %v10477_v45 = vld [vmem:[%s15503_s6 + $0x70c] ss:$16 sps:$4 sm:$0xff]  }
 0x335   : > { %15950 = vst [vmem:[#allocation53_spill] sm:$0xff] %v14604_v22  ;;  %7389 = vmatmul.mubr.bf16.gmra.mxu1 %v15952_v18  ;;  %7435 = vmatprep.subr.bf16.mxu0 %v10462_v21  ;;  %v14615_v32 = vadd.f32 %v5432_v17, %v5320_v2  ;;  %v5322_v34 = vadd.f32 %v5321_v12, %v14311_v35  ;;  %v10466_v35 = vld [vmem:[%s15503_s6 + $0x528] ss:$16 sps:$4 sm:$0xff]   ;;  %v10480_v11 = vld [vmem:[%s15506_s9 + $0x74] ss:$8 sps:$4 sm:$0xff]  }
 0x336   : > { %7398 = vmatprep.mubr.bf16.mxu1 %v15954_v31  ;;  %7547 = vmatpush2.bf16.msra.mxu1 %v10457_v6  ;;  %v5434_v50 = vpop.f32.mrf.mxu1  ;;  %v5323_v7 = vpop.f32.mrf.mxu0  ;;  %v15957_v21 = vld [vmem:[#allocation46_spill] sm:$0xff]  ;;  %v15993_v22 = vld [vmem:[#allocation109_spill] sm:$0xff]  ;;  %v16016_v59 = vld [vmem:[#allocation56_spill] sm:$0xff] }
 0x337   : > { %15953 = vst [vmem:[#allocation62_spill] sm:$0xff] %v14615_v32  ;;  %7548 = vmatprep.subr.bf16.mxu1 %v10465_v63  ;;  %v14625_v56 = vadd.f32 %v5434_v50, %v5322_v34  ;;  %v5324_v19 = vadd.f32 %v5323_v7, %v14319_v26  ;;  %v10469_v26 = vld [vmem:[%s15503_s6 + $0x728] ss:$16 sps:$4 sm:$0xff]  }
 0x338   : > { %7436 = vmatpush2.bf16.msra.mxu0 %v10460_v39  ;;  %v5436_v8 = vpop.f32.mrf.mxu1  ;;  %v5325_v0 = vpop.f32.mrf.mxu0  ;;  %v15959_v62 = vld [vmem:[#allocation10_spill] sm:$0xff]  ;;  %v15960_v63 = vld [vmem:[#allocation48_spill] sm:$0xff] }
 0x339   : > { %15955 = vst [vmem:[#allocation58_spill] sm:$0xff] %v14625_v56  ;;  %7437 = vmatprep.subr.bf16.mxu0 %v10468_v9  ;;  %v14634_v55 = vadd.f32 %v5436_v8, %v5324_v19  ;;  %v5326_v49 = vadd.f32 %v5325_v0, %v14328_v3  ;;  %v10472_v3 = vld [vmem:[%s15503_s6 + $0x508] ss:$16 sps:$4 sm:$0xff]  }
 0x33a   : > { %7549 = vmatpush2.bf16.msra.mxu1 %v10463_v48  ;;  %v5438_v54 = vpop.f32.mrf.mxu1  ;;  %v5329_v53 = vpop.f32.mrf.mxu0  ;;  %v10475_v18 = vld [vmem:[%s15503_s6 + $0x708] ss:$16 sps:$4 sm:$0xff]  }
 0x33b   : > { %15956 = vst [vmem:[#allocation63_spill] sm:$0xff] %v14634_v55  ;;  %7286 = vmatmul.mubr.bf16.gmra.mxu0 %v15957_v21  ;;  %7550 = vmatprep.subr.bf16.mxu1 %v10471_v40  ;;  %v14644_v6 = vadd.f32 %v5438_v54, %v5326_v49  ;;  %v5330_v33 = vadd.f32 %v5329_v53, %v14338_v36  ;;  %v15962_v36 = vld [vmem:[#allocation13_spill] sm:$0xff]  ;;  %v10481_v54 = vld [vmem:[%s15506_s9 + $0x60] ss:$8 sps:$4 sm:$0xff]  }
 0x33c   : > { %7438 = vmatpush2.bf16.msra.mxu0 %v10466_v35  ;;  %7441 = vmatprep.mubr.bf16.mxu0 %v15959_v62  ;;  %v5442_v30 = vpop.f32.mrf.mxu1  ;;  %v5331_v2 = vpop.f32.mrf.mxu0  ;;  %v10478_v48 = vld [vmem:[%s15506_s9 + $0x70] ss:$8 sps:$4 sm:$0xff]   ;;  %v15970_v62 = vld [vmem:[#allocation19_spill] sm:$0xff] }
 0x33d   : > { %15958 = vst [vmem:[#allocation60_spill] sm:$0xff] %v14644_v6  ;;  %7399 = vmatmul.mubr.bf16.gmra.mxu1 %v15960_v63  ;;  %7439 = vmatprep.subr.bf16.mxu0 %v10474_v14  ;;  %v14655_v39 = vadd.f32 %v5442_v30, %v5330_v33  ;;  %v5332_v17 = vadd.f32 %v5331_v2, %v14347_v44  ;;  %v10483_v44 = vld [vmem:[%s15506_s9 + $0x64] ss:$8 sps:$4 sm:$0xff]   ;;  %v15967_v14 = vld [vmem:[#allocation98_spill] sm:$0xff] }
 0x33e   : > { %7551 = vmatpush2.bf16.msra.mxu1 %v10469_v26  ;;  %7554 = vmatprep.mubr.bf16.mxu1 %v15962_v36  ;;  %v5444_v12 = vpop.f32.mrf.mxu1  ;;  %v5333_v9 = vpop.f32.mrf.mxu0  ;;  %v15968_v26 = vld [vmem:[#allocation7_spill] sm:$0xff]  ;;  %v15969_v21 = vld [vmem:[#allocation54_spill] sm:$0xff] }
 0x33f   : > { %15961 = vst [vmem:[#allocation68_spill] sm:$0xff] %v14655_v39  ;;  %7552 = vmatprep.subr.bf16.mxu1 %v10477_v45  ;;  %v14662_v31 = vadd.f32 %v5444_v12, %v5332_v17  ;;  %v5334_v34 = vadd.f32 %v5333_v9, %v14355_v52  ;;  %v15965_v52 = vld [vmem:[#allocation52_spill] sm:$0xff]  ;;  %v15972_v36 = vld [vmem:[#allocation99_spill] sm:$0xff]  ;;  %v16006_v55 = vld [vmem:[#allocation126_spill] sm:$0xff] }
 0x340   : > { %7440 = vmatpush2.bf16.msra.mxu0 %v10472_v3  ;;  %v5446_v50 = vpop.f32.mrf.mxu1  ;;  %v5335_v7 = vpop.f32.mrf.mxu0  ;;  %v15971_v3 = vld [vmem:[#allocation101_spill] sm:$0xff]  ;;  %v16011_v24 = vld [vmem:[#allocation18_spill] sm:$0xff] }
 0x341   : > { %15963 = vst [vmem:[#allocation64_spill] sm:$0xff] %v14662_v31  ;;  %8341 = vmatprep.subr.bf16.mxu0 %v10480_v11  ;;  %v14671_v40 = vadd.f32 %v5446_v50, %v5334_v34  ;;  %v5336_v19 = vadd.f32 %v5335_v7, %v14364_v15  ;;  %v10486_v15 = vld [vmem:[%s15506_s9 + $0x54] ss:$8 sps:$4 sm:$0xff]   ;;  %v10489_v34 = vld [vmem:[%s15506_s9 + $0x44] ss:$8 sps:$4 sm:$0xff]  }
 0x342   : > { %7553 = vmatpush2.bf16.msra.mxu1 %v10475_v18  ;;  %v5448_v35 = vpop.f32.mrf.mxu1  ;;  %v6765_v8 = vpop.f32.mrf.mxu0  ;;  %v10484_v18 = vld [vmem:[%s15506_s9 + $0x50] ss:$8 sps:$4 sm:$0xff]  }
 0x343   : > { %15964 = vst [vmem:[#allocation69_spill] sm:$0xff] %v14671_v40  ;;  %7442 = vmatmul.mubr.bf16.vlgmr.msra.gmra.mxu0 %v15965_v52  ;;  %v14675_v0 = vadd.f32 %v5448_v35, %v5336_v19  ;;  %v6766_v49 = vadd.f32 %v6765_v8, %v15967_v14  ;;  %v15974_v19 = vld [vmem:[#allocation100_spill] sm:$0xff]  ;;  %v15975_v8 = vld [vmem:[#allocation11_spill] sm:$0xff] }
 0x344   : > { %7451 = vmatprep.mubr.bf16.mxu0 %v15968_v26  ;;  %8342 = vmatpush1.bf16.msra.mxu0 %v10478_v48  ;;  %v6878_v53 = vpop.f32.mrf.mxu1  ;;  %v6767_v45 = vpop.f32.mrf.mxu0  ;;  %v10487_v52 = vld [vmem:[%s15506_s9 + $0x40] ss:$8 sps:$4 sm:$0xff]  }
 0x345   : > { %15966 = vst [vmem:[#allocation66_spill] sm:$0xff] %v14675_v0  ;;  %7555 = vmatmul.mubr.bf16.vlgmr.msra.gmra.mxu1 %v15969_v21  ;;  %8343 = vmatprep.subr.bf16.mxu0 %v10483_v44  ;;  %v14686_v33 = vadd.f32 %v6878_v53, %v6766_v49  ;;  %v6768_v30 = vadd.f32 %v6767_v45, %v15971_v3  ;;  %v15973_v44 = vld [vmem:[#allocation59_spill] sm:$0xff]  ;;  %v15976_v49 = vld [vmem:[#allocation61_spill] sm:$0xff]  ;;  %v15977_v21 = vld [vmem:[#allocation24_spill] sm:$0xff] }
 0x346   : > { %7564 = vmatprep.mubr.bf16.mxu1 %v15970_v62  ;;  %v6880_v63 = vpop.f32.mrf.mxu1  ;;  %v6769_v2 = vpop.f32.mrf.mxu0  ;;  %v15978_v45 = vld [vmem:[#allocation106_spill] sm:$0xff] }
 0x347   : > { %v14690_v11 = vadd.f32 %v6880_v63, %v6768_v30  ;;  %v6770_v17 = vadd.f32 %v6769_v2, %v15972_v36  ;;  %v15979_v63 = vld [vmem:[#allocation103_spill] sm:$0xff]  ;;  %v10490_v36 = vld [vmem:[%s15506_s9 + $0x30] ss:$8 sps:$4 sm:$0xff]  }
 0x348   : > { %8344 = vmatpush1.bf16.msra.mxu0 %v10481_v54  ;;  %v6882_v12 = vpop.f32.mrf.mxu1  ;;  %v14696_v9 = vpop.f32.mrf.mxu0  ;;  %v10492_v54 = vld [vmem:[%s15506_s9 + $0x34] ss:$8 sps:$4 sm:$0xff]  }
 0x349   : > { %8345 = vmatprep.subr.bf16.mxu0 %v10486_v15  ;;  %v14701_v48 = vadd.f32 %v6882_v12, %v6770_v17  ;;  %v10495_v12 = vld [vmem:[%s15506_s9 + $0x24] ss:$8 sps:$4 sm:$0xff]  }
 0x34a   : > { %v14703_v50 = vpop.f32.mrf.mxu1  ;;  %v6775_v7 = vpop.f32.mrf.mxu0 }
 0x34b   : > { %7452 = vmatmul.mubr.bf16.gmra.mxu0 %v15973_v44  ;;  %v6776_v35 = vadd.f32 %v6775_v7, %v15974_v19  ;;  %v15980_v19 = vld [vmem:[#allocation65_spill] sm:$0xff] }
 0x34c   : > { %7461 = vmatprep.mubr.bf16.mxu0 %v15975_v8  ;;  %8346 = vmatpush1.bf16.msra.mxu0 %v10484_v18  ;;  %v6888_v14 = vpop.f32.mrf.mxu1  ;;  %v6777_v26 = vpop.f32.mrf.mxu0 }
 0x34d   : > { %7565 = vmatmul.mubr.bf16.gmra.mxu1 %v15976_v49  ;;  %8347 = vmatprep.subr.bf16.mxu0 %v10489_v34  ;;  %v14715_v53 = vadd.f32 %v6888_v14, %v6776_v35  ;;  %v6778_v15 = vadd.f32 %v6777_v26, %v15978_v45  ;;  %v15981_v35 = vld [vmem:[#allocation104_spill] sm:$0xff]  ;;  %v15983_v26 = vld [vmem:[#allocation67_spill] sm:$0xff] }
 0x34e   : > { %7574 = vmatprep.mubr.bf16.mxu1 %v15977_v21  ;;  %v6890_v62 = vpop.f32.mrf.mxu1  ;;  %v6779_v3 = vpop.f32.mrf.mxu0  ;;  %v10493_v14 = vld [vmem:[%s15506_s9 + $0x20] ss:$8 sps:$4 sm:$0xff]   ;;  %v10498_v21 = vld [vmem:[%s15506_s9 + $0x14] ss:$8 sps:$4 sm:$0xff]  }
 0x34f   : > { %v14719_v30 = vadd.f32 %v6890_v62, %v6778_v15  ;;  %v6780_v2 = vadd.f32 %v6779_v3, %v15979_v63  ;;  %v15984_v15 = vld [vmem:[#allocation16_spill] sm:$0xff]  ;;  %v15985_v62 = vld [vmem:[#allocation110_spill] sm:$0xff] }
 0x350   : > { %8348 = vmatpush1.bf16.msra.mxu0 %v10487_v52  ;;  %v6892_v17 = vpop.f32.mrf.mxu1  ;;  %v14725_v18 = vpop.f32.mrf.mxu0  ;;  %v15982_v52 = vld [vmem:[#allocation21_spill] sm:$0xff] }
 0x351   : > { %8349 = vmatprep.subr.bf16.mxu0 %v10492_v54  ;;  %v14730_v34 = vadd.f32 %v6892_v17, %v6780_v2  ;;  %v15986_v17 = vld [vmem:[#allocation105_spill] sm:$0xff] }
 0x352   : > { %v14732_v7 = vpop.f32.mrf.mxu1  ;;  %v6785_v44 = vpop.f32.mrf.mxu0 }
 0x353   : > { %7462 = vmatmul.mubr.bf16.gmra.mxu0 %v15980_v19  ;;  %v6786_v8 = vadd.f32 %v6785_v44, %v15981_v35  ;;  %v10526_v19 = vld [vmem:[%s15506_s9 + $0x170] ss:$8 sps:$4 sm:$0xff]   ;;  %v10528_v35 = vld [vmem:[%s15506_s9 + $0x174] ss:$8 sps:$4 sm:$0xff]  }
 0x354   : > { %7471 = vmatprep.mubr.bf16.mxu0 %v15982_v52  ;;  %8350 = vmatpush1.bf16.msra.mxu0 %v10490_v36  ;;  %v6898_v49 = vpop.f32.mrf.mxu1  ;;  %v6787_v54 = vpop.f32.mrf.mxu0 }
 0x355   : > { %7575 = vmatmul.mubr.bf16.gmra.mxu1 %v15983_v26  ;;  %8351 = vmatprep.subr.bf16.mxu0 %v10495_v12  ;;  %v14744_v45 = vadd.f32 %v6898_v49, %v6786_v8  ;;  %v6788_v3 = vadd.f32 %v6787_v54, %v15985_v62  ;;  %v10496_v12 = vld [vmem:[%s15506_s9 + $0x10] ss:$8 sps:$4 sm:$0xff]  }
 0x356   : > { %7584 = vmatprep.mubr.bf16.mxu1 %v15984_v15  ;;  %v6900_v63 = vpop.f32.mrf.mxu1  ;;  %v6789_v2 = vpop.f32.mrf.mxu0  ;;  %8454 = vmatprep.subr.bf16.mxu1 %v10528_v35  ;;  %v15987_v15 = vld [vmem:[#allocation71_spill] sm:$0xff]  ;;  %v15988_v62 = vld [vmem:[#allocation108_spill] sm:$0xff]  ;;  %v15990_v35 = vld [vmem:[#allocation73_spill] sm:$0xff] }
 0x357   : > { %v14748_v36 = vadd.f32 %v6900_v63, %v6788_v3  ;;  %v6790_v44 = vadd.f32 %v6789_v2, %v15986_v17  ;;  %8455 = vmatpush1.bf16.msra.mxu1 %v10526_v19  ;;  %v15989_v63 = vld [vmem:[#allocation77_spill] sm:$0xff]  ;;  %v10529_v2 = vld [vmem:[%s15506_s9 + $0x160] ss:$8 sps:$4 sm:$0xff]   ;;  %v10531_v17 = vld [vmem:[%s15506_s9 + $0x164] ss:$8 sps:$4 sm:$0xff]  }
 0x358   : > { %8352 = vmatpush1.bf16.msra.mxu0 %v10493_v14  ;;  %v6902_v8 = vpop.f32.mrf.mxu1  ;;  %v14760_v52 = vpop.f32.mrf.mxu0  ;;  %v10501_v14 = vld [vmem:[%s15506_s9 + $0x4] ss:$8 sps:$4 sm:$0xff]   ;;  %8456 = vmatprep.subr.bf16.mxu1 %v10531_v17  ;;  %v10534_v17 = vld [vmem:[%s15506_s9 + $0x154] ss:$8 sps:$4 sm:$0xff]  }
 0x359   : > { %8353 = vmatprep.subr.bf16.mxu0 %v10498_v21  ;;  %v14765_v49 = vadd.f32 %v6902_v8, %v6790_v44  ;;  %v10499_v21 = vld [vmem:[%s15506_s9] ss:$8 sps:$4 sm:$0xff]  }
 0x35a   : > { %v14767_v26 = vpop.f32.mrf.mxu1  ;;  %v6795_v54 = vpop.f32.mrf.mxu0 }
 0x35b   : > { %7472 = vmatmul.mubr.bf16.gmra.mxu0 %v15987_v15  ;;  %v6796_v3 = vadd.f32 %v6795_v54, %v15988_v62  ;;  %v15991_v54 = vld [vmem:[#allocation17_spill] sm:$0xff]  ;;  %v15992_v15 = vld [vmem:[#allocation114_spill] sm:$0xff]  ;;  %8457 = vmatpush1.bf16.msra.mxu1 %v10529_v2 }
 0x35c   : > { %7481 = vmatprep.mubr.bf16.mxu0 %v15989_v63  ;;  %8354 = vmatpush1.bf16.msra.mxu0 %v10496_v12  ;;  %v6908_v44 = vpop.f32.mrf.mxu1  ;;  %v6797_v19 = vpop.f32.mrf.mxu0  ;;  %v10504_v12 = vld [vmem:[%s15506_s9 + $0xf4] ss:$8 sps:$4 sm:$0xff]  }
 0x35d   : > { %7585 = vmatmul.mubr.bf16.gmra.mxu1 %v15990_v35  ;;  %8355 = vmatprep.subr.bf16.mxu0 %v10501_v14  ;;  %v14785_v8 = vadd.f32 %v6908_v44, %v6796_v3  ;;  %v6798_v62 = vadd.f32 %v6797_v19, %v15992_v15  ;;  %v10502_v14 = vld [vmem:[%s15506_s9 + $0xf0] ss:$8 sps:$4 sm:$0xff]  }
 0x35e   : > { %7594 = vmatprep.mubr.bf16.mxu1 %v15991_v54  ;;  %v6910_v63 = vpop.f32.mrf.mxu1  ;;  %v6799_v0 = vpop.f32.mrf.mxu0  ;;  %v10532_v3 = vld [vmem:[%s15506_s9 + $0x150] ss:$8 sps:$4 sm:$0xff]   ;;  %8458 = vmatprep.subr.bf16.mxu1 %v10534_v17  ;;  %v10537_v17 = vld [vmem:[%s15506_s9 + $0x144] ss:$8 sps:$4 sm:$0xff]  }
 0x35f   : > { %v14789_v6 = vadd.f32 %v6910_v63, %v6798_v62  ;;  %v6800_v35 = vadd.f32 %v6799_v0, %v15993_v22  ;;  %v10507_v22 = vld [vmem:[%s15506_s9 + $0xe4] ss:$8 sps:$4 sm:$0xff]   ;;  %v15994_v54 = vld [vmem:[#allocation78_spill] sm:$0xff]  ;;  %8459 = vmatpush1.bf16.msra.mxu1 %v10532_v3 }
 0x360   : > { %8356 = vmatpush1.bf16.msra.mxu0 %v10499_v21  ;;  %v6912_v44 = vpop.f32.mrf.mxu1  ;;  %v14801_v19 = vpop.f32.mrf.mxu0  ;;  %v15995_v15 = vld [vmem:[#allocation118_spill] sm:$0xff]  ;;  %v15996_v63 = vld [vmem:[#allocation88_spill] sm:$0xff]  ;;  %8460 = vmatprep.subr.bf16.mxu1 %v10537_v17 }
 0x361   : > { %8357 = vmatprep.subr.bf16.mxu0 %v10504_v12  ;;  %v14806_v0 = vadd.f32 %v6912_v44, %v6800_v35  ;;  %v10505_v12 = vld [vmem:[%s15506_s9 + $0xe0] ss:$8 sps:$4 sm:$0xff]   ;;  %v10540_v17 = vld [vmem:[%s15506_s9 + $0x134] ss:$8 sps:$4 sm:$0xff]  }
 0x362   : > { %v14808_v21 = vpop.f32.mrf.mxu1  ;;  %v6805_v2 = vpop.f32.mrf.mxu0  ;;  %v10535_v35 = vld [vmem:[%s15506_s9 + $0x140] ss:$8 sps:$4 sm:$0xff]  }
 0x363   : > { %7482 = vmatmul.mubr.bf16.gmra.mxu0 %v15994_v54  ;;  %v6806_v62 = vadd.f32 %v6805_v2, %v15995_v15  ;;  %v15997_v54 = vld [vmem:[#allocation80_spill] sm:$0xff]  ;;  %v15998_v15 = vld [vmem:[#allocation29_spill] sm:$0xff]  ;;  %8461 = vmatpush1.bf16.msra.mxu1 %v10535_v35 }
 0x364   : > { %7491 = vmatprep.mubr.bf16.mxu0 %v15996_v63  ;;  %8358 = vmatpush2.bf16.msra.mxu0 %v10502_v14  ;;  %v6918_v44 = vpop.f32.mrf.mxu1  ;;  %v6807_v3 = vpop.f32.mrf.mxu0  ;;  %v10510_v14 = vld [vmem:[%s15506_s9 + $0xd4] ss:$8 sps:$4 sm:$0xff]   ;;  %v15999_v63 = vld [vmem:[#allocation119_spill] sm:$0xff] }
 0x365   : > { %7595 = vmatmul.mubr.bf16.gmra.mxu1 %v15997_v54  ;;  %8359 = vmatprep.subr.bf16.mxu0 %v10507_v22  ;;  %v14826_v2 = vadd.f32 %v6918_v44, %v6806_v62  ;;  %v6808_v16 = vadd.f32 %v6807_v3, %v15999_v63  ;;  %v10508_v22 = vld [vmem:[%s15506_s9 + $0xd0] ss:$8 sps:$4 sm:$0xff]   ;;  %v10541_v63 = vld [vmem:[%s15506_s9 + $0x120] ss:$8 sps:$4 sm:$0xff]  }
 0x366   : > { %7604 = vmatprep.mubr.bf16.mxu1 %v15998_v15  ;;  %v6920_v38 = vpop.f32.mrf.mxu1  ;;  %v6809_v37 = vpop.f32.mrf.mxu0  ;;  %v10538_v62 = vld [vmem:[%s15506_s9 + $0x130] ss:$8 sps:$4 sm:$0xff]   ;;  %8462 = vmatprep.subr.bf16.mxu1 %v10540_v17 }
 0x367   : > { %v14830_v25 = vadd.f32 %v6920_v38, %v6808_v16  ;;  %v6810_v54 = vadd.f32 %v6809_v37, %v16000_v58  ;;  %v10513_v58 = vld [vmem:[%s15506_s9 + $0xc4] ss:$8 sps:$4 sm:$0xff]   ;;  %8463 = vmatpush1.bf16.msra.mxu1 %v10538_v62  ;;  %v16002_v15 = vld [vmem:[#allocation25_spill] sm:$0xff] }
 0x368   : > { %8360 = vmatpush2.bf16.msra.mxu0 %v10505_v12  ;;  %v6922_v44 = vpop.f32.mrf.mxu1  ;;  %v14842_v3 = vpop.f32.mrf.mxu0  ;;  %v16001_v12 = vld [vmem:[#allocation120_spill] sm:$0xff] }
 0x369   : > { %8361 = vmatprep.subr.bf16.mxu0 %v10510_v14  ;;  %v14847_v37 = vadd.f32 %v6922_v44, %v6810_v54  ;;  %v10511_v14 = vld [vmem:[%s15506_s9 + $0xc0] ss:$8 sps:$4 sm:$0xff]   ;;  %v10543_v54 = vld [vmem:[%s15506_s9 + $0x124] ss:$8 sps:$4 sm:$0xff]  }
 0x36a   : > { %v14849_v38 = vpop.f32.mrf.mxu1  ;;  %v6815_v16 = vpop.f32.mrf.mxu0  ;;  %8464 = vmatprep.subr.bf16.mxu1 %v10543_v54  ;;  %v10546_v54 = vld [vmem:[%s15506_s9 + $0x114] ss:$8 sps:$4 sm:$0xff]  }
 0x36b   : > { %7492 = vmatmul.mubr.bf16.gmra.mxu0 %v15915_v61  ;;  %v6816_v35 = vadd.f32 %v6815_v16, %v16001_v12  ;;  %v16003_v61 = vld [vmem:[#allocation86_spill] sm:$0xff]  ;;  %v16005_v12 = vld [vmem:[#allocation123_spill] sm:$0xff]  ;;  %8465 = vmatpush1.bf16.msra.mxu1 %v10541_v63 }
 0x36c   : > { %7501 = vmatprep.mubr.bf16.mxu0 %v16002_v15  ;;  %8362 = vmatpush2.bf16.msra.mxu0 %v10508_v22  ;;  %v6928_v17 = vpop.f32.mrf.mxu1  ;;  %v6817_v62 = vpop.f32.mrf.mxu0  ;;  %v10516_v22 = vld [vmem:[%s15506_s9 + $0xb4] ss:$8 sps:$4 sm:$0xff]   ;;  %v16007_v63 = vld [vmem:[#allocation15_spill] sm:$0xff] }
 0x36d   : > { %7605 = vmatmul.mubr.bf16.gmra.mxu1 %v16003_v61  ;;  %8363 = vmatprep.subr.bf16.mxu0 %v10513_v58  ;;  %v14867_v44 = vadd.f32 %v6928_v17, %v6816_v35  ;;  %v16004_v16 = vld [vmem:[#allocation30_spill] sm:$0xff]  ;;  %v6818_v15 = vadd.f32 %v6817_v62, %v16005_v12 }
 0x36e   : > { %7614 = vmatprep.mubr.bf16.mxu1 %v16004_v16  ;;  %v6930_v40 = vpop.f32.mrf.mxu1  ;;  %v6819_v31 = vpop.f32.mrf.mxu0  ;;  %v10514_v58 = vld [vmem:[%s15506_s9 + $0xb0] ss:$8 sps:$4 sm:$0xff]   ;;  %8466 = vmatprep.subr.bf16.mxu1 %v10546_v54  ;;  %v10547_v12 = vld [vmem:[%s15506_s9 + $0x100] ss:$8 sps:$4 sm:$0xff]  }
 0x36f   : > { %v14871_v39 = vadd.f32 %v6930_v40, %v6818_v15  ;;  %v6820_v61 = vadd.f32 %v6819_v31, %v16006_v55  ;;  %v10544_v35 = vld [vmem:[%s15506_s9 + $0x110] ss:$8 sps:$4 sm:$0xff]   ;;  %v10519_v55 = vld [vmem:[%s15506_s9 + $0xa4] ss:$8 sps:$4 sm:$0xff]  }
 0x370   : > { %8364 = vmatpush2.bf16.msra.mxu0 %v10511_v14  ;;  %v6932_v17 = vpop.f32.mrf.mxu1  ;;  %v14883_v62 = vpop.f32.mrf.mxu0  ;;  %8467 = vmatpush1.bf16.msra.mxu1 %v10544_v35  ;;  %v10549_v15 = vld [vmem:[%s15506_s9 + $0x104] ss:$8 sps:$4 sm:$0xff]  }
 0x371   : > { %8365 = vmatprep.subr.bf16.mxu0 %v10516_v22  ;;  %v14888_v31 = vadd.f32 %v6932_v17, %v6820_v61  ;;  %v10517_v22 = vld [vmem:[%s15506_s9 + $0xa0] ss:$8 sps:$4 sm:$0xff]   ;;  %v16010_v17 = vld [vmem:[#allocation9_spill] sm:$0xff]  ;;  %8468 = vmatprep.subr.bf16.mxu1 %v10549_v15 }
 0x372   : > { %v14890_v40 = vpop.f32.mrf.mxu1  ;;  %v6825_v14 = vpop.f32.mrf.mxu0  ;;  %v16009_v54 = vld [vmem:[#allocation27_spill] sm:$0xff]  ;;  %v10552_v15 = vld [vmem:[%s15506_s9 + $0x1f4] ss:$8 sps:$4 sm:$0xff]  }
 0x373   : > { %7502 = vmatmul.mubr.bf16.gmra.mxu0 %v15918_v28  ;;  %v6826_v16 = vadd.f32 %v6825_v14, %v16007_v63  ;;  %v16008_v28 = vld [vmem:[#allocation93_spill] sm:$0xff] }
 0x374   : > { %7511 = vmatprep.mubr.bf16.mxu0 %v14283_v29  ;;  %8366 = vmatpush2.bf16.msra.mxu0 %v10514_v58  ;;  %v6938_v61 = vpop.f32.mrf.mxu1  ;;  %v6827_v35 = vpop.f32.mrf.mxu0  ;;  %v10522_v29 = vld [vmem:[%s15506_s9 + $0x94] ss:$8 sps:$4 sm:$0xff]  }
 0x375   : > { %7615 = vmatmul.mubr.bf16.gmra.mxu1 %v16008_v28  ;;  %8367 = vmatprep.subr.bf16.mxu0 %v10519_v55  ;;  %v14908_v58 = vadd.f32 %v6938_v61, %v6826_v16  ;;  %v6828_v14 = vadd.f32 %v6827_v35, %v16010_v17  ;;  %v10520_v55 = vld [vmem:[%s15506_s9 + $0x90] ss:$8 sps:$4 sm:$0xff]  }
 0x376   : > { %7624 = vmatprep.mubr.bf16.mxu1 %v16009_v54  ;;  %v6940_v63 = vpop.f32.mrf.mxu1  ;;  %v6829_v56 = vpop.f32.mrf.mxu0  ;;  %8469 = vmatpush1.bf16.msra.mxu1 %v10547_v12  ;;  %v10550_v16 = vld [vmem:[%s15506_s9 + $0x1f0] ss:$8 sps:$4 sm:$0xff]  }
 0x377   : > { %v14912_v32 = vadd.f32 %v6940_v63, %v6828_v14  ;;  %v6830_v28 = vadd.f32 %v6829_v56, %v16011_v24  ;;  %v10525_v24 = vld [vmem:[%s15506_s9 + $0x84] ss:$8 sps:$4 sm:$0xff]   ;;  %8470 = vmatprep.subr.bf16.mxu1 %v10552_v15  ;;  %v16013_v17 = vld [vmem:[#allocation45_spill] sm:$0xff]  ;;  %v10553_v63 = vld [vmem:[%s15506_s9 + $0x1e0] ss:$8 sps:$4 sm:$0xff]  }
 0x378   : > { %8368 = vmatpush2.bf16.msra.mxu0 %v10517_v22  ;;  %v6942_v61 = vpop.f32.mrf.mxu1  ;;  %v14924_v35 = vpop.f32.mrf.mxu0  ;;  %v16012_v54 = vld [vmem:[#allocation96_spill] sm:$0xff] }
 0x379   : > { %8369 = vmatprep.subr.bf16.mxu0 %v10522_v29  ;;  %v14929_v56 = vadd.f32 %v6942_v61, %v6830_v28  ;;  %v10523_v29 = vld [vmem:[%s15506_s9 + $0x80] ss:$8 sps:$4 sm:$0xff]   ;;  %v10555_v28 = vld [vmem:[%s15506_s9 + $0x1e4] ss:$8 sps:$4 sm:$0xff]   ;;  %v16014_v61 = vld [vmem:[#allocation97_spill] sm:$0xff] }
 0x37a   : > { %v14931_v22 = vpop.f32.mrf.mxu1  ;;  %v6835_v12 = vpop.f32.mrf.mxu0  ;;  %8471 = vmatpush2.bf16.msra.mxu1 %v10550_v16 }
 0x37b   : > { %7512 = vmatmul.mubr.bf16.gmra.mxu0 %v16012_v54  ;;  %v6836_v14 = vadd.f32 %v6835_v12, %v16013_v17  ;;  %8472 = vmatprep.subr.bf16.mxu1 %v10555_v28 }
 0x37c   : > { %8370 = vmatpush2.bf16.msra.mxu0 %v10520_v55  ;;  %v6948_v15 = vpop.f32.mrf.mxu1  ;;  %v6837_v54 = vpop.f32.mrf.mxu0  ;;  %v16015_v55 = vld [vmem:[#allocation14_spill] sm:$0xff] }
 0x37d   : > { %7625 = vmatmul.mubr.bf16.gmra.mxu1 %v16014_v61  ;;  %8371 = vmatprep.subr.bf16.mxu0 %v10525_v24  ;;  %v14945_v16 = vadd.f32 %v6948_v15, %v6836_v14  ;;  %v6838_v12 = vadd.f32 %v6837_v54, %v16015_v55  ;;  %v10558_v24 = vld [vmem:[%s15506_s9 + $0x1d4] ss:$8 sps:$4 sm:$0xff]   ;;  %v16018_v61 = vld [vmem:[#allocation4_spill] sm:$0xff] }
 0x37e   : > { %v6950_v17 = vpop.f32.mrf.mxu1  ;;  %v6839_v1 = vpop.f32.mrf.mxu0  ;;  %8473 = vmatpush2.bf16.msra.mxu1 %v10553_v63  ;;  %v14962_v63 = vld [vmem:[%s15505_s8] sm:$0xf] }
 0x37f   : > { %v14948_v51 = vadd.f32 %v6950_v17, %v6838_v12  ;;  %v6840_v47 = vadd.f32 %v6839_v1, %v16016_v59  ;;  %16017 = vst [vmem:[#allocation74_spill] sm:$0xff] %v14962_v63  ;;  %8474 = vmatprep.subr.bf16.mxu1 %v10558_v24  ;;  %v14971_v54 = vrot.slane %v14962_v63, %v16018_v61  ;;  %v10559_v55 = vld [vmem:[%s15506_s9 + $0x1c0] ss:$8 sps:$4 sm:$0xff]  }
 0x380   : > { %8372 = vmatpush2.bf16.msra.mxu0 %v10523_v29  ;;  %v6952_v14 = vpop.f32.mrf.mxu1  ;;  %v14957_v15 = vpop.f32.mrf.mxu0  ;;  %v16019_v12 = vld [vmem:[#allocation102_spill] sm:$0xff] }
 0x381   : > { %v14964_v28 = vadd.f32 %v6952_v14, %v6840_v47  ;;  %v10561_v47 = vld [vmem:[%s15506_s9 + $0x1c4] ss:$8 sps:$4 sm:$0xff]   ;;  %v6772_v17 = vadd.f32 %v14696_v9, %v16019_v12  ;;  %v16020_v61 = vld [vmem:[#allocation6_spill] sm:$0xff] }
 0x382   : > { %v14966_v59 = vpop.f32.mrf.mxu1  ;;  %8475 = vmatpush2.bf16.msra.mxu1 %v10556_v10  ;;  %v14984_v60 = vrot.slane %v14962_v63, %v16020_v61 }
 0x383   : > { %v6991_v1 = vpop.f32.mrf.mxu0  ;;  %8476 = vmatprep.subr.bf16.mxu1 %v10561_v47  ;;  %v6885_v9 = vadd.f32 %v14703_v50, %v6772_v17 }
 0x384   : > { %v6992_v29 = vadd.f32 %v6991_v1, %v14686_v33 }
 0x385   : > { %v7104_v24 = vpop.f32.mrf.mxu1  ;;  %v6993_v14 = vpop.f32.mrf.mxu0 }
 0x386   : > { %v7105_v10 = vadd.f32 %v7104_v24, %v6992_v29  ;;  %v6994_v33 = vadd.f32 %v6993_v14, %v14690_v11  ;;  %8477 = vmatpush2.bf16.msra.mxu1 %v10559_v55  ;;  %v16021_v29 = vld [vmem:[#allocation107_spill] sm:$0xff] }
 0x387   : > { %v7106_v1 = vpop.f32.mrf.mxu1  ;;  %v6995_v42 = vpop.f32.mrf.mxu0  ;;  %v6782_v11 = vadd.f32 %v14725_v18, %v16021_v29 }
 0x388   : > { %v7657_v13 = vadd.f32 %v14971_v54, %v7105_v10  ;;  %v7107_v27 = vadd.f32 %v7106_v1, %v6994_v33  ;;  %v6996_v57 = vadd.f32 %v6995_v42, %v14701_v48  ;;  %v10562_v42 = vld [vmem:[%s15506_s9 + $0x1b0] ss:$8 sps:$4 sm:$0xff]  }
 0x389   : > { %v7108_v12 = vpop.f32.mrf.mxu1  ;;  %v6997_v41 = vpop.f32.mrf.mxu0 }
 0x38a   : > { %v7109_v47 = vadd.f32 %v7108_v12, %v6996_v57  ;;  %v7785_v24 = vmul.f32 0.2, %v7657_v13  ;;  %v7658_v14 = vadd.f32 %v14984_v60, %v7107_v27  ;;  %v6998_v61 = vadd.f32 %v6997_v41, %v6885_v9  ;;  %v10564_v57 = vld [vmem:[%s15506_s9 + $0x1b4] ss:$8 sps:$4 sm:$0xff]  }
 0x38b   : > { %v7110_v63 = vpop.f32.mrf.mxu1  ;;  %v7001_v5 = vpop.f32.mrf.mxu0  ;;  %vm7721_vm4 = vcmp.gt.f32.partialorder %v7657_v13, 0.0  ;;  %v6895_v41 = vadd.f32 %v14732_v7, %v6782_v11  ;;  %8478 = vmatprep.subr.bf16.mxu1 %v10564_v57 }
 0x38c   : > { %v7661_v55 = vadd.f32 %v14971_v54, %v7109_v47  ;;  %v7111_v48 = vadd.f32 %v7110_v63, %v6998_v61  ;;  %v7002_v50 = vadd.f32 %v7001_v5, %v14715_v53  ;;  %v7849_v33 = vsel %vm7721_vm4, %v7657_v13, %v7785_v24  ;;  %8479 = vmatpush2.bf16.msra.mxu1 %v10562_v42  ;;  %v10565_v13 = vld [vmem:[%s15506_s9 + $0x1a0] ss:$8 sps:$4 sm:$0xff]  }
 0x38d   : > { %v7114_v17 = vpop.f32.mrf.mxu1  ;;  %v7003_v10 = vpop.f32.mrf.mxu0  ;;  %v7786_v1 = vmul.f32 0.2, %v7658_v14  ;;  %vm7722_vm6 = vcmp.gt.f32.partialorder %v7658_v14, 0.0 }
 0x38e   : > { %vm7725_vm5 = vcmp.gt.f32.partialorder %v7661_v55, 0.0  ;;  %v7789_v27 = vmul.f32 0.2, %v7661_v55  ;;  %v7004_v18 = vadd.f32 %v7003_v10, %v14719_v30  ;;  %v7662_v9 = vadd.f32 %v14984_v60, %v7111_v48 }
 0x38f   : > { %v7115_v12 = vadd.f32 %v7114_v17, %v7002_v50  ;;  %v7116_v63 = vpop.f32.mrf.mxu1  ;;  %v7005_v61 = vpop.f32.mrf.mxu0 }
 0x390   : > { %v7853_v5 = vsel %vm7725_vm5, %v7661_v55, %v7789_v27  ;;  %v7117_v53 = vadd.f32 %v7116_v63, %v7004_v18  ;;  %v7006_v29 = vadd.f32 %v7005_v61, %v14730_v34  ;;  %v7790_v7 = vmul.f32 0.2, %v7662_v9  ;;  %v10567_v34 = vld [vmem:[%s15506_s9 + $0x1a4] ss:$8 sps:$4 sm:$0xff]  }
 0x391   : > { %v7913_v47 = vpack.c.bf16 %v7853_v5, %v7849_v33  ;;  %v7665_v11 = vadd.f32 %v14971_v54, %v7115_v12  ;;  %v7118_v20 = vpop.f32.mrf.mxu1  ;;  %v7007_v30 = vpop.f32.mrf.mxu0  ;;  %vm7726_vm7 = vcmp.gt.f32.partialorder %v7662_v9, 0.0  ;;  %v16022_v55 = vld [vmem:[#allocation111_spill] sm:$0xff]  ;;  %v7850_v27 = vsel %vm7722_vm6, %v7658_v14, %v7786_v1  ;;  %8480 = vmatprep.subr.bf16.mxu1 %v10567_v34  ;;  %v10570_v14 = vld [vmem:[%s15506_s9 + $0x194] ss:$8 sps:$4 sm:$0xff]  }
 0x392   : > { %v7666_v24 = vadd.f32 %v14984_v60, %v7117_v53  ;;  %v7119_v48 = vadd.f32 %v7118_v20, %v7006_v29  ;;  %v7008_v50 = vadd.f32 %v7007_v30, %v6895_v41  ;;  %v6792_v42 = vadd.f32 %v14760_v52, %v16022_v55  ;;  %8481 = vmatpush2.bf16.msra.mxu1 %v10565_v13  ;;  %v10568_v52 = vld [vmem:[%s15506_s9 + $0x190] ss:$8 sps:$4 sm:$0xff]  }
 0x393   : > { %v7793_v17 = vmul.f32 0.2, %v7665_v11  ;;  %v7120_v10 = vpop.f32.mrf.mxu1  ;;  %v7011_v57 = vpop.f32.mrf.mxu0  ;;  %v7854_v18 = vsel %vm7726_vm7, %v7662_v9, %v7790_v7  ;;  %vm7729_vm1 = vcmp.gt.f32.partialorder %v7665_v11, 0.0  ;;  %8482 = vmatprep.subr.bf16.mxu1 %v10570_v14 }
 0x394   : > { %vm7730_vm8 = vcmp.gt.f32.partialorder %v7666_v24, 0.0  ;;  %v7669_v33 = vadd.f32 %v14971_v54, %v7119_v48  ;;  %v7121_v12 = vadd.f32 %v7120_v10, %v7008_v50  ;;  %v7794_v20 = vmul.f32 0.2, %v7666_v24  ;;  %v10573_v10 = vld [vmem:[%s15506_s9 + $0x184] ss:$8 sps:$4 sm:$0xff]  }
 0x395   : > { %v7012_v41 = vadd.f32 %v7011_v57, %v14744_v45  ;;  %v7124_v63 = vpop.f32.mrf.mxu1  ;;  %v7013_v61 = vpop.f32.mrf.mxu0  ;;  %v7914_v5 = vpack.c.bf16 %v7854_v18, %v7850_v27  ;;  %v6905_v45 = vadd.f32 %v14767_v26, %v6792_v42  ;;  %v7857_v29 = vsel %vm7729_vm1, %v7665_v11, %v7793_v17  ;;  %v10571_v57 = vld [vmem:[%s15506_s9 + $0x180] ss:$8 sps:$4 sm:$0xff]  }
 0x396   : > { %vm7733_vm9 = vcmp.gt.f32.partialorder %v7669_v33, 0.0  ;;  %v7797_v1 = vmul.f32 0.2, %v7669_v33  ;;  %v7670_v9 = vadd.f32 %v14984_v60, %v7121_v12  ;;  %v7014_v53 = vadd.f32 %v7013_v61, %v14748_v36  ;;  %8483 = vmatpush2.bf16.msra.mxu1 %v10568_v52 }
 0x397   : > { %v7125_v7 = vadd.f32 %v7124_v63, %v7012_v41  ;;  %v7126_v30 = vpop.f32.mrf.mxu1  ;;  %8373 = vmatprep.mubr.bf16.mxu0 %v7914_v5  ;;  %v7015_v13 = vpop.f32.mrf.mxu0  ;;  %v7858_v11 = vsel %vm7730_vm8, %v7666_v24, %v7794_v20  ;;  %8484 = vmatprep.subr.bf16.mxu1 %v10573_v10 }
 0x398   : > { %v7861_v48 = vsel %vm7733_vm9, %v7669_v33, %v7797_v1  ;;  %v7798_v50 = vmul.f32 0.2, %v7670_v9  ;;  %v7127_v34 = vadd.f32 %v7126_v30, %v7014_v53  ;;  %8374 = vmatmul.mubr.bf16.vlgmr.msra.gmra.mxu0 %v7913_v47  ;;  %v7016_v55 = vadd.f32 %v7015_v13, %v14765_v49  ;;  %v16023_v33 = vld [vmem:[#allocation115_spill] sm:$0xff] }
 0x399   : > { %v7673_v36 = vadd.f32 %v14971_v54, %v7125_v7  ;;  %v7128_v26 = vpop.f32.mrf.mxu1  ;;  %v7017_v42 = vpop.f32.mrf.mxu0  ;;  %vm7734_vm10 = vcmp.gt.f32.partialorder %v7670_v9, 0.0  ;;  %v7917_v17 = vpack.c.bf16 %v7861_v48, %v7857_v29  ;;  %v6802_v12 = vadd.f32 %v14801_v19, %v16023_v33 }
 0x39a   : > { %v7674_v47 = vadd.f32 %v14984_v60, %v7127_v34  ;;  %v7129_v49 = vadd.f32 %v7128_v26, %v7016_v55  ;;  %v7018_v27 = vadd.f32 %v7017_v42, %v6905_v45  ;;  %v7862_v18 = vsel %vm7734_vm10, %v7670_v9, %v7798_v50  ;;  %8485 = vmatpush2.bf16.msra.mxu1 %v10571_v57 }
 0x39b   : > { %v7801_v41 = vmul.f32 0.2, %v7673_v36  ;;  %v7130_v63 = vpop.f32.mrf.mxu1  ;;  %v7021_v61 = vpop.f32.mrf.mxu0  ;;  %v7918_v5 = vpack.c.bf16 %v7862_v18, %v7858_v11  ;;  %vm7737_vm11 = vcmp.gt.f32.partialorder %v7673_v36, 0.0  ;;  %v6915_v29 = vadd.f32 %v14808_v21, %v6802_v12 }
 0x39c   : > { %v7677_v24 = vadd.f32 %v14971_v54, %v7129_v49  ;;  %v7131_v20 = vadd.f32 %v7130_v63, %v7018_v27  ;;  %vm7738_vm12 = vcmp.gt.f32.partialorder %v7674_v47, 0.0  ;;  %v7802_v52 = vmul.f32 0.2, %v7674_v47  ;;  %v16024_v27 = vld [vmem:[#allocation121_spill] sm:$0xff] }
 0x39d   : > { %v7022_v14 = vadd.f32 %v7021_v61, %v14785_v8  ;;  %v7134_v1 = vpop.f32.mrf.mxu1  ;;  %v7023_v53 = vpop.f32.mrf.mxu0  ;;  %8383 = vmatprep.mubr.bf16.mxu0 %v7918_v5  ;;  %v7865_v7 = vsel %vm7737_vm11, %v7673_v36, %v7801_v41  ;;  %v6812_v18 = vadd.f32 %v14842_v3, %v16024_v27 }
 0x39e   : > { %vm7741_vm13 = vcmp.gt.f32.partialorder %v7677_v24, 0.0  ;;  %v7805_v9 = vmul.f32 0.2, %v7677_v24  ;;  %v7678_v19 = vadd.f32 %v14984_v60, %v7131_v20  ;;  %v7024_v45 = vadd.f32 %v7023_v53, %v14789_v6 }
 0x39f   : > { %v7135_v30 = vadd.f32 %v7134_v1, %v7022_v14  ;;  %v7136_v13 = vpop.f32.mrf.mxu1  ;;  %v7025_v48 = vpop.f32.mrf.mxu0  ;;  %v7866_v11 = vsel %vm7738_vm12, %v7674_v47, %v7802_v52  ;;  %v6925_v14 = vadd.f32 %v14849_v38, %v6812_v18 }
 0x3a0   : > { %v7869_v50 = vsel %vm7741_vm13, %v7677_v24, %v7805_v9  ;;  %v7806_v34 = vmul.f32 0.2, %v7678_v19  ;;  %v7137_v55 = vadd.f32 %v7136_v13, %v7024_v45  ;;  %8384 = vmatmul.mubr.bf16.gmra.mxu0 %v7917_v17  ;;  %v7026_v8 = vadd.f32 %v7025_v48, %v14806_v0 }
 0x3a1   : > { %v7681_v10 = vadd.f32 %v14971_v54, %v7135_v30  ;;  %v7138_v26 = vpop.f32.mrf.mxu1  ;;  %v7027_v42 = vpop.f32.mrf.mxu0  ;;  %vm7742_vm14 = vcmp.gt.f32.partialorder %v7678_v19, 0.0  ;;  %v7921_v6 = vpack.c.bf16 %v7869_v50, %v7865_v7 }
 0x3a2   : > { %v7682_v21 = vadd.f32 %v14984_v60, %v7137_v55  ;;  %v7139_v36 = vadd.f32 %v7138_v26, %v7026_v8  ;;  %v7028_v57 = vadd.f32 %v7027_v42, %v6915_v29  ;;  %v7870_v49 = vsel %vm7742_vm14, %v7678_v19, %v7806_v34 }
 0x3a3   : > { %v7809_v33 = vmul.f32 0.2, %v7681_v10  ;;  %v7140_v17 = vpop.f32.mrf.mxu1  ;;  %v7031_v12 = vpop.f32.mrf.mxu0  ;;  %v7922_v0 = vpack.c.bf16 %v7870_v49, %v7866_v11  ;;  %vm7745_vm15 = vcmp.gt.f32.partialorder %v7681_v10, 0.0 }
 0x3a4   : > { %v7685_v41 = vadd.f32 %v14971_v54, %v7139_v36  ;;  %v7141_v63 = vadd.f32 %v7140_v17, %v7028_v57  ;;  %vm7746_vm0 = vcmp.gt.f32.partialorder %v7682_v21, 0.0  ;;  %v7810_v61 = vmul.f32 0.2, %v7682_v21 }
 0x3a5   : > { %v7032_v47 = vadd.f32 %v7031_v12, %v14826_v2  ;;  %v7144_v5 = vpop.f32.mrf.mxu1  ;;  %v7033_v24 = vpop.f32.mrf.mxu0  ;;  %8393 = vmatprep.mubr.bf16.mxu0 %v7922_v0  ;;  %v7873_v1 = vsel %vm7745_vm15, %v7681_v10, %v7809_v33  ;;  %v16025_v10 = vld [vmem:[#allocation125_spill] sm:$0xff] }
 0x3a6   : > { %vm7749_vm2 = vcmp.gt.f32.partialorder %v7685_v41, 0.0  ;;  %v7813_v20 = vmul.f32 0.2, %v7685_v41  ;;  %v7686_v52 = vadd.f32 %v14984_v60, %v7141_v63  ;;  %v7034_v3 = vadd.f32 %v7033_v24, %v14830_v25  ;;  %v16026_v24 = vld [vmem:[#allocation36_spill] sm:$0xff] }
 0x3a7   : > { %v7145_v53 = vadd.f32 %v7144_v5, %v7032_v47  ;;  %v7146_v9 = vpop.f32.mrf.mxu1  ;;  %v7035_v19 = vpop.f32.mrf.mxu0  ;;  %v7874_v50 = vsel %vm7746_vm0, %v7682_v21, %v7810_v61  ;;  %v6822_v26 = vadd.f32 %v14883_v62, %v16025_v10 }
 0x3a8   : > { %v7877_v45 = vsel %vm7749_vm2, %v7685_v41, %v7813_v20  ;;  %v7814_v29 = vmul.f32 0.2, %v7686_v52  ;;  %v7147_v7 = vadd.f32 %v7146_v9, %v7034_v3  ;;  %8394 = vmatmul.mubr.bf16.gmra.mxu0 %v7921_v6  ;;  %v7036_v2 = vadd.f32 %v7035_v19, %v14847_v37 }
 0x3a9   : > { %v7689_v30 = vadd.f32 %v14971_v54, %v7145_v53  ;;  %v7148_v13 = vpop.f32.mrf.mxu1  ;;  %v7037_v48 = vpop.f32.mrf.mxu0  ;;  %vm7750_vm3 = vcmp.gt.f32.partialorder %v7686_v52, 0.0  ;;  %v7925_v25 = vpack.c.bf16 %v7877_v45, %v7873_v1  ;;  %v6935_v12 = vadd.f32 %v14890_v40, %v6822_v26 }
 0x3aa   : > { %v7690_v38 = vadd.f32 %v14984_v60, %v7147_v7  ;;  %v7149_v34 = vadd.f32 %v7148_v13, %v7036_v2  ;;  %v7038_v55 = vadd.f32 %v7037_v48, %v6925_v14  ;;  %v7878_v8 = vsel %vm7750_vm3, %v7686_v52, %v7814_v29 }
 0x3ab   : > { %v7817_v42 = vmul.f32 0.2, %v7689_v30  ;;  %v7150_v11 = vpop.f32.mrf.mxu1  ;;  %v7041_v6 = vpop.f32.mrf.mxu0  ;;  %v7926_v37 = vpack.c.bf16 %v7878_v8, %v7874_v50  ;;  %vm7753_vm4 = vcmp.gt.f32.partialorder %v7689_v30, 0.0  ;;  %v6832_v20 = vadd.f32 %v14924_v35, %v16026_v24 }
 0x3ac   : > { %v7693_v36 = vadd.f32 %v14971_v54, %v7149_v34  ;;  %v7151_v57 = vadd.f32 %v7150_v11, %v7038_v55  ;;  %v7818_v49 = vmul.f32 0.2, %v7690_v38  ;;  %v7042_v21 = vadd.f32 %v7041_v6, %v14867_v44 }
 0x3ad   : > { %v7154_v27 = vpop.f32.mrf.mxu1  ;;  %v7043_v18 = vpop.f32.mrf.mxu0  ;;  %8403 = vmatprep.mubr.bf16.mxu0 %v7926_v37  ;;  %v7881_v0 = vsel %vm7753_vm4, %v7689_v30, %v7817_v42  ;;  %vm7754_vm6 = vcmp.gt.f32.partialorder %v7690_v38, 0.0 }
 0x3ae   : > { %vm7757_vm5 = vcmp.gt.f32.partialorder %v7693_v36, 0.0  ;;  %v7821_v33 = vmul.f32 0.2, %v7693_v36  ;;  %v7694_v17 = vadd.f32 %v14984_v60, %v7151_v57  ;;  %v7044_v62 = vadd.f32 %v7043_v18, %v14871_v39 }
 0x3af   : > { %v7155_v41 = vadd.f32 %v7154_v27, %v7042_v21  ;;  %v7156_v63 = vpop.f32.mrf.mxu1  ;;  %v7045_v61 = vpop.f32.mrf.mxu0  ;;  %v7882_v53 = vsel %vm7754_vm6, %v7690_v38, %v7818_v49  ;;  %v16027_v27 = vld [vmem:[#allocation23_spill] sm:$0xff] }
 0x3b0   : > { %v7885_v47 = vsel %vm7757_vm5, %v7693_v36, %v7821_v33  ;;  %vm7758_vm7 = vcmp.gt.f32.partialorder %v7694_v17, 0.0  ;;  %v7822_v5 = vmul.f32 0.2, %v7694_v17  ;;  %v7157_v44 = vadd.f32 %v7156_v63, %v7044_v62  ;;  %8404 = vmatmul.mubr.bf16.gmra.mxu0 %v7925_v25 }
 0x3b1   : > { %v7046_v52 = vadd.f32 %v7045_v61, %v14888_v31  ;;  %v7158_v3 = vpop.f32.mrf.mxu1  ;;  %v7047_v14 = vpop.f32.mrf.mxu0  ;;  %v7929_v39 = vpack.c.bf16 %v7885_v47, %v7881_v0  ;;  %v7697_v40 = vadd.f32 %v14971_v54, %v7155_v41  ;;  %v6945_v31 = vadd.f32 %v14931_v22, %v6832_v20 }
 0x3b2   : > { %v7048_v1 = vadd.f32 %v7047_v14, %v6935_v12  ;;  %v7886_v9 = vsel %vm7758_vm7, %v7694_v17, %v7822_v5  ;;  %v7698_v19 = vadd.f32 %v14984_v60, %v7157_v44  ;;  %v6842_v18 = vadd.f32 %v14957_v15, %v16027_v27 }
 0x3b3   : > { %v7159_v45 = vadd.f32 %v7158_v3, %v7046_v52  ;;  %v7160_v29 = vpop.f32.mrf.mxu1  ;;  %v7051_v7 = vpop.f32.mrf.mxu0  ;;  %v7930_v2 = vpack.c.bf16 %v7886_v9, %v7882_v53  ;;  %v7825_v25 = vmul.f32 0.2, %v7697_v40  ;;  %vm7761_vm1 = vcmp.gt.f32.partialorder %v7697_v40, 0.0 }
 0x3b4   : > { %v7161_v30 = vadd.f32 %v7160_v29, %v7048_v1  ;;  %v7052_v35 = vadd.f32 %v7051_v7, %v14908_v58  ;;  %v7826_v8 = vmul.f32 0.2, %v7698_v19  ;;  %vm7762_vm10 = vcmp.gt.f32.partialorder %v7698_v19, 0.0 }
 0x3b5   : > { %v7701_v13 = vadd.f32 %v14971_v54, %v7159_v45  ;;  %v7164_v48 = vpop.f32.mrf.mxu1  ;;  %v7053_v50 = vpop.f32.mrf.mxu0  ;;  %8413 = vmatprep.mubr.bf16.mxu0 %v7930_v2  ;;  %v6955_v3 = vadd.f32 %v14966_v59, %v6842_v18 }
 0x3b6   : > { %v7702_v38 = vadd.f32 %v14984_v60, %v7161_v30  ;;  %v7165_v34 = vadd.f32 %v7164_v48, %v7052_v35  ;;  %v7054_v55 = vadd.f32 %v7053_v50, %v14912_v32  ;;  %v7889_v32 = vsel %vm7761_vm1, %v7697_v40, %v7825_v25 }
 0x3b7   : > { %vm7765_vm8 = vcmp.gt.f32.partialorder %v7701_v13, 0.0  ;;  %v7829_v10 = vmul.f32 0.2, %v7701_v13  ;;  %v7166_v26 = vpop.f32.mrf.mxu1  ;;  %v7055_v42 = vpop.f32.mrf.mxu0 }
 0x3b8   : > { %vm7766_vm9 = vcmp.gt.f32.partialorder %v7702_v38, 0.0  ;;  %v7830_v58 = vmul.f32 0.2, %v7702_v38  ;;  %v7705_v22 = vadd.f32 %v14971_v54, %v7165_v34  ;;  %v7167_v11 = vadd.f32 %v7166_v26, %v7054_v55  ;;  %8414 = vmatmul.mubr.bf16.gmra.mxu0 %v7929_v39 }
 0x3b9   : > { %v7893_v6 = vsel %vm7765_vm8, %v7701_v13, %v7829_v10  ;;  %v7056_v37 = vadd.f32 %v7055_v42, %v14929_v56  ;;  %v7168_v36 = vpop.f32.mrf.mxu1  ;;  %v7057_v57 = vpop.f32.mrf.mxu0  ;;  %v7890_v56 = vsel %vm7762_vm10, %v7698_v19, %v7826_v8 }
 0x3ba   : > { %v7706_v49 = vadd.f32 %v14984_v60, %v7167_v11  ;;  %v7058_v21 = vadd.f32 %v7057_v57, %v6945_v31  ;;  %v7894_v12 = vsel %vm7766_vm9, %v7702_v38, %v7830_v58  ;;  %v7933_v0 = vpack.c.bf16 %v7893_v6, %v7889_v32 }
 0x3bb   : > { %v7169_v33 = vadd.f32 %v7168_v36, %v7056_v37  ;;  %v7170_v17 = vpop.f32.mrf.mxu1  ;;  %v7061_v62 = vpop.f32.mrf.mxu0  ;;  %v7833_v41 = vmul.f32 0.2, %v7705_v22  ;;  %v7934_v20 = vpack.c.bf16 %v7894_v12, %v7890_v56  ;;  %vm7769_vm11 = vcmp.gt.f32.partialorder %v7705_v22, 0.0 }
 0x3bc   : > { %v7171_v63 = vadd.f32 %v7170_v17, %v7058_v21  ;;  %v7834_v61 = vmul.f32 0.2, %v7706_v49  ;;  %v7062_v5 = vadd.f32 %v7061_v62, %v14945_v16  ;;  %vm7770_vm12 = vcmp.gt.f32.partialorder %v7706_v49, 0.0 }
 0x3bd   : > { %v7709_v47 = vadd.f32 %v14971_v54, %v7169_v33  ;;  %v7174_v44 = vpop.f32.mrf.mxu1  ;;  %v7063_v24 = vpop.f32.mrf.mxu0  ;;  %8423 = vmatprep.mubr.bf16.mxu0 %v7934_v20  ;;  %v7897_v19 = vsel %vm7769_vm11, %v7705_v22, %v7833_v41 }
 0x3be   : > { %v7710_v15 = vadd.f32 %v14984_v60, %v7171_v63  ;;  %v7064_v52 = vadd.f32 %v7063_v24, %v14948_v51  ;;  %v7175_v39 = vadd.f32 %v7174_v44, %v7062_v5  ;;  %v7898_v59 = vsel %vm7770_vm12, %v7706_v49, %v7834_v61  ;;  %v16029_v44 = vld [vmem:[#allocation35_spill] sm:$0xff] }
 0x3bf   : > { %vm7773_vm13 = vcmp.gt.f32.partialorder %v7709_v47, 0.0  ;;  %v7837_v14 = vmul.f32 0.2, %v7709_v47  ;;  %v7176_v40 = vpop.f32.mrf.mxu1  ;;  %v7065_v1 = vpop.f32.mrf.mxu0 }
 0x3c0   : > { %vm7774_vm14 = vcmp.gt.f32.partialorder %v7710_v15, 0.0  ;;  %v7838_v53 = vmul.f32 0.2, %v7710_v15  ;;  %v7177_v16 = vadd.f32 %v7176_v40, %v7064_v52  ;;  %8424 = vmatmul.mubr.bf16.gmra.mxu0 %v7933_v0  ;;  %v7066_v9 = vadd.f32 %v7065_v1, %v14964_v28 }
 0x3c1   : > { %v7901_v45 = vsel %vm7773_vm13, %v7709_v47, %v7837_v14  ;;  %v7713_v29 = vadd.f32 %v14971_v54, %v7175_v39  ;;  %v7178_v51 = vpop.f32.mrf.mxu1  ;;  %v7067_v7 = vpop.f32.mrf.mxu0  ;;  %v16030_v14 = vld [vmem:[#allocation37_spill] sm:$0xff] }
 0x3c2   : > { %v7714_v2 = vadd.f32 %v14984_v60, %v7177_v16  ;;  %v7179_v30 = vadd.f32 %v7178_v51, %v7066_v9  ;;  %v7068_v35 = vadd.f32 %v7067_v7, %v6955_v3  ;;  %v7902_v31 = vsel %vm7774_vm14, %v7710_v15, %v7838_v53  ;;  %v16031_v16 = vld [vmem:[#allocation33_spill] sm:$0xff]  ;;  %v16032_v51 = vld [vmem:[#allocation26_spill] sm:$0xff] }
 0x3c3   : > { %v7841_v13 = vmul.f32 0.2, %v7713_v29  ;;  %v7180_v48 = vpop.f32.mrf.mxu1  ;;  %v7217_v50 = vpop.f32.mrf.mxu0  ;;  %v7938_v25 = vpack.c.bf16 %v7902_v31, %v7898_v59  ;;  %v7937_v38 = vpack.c.bf16 %v7901_v45, %v7897_v19  ;;  %vm7777_vm15 = vcmp.gt.f32.partialorder %v7713_v29, 0.0 }
 0x3c4   : > { %v7717_v28 = vadd.f32 %v14971_v54, %v7179_v30  ;;  %v7181_v34 = vadd.f32 %v7180_v48, %v7068_v35  ;;  %v7842_v55 = vmul.f32 0.2, %v7714_v2  ;;  %v7218_v8 = vadd.f32 %v7217_v50, %v14375_v43 }
 0x3c5   : > { %v7330_v10 = vpop.f32.mrf.mxu1  ;;  %v7219_v26 = vpop.f32.mrf.mxu0  ;;  %8433 = vmatprep.mubr.bf16.mxu0 %v7938_v25  ;;  %v7905_v11 = vsel %vm7777_vm15, %v7713_v29, %v7841_v13  ;;  %vm7778_vm2 = vcmp.gt.f32.partialorder %v7714_v2, 0.0  ;;  %v16033_v13 = vld [vmem:[#allocation38_spill] sm:$0xff] }
 0x3c6   : > { %vm7781_vm0 = vcmp.gt.f32.partialorder %v7717_v28, 0.0  ;;  %v7845_v42 = vmul.f32 0.2, %v7717_v28  ;;  %v7718_v58 = vadd.f32 %v14984_v60, %v7181_v34  ;;  %v7220_v22 = vadd.f32 %v7219_v26, %v14385_v4  ;;  %v16035_v26 = vld [vmem:[#allocation40_spill] sm:$0xff] }
 0x3c7   : > { %v15099_v6 = vadd.f32 %v7330_v10, %v7218_v8  ;;  %v7332_v37 = vpop.f32.mrf.mxu1  ;;  %v7221_v36 = vpop.f32.mrf.mxu0  ;;  %v7906_v27 = vsel %vm7778_vm2, %v7714_v2, %v7842_v55 }
 0x3c8   : > { %v7909_v54 = vsel %vm7781_vm0, %v7717_v28, %v7845_v42  ;;  %vm7782_vm3 = vcmp.gt.f32.partialorder %v7718_v58, 0.0  ;;  %v7846_v57 = vmul.f32 0.2, %v7718_v58  ;;  %v15101_v32 = vadd.f32 %v7332_v37, %v7220_v22  ;;  %8434 = vmatmul.mubr.bf16.gmra.mxu0 %v7937_v38  ;;  %v16034_v28 = vld [vmem:[#allocation43_spill] sm:$0xff] }
 0x3c9   : > { %v7222_v43 = vadd.f32 %v7221_v36, %v14394_v23  ;;  %v7334_v49 = vpop.f32.mrf.mxu1  ;;  %v15104_v21 = vpop.f32.mrf.mxu0  ;;  %v7941_v60 = vpack.c.bf16 %v7909_v54, %v7905_v11  ;;  %v16028_v23 = vld [vmem:[#allocation22_spill] sm:$0xff]  ;;  %v16036_v54 = vld [vmem:[#allocation49_spill] sm:$0xff] }
 0x3ca   : > { %v7910_v4 = vsel %vm7782_vm3, %v7718_v58, %v7846_v57 }
 0x3cb   : > { %v15106_v18 = vadd.f32 %v7334_v49, %v7222_v43  ;;  %v15108_v33 = vpop.f32.mrf.mxu1  ;;  %v7227_v17 = vpop.f32.mrf.mxu0  ;;  %v7942_v62 = vpack.c.bf16 %v7910_v4, %v7906_v27  ;;  %v16037_v27 = vld [vmem:[#allocation44_spill] sm:$0xff] }
 0x3cc   : > { %v7228_v12 = vadd.f32 %v7227_v17, %v14415_v46 }
 0x3cd   : > { %v7340_v0 = vpop.f32.mrf.mxu1  ;;  %v7229_v41 = vpop.f32.mrf.mxu0  ;;  %8443 = vmatprep.mubr.bf16.mxu0 %v7942_v62 }
 0x3ce   : > { %v15111_v63 = vadd.f32 %v7340_v0, %v7228_v12  ;;  %v7230_v56 = vadd.f32 %v7229_v41, %v16028_v23  ;;  %v16038_v0 = vld [vmem:[#allocation50_spill] sm:$0xff] }
 0x3cf   : > { %v7342_v61 = vpop.f32.mrf.mxu1  ;;  %v7231_v47 = vpop.f32.mrf.mxu0 }
 0x3d0   : > { %v15114_v5 = vadd.f32 %v7342_v61, %v7230_v56  ;;  %8444 = vmatmul.mubr.bf16.gmra.mxu0 %v7941_v60  ;;  %v7232_v24 = vadd.f32 %v7231_v47, %v16029_v44 }
 0x3d1   : > { %v7344_v20 = vpop.f32.mrf.mxu1  ;;  %v15117_v15 = vpop.f32.mrf.mxu0 }
 0x3d2   : > { %v15119_v52 = vadd.f32 %v7344_v20, %v7232_v24  ;;  %v16039_v24 = vld [vmem:[#allocation55_spill] sm:$0xff] }
 0x3d3   : > { %v15121_v46 = vpop.f32.mrf.mxu1  ;;  %v7237_v3 = vpop.f32.mrf.mxu0 }
 0x3d4   : > { %v7238_v39 = vadd.f32 %v7237_v3, %v16030_v14 }
 0x3d5   : > { %v7350_v40 = vpop.f32.mrf.mxu1  ;;  %v7239_v1 = vpop.f32.mrf.mxu0 }
 0x3d6   : > { %v15124_v53 = vadd.f32 %v7350_v40, %v7238_v39  ;;  %v7240_v9 = vadd.f32 %v7239_v1, %v16031_v16  ;;  %v16040_v40 = vld [vmem:[#allocation51_spill] sm:$0xff] }
 0x3d7   : > { %v7352_v19 = vpop.f32.mrf.mxu1  ;;  %v7241_v45 = vpop.f32.mrf.mxu0 }
 0x3d8   : > { %v15127_v29 = vadd.f32 %v7352_v19, %v7240_v9  ;;  %v7242_v7 = vadd.f32 %v7241_v45, %v16032_v51  ;;  %v16041_v45 = vld [vmem:[#allocation57_spill] sm:$0xff] }
 0x3d9   : > { %v7354_v59 = vpop.f32.mrf.mxu1  ;;  %v15130_v2 = vpop.f32.mrf.mxu0 }
 0x3da   : > { %v15132_v30 = vadd.f32 %v7354_v59, %v7242_v7 }
 0x3db   : > { %v15134_v35 = vpop.f32.mrf.mxu1  ;;  %v7247_v31 = vpop.f32.mrf.mxu0 }
 0x3dc   : > { %v7248_v48 = vadd.f32 %v7247_v31, %v16033_v13 }
 0x3dd   : > { %v7360_v50 = vpop.f32.mrf.mxu1  ;;  %v7249_v25 = vpop.f32.mrf.mxu0 }
 0x3de   : > { %v15137_v38 = vadd.f32 %v7360_v50, %v7248_v48  ;;  %v7250_v34 = vadd.f32 %v7249_v25, %v16034_v28  ;;  %v16042_v50 = vld [vmem:[#allocation62_spill] sm:$0xff] }
 0x3df   : > { %v7362_v55 = vpop.f32.mrf.mxu1  ;;  %v7251_v8 = vpop.f32.mrf.mxu0 }
 0x3e0   : > { %v15140_v10 = vadd.f32 %v7362_v55, %v7250_v34  ;;  %v7252_v42 = vadd.f32 %v7251_v8, %v16035_v26  ;;  %v16043_v8 = vld [vmem:[#allocation58_spill] sm:$0xff] }
 0x3e1   : > { %v7364_v58 = vpop.f32.mrf.mxu1  ;;  %v15143_v22 = vpop.f32.mrf.mxu0 }
 0x3e2   : > { %v15145_v11 = vadd.f32 %v7364_v58, %v7252_v42 }
 0x3e3   : > { %v15147_v37 = vpop.f32.mrf.mxu1  ;;  %v7257_v36 = vpop.f32.mrf.mxu0 }
 0x3e4   : > { %v7258_v57 = vadd.f32 %v7257_v36, %v16036_v54  ;;  %v16044_v54 = vld [vmem:[#allocation63_spill] sm:$0xff] }
 0x3e5   : > { %v7370_v43 = vpop.f32.mrf.mxu1  ;;  %v7259_v49 = vpop.f32.mrf.mxu0 }
 0x3e6   : > { %v15150_v60 = vadd.f32 %v7370_v43, %v7258_v57  ;;  %v7260_v4 = vadd.f32 %v7259_v49, %v16037_v27 }
 0x3e7   : > { %v7372_v17 = vpop.f32.mrf.mxu1  ;;  %v7261_v62 = vpop.f32.mrf.mxu0 }
 0x3e8   : > { %v15153_v12 = vadd.f32 %v7372_v17, %v7260_v4  ;;  %v7262_v41 = vadd.f32 %v7261_v62, %v16038_v0  ;;  %v16045_v62 = vld [vmem:[#allocation68_spill] sm:$0xff] }
 0x3e9   : > { %v7374_v23 = vpop.f32.mrf.mxu1  ;;  %v15156_v56 = vpop.f32.mrf.mxu0 }
 0x3ea   : > { %v15158_v61 = vadd.f32 %v7374_v23, %v7262_v41 }
 0x3eb   : > { %v15160_v47 = vpop.f32.mrf.mxu1  ;;  %v7267_v44 = vpop.f32.mrf.mxu0 }
 0x3ec   : > { %v7268_v20 = vadd.f32 %v7267_v44, %v16039_v24  ;;  %v16046_v24 = vld [vmem:[#allocation64_spill] sm:$0xff] }
 0x3ed   : > { %v7380_v3 = vpop.f32.mrf.mxu1  ;;  %v7269_v14 = vpop.f32.mrf.mxu0 }
 0x3ee   : > { %v15163_v39 = vadd.f32 %v7380_v3, %v7268_v20  ;;  %v7270_v1 = vadd.f32 %v7269_v14, %v16040_v40 }
 0x3ef   : > { %v7382_v16 = vpop.f32.mrf.mxu1  ;;  %v7271_v9 = vpop.f32.mrf.mxu0 }
 0x3f0   : > { %v15166_v19 = vadd.f32 %v7382_v16, %v7270_v1  ;;  %v7272_v51 = vadd.f32 %v7271_v9, %v16041_v45  ;;  %v16047_v1 = vld [vmem:[#allocation69_spill] sm:$0xff] }
 0x3f1   : > { %v7384_v7 = vpop.f32.mrf.mxu1  ;;  %v15169_v59 = vpop.f32.mrf.mxu0 }
 0x3f2   : > { %v15171_v31 = vadd.f32 %v7384_v7, %v7272_v51 }
 0x3f3   : > { %v15173_v13 = vpop.f32.mrf.mxu1  ;;  %v7277_v48 = vpop.f32.mrf.mxu0 }
 0x3f4   : > { %v7278_v25 = vadd.f32 %v7277_v48, %v16042_v50 }
 0x3f5   : > { %v7390_v28 = vpop.f32.mrf.mxu1  ;;  %v7279_v34 = vpop.f32.mrf.mxu0 }
 0x3f6   : > { %v15176_v55 = vadd.f32 %v7390_v28, %v7278_v25  ;;  %v7280_v26 = vadd.f32 %v7279_v34, %v16043_v8  ;;  %v16048_v25 = vld [vmem:[#allocation5_spill] sm:$0xff]  ;;  %v16049_v28 = vld [vmem:[#allocation74_spill] sm:$0xff]  ;;  %v16050_v8 = vld [vmem:[#allocation20_spill] sm:$0xff] }
 0x3f7   : > { %v7392_v42 = vpop.f32.mrf.mxu1  ;;  %v7281_v58 = vpop.f32.mrf.mxu0  ;;  %v15204_v34 = vrot.slane %v16049_v28, %v16048_v25 }
 0x3f8   : > { %v15179_v36 = vadd.f32 %v7392_v42, %v7280_v26  ;;  %v7282_v57 = vadd.f32 %v7281_v58, %v16044_v54  ;;  %v7224_v26 = vadd.f32 %v15104_v21, %v16050_v8 }
 0x3f9   : > { %v7394_v43 = vpop.f32.mrf.mxu1  ;;  %v15182_v49 = vpop.f32.mrf.mxu0 }
 0x3fa   : > { %v15184_v27 = vadd.f32 %v7394_v43, %v7282_v57 }
 0x3fb   : > { %v15186_v4 = vpop.f32.mrf.mxu1  ;;  %v7287_v17 = vpop.f32.mrf.mxu0 }
 0x3fc   : > { %v7288_v0 = vadd.f32 %v7287_v17, %v16045_v62  ;;  %v16051_v17 = vld [vmem:[#allocation8_spill] sm:$0xff] }
 0x3fd   : > { %v7400_v41 = vpop.f32.mrf.mxu1  ;;  %v7289_v23 = vpop.f32.mrf.mxu0  ;;  %v15211_v62 = vrot.slane %v16049_v28, %v16051_v17 }
 0x3fe   : > { %v15189_v44 = vadd.f32 %v7400_v41, %v7288_v0  ;;  %v7290_v20 = vadd.f32 %v7289_v23, %v16046_v24  ;;  %v7337_v24 = vadd.f32 %v15108_v33, %v7224_v26 }
 0x3ff   : > { %v7402_v3 = vpop.f32.mrf.mxu1  ;;  %v7291_v14 = vpop.f32.mrf.mxu0 }
 0x400   : > { %v15192_v40 = vadd.f32 %v7402_v3, %v7290_v20  ;;  %v7292_v16 = vadd.f32 %v7291_v14, %v16047_v1  ;;  %v16052_v3 = vld [vmem:[#allocation31_spill] sm:$0xff] }
 0x401   : > { %v7404_v9 = vpop.f32.mrf.mxu1  ;;  %v15195_v45 = vpop.f32.mrf.mxu0  ;;  %v7234_v14 = vadd.f32 %v15117_v15, %v16052_v3 }
 0x402   : > { %v15197_v51 = vadd.f32 %v7404_v9, %v7292_v16 }
 0x403   : > { %v15199_v7 = vpop.f32.mrf.mxu1  ;;  %v7443_v48 = vpop.f32.mrf.mxu0  ;;  %v7347_v26 = vadd.f32 %v15121_v46, %v7234_v14 }
 0x404   : > { %v7444_v50 = vadd.f32 %v7443_v48, %v15099_v6 }
 0x405   : > { %v7556_v42 = vpop.f32.mrf.mxu1  ;;  %v7445_v58 = vpop.f32.mrf.mxu0 }
 0x406   : > { %v7557_v54 = vadd.f32 %v7556_v42, %v7444_v50  ;;  %v7446_v57 = vadd.f32 %v7445_v58, %v15101_v32 }
 0x407   : > { %v7558_v43 = vpop.f32.mrf.mxu1  ;;  %v7447_v0 = vpop.f32.mrf.mxu0 }
 0x408   : > { %v7659_v6 = vadd.f32 %v15204_v34, %v7557_v54  ;;  %v7559_v41 = vadd.f32 %v7558_v43, %v7446_v57  ;;  %v7448_v23 = vadd.f32 %v7447_v0, %v15106_v18 }
 0x409   : > { %v7560_v20 = vpop.f32.mrf.mxu1  ;;  %v7449_v21 = vpop.f32.mrf.mxu0 }
 0x40a   : > { %v7561_v1 = vadd.f32 %v7560_v20, %v7448_v23  ;;  %v7787_v32 = vmul.f32 0.2, %v7659_v6  ;;  %v7660_v16 = vadd.f32 %v15211_v62, %v7559_v41  ;;  %v7450_v9 = vadd.f32 %v7449_v21, %v7337_v24 }
 0x40b   : > { %v7562_v48 = vpop.f32.mrf.mxu1  ;;  %v7453_v50 = vpop.f32.mrf.mxu0  ;;  %vm7723_vm4 = vcmp.gt.f32.partialorder %v7659_v6, 0.0 }
 0x40c   : > { %v7663_v25 = vadd.f32 %v15204_v34, %v7561_v1  ;;  %v7563_v28 = vadd.f32 %v7562_v48, %v7450_v9  ;;  %v7454_v18 = vadd.f32 %v7453_v50, %v15111_v63  ;;  %v7851_v58 = vsel %vm7723_vm4, %v7659_v6, %v7787_v32  ;;  %v16053_v1 = vld [vmem:[#allocation42_spill] sm:$0xff] }
 0x40d   : > { %v7566_v8 = vpop.f32.mrf.mxu1  ;;  %v7455_v33 = vpop.f32.mrf.mxu0  ;;  %vm7724_vm6 = vcmp.gt.f32.partialorder %v7660_v16, 0.0  ;;  %v7788_v0 = vmul.f32 0.2, %v7660_v16  ;;  %v7244_v32 = vadd.f32 %v15130_v2, %v16053_v1 }
 0x40e   : > { %vm7727_vm5 = vcmp.gt.f32.partialorder %v7663_v25, 0.0  ;;  %v7791_v42 = vmul.f32 0.2, %v7663_v25  ;;  %v7456_v15 = vadd.f32 %v7455_v33, %v15114_v5  ;;  %v7664_v54 = vadd.f32 %v15211_v62, %v7563_v28 }
 0x40f   : > { %v7567_v57 = vadd.f32 %v7566_v8, %v7454_v18  ;;  %v7568_v43 = vpop.f32.mrf.mxu1  ;;  %v7457_v17 = vpop.f32.mrf.mxu0  ;;  %v7852_v18 = vsel %vm7724_vm6, %v7660_v16, %v7788_v0 }
 0x410   : > { %v7855_v41 = vsel %vm7727_vm5, %v7663_v25, %v7791_v42  ;;  %v7569_v23 = vadd.f32 %v7568_v43, %v7456_v15  ;;  %v7458_v63 = vadd.f32 %v7457_v17, %v15119_v52  ;;  %vm7728_vm7 = vcmp.gt.f32.partialorder %v7664_v54, 0.0 }
 0x411   : > { %v7915_v24 = vpack.c.bf16 %v7855_v41, %v7851_v58  ;;  %v7792_v20 = vmul.f32 0.2, %v7664_v54  ;;  %v7667_v46 = vadd.f32 %v15204_v34, %v7567_v57  ;;  %v7570_v21 = vpop.f32.mrf.mxu1  ;;  %v7459_v3 = vpop.f32.mrf.mxu0 }
 0x412   : > { %v7668_v5 = vadd.f32 %v15211_v62, %v7569_v23  ;;  %v7571_v6 = vadd.f32 %v7570_v21, %v7458_v63  ;;  %v7460_v14 = vadd.f32 %v7459_v3, %v7347_v26  ;;  %v16054_v63 = vld [vmem:[#allocation3_spill] sm:$0xff] }
 0x413   : > { %v7795_v9 = vmul.f32 0.2, %v7667_v46  ;;  %v7572_v48 = vpop.f32.mrf.mxu1  ;;  %v7463_v50 = vpop.f32.mrf.mxu0  ;;  %v7856_v25 = vsel %vm7728_vm7, %v7664_v54, %v7792_v20  ;;  %vm7731_vm1 = vcmp.gt.f32.partialorder %v7667_v46, 0.0  ;;  %v7357_v54 = vadd.f32 %v15134_v35, %v7244_v32 }
 0x414   : > { %v7671_v52 = vadd.f32 %v15204_v34, %v7571_v6  ;;  %v7573_v28 = vadd.f32 %v7572_v48, %v7460_v14  ;;  %v7796_v8 = vmul.f32 0.2, %v7668_v5  ;;  %v7464_v33 = vadd.f32 %v7463_v50, %v15124_v53 }
 0x415   : > { %v7576_v42 = vpop.f32.mrf.mxu1  ;;  %v7465_v15 = vpop.f32.mrf.mxu0  ;;  %v7916_v58 = vpack.c.bf16 %v7856_v25, %v7852_v18  ;;  %v7859_v43 = vsel %vm7731_vm1, %v7667_v46, %v7795_v9  ;;  %vm7732_vm9 = vcmp.gt.f32.partialorder %v7668_v5, 0.0  ;;  %v7254_v20 = vadd.f32 %v15143_v22, %v16054_v63 }
 0x416   : > { %vm7735_vm8 = vcmp.gt.f32.partialorder %v7671_v52, 0.0  ;;  %v7799_v26 = vmul.f32 0.2, %v7671_v52  ;;  %v7672_v2 = vadd.f32 %v15211_v62, %v7573_v28  ;;  %v7466_v57 = vadd.f32 %v7465_v15, %v15127_v29 }
 0x417   : > { %v7577_v17 = vadd.f32 %v7576_v42, %v7464_v33  ;;  %v7578_v41 = vpop.f32.mrf.mxu1  ;;  %8486 = vmatprep.mubr.bf16.mxu1 %v7916_v58  ;;  %v7467_v16 = vpop.f32.mrf.mxu0  ;;  %v7860_v14 = vsel %vm7732_vm9, %v7668_v5, %v7796_v8 }
 0x418   : > { %v7863_v0 = vsel %vm7735_vm8, %v7671_v52, %v7799_v26  ;;  %vm7736_vm10 = vcmp.gt.f32.partialorder %v7672_v2, 0.0  ;;  %v7800_v53 = vmul.f32 0.2, %v7672_v2  ;;  %v7579_v23 = vadd.f32 %v7578_v41, %v7466_v57  ;;  %8487 = vmatmul.mubr.bf16.vlgmr.msra.gmra.mxu1 %v7915_v24 }
 0x419   : > { %v7468_v21 = vadd.f32 %v7467_v16, %v15132_v30  ;;  %v7580_v3 = vpop.f32.mrf.mxu1  ;;  %v7469_v29 = vpop.f32.mrf.mxu0  ;;  %v7919_v6 = vpack.c.bf16 %v7863_v0, %v7859_v43  ;;  %v7675_v35 = vadd.f32 %v15204_v34, %v7577_v17  ;;  %v7367_v30 = vadd.f32 %v15147_v37, %v7254_v20 }
 0x41a   : > { %v7470_v46 = vadd.f32 %v7469_v29, %v7357_v54  ;;  %v7864_v1 = vsel %vm7736_vm10, %v7672_v2, %v7800_v53  ;;  %v7676_v32 = vadd.f32 %v15211_v62, %v7579_v23  ;;  %v16055_v53 = vld [vmem:[#allocation47_spill] sm:$0xff] }
 0x41b   : > { %v7581_v9 = vadd.f32 %v7580_v3, %v7468_v21  ;;  %v7582_v48 = vpop.f32.mrf.mxu1  ;;  %v7473_v50 = vpop.f32.mrf.mxu0  ;;  %v7920_v24 = vpack.c.bf16 %v7864_v1, %v7860_v14  ;;  %v7803_v33 = vmul.f32 0.2, %v7675_v35  ;;  %vm7739_vm11 = vcmp.gt.f32.partialorder %v7675_v35, 0.0 }
 0x41c   : > { %v7583_v25 = vadd.f32 %v7582_v48, %v7470_v46  ;;  %v7474_v22 = vadd.f32 %v7473_v50, %v15137_v38  ;;  %v7804_v15 = vmul.f32 0.2, %v7676_v32  ;;  %vm7740_vm14 = vcmp.gt.f32.partialorder %v7676_v32, 0.0 }
 0x41d   : > { %v7679_v52 = vadd.f32 %v15204_v34, %v7581_v9  ;;  %v7586_v28 = vpop.f32.mrf.mxu1  ;;  %v7475_v18 = vpop.f32.mrf.mxu0  ;;  %8496 = vmatprep.mubr.bf16.mxu1 %v7920_v24  ;;  %v7264_v23 = vadd.f32 %v15156_v56, %v16055_v53 }
 0x41e   : > { %v7680_v5 = vadd.f32 %v15211_v62, %v7583_v25  ;;  %v7587_v8 = vadd.f32 %v7586_v28, %v7474_v22  ;;  %v7476_v42 = vadd.f32 %v7475_v18, %v15140_v10  ;;  %v7867_v10 = vsel %vm7739_vm11, %v7675_v35, %v7803_v33 }
 0x41f   : > { %vm7743_vm12 = vcmp.gt.f32.partialorder %v7679_v52, 0.0  ;;  %v7807_v58 = vmul.f32 0.2, %v7679_v52  ;;  %v7588_v26 = vpop.f32.mrf.mxu1  ;;  %v7477_v2 = vpop.f32.mrf.mxu0  ;;  %v7377_v25 = vadd.f32 %v15160_v47, %v7264_v23 }
 0x420   : > { %vm7744_vm13 = vcmp.gt.f32.partialorder %v7680_v5, 0.0  ;;  %v7808_v38 = vmul.f32 0.2, %v7680_v5  ;;  %v7683_v37 = vadd.f32 %v15204_v34, %v7587_v8  ;;  %v7589_v57 = vadd.f32 %v7588_v26, %v7476_v42  ;;  %8497 = vmatmul.mubr.bf16.gmra.mxu1 %v7919_v6 }
 0x421   : > { %v7871_v54 = vsel %vm7743_vm12, %v7679_v52, %v7807_v58  ;;  %v7478_v43 = vadd.f32 %v7477_v2, %v15145_v11  ;;  %v7590_v17 = vpop.f32.mrf.mxu1  ;;  %v7479_v41 = vpop.f32.mrf.mxu0  ;;  %v7868_v11 = vsel %vm7740_vm14, %v7676_v32, %v7804_v15 }
 0x422   : > { %v7684_v16 = vadd.f32 %v15211_v62, %v7589_v57  ;;  %v7480_v0 = vadd.f32 %v7479_v41, %v7367_v30  ;;  %v7872_v3 = vsel %vm7744_vm13, %v7680_v5, %v7808_v38  ;;  %v7923_v29 = vpack.c.bf16 %v7871_v54, %v7867_v10  ;;  %v16056_v38 = vld [vmem:[#allocation53_spill] sm:$0xff] }
 0x423   : > { %v7591_v63 = vadd.f32 %v7590_v17, %v7478_v43  ;;  %v7592_v20 = vpop.f32.mrf.mxu1  ;;  %v7483_v21 = vpop.f32.mrf.mxu0  ;;  %v7811_v6 = vmul.f32 0.2, %v7683_v37  ;;  %v7924_v50 = vpack.c.bf16 %v7872_v3, %v7868_v11  ;;  %vm7747_vm15 = vcmp.gt.f32.partialorder %v7683_v37, 0.0 }
 0x424   : > { %v7593_v46 = vadd.f32 %v7592_v20, %v7480_v0  ;;  %v7812_v14 = vmul.f32 0.2, %v7684_v16  ;;  %v7484_v35 = vadd.f32 %v7483_v21, %v15150_v60  ;;  %vm7748_vm0 = vcmp.gt.f32.partialorder %v7684_v16, 0.0 }
 0x425   : > { %v7687_v1 = vadd.f32 %v15204_v34, %v7591_v63  ;;  %v7596_v9 = vpop.f32.mrf.mxu1  ;;  %v7485_v48 = vpop.f32.mrf.mxu0  ;;  %8506 = vmatprep.mubr.bf16.mxu1 %v7924_v50  ;;  %v7875_v33 = vsel %vm7747_vm15, %v7683_v37, %v7811_v6  ;;  %v7274_v57 = vadd.f32 %v15169_v59, %v16056_v38 }
 0x426   : > { %v7688_v56 = vadd.f32 %v15211_v62, %v7593_v46  ;;  %v7486_v24 = vadd.f32 %v7485_v48, %v15153_v12  ;;  %v7597_v30 = vadd.f32 %v7596_v9, %v7484_v35  ;;  %v7876_v47 = vsel %vm7748_vm0, %v7684_v16, %v7812_v14 }
 0x427   : > { %vm7751_vm2 = vcmp.gt.f32.partialorder %v7687_v1, 0.0  ;;  %v7815_v22 = vmul.f32 0.2, %v7687_v1  ;;  %v7598_v32 = vpop.f32.mrf.mxu1  ;;  %v7487_v52 = vpop.f32.mrf.mxu0  ;;  %v7387_v21 = vadd.f32 %v15173_v13, %v7274_v57 }
 0x428   : > { %vm7752_vm3 = vcmp.gt.f32.partialorder %v7688_v56, 0.0  ;;  %v7816_v28 = vmul.f32 0.2, %v7688_v56  ;;  %v7599_v60 = vadd.f32 %v7598_v32, %v7486_v24  ;;  %8507 = vmatmul.mubr.bf16.gmra.mxu1 %v7923_v29  ;;  %v7488_v18 = vadd.f32 %v7487_v52, %v15158_v61 }
 0x429   : > { %v7879_v5 = vsel %vm7751_vm2, %v7687_v1, %v7815_v22  ;;  %v7691_v8 = vadd.f32 %v15204_v34, %v7597_v30  ;;  %v7600_v12 = vpop.f32.mrf.mxu1  ;;  %v7489_v42 = vpop.f32.mrf.mxu0  ;;  %v16057_v1 = vld [vmem:[#allocation60_spill] sm:$0xff] }
 0x42a   : > { %v7692_v15 = vadd.f32 %v15211_v62, %v7599_v60  ;;  %v7601_v58 = vadd.f32 %v7600_v12, %v7488_v18  ;;  %v7490_v26 = vadd.f32 %v7489_v42, %v7377_v25  ;;  %v7880_v2 = vsel %vm7752_vm3, %v7688_v56, %v7816_v28 }
 0x42b   : > { %v7819_v54 = vmul.f32 0.2, %v7691_v8  ;;  %v7602_v43 = vpop.f32.mrf.mxu1  ;;  %v7493_v61 = vpop.f32.mrf.mxu0  ;;  %v7928_v17 = vpack.c.bf16 %v7880_v2, %v7876_v47  ;;  %v7927_v37 = vpack.c.bf16 %v7879_v5, %v7875_v33  ;;  %vm7755_vm4 = vcmp.gt.f32.partialorder %v7691_v8, 0.0 }
 0x42c   : > { %v7695_v41 = vadd.f32 %v15204_v34, %v7601_v58  ;;  %v7603_v10 = vadd.f32 %v7602_v43, %v7490_v26  ;;  %v7820_v0 = vmul.f32 0.2, %v7692_v15  ;;  %v7494_v16 = vadd.f32 %v7493_v61, %v15163_v39 }
 0x42d   : > { %v7606_v53 = vpop.f32.mrf.mxu1  ;;  %v7495_v23 = vpop.f32.mrf.mxu0  ;;  %8516 = vmatprep.mubr.bf16.mxu1 %v7928_v17  ;;  %v7883_v3 = vsel %vm7755_vm4, %v7691_v8, %v7819_v54  ;;  %vm7756_vm6 = vcmp.gt.f32.partialorder %v7692_v15, 0.0  ;;  %v7284_v35 = vadd.f32 %v15182_v49, %v16057_v1 }
 0x42e   : > { %vm7759_vm5 = vcmp.gt.f32.partialorder %v7695_v41, 0.0  ;;  %v7823_v63 = vmul.f32 0.2, %v7695_v41  ;;  %v7696_v20 = vadd.f32 %v15211_v62, %v7603_v10  ;;  %v7496_v59 = vadd.f32 %v7495_v23, %v15166_v19 }
 0x42f   : > { %v7607_v29 = vadd.f32 %v7606_v53, %v7494_v16  ;;  %v7608_v6 = vpop.f32.mrf.mxu1  ;;  %v7497_v46 = vpop.f32.mrf.mxu0  ;;  %v7884_v24 = vsel %vm7756_vm6, %v7692_v15, %v7820_v0 }
 0x430   : > { %v7887_v11 = vsel %vm7759_vm5, %v7695_v41, %v7823_v63  ;;  %vm7760_vm7 = vcmp.gt.f32.partialorder %v7696_v20, 0.0  ;;  %v7824_v14 = vmul.f32 0.2, %v7696_v20  ;;  %v7609_v39 = vadd.f32 %v7608_v6, %v7496_v59  ;;  %8517 = vmatmul.mubr.bf16.gmra.mxu1 %v7927_v37  ;;  %v16058_v41 = vld [vmem:[#allocation66_spill] sm:$0xff] }
 0x431   : > { %v7498_v9 = vadd.f32 %v7497_v46, %v15171_v31  ;;  %v7610_v48 = vpop.f32.mrf.mxu1  ;;  %v7499_v50 = vpop.f32.mrf.mxu0  ;;  %v7931_v19 = vpack.c.bf16 %v7887_v11, %v7883_v3  ;;  %v7699_v13 = vadd.f32 %v15204_v34, %v7607_v29  ;;  %v7397_v31 = vadd.f32 %v15186_v4, %v7284_v35 }
 0x432   : > { %v7500_v56 = vadd.f32 %v7499_v50, %v7387_v21  ;;  %v7888_v25 = vsel %vm7760_vm7, %v7696_v20, %v7824_v14  ;;  %v7700_v22 = vadd.f32 %v15211_v62, %v7609_v39  ;;  %v7294_v10 = vadd.f32 %v15195_v45, %v16058_v41 }
 0x433   : > { %v7611_v30 = vadd.f32 %v7610_v48, %v7498_v9  ;;  %v7612_v32 = vpop.f32.mrf.mxu1  ;;  %v7503_v52 = vpop.f32.mrf.mxu0  ;;  %v7932_v28 = vpack.c.bf16 %v7888_v25, %v7884_v24  ;;  %v7827_v8 = vmul.f32 0.2, %v7699_v13  ;;  %vm7763_vm1 = vcmp.gt.f32.partialorder %v7699_v13, 0.0 }
 0x434   : > { %v7613_v60 = vadd.f32 %v7612_v32, %v7500_v56  ;;  %v7504_v49 = vadd.f32 %v7503_v52, %v15176_v55  ;;  %v7828_v15 = vmul.f32 0.2, %v7700_v22  ;;  %vm7764_vm10 = vcmp.gt.f32.partialorder %v7700_v22, 0.0 }
 0x435   : > { %v7703_v18 = vadd.f32 %v15204_v34, %v7611_v30  ;;  %v7616_v33 = vpop.f32.mrf.mxu1  ;;  %v7505_v5 = vpop.f32.mrf.mxu0  ;;  %8526 = vmatprep.mubr.bf16.mxu1 %v7932_v28  ;;  %v7407_v39 = vadd.f32 %v15199_v7, %v7294_v10 }
 0x436   : > { %v7704_v12 = vadd.f32 %v15211_v62, %v7613_v60  ;;  %v7617_v42 = vadd.f32 %v7616_v33, %v7504_v49  ;;  %v7506_v47 = vadd.f32 %v7505_v5, %v15179_v36  ;;  %v7891_v36 = vsel %vm7763_vm1, %v7699_v13, %v7827_v8 }
 0x437   : > { %vm7767_vm8 = vcmp.gt.f32.partialorder %v7703_v18, 0.0  ;;  %v7831_v58 = vmul.f32 0.2, %v7703_v18  ;;  %v7618_v26 = vpop.f32.mrf.mxu1  ;;  %v7507_v2 = vpop.f32.mrf.mxu0 }
 0x438   : > { %vm7768_vm9 = vcmp.gt.f32.partialorder %v7704_v12, 0.0  ;;  %v7832_v55 = vmul.f32 0.2, %v7704_v12  ;;  %v7707_v4 = vadd.f32 %v15204_v34, %v7617_v42  ;;  %v7619_v38 = vadd.f32 %v7618_v26, %v7506_v47  ;;  %8527 = vmatmul.mubr.bf16.gmra.mxu1 %v7931_v19 }
 0x439   : > { %v7895_v57 = vsel %vm7767_vm8, %v7703_v18, %v7831_v58  ;;  %v7508_v54 = vadd.f32 %v7507_v2, %v15184_v27  ;;  %v7620_v43 = vpop.f32.mrf.mxu1  ;;  %v7509_v61 = vpop.f32.mrf.mxu0  ;;  %v7892_v27 = vsel %vm7764_vm10, %v7700_v22, %v7828_v15 }
 0x43a   : > { %v7708_v17 = vadd.f32 %v15211_v62, %v7619_v38  ;;  %v7510_v37 = vadd.f32 %v7509_v61, %v7397_v31  ;;  %v7896_v23 = vsel %vm7768_vm9, %v7704_v12, %v7832_v55  ;;  %v7935_v63 = vpack.c.bf16 %v7895_v57, %v7891_v36 }
 0x43b   : > { %v7621_v0 = vadd.f32 %v7620_v43, %v7508_v54  ;;  %v7622_v16 = vpop.f32.mrf.mxu1  ;;  %v7513_v53 = vpop.f32.mrf.mxu0  ;;  %v7835_v20 = vmul.f32 0.2, %v7707_v4  ;;  %v7936_v11 = vpack.c.bf16 %v7896_v23, %v7892_v27  ;;  %vm7771_vm11 = vcmp.gt.f32.partialorder %v7707_v4, 0.0  ;;  %v16059_v23 = vld [vmem:[#allocation4_spill] sm:$0xff] }
 0x43c   : > { %v7623_v59 = vadd.f32 %v7622_v16, %v7510_v37  ;;  %v7836_v21 = vmul.f32 0.2, %v7708_v17  ;;  %v7514_v29 = vadd.f32 %v7513_v53, %v15189_v44  ;;  %vm7772_vm12 = vcmp.gt.f32.partialorder %v7708_v17, 0.0  ;;  %v8009_v16 = vld [vmem:[%s15507_s10] sm:$0x3] }
 0x43d   : > { %v7711_v3 = vadd.f32 %v15204_v34, %v7621_v0  ;;  %v7626_v6 = vpop.f32.mrf.mxu1  ;;  %v7515_v46 = vpop.f32.mrf.mxu0  ;;  %8536 = vmatprep.mubr.bf16.mxu1 %v7936_v11  ;;  %v7899_v13 = vsel %vm7771_vm11, %v7707_v4, %v7835_v20  ;;  %v16060_v20 = vld [vmem:[#allocation6_spill] sm:$0xff] }
 0x43e   : > { %v7712_v45 = vadd.f32 %v15211_v62, %v7623_v59  ;;  %v7516_v14 = vadd.f32 %v7515_v46, %v15192_v40  ;;  %v7627_v35 = vadd.f32 %v7626_v6, %v7514_v29  ;;  %v7900_v7 = vsel %vm7772_vm12, %v7708_v17, %v7836_v21  ;;  %v8663_v11 = vld [vmem:[%s15508_s11] sm:$0x3] }
 0x43f   : > { %vm7775_vm13 = vcmp.gt.f32.partialorder %v7711_v3, 0.0  ;;  %v7839_v1 = vmul.f32 0.2, %v7711_v3  ;;  %v7628_v9 = vpop.f32.mrf.mxu1  ;;  %v7517_v48 = vpop.f32.mrf.mxu0  ;;  %v15325_v59 = vrot.slane %v8009_v16, %v16060_v20 }
 0x440   : > { %vm7776_vm14 = vcmp.gt.f32.partialorder %v7712_v45, 0.0  ;;  %v7840_v50 = vmul.f32 0.2, %v7712_v45  ;;  %v7629_v44 = vadd.f32 %v7628_v9, %v7516_v14  ;;  %8537 = vmatmul.mubr.bf16.gmra.mxu1 %v7935_v63  ;;  %v7518_v19 = vadd.f32 %v7517_v48, %v15197_v51 }
 0x441   : > { %v7903_v56 = vsel %vm7775_vm13, %v7711_v3, %v7839_v1  ;;  %v7715_v24 = vadd.f32 %v15204_v34, %v7627_v35  ;;  %v7630_v40 = vpop.f32.mrf.mxu1  ;;  %v7519_v25 = vpop.f32.mrf.mxu0  ;;  %v15322_v63 = vrot.slane %v8009_v16, %v16059_v23  ;;  %v15339_v48 = vrot.slane %v8663_v11, %v16059_v23 }
 0x442   : > { %v7716_v22 = vadd.f32 %v15211_v62, %v7629_v44  ;;  %v7631_v30 = vadd.f32 %v7630_v40, %v7518_v19  ;;  %v7520_v32 = vadd.f32 %v7519_v25, %v7407_v39  ;;  %v7904_v52 = vsel %vm7776_vm14, %v7712_v45, %v7840_v50 }
 0x443   : > { %v7632_v28 = vpop.f32.mrf.mxu1  ;;  %v7940_v60 = vpack.c.bf16 %v7904_v52, %v7900_v7  ;;  %v7939_v49 = vpack.c.bf16 %v7903_v56, %v7899_v13  ;;  %v7843_v31 = vmul.f32 0.2, %v7715_v24  ;;  %vm7779_vm15 = vcmp.gt.f32.partialorder %v7715_v24, 0.0 }
 0x444   : > { %v7719_v51 = vadd.f32 %v15204_v34, %v7631_v30  ;;  %v7633_v18 = vadd.f32 %v7632_v28, %v7520_v32  ;;  %v7844_v33 = vmul.f32 0.2, %v7716_v22  ;;  %vm7780_vm2 = vcmp.gt.f32.partialorder %v7716_v22, 0.0 }
 0x445   : > { %8546 = vmatprep.mubr.bf16.mxu1 %v7940_v60  ;;  %v7907_v12 = vsel %vm7779_vm15, %v7715_v24, %v7843_v31  ;;  %v15342_v50 = vrot.slane %v8663_v11, %v16060_v20 }
 0x446   : > { %vm7783_vm0 = vcmp.gt.f32.partialorder %v7719_v51, 0.0  ;;  %v7847_v5 = vmul.f32 0.2, %v7719_v51  ;;  %v7720_v8 = vadd.f32 %v15211_v62, %v7633_v18  ;;  %v7908_v58 = vsel %vm7780_vm2, %v7716_v22, %v7844_v33 }
 0x448   : > { %v7911_v42 = vsel %vm7783_vm0, %v7719_v51, %v7847_v5  ;;  %vm7784_vm3 = vcmp.gt.f32.partialorder %v7720_v8, 0.0  ;;  %v7848_v47 = vmul.f32 0.2, %v7720_v8  ;;  %8547 = vmatmul.mubr.bf16.gmra.mxu1 %v7939_v49 }
 0x449   : > { %v7943_v15 = vpack.c.bf16 %v7911_v42, %v7907_v12 }
 0x44a   : > { %v7912_v26 = vsel %vm7784_vm3, %v7720_v8, %v7848_v47 }
 0x44b   : > { %v7944_v2 = vpack.c.bf16 %v7912_v26, %v7908_v58 }
 0x44d   : > { %8556 = vmatprep.mubr.bf16.mxu1 %v7944_v2 }
 0x450   : > { %8557 = vmatmul.mubr.bf16.gmra.mxu1 %v7943_v15 }
 0x458   : > { %v8375_v34 = vpop.f32.mrf.mxu0 }
 0x459   : > { %v8376_v21 = vadd.f32 %v8375_v34, %v15322_v63 }
 0x45a   : > { %v8377_v55 = vpop.f32.mrf.mxu0 }
 0x45b   : > { %v8378_v29 = vadd.f32 %v8377_v55, %v15325_v59 }
 0x45c   : > { %v8379_v4 = vpop.f32.mrf.mxu0 }
 0x45d   : > { %v8380_v14 = vadd.f32 %v8379_v4, %v15322_v63 }
 0x45e   : > { %v8381_v38 = vpop.f32.mrf.mxu0 }
 0x45f   : > { %v8382_v35 = vadd.f32 %v8381_v38, %v15325_v59 }
 0x460   : > { %v8385_v57 = vpop.f32.mrf.mxu0 }
 0x461   : > { %v8386_v24 = vadd.f32 %v8385_v57, %v15322_v63 }
 0x462   : > { %v8387_v54 = vpop.f32.mrf.mxu0 }
 0x463   : > { %v8388_v30 = vadd.f32 %v8387_v54, %v15325_v59 }
 0x464   : > { %v8389_v43 = vpop.f32.mrf.mxu0 }
 0x465   : > { %v8390_v18 = vadd.f32 %v8389_v43, %v15322_v63 }
 0x466   : > { %v8391_v62 = vpop.f32.mrf.mxu0 }
 0x467   : > { %v8392_v47 = vadd.f32 %v8391_v62, %v15325_v59 }
 0x468   : > { %v15302_v61 = vpop.f32.mrf.mxu0 }
 0x469   : > { %v8396_v38 = vadd.f32 %v15302_v61, %v15322_v63 }
 0x46a   : > { %v15304_v36 = vpop.f32.mrf.mxu0 }
 0x46b   : > { %v8398_v23 = vadd.f32 %v15304_v36, %v15325_v59 }
 0x46c   : > { %v15306_v17 = vpop.f32.mrf.mxu0 }
 0x46e   : > { %v15308_v37 = vpop.f32.mrf.mxu0 }
 0x470   : > { %v15310_v41 = vpop.f32.mrf.mxu0 }
 0x472   : > { %v15312_v10 = vpop.f32.mrf.mxu0 }
 0x474   : > { %v15314_v0 = vpop.f32.mrf.mxu0 }
 0x476   : > { %v15319_v53 = vpop.f32.mrf.mxu0 }
 0x478   : > { %v15327_v27 = vpop.f32.mrf.mxu0 }
 0x47a   : > { %v15331_v6 = vpop.f32.mrf.mxu0 }
 0x47c   : > { %v15344_v44 = vpop.f32.mrf.mxu0 }
 0x47e   : > { %v15350_v60 = vpop.f32.mrf.mxu0 }
 0x480   : > { %v15356_v2 = vpop.f32.mrf.mxu0 }
 0x4d8   : > { %v8488_v3 = vpop.f32.mrf.mxu1 }
 0x4d9   : > { %v8489_v46 = vadd.f32 %v8488_v3, %v8376_v21 }
 0x4da   : > { %v8490_v45 = vpop.f32.mrf.mxu1 }
 0x4db   : > { %vm8567_vm4 = vcmp.gt.f32.partialorder %v8489_v46, 0.0  ;;  %v8599_v39 = vmul.f32 0.2, %v8489_v46  ;;  %v8491_v1 = vadd.f32 %v8490_v45, %v8378_v29  ;;  %v15364_v29 = vpop.f32.mrf.mxu0  ;;  %v8400_v45 = vadd.f32 %v15306_v17, %v15322_v63 }
 0x4dc   : > { %v8492_v9 = vpop.f32.mrf.mxu1 }
 0x4dd   : > { %vm8568_vm5 = vcmp.gt.f32.partialorder %v8491_v1, 0.0  ;;  %v8600_v19 = vmul.f32 0.2, %v8491_v1  ;;  %v8493_v13 = vadd.f32 %v8492_v9, %v8380_v14  ;;  %v8631_v56 = vsel %vm8567_vm4, %v8489_v46, %v8599_v39 }
 0x4de   : > { %v8494_v40 = vpop.f32.mrf.mxu1  ;;  %v8675_v52 = vmul.f32 %v15339_v48, %v8631_v56  ;;  %v8402_v9 = vadd.f32 %v15308_v37, %v15325_v59 }
 0x4df   : > { %vm8569_vm6 = vcmp.gt.f32.partialorder %v8493_v13, 0.0  ;;  %v8601_v25 = vmul.f32 0.2, %v8493_v13  ;;  %v8495_v7 = vadd.f32 %v8494_v40, %v8382_v35  ;;  %v8632_v22 = vsel %vm8568_vm5, %v8491_v1, %v8600_v19 }
 0x4e0   : > { %v8498_v32 = vpop.f32.mrf.mxu1  ;;  %v8676_v28 = vmul.f32 %v15342_v50, %v8632_v22 }
 0x4e1   : > { %vm8570_vm7 = vcmp.gt.f32.partialorder %v8495_v7, 0.0  ;;  %v8602_v49 = vmul.f32 0.2, %v8495_v7  ;;  %v8499_v31 = vadd.f32 %v8498_v32, %v8386_v24  ;;  %v8633_v51 = vsel %vm8569_vm6, %v8493_v13, %v8601_v25  ;;  %v15372_v24 = vpop.f32.mrf.mxu0 }
 0x4e2   : > { %v8500_v33 = vpop.f32.mrf.mxu1  ;;  %v8707_v5 = vadd.f32 %v8676_v28, %v8675_v52  ;;  %v8677_v58 = vmul.f32 %v15339_v48, %v8633_v51  ;;  %v8408_v28 = vadd.f32 %v15312_v10, %v15325_v59 }
 0x4e3   : > { %vm8571_vm1 = vcmp.gt.f32.partialorder %v8499_v31, 0.0  ;;  %v8603_v8 = vmul.f32 0.2, %v8499_v31  ;;  %v8501_v12 = vadd.f32 %v8500_v33, %v8388_v30  ;;  %v8634_v42 = vsel %vm8570_vm7, %v8495_v7, %v8602_v49 }
 0x4e4   : > { %v8502_v15 = vpop.f32.mrf.mxu1  ;;  %8708 = vadd.xlane.f32.xlu0 %v8707_v5  ;;  %v8678_v26 = vmul.f32 %v15342_v50, %v8634_v42  ;;  %v8406_v7 = vadd.f32 %v15310_v41, %v15322_v63 }
 0x4e5   : > { %vm8572_vm8 = vcmp.gt.f32.partialorder %v8501_v12, 0.0  ;;  %v8604_v34 = vmul.f32 0.2, %v8501_v12  ;;  %v8503_v55 = vadd.f32 %v8502_v15, %v8390_v18  ;;  %v8635_v4 = vsel %vm8571_vm1, %v8499_v31, %v8603_v8  ;;  %v15380_v18 = vpop.f32.mrf.mxu0 }
 0x4e6   : > { %v8504_v57 = vpop.f32.mrf.mxu1  ;;  %v8710_v54 = vadd.f32 %v8678_v26, %v8677_v58  ;;  %v8679_v21 = vmul.f32 %v15339_v48, %v8635_v4  ;;  %v8410_v8 = vadd.f32 %v15314_v0, %v15322_v63  ;;  %v8412_v58 = vadd.f32 %v15319_v53, %v15325_v59 }
 0x4e7   : > { %vm8573_vm9 = vcmp.gt.f32.partialorder %v8503_v55, 0.0  ;;  %v8605_v43 = vmul.f32 0.2, %v8503_v55  ;;  %v8505_v62 = vadd.f32 %v8504_v57, %v8392_v47  ;;  %v8636_v16 = vsel %vm8572_vm8, %v8501_v12, %v8604_v34  ;;  %v15388_v4 = vpop.f32.mrf.mxu0 }
 0x4e8   : > { %v8508_v20 = vpop.f32.mrf.mxu1  ;;  %8711 = vadd.xlane.f32.xlu0 %v8710_v54  ;;  %v8680_v3 = vmul.f32 %v15342_v50, %v8636_v16  ;;  %v8416_v54 = vadd.f32 %v15327_v27, %v15322_v63 }
 0x4e9   : > { %vm8574_vm10 = vcmp.gt.f32.partialorder %v8505_v62, 0.0  ;;  %v8606_v46 = vmul.f32 0.2, %v8505_v62  ;;  %v8509_v61 = vadd.f32 %v8508_v20, %v8396_v38  ;;  %v8637_v11 = vsel %vm8573_vm9, %v8503_v55, %v8605_v43 }
 0x4ea   : > { %v8510_v14 = vpop.f32.mrf.mxu1  ;;  %v8713_v39 = vadd.f32 %v8680_v3, %v8679_v21  ;;  %v8681_v13 = vmul.f32 %v15339_v48, %v8637_v11  ;;  %v8418_v20 = vadd.f32 %v15331_v6, %v15325_v59 }
 0x4eb   : > { %vm8575_vm11 = vcmp.gt.f32.partialorder %v8509_v61, 0.0  ;;  %v8607_v1 = vmul.f32 0.2, %v8509_v61  ;;  %v8511_v36 = vadd.f32 %v8510_v14, %v8398_v23  ;;  %v8638_v35 = vsel %vm8574_vm10, %v8505_v62, %v8606_v46 }
 0x4ec   : > { %v8512_v19 = vpop.f32.mrf.mxu1  ;;  %8714 = vadd.xlane.f32.xlu1 %v8713_v39  ;;  %v8682_v56 = vmul.f32 %v15342_v50, %v8638_v35  ;;  %v8420_v14 = vadd.f32 %v15344_v44, %v15322_v63 }
 0x4ed   : > { %vm8576_vm12 = vcmp.gt.f32.partialorder %v8511_v36, 0.0  ;;  %v8608_v40 = vmul.f32 0.2, %v8511_v36  ;;  %v8513_v17 = vadd.f32 %v8512_v19, %v8400_v45  ;;  %v8639_v25 = vsel %vm8575_vm11, %v8509_v61, %v8607_v1  ;;  %v15396_v61 = vpop.f32.mrf.mxu0 }
 0x4ee   : > { %v8514_v22 = vpop.f32.mrf.mxu1  ;;  %v8716_v30 = vadd.f32 %v8682_v56, %v8681_v13  ;;  %v8683_v31 = vmul.f32 %v15339_v48, %v8639_v25 }
 0x4ef   : > { %vm8577_vm13 = vcmp.gt.f32.partialorder %v8513_v17, 0.0  ;;  %v8609_v32 = vmul.f32 0.2, %v8513_v17  ;;  %v8515_v37 = vadd.f32 %v8514_v22, %v8402_v9  ;;  %v8640_v52 = vsel %vm8576_vm12, %v8511_v36, %v8608_v40  ;;  %v8439_v40 = vpop.f32.mrf.mxu0 }
 0x4f0   : > { %v8518_v49 = vpop.f32.mrf.mxu1  ;;  %8717 = vadd.xlane.f32.xlu1 %v8716_v30  ;;  %v8684_v51 = vmul.f32 %v15342_v50, %v8640_v52  ;;  %v8422_v9 = vadd.f32 %v15350_v60, %v15325_v59  ;;  %v8428_v52 = vadd.f32 %v15364_v29, %v15325_v59 }
 0x4f1   : > { %vm8578_vm14 = vcmp.gt.f32.partialorder %v8515_v37, 0.0  ;;  %v8610_v33 = vmul.f32 0.2, %v8515_v37  ;;  %v8519_v41 = vadd.f32 %v8518_v49, %v8406_v7  ;;  %v8641_v5 = vsel %vm8577_vm13, %v8513_v17, %v8609_v32 }
 0x4f2   : > { %v8520_v12 = vpop.f32.mrf.mxu1  ;;  %v8719_v42 = vadd.f32 %v8684_v51, %v8683_v31  ;;  %v8685_v34 = vmul.f32 %v15339_v48, %v8641_v5  ;;  %v8426_v7 = vadd.f32 %v15356_v2, %v15322_v63  ;;  %v8441_v51 = vpop.f32.mrf.mxu0  ;;  %v8430_v5 = vadd.f32 %v15372_v24, %v15322_v63 }
 0x4f3   : > { %vm8579_vm15 = vcmp.gt.f32.partialorder %v8519_v41, 0.0  ;;  %v8611_v47 = vmul.f32 0.2, %v8519_v41  ;;  %v8521_v10 = vadd.f32 %v8520_v12, %v8408_v28  ;;  %v8642_v15 = vsel %vm8578_vm14, %v8515_v37, %v8610_v33 }
 0x4f4   : > { %v8522_v26 = vpop.f32.mrf.mxu1  ;;  %8720 = vadd.xlane.f32.xlu0 %v8719_v42  ;;  %v8686_v55 = vmul.f32 %v15342_v50, %v8642_v15 }
 0x4f5   : > { %vm8580_vm0 = vcmp.gt.f32.partialorder %v8521_v10, 0.0  ;;  %v8612_v38 = vmul.f32 0.2, %v8521_v10  ;;  %v8523_v0 = vadd.f32 %v8522_v26, %v8410_v8  ;;  %v8643_v57 = vsel %vm8579_vm15, %v8519_v41, %v8611_v47 }
 0x4f6   : > { %v8524_v43 = vpop.f32.mrf.mxu1  ;;  %v8722_v62 = vadd.f32 %v8686_v55, %v8685_v34  ;;  %v8687_v3 = vmul.f32 %v15339_v48, %v8643_v57  ;;  %v8445_v34 = vpop.f32.mrf.mxu0 }
 0x4f7   : > { %vm8581_vm2 = vcmp.gt.f32.partialorder %v8523_v0, 0.0  ;;  %v8613_v16 = vmul.f32 0.2, %v8523_v0  ;;  %v8525_v53 = vadd.f32 %v8524_v43, %v8412_v58  ;;  %v8644_v23 = vsel %vm8580_vm0, %v8521_v10, %v8612_v38 }
 0x4f8   : > { %v8528_v21 = vpop.f32.mrf.mxu1  ;;  %8723 = vadd.xlane.f32.xlu1 %v8722_v62  ;;  %v8688_v46 = vmul.f32 %v15342_v50, %v8644_v23  ;;  %v8432_v10 = vadd.f32 %v15380_v18, %v15325_v59 }
 0x4f9   : > { %vm8582_vm3 = vcmp.gt.f32.partialorder %v8525_v53, 0.0  ;;  %v8614_v11 = vmul.f32 0.2, %v8525_v53  ;;  %v8529_v27 = vadd.f32 %v8528_v21, %v8416_v54  ;;  %v8645_v45 = vsel %vm8581_vm2, %v8523_v0, %v8613_v16  ;;  %v8447_v21 = vpop.f32.mrf.mxu0 }
 0x4fa   : > { %v8530_v39 = vpop.f32.mrf.mxu1  ;;  %v8725_v1 = vadd.f32 %v8688_v46, %v8687_v3  ;;  %v8689_v13 = vmul.f32 %v15339_v48, %v8645_v45  ;;  %v8436_v0 = vadd.f32 %v15388_v4, %v15322_v63  ;;  %v8438_v16 = vadd.f32 %v15396_v61, %v15325_v59 }
 0x4fb   : > { %vm8583_vm4 = vcmp.gt.f32.partialorder %v8529_v27, 0.0  ;;  %v8615_v36 = vmul.f32 0.2, %v8529_v27  ;;  %v8531_v6 = vadd.f32 %v8530_v39, %v8418_v20  ;;  %v8646_v35 = vsel %vm8582_vm3, %v8525_v53, %v8614_v11 }
 0x4fc   : > { %v8532_v19 = vpop.f32.mrf.mxu1  ;;  %8726 = vadd.xlane.f32.xlu0 %v8725_v1  ;;  %v8690_v56 = vmul.f32 %v15342_v50, %v8646_v35  ;;  %v8440_v11 = vadd.f32 %v8439_v40, %v15322_v63  ;;  %v8442_v61 = vadd.f32 %v8441_v51, %v15325_v59  ;;  %v8446_v40 = vadd.f32 %v8445_v34, %v15322_v63 }
 0x4fd   : > { %vm8584_vm5 = vcmp.gt.f32.partialorder %v8531_v6, 0.0  ;;  %v8616_v17 = vmul.f32 0.2, %v8531_v6  ;;  %v8533_v25 = vadd.f32 %v8532_v19, %v8420_v14  ;;  %v8647_v44 = vsel %vm8583_vm4, %v8529_v27, %v8615_v36 }
 0x4fe   : > { %v8534_v22 = vpop.f32.mrf.mxu1  ;;  %v8728_v30 = vadd.f32 %v8690_v56, %v8689_v13  ;;  %v8691_v49 = vmul.f32 %v15339_v48, %v8647_v44  ;;  %vm8874_vm4 = vcmask 7168  }
 0x4ff   : > { %vm8585_vm6 = vcmp.gt.f32.partialorder %v8533_v25, 0.0  ;;  %v8617_v32 = vmul.f32 0.2, %v8533_v25  ;;  %v8535_v37 = vadd.f32 %v8534_v22, %v8422_v9  ;;  %v8648_v60 = vsel %vm8584_vm5, %v8531_v6, %v8616_v17  ;;  %v8449_v9 = vpop.f32.mrf.mxu0 }
 0x500   : > { %v8538_v28 = vpop.f32.mrf.mxu1  ;;  %8729 = vadd.xlane.f32.xlu1 %v8728_v30  ;;  %v8692_v31 = vmul.f32 %v15342_v50, %v8648_v60  ;;  %v8448_v30 = vadd.f32 %v8447_v21, %v15325_v59  ;;  %v8450_v51 = vadd.f32 %v8449_v9, %v15322_v63 }
 0x501   : > { %vm8586_vm7 = vcmp.gt.f32.partialorder %v8535_v37, 0.0  ;;  %v8618_v33 = vmul.f32 0.2, %v8535_v37  ;;  %v8539_v41 = vadd.f32 %v8538_v28, %v8426_v7  ;;  %v8649_v2 = vsel %vm8585_vm6, %v8533_v25, %v8617_v32 }
 0x502   : > { %v8540_v8 = vpop.f32.mrf.mxu1  ;;  %v8731_v12 = vadd.f32 %v8692_v31, %v8691_v49  ;;  %v8693_v58 = vmul.f32 %v15339_v48, %v8649_v2 }
 0x503   : > { %vm8587_vm1 = vcmp.gt.f32.partialorder %v8539_v41, 0.0  ;;  %v8619_v42 = vmul.f32 0.2, %v8539_v41  ;;  %v8541_v47 = vadd.f32 %v8540_v8, %v8428_v52  ;;  %v8650_v29 = vsel %vm8586_vm7, %v8535_v37, %v8618_v33  ;;  %v8451_v52 = vpop.f32.mrf.mxu0 }
 0x504   : > { %v8542_v15 = vpop.f32.mrf.mxu1  ;;  %8732 = vadd.xlane.f32.xlu0 %v8731_v12  ;;  %v8694_v26 = vmul.f32 %v15342_v50, %v8650_v29  ;;  %v8452_v12 = vadd.f32 %v8451_v52, %v15325_v59 }
 0x505   : > { %vm8588_vm8 = vcmp.gt.f32.partialorder %v8541_v47, 0.0  ;;  %v8620_v55 = vmul.f32 0.2, %v8541_v47  ;;  %v8543_v38 = vadd.f32 %v8542_v15, %v8430_v5  ;;  %v8651_v24 = vsel %vm8587_vm1, %v8539_v41, %v8619_v42 }
 0x506   : > { %v8544_v57 = vpop.f32.mrf.mxu1  ;;  %v8734_v54 = vadd.f32 %v8694_v26, %v8693_v58  ;;  %v8695_v23 = vmul.f32 %v15339_v48, %v8651_v24 }
 0x507   : > { %vm8589_vm9 = vcmp.gt.f32.partialorder %v8543_v38, 0.0  ;;  %v8621_v43 = vmul.f32 0.2, %v8543_v38  ;;  %v8545_v62 = vadd.f32 %v8544_v57, %v8432_v10  ;;  %v8652_v18 = vsel %vm8588_vm8, %v8541_v47, %v8620_v55 }
 0x508   : > { %v8548_v53 = vpop.f32.mrf.mxu1  ;;  %8735 = vadd.xlane.f32.xlu1 %v8734_v54  ;;  %v8696_v20 = vmul.f32 %v15342_v50, %v8652_v18 }
 0x509   : > { %vm8590_vm10 = vcmp.gt.f32.partialorder %v8545_v62, 0.0  ;;  %v8622_v3 = vmul.f32 0.2, %v8545_v62  ;;  %v8549_v46 = vadd.f32 %v8548_v53, %v8436_v0  ;;  %v8653_v4 = vsel %vm8589_vm9, %v8543_v38, %v8621_v43  ;;  %v15438_v53 = vld [vmem:[#allocation2] ss:$0 sm:$0xff] }
 0x50a   : > { %v8550_v27 = vpop.f32.mrf.mxu1  ;;  %v8737_v45 = vadd.f32 %v8696_v20, %v8695_v23  ;;  %v8697_v6 = vmul.f32 %v15339_v48, %v8653_v4 }
 0x50b   : > { %vm8591_vm11 = vcmp.gt.f32.partialorder %v8549_v46, 0.0  ;;  %v8623_v14 = vmul.f32 0.2, %v8549_v46  ;;  %v8551_v39 = vadd.f32 %v8550_v27, %v8438_v16  ;;  %v8654_v1 = vsel %vm8590_vm10, %v8545_v62, %v8622_v3 }
 0x50c   : > { %v8552_v36 = vpop.f32.mrf.mxu1  ;;  %8738 = vadd.xlane.f32.xlu0 %v8737_v45  ;;  %v8698_v35 = vmul.f32 %v15342_v50, %v8654_v1 }
 0x50d   : > { %vm8592_vm12 = vcmp.gt.f32.partialorder %v8551_v39, 0.0  ;;  %v8624_v19 = vmul.f32 0.2, %v8551_v39  ;;  %v8553_v13 = vadd.f32 %v8552_v36, %v8440_v11  ;;  %v8655_v56 = vsel %vm8591_vm11, %v8549_v46, %v8623_v14 }
 0x50e   : > { %v8554_v17 = vpop.f32.mrf.mxu1  ;;  %v8740_v25 = vadd.f32 %v8698_v35, %v8697_v6  ;;  %v8699_v37 = vmul.f32 %v15339_v48, %v8655_v56 }
 0x50f   : > { %vm8593_vm13 = vcmp.gt.f32.partialorder %v8553_v13, 0.0  ;;  %v8625_v44 = vmul.f32 0.2, %v8553_v13  ;;  %v8555_v7 = vadd.f32 %v8554_v17, %v8442_v61  ;;  %v8656_v22 = vsel %vm8592_vm12, %v8551_v39, %v8624_v19 }
 0x510   : > { %v8558_v32 = vpop.f32.mrf.mxu1  ;;  %8741 = vadd.xlane.f32.xlu1 %v8740_v25  ;;  %v8700_v60 = vmul.f32 %v15342_v50, %v8656_v22 }
 0x511   : > { %vm8594_vm14 = vcmp.gt.f32.partialorder %v8555_v7, 0.0  ;;  %v8626_v28 = vmul.f32 0.2, %v8555_v7  ;;  %v8559_v49 = vadd.f32 %v8558_v32, %v8446_v40  ;;  %v8657_v31 = vsel %vm8593_vm13, %v8553_v13, %v8625_v44 }
 0x512   : > { %v8560_v33 = vpop.f32.mrf.mxu1  ;;  %v8743_v41 = vadd.f32 %v8700_v60, %v8699_v37  ;;  %v8701_v47 = vmul.f32 %v15339_v48, %v8657_v31 }
 0x513   : > { %vm8595_vm15 = vcmp.gt.f32.partialorder %v8559_v49, 0.0  ;;  %v8627_v2 = vmul.f32 0.2, %v8559_v49  ;;  %v8561_v5 = vadd.f32 %v8560_v33, %v8448_v30  ;;  %v8658_v8 = vsel %vm8594_vm14, %v8555_v7, %v8626_v28 }
 0x514   : > { %v8562_v42 = vpop.f32.mrf.mxu1  ;;  %8744 = vadd.xlane.f32.xlu0 %v8743_v41  ;;  %v8702_v29 = vmul.f32 %v15342_v50, %v8658_v8 }
 0x515   : > { %vm8596_vm0 = vcmp.gt.f32.partialorder %v8561_v5, 0.0  ;;  %v8628_v10 = vmul.f32 0.2, %v8561_v5  ;;  %v8563_v15 = vadd.f32 %v8562_v42, %v8450_v51  ;;  %v8659_v58 = vsel %vm8595_vm15, %v8559_v49, %v8627_v2 }
 0x516   : > { %v8564_v26 = vpop.f32.mrf.mxu1  ;;  %v8746_v63 = vadd.f32 %v8702_v29, %v8701_v47  ;;  %v8703_v24 = vmul.f32 %v15339_v48, %v8659_v58 }
 0x517   : > { %vm8597_vm2 = vcmp.gt.f32.partialorder %v8563_v15, 0.0  ;;  %v8629_v34 = vmul.f32 0.2, %v8563_v15  ;;  %v8565_v55 = vadd.f32 %v8564_v26, %v8452_v12  ;;  %v8660_v38 = vsel %vm8596_vm0, %v8561_v5, %v8628_v10 }
 0x518   : > { %8747 = vadd.xlane.f32.xlu1 %v8746_v63  ;;  %v8704_v59 = vmul.f32 %v15342_v50, %v8660_v38 }
 0x519   : > { %vm8598_vm3 = vcmp.gt.f32.partialorder %v8565_v55, 0.0  ;;  %v8630_v0 = vmul.f32 0.2, %v8565_v55  ;;  %v8661_v57 = vsel %vm8597_vm2, %v8563_v15, %v8629_v34 }
 0x51a   : > { %v8749_v54 = vadd.f32 %v8704_v59, %v8703_v24  ;;  %v8705_v62 = vmul.f32 %v15339_v48, %v8661_v57 }
 0x51b   : > { %v8662_v43 = vsel %vm8598_vm3, %v8565_v55, %v8630_v0 }
 0x51c   : > { %8750 = vadd.xlane.f32.xlu0 %v8749_v54  ;;  %v8706_v18 = vmul.f32 %v15342_v50, %v8662_v43 }
 0x51e   : > { %v8752_v16 = vadd.f32 %v8706_v18, %v8705_v62 }
 0x520   : > { %8753 = vadd.xlane.f32.xlu1 %v8752_v16 }
 0x56d   : > { %v8709_v23 = vpop.xlane.xlu0 %8708 }
 0x56e   : > { %v8762_v20 = vadd.f32 %v15438_v53, %v8709_v23 }
 0x570   : > { %v9667_v21 = vmul.f32 -1.442695, %v8762_v20 }
 0x571   : > { %v8712_v3 = vpop.xlane.xlu0 %8711 }
 0x572   : > { %10574 = vpow2.f32 %v9667_v21  ;;  %v8763_v46 = vadd.f32 %v15438_v53, %v8712_v3 }
 0x574   : > { %v9668_v4 = vmul.f32 -1.442695, %v8763_v46 }
 0x575   : > { %v8715_v11 = vpop.xlane.xlu1 %8714 }
 0x576   : > { %10576 = vpow2.f32 %v9668_v4  ;;  %v8764_v27 = vadd.f32 %v15438_v53, %v8715_v11 }
 0x578   : > { %v9669_v48 = vmul.f32 -1.442695, %v8764_v27 }
 0x579   : > { %v8718_v45 = vpop.xlane.xlu1 %8717 }
 0x57a   : > { %10578 = vpow2.f32 %v9669_v48  ;;  %v8765_v50 = vadd.f32 %v15438_v53, %v8718_v45 }
 0x57c   : > { %v9670_v14 = vmul.f32 -1.442695, %v8765_v50 }
 0x57d   : > { %v8721_v39 = vpop.xlane.xlu0 %8720 }
 0x57e   : > { %10580 = vpow2.f32 %v9670_v14  ;;  %v8766_v1 = vadd.f32 %v15438_v53, %v8721_v39 }
 0x57f   : > { %v10575_v61 = vpop.eup %10574 }
 0x580   : > { %v8826_v36 = vadd.f32 1.0, %v10575_v61  ;;  %v9671_v6 = vmul.f32 -1.442695, %v8766_v1 }
 0x581   : > { %v8724_v35 = vpop.xlane.xlu1 %8723 }
 0x582   : > { %10582 = vrcp.f32 %v8826_v36  ;;  %v8767_v9 = vadd.f32 %v15438_v53, %v8724_v35 }
 0x583   : > { %v10577_v19 = vpop.eup %10576  ;;  %10584 = vpow2.f32 %v9671_v6 }
 0x584   : > { %v8827_v13 = vadd.f32 1.0, %v10577_v19  ;;  %v9672_v56 = vmul.f32 -1.442695, %v8767_v9 }
 0x585   : > { %v8727_v40 = vpop.xlane.xlu0 %8726 }
 0x586   : > { %10586 = vrcp.f32 %v8827_v13  ;;  %v8768_v17 = vadd.f32 %v15438_v53, %v8727_v40 }
 0x587   : > { %v10579_v25 = vpop.eup %10578  ;;  %10588 = vpow2.f32 %v9672_v56 }
 0x588   : > { %v8828_v44 = vadd.f32 1.0, %v10579_v25  ;;  %v9673_v7 = vmul.f32 -1.442695, %v8768_v17 }
 0x589   : > { %v8730_v22 = vpop.xlane.xlu1 %8729 }
 0x58a   : > { %10590 = vrcp.f32 %v8828_v44  ;;  %v8769_v30 = vadd.f32 %v15438_v53, %v8730_v22 }
 0x58b   : > { %v10581_v32 = vpop.eup %10580  ;;  %10592 = vpow2.f32 %v9673_v7 }
 0x58c   : > { %v8829_v37 = vadd.f32 1.0, %v10581_v32  ;;  %v9674_v60 = vmul.f32 -1.442695, %v8769_v30 }
 0x58d   : > { %v8733_v52 = vpop.xlane.xlu0 %8732 }
 0x58e   : > { %10594 = vrcp.f32 %v8829_v37  ;;  %v8770_v28 = vadd.f32 %v15438_v53, %v8733_v52 }
 0x58f   : > { %v10583_v49 = vpop.eup %10582  ;;  %10596 = vpow2.f32 %v9674_v60 }
 0x590   : > { %v10585_v31 = vpop.eup %10584  ;;  %8875 = vst.msk [vmem:[%s15452_s23] sm:$0xff] %vm8874_vm4, %v10583_v49  ;;  %v9675_v51 = vmul.f32 -1.442695, %v8770_v28 }
 0x591   : > { %v8830_v33 = vadd.f32 1.0, %v10585_v31  ;;  %v8736_v41 = vpop.xlane.xlu1 %8735 }
 0x592   : > { %10598 = vpow2.f32 %v9675_v51  ;;  %v8771_v2 = vadd.f32 %v15438_v53, %v8736_v41 }
 0x593   : > { %v10587_v5 = vpop.eup %10586  ;;  %10600 = vrcp.f32 %v8830_v33 }
 0x594   : > { %v10589_v8 = vpop.eup %10588  ;;  %8876 = vst.msk [vmem:[%s15452_s23 + $0x8] sm:$0xff] %vm8874_vm4, %v10587_v5  ;;  %v9676_v12 = vmul.f32 -1.442695, %v8771_v2 }
 0x595   : > { %v8831_v42 = vadd.f32 1.0, %v10589_v8  ;;  %v8739_v47 = vpop.xlane.xlu0 %8738 }
 0x596   : > { %10602 = vpow2.f32 %v9676_v12  ;;  %v8772_v29 = vadd.f32 %v15438_v53, %v8739_v47 }
 0x597   : > { %v10591_v10 = vpop.eup %10590  ;;  %10604 = vrcp.f32 %v8831_v42 }
 0x598   : > { %v10593_v15 = vpop.eup %10592  ;;  %8877 = vst.msk [vmem:[%s15452_s23 + $0x10] sm:$0xff] %vm8874_vm4, %v10591_v10  ;;  %v9677_v58 = vmul.f32 -1.442695, %v8772_v29 }
 0x599   : > { %v8832_v26 = vadd.f32 1.0, %v10593_v15  ;;  %v8742_v63 = vpop.xlane.xlu1 %8741 }
 0x59a   : > { %10606 = vpow2.f32 %v9677_v58  ;;  %v8773_v34 = vadd.f32 %v15438_v53, %v8742_v63 }
 0x59b   : > { %v10595_v55 = vpop.eup %10594  ;;  %10608 = vrcp.f32 %v8832_v26 }
 0x59c   : > { %v10597_v38 = vpop.eup %10596  ;;  %8878 = vst.msk [vmem:[%s15452_s23 + $0x18] sm:$0xff] %vm8874_vm4, %v10595_v55  ;;  %v9678_v24 = vmul.f32 -1.442695, %v8773_v34 }
 0x59d   : > { %v8833_v59 = vadd.f32 1.0, %v10597_v38  ;;  %v8745_v0 = vpop.xlane.xlu0 %8744 }
 0x59e   : > { %10610 = vpow2.f32 %v9678_v24  ;;  %v8774_v57 = vadd.f32 %v15438_v53, %v8745_v0 }
 0x59f   : > { %v10599_v54 = vpop.eup %10598  ;;  %10612 = vrcp.f32 %v8833_v59 }
 0x5a0   : > { %v10601_v43 = vpop.eup %10600  ;;  %v8834_v62 = vadd.f32 1.0, %v10599_v54  ;;  %v9679_v18 = vmul.f32 -1.442695, %v8774_v57 }
 0x5a1   : > { %8879 = vst.msk [vmem:[%s15452_s23 + $0x20] sm:$0xff] %vm8874_vm4, %v10601_v43  ;;  %v8748_v16 = vpop.xlane.xlu1 %8747 }
 0x5a2   : > { %10614 = vrcp.f32 %v8834_v62  ;;  %v8775_v23 = vadd.f32 %v15438_v53, %v8748_v16 }
 0x5a3   : > { %v10603_v20 = vpop.eup %10602  ;;  %10616 = vpow2.f32 %v9679_v18 }
 0x5a4   : > { %v10605_v21 = vpop.eup %10604  ;;  %v8835_v3 = vadd.f32 1.0, %v10603_v20  ;;  %v9680_v46 = vmul.f32 -1.442695, %v8775_v23 }
 0x5a5   : > { %8880 = vst.msk [vmem:[%s15452_s23 + $0x28] sm:$0xff] %vm8874_vm4, %v10605_v21  ;;  %v8751_v4 = vpop.xlane.xlu0 %8750 }
 0x5a6   : > { %10618 = vrcp.f32 %v8835_v3  ;;  %v8776_v11 = vadd.f32 %v15438_v53, %v8751_v4 }
 0x5a7   : > { %v10607_v27 = vpop.eup %10606  ;;  %10620 = vpow2.f32 %v9680_v46 }
 0x5a8   : > { %v10609_v48 = vpop.eup %10608  ;;  %v8836_v45 = vadd.f32 1.0, %v10607_v27  ;;  %v9681_v50 = vmul.f32 -1.442695, %v8776_v11 }
 0x5a9   : > { %8881 = vst.msk [vmem:[%s15452_s23 + $0x30] sm:$0xff] %vm8874_vm4, %v10609_v48  ;;  %v8754_v14 = vpop.xlane.xlu1 %8753 }
 0x5aa   : > { %10622 = vrcp.f32 %v8836_v45  ;;  %v8777_v39 = vadd.f32 %v15438_v53, %v8754_v14 }
 0x5ab   : > { %v10611_v1 = vpop.eup %10610  ;;  %10624 = vpow2.f32 %v9681_v50 }
 0x5ac   : > { %v10613_v61 = vpop.eup %10612  ;;  %v8837_v36 = vadd.f32 1.0, %v10611_v1  ;;  %v9682_v6 = vmul.f32 -1.442695, %v8777_v39 }
 0x5ad   : > { %8882 = vst.msk [vmem:[%s15452_s23 + $0x38] sm:$0xff] %vm8874_vm4, %v10613_v61 }
 0x5ae   : > { %10626 = vrcp.f32 %v8837_v36 }
 0x5af   : > { %v10615_v35 = vpop.eup %10614  ;;  %10628 = vpow2.f32 %v9682_v6 }
 0x5b0   : > { %v10617_v9 = vpop.eup %10616  ;;  %8883 = vst.msk [vmem:[%s15452_s23 + $0x40] sm:$0xff] %vm8874_vm4, %v10615_v35 }
 0x5b1   : > { %v8838_v19 = vadd.f32 1.0, %v10617_v9 }
 0x5b3   : > { %v10619_v13 = vpop.eup %10618  ;;  %10630 = vrcp.f32 %v8838_v19 }
 0x5b4   : > { %v10621_v53 = vpop.eup %10620  ;;  %8884 = vst.msk [vmem:[%s15452_s23 + $0x48] sm:$0xff] %vm8874_vm4, %v10619_v13 }
 0x5b5   : > { %v8839_v56 = vadd.f32 1.0, %v10621_v53 }
 0x5b7   : > { %v10623_v40 = vpop.eup %10622  ;;  %10632 = vrcp.f32 %v8839_v56 }
 0x5b8   : > { %v10625_v17 = vpop.eup %10624  ;;  %8885 = vst.msk [vmem:[%s15452_s23 + $0x50] sm:$0xff] %vm8874_vm4, %v10623_v40 }
 0x5b9   : > { %v8840_v25 = vadd.f32 1.0, %v10625_v17 }
 0x5bb   : > { %v10627_v44 = vpop.eup %10626  ;;  %10634 = vrcp.f32 %v8840_v25 }
 0x5bc   : > { %v10629_v7 = vpop.eup %10628  ;;  %8886 = vst.msk [vmem:[%s15452_s23 + $0x58] sm:$0xff] %vm8874_vm4, %v10627_v44 }
 0x5bd   : > { %v8841_v22 = vadd.f32 1.0, %v10629_v7 }
 0x5bf   : > { %10636 = vrcp.f32 %v8841_v22 }
 0x5c0   : > { %v10631_v30 = vpop.eup %10630 }
 0x5c1   : > { %8887 = vst.msk [vmem:[%s15452_s23 + $0x60] sm:$0xff] %vm8874_vm4, %v10631_v30 }
 0x5c4   : > { %v10633_v32 = vpop.eup %10632 }
 0x5c5   : > { %8888 = vst.msk [vmem:[%s15452_s23 + $0x68] sm:$0xff] %vm8874_vm4, %v10633_v32 }
 0x5c8   : > { %v10635_v37 = vpop.eup %10634 }
 0x5c9   : > { %8889 = vst.msk [vmem:[%s15452_s23 + $0x70] sm:$0xff] %vm8874_vm4, %v10635_v37 }
 0x5cc   : > { %v10637_v60 = vpop.eup %10636 }
 0x5cd   : > { %8890 = vst.msk [vmem:[%s15452_s23 + $0x78] sm:$0xff] %vm8874_vm4, %v10637_v60 }
 0x5ce PF: > { %s25_s27 = sadd.s32 1, %s10645_s27  }
 0x5cf   : > { %p22_p4 = scmp.ge.s32.totalorder %s25_s27, 4  }
 0x5d1   :  { %24 = sbr.rel (!%p22_p4) target bundleno = 3 (0x3), region = 105 }

</bundles_post_ra>
